<compile_context>
chip_gen: v7x
topology: tpu7x:2x2x1
jax: 0.10.0
libtpu: 0.0.40
codegen_flags: <defaults>
</compile_context>

<pallas_src>
import jax
import jax.numpy as jnp
import numpy as np
from jax import lax
from jax.experimental import pallas as pl
from jax.experimental.pallas import tpu as pltpu


# ------------------------------ fused kernel --------------------------------

def _net_kernel(x_ref, w1_ref, b1_ref, r1_ref, s1_ref,
                w2_ref, b2_ref, r2_ref, s2_ref,
                wp1_ref, bf1_ref, wf2_ref, bf2_ref, wf3_ref, bf3_ref,
                o_ref,
                act1_s, p1_s, act2_s, p2_s):
    """One grid step == one image.  x_ref: (32, 96) = (H, W*3)."""

    def mm(a, b):
        return jnp.dot(a, b, preferred_element_type=jnp.float32)

    # ---- conv1 (5x5, 3->6) + bias + ReLU: 25 shifted block-diagonal matmuls.
    acc1 = jnp.zeros((28, 168), jnp.float32)                      # (H, W*6)
    for k in range(25):
        kh, kw = k // 5, k % 5
        lhs = x_ref[pl.ds(kh, 28), pl.ds(3 * kw, 84)]             # (28, 84)
        acc1 = acc1 + mm(lhs, w1_ref[k])                          # (28, 168)
    act1_s[...] = jnp.maximum(acc1 + b1_ref[...], 0.0)

    # ---- maxpool 2x2: max of 4 shifted slabs + 0/1 selection matmuls.
    m1 = jnp.maximum(
        jnp.maximum(act1_s[pl.ds(0, 27), pl.ds(0, 162)],
                    act1_s[pl.ds(0, 27), pl.ds(6, 162)]),
        jnp.maximum(act1_s[pl.ds(1, 27), pl.ds(0, 162)],
                    act1_s[pl.ds(1, 27), pl.ds(6, 162)]))
    p1_s[...] = mm(mm(r1_ref[...], m1), s1_ref[...])              # (14, 84)

    # ---- conv2 (5x5, 6->16) + bias + ReLU.
    acc2 = jnp.zeros((10, 160), jnp.float32)                      # (H, W*16)
    for k in range(25):
        kh, kw = k // 5, k % 5
        lhs = p1_s[pl.ds(kh, 10), pl.ds(6 * kw, 60)]              # (10, 60)
        acc2 = acc2 + mm(lhs, w2_ref[k])                          # (10, 160)
    act2_s[...] = jnp.maximum(acc2 + b2_ref[...], 0.0)

    # ---- maxpool 2x2.
    m2 = jnp.maximum(
        jnp.maximum(act2_s[pl.ds(0, 9), pl.ds(0, 144)],
                    act2_s[pl.ds(0, 9), pl.ds(16, 144)]),
        jnp.maximum(act2_s[pl.ds(1, 9), pl.ds(0, 144)],
                    act2_s[pl.ds(1, 9), pl.ds(16, 144)]))
    p2_s[...] = mm(mm(r2_ref[...], m2), s2_ref[...])              # (5, 80)

    # ---- fc1 (torch's (C,H,W)-order flatten folded into wp1) + ReLU.
    h1 = bf1_ref[...]                                             # (1, 120)
    for i in range(5):
        h1 = h1 + mm(p2_s[pl.ds(i, 1), :], wp1_ref[i])
    h1 = jnp.maximum(h1, 0.0)

    # ---- fc2 + ReLU, fc3.
    h2 = jnp.maximum(mm(h1, wf2_ref[...]) + bf2_ref[...], 0.0)    # (1, 84)
    o_ref[...] = (mm(h2, wf3_ref[...]) + bf3_ref[...]).astype(o_ref.dtype)


# ------------------------------ host wrapper ---------------------------------

def net_forward(x_nchw, kp):
    """x_nchw: (B, 3, 32, 32) float32 (PyTorch layout); kp: prepare_params() output."""
    B, C, H, W = x_nchw.shape
    assert (C, H, W) == (3, 32, 32)
    # (B, 3, 32, 32) -> (B, 32, 96) = (B, H, W*C), channels fastest.
    xf = jnp.transpose(x_nchw, (0, 2, 3, 1)).reshape(B, 32, 96).astype(jnp.float32)

    weight_names = ("w1bd", "b1row", "r1", "s1", "w2bd", "b2row", "r2", "s2",
                    "wp1", "bf1", "wf2t", "bf2", "wf3t", "bf3")
    weights = [kp[n] for n in weight_names]

    def full_spec(a):
        nd = a.ndim
        return pl.BlockSpec(tuple(a.shape), lambda b, _nd=nd: (0,) * _nd)

    flops = B * (2 * 25 * 28 * 84 * 168 + 2 * 25 * 10 * 60 * 160
                 + 2 * (14 * 27 * 162 + 14 * 162 * 84)
                 + 2 * (5 * 9 * 144 + 5 * 144 * 80)
                 + 2 * (5 * 80 * 120 + 120 * 84 + 84 * 10))
    bytes_accessed = 4 * (xf.size + sum(int(w.size) for w in weights) + B * 10)

    out = pl.pallas_call(
        _net_kernel,
        out_shape=jax.ShapeDtypeStruct((B, 1, 10), jnp.float32),
        grid=(B,),
        in_specs=[pl.BlockSpec((None, 32, 96), lambda b: (b, 0, 0))]
                + [full_spec(w) for w in weights],
        out_specs=pl.BlockSpec((None, 1, 10), lambda b: (b, 0, 0)),
        scratch_shapes=[pltpu.VMEM((28, 168), jnp.float32),   # conv1+relu out
                        pltpu.VMEM((14, 84), jnp.float32),    # pool1 out
                        pltpu.VMEM((10, 160), jnp.float32),   # conv2+relu out
                        pltpu.VMEM((5, 80), jnp.float32)],    # pool2 out
        compiler_params=pltpu.CompilerParams(
            dimension_semantics=("parallel",),
            vmem_limit_bytes=32 * 1024 * 1024),
        cost_estimate=pl.CostEstimate(flops=flops, transcendentals=0,
                                      bytes_accessed=bytes_accessed),
    )(xf, *weights)
    return out.reshape(B, 10)


# --------------------------- parameter preparation ---------------------------

def init_params(key):
    """PyTorch-layout params, default U(-1/sqrt(fan_in), +1/sqrt(fan_in)) init."""
    def u(k, shape, fan_in):
        bound = 1.0 / (fan_in ** 0.5)
        return jax.random.uniform(k, shape, jnp.float32, -bound, bound)

    ks = jax.random.split(key, 10)
    return {
        "conv1_w": u(ks[0], (6, 3, 5, 5), 3 * 5 * 5),
        "conv1_b": u(ks[1], (6,), 3 * 5 * 5),
        "conv2_w": u(ks[2], (16, 6, 5, 5), 6 * 5 * 5),
        "conv2_b": u(ks[3], (16,), 6 * 5 * 5),
        "fc1_w": u(ks[4], (120, 400), 400),
        "fc1_b": u(ks[5], (120,), 400),
        "fc2_w": u(ks[6], (84, 120), 120),
        "fc2_b": u(ks[7], (84,), 120),
        "fc3_w": u(ks[8], (10, 84), 84),
        "fc3_b": u(ks[9], (10,), 84),
    }


def prepare_params(params):
    """One-time (init-time) rearrangement of PyTorch weights into kernel-ready tensors."""
    p = {k: np.asarray(v, dtype=np.float32) for k, v in params.items()}
    w1, b1 = p["conv1_w"], p["conv1_b"]          # (6,3,5,5), (6,)
    w2, b2 = p["conv2_w"], p["conv2_b"]          # (16,6,5,5), (16,)

    # Per-tap block-diagonal conv weights: out[i, j*Co+co] += x[i+kh,(j+kw)*Ci+ci]*w.
    w1bd = np.stack([np.kron(np.eye(28, dtype=np.float32), w1[:, :, kh, kw].T)
                     for kh in range(5) for kw in range(5)])          # (25, 84, 168)
    w2bd = np.stack([np.kron(np.eye(10, dtype=np.float32), w2[:, :, kh, kw].T)
                     for kh in range(5) for kw in range(5)])          # (25, 60, 160)

    # Pooling row / column downsample-by-2 selection matrices.
    r1 = np.eye(27, dtype=np.float32)[0::2]                           # (14, 27)
    s1 = np.kron(np.eye(14, dtype=np.float32),
                 np.vstack([np.eye(6), np.zeros((6, 6))]).astype(np.float32))[:162]   # (162, 84)
    r2 = np.eye(9, dtype=np.float32)[0::2]                            # (5, 9)
    s2 = np.kron(np.eye(5, dtype=np.float32),
                 np.vstack([np.eye(16), np.zeros((16, 16))]).astype(np.float32))[:144]  # (144, 80)

    # fc1 with torch's (C,H,W) flatten permutation folded in: (5, 80, 120),
    # wp1[p][q*16+c, n] = fc1_w[n, c*25 + p*5 + q].
    wp1 = p["fc1_w"].reshape(120, 16, 5, 5).transpose(2, 3, 1, 0).reshape(5, 80, 120)

    kp = {
        "w1bd": w1bd, "b1row": np.tile(b1, 28)[None],                 # (1, 168)
        "r1": r1, "s1": s1,
        "w2bd": w2bd, "b2row": np.tile(b2, 10)[None],                 # (1, 160)
        "r2": r2, "s2": s2,
        "wp1": wp1, "bf1": p["fc1_b"][None],
        "wf2t": np.ascontiguousarray(p["fc2_w"].T), "bf2": p["fc2_b"][None],
        "wf3t": np.ascontiguousarray(p["fc3_w"].T), "bf3": p["fc3_b"][None],
    }
    return {k: jnp.asarray(v, dtype=jnp.float32) for k, v in kp.items()}


# ------------------------------ pure-JAX reference ---------------------------

def net_forward_reference(x, params):
    def pool(y):
        return jnp.maximum(jnp.maximum(y[:, :, 0::2, 0::2], y[:, :, 0::2, 1::2]),
                           jnp.maximum(y[:, :, 1::2, 0::2], y[:, :, 1::2, 1::2]))

    y = lax.conv_general_dilated(x, params["conv1_w"], (1, 1), "VALID",
                                 dimension_numbers=("NCHW", "OIHW", "NCHW"))
    y = pool(jnp.maximum(y + params["conv1_b"][None, :, None, None], 0.0))
    y = lax.conv_general_dilated(y, params["conv2_w"], (1, 1), "VALID",
                                 dimension_numbers=("NCHW", "OIHW", "NCHW"))
    y = pool(jnp.maximum(y + params["conv2_b"][None, :, None, None], 0.0))
    y = y.reshape(y.shape[0], 16 * 5 * 5)
    y = jnp.maximum(y @ params["fc1_w"].T + params["fc1_b"], 0.0)
    y = jnp.maximum(y @ params["fc2_w"].T + params["fc2_b"], 0.0)
    return y @ params["fc3_w"].T + params["fc3_b"]


# ----------------------------------- main -------------------------------------

if __name__ == "__main__":
    key = jax.random.PRNGKey(0)
    k_x, k_p = jax.random.split(key)
    x = jax.random.normal(k_x, (2, 3, 32, 32), jnp.float32)   # NCHW, like PyTorch
    params = init_params(k_p)
    kparams = prepare_params(params)                          # one-time weight prep

    out = jax.jit(net_forward)(x, kparams)
    out = jax.block_until_ready(out)

    assert out.shape == (2, 10), out.shape
    assert jnp.all(jnp.isfinite(out))

    ref = net_forward_reference(x, params)
    err = float(jnp.max(jnp.abs(out - ref)))
    assert err < 5e-2, f"mismatch vs reference: max abs err = {err}"

    print("KERNEL_OK")
</pallas_src>

<mosaic_0001>
module attributes {stable_mosaic.version = 11 : i64} {
  func.func @_net_kernel(%arg0: i32, %arg1: memref<1x32x96xf32, #tpu.memory_space<vmem>>, %arg2: memref<25x84x168xf32, #tpu.memory_space<vmem>>, %arg3: memref<1x168xf32, #tpu.memory_space<vmem>>, %arg4: memref<14x27xf32, #tpu.memory_space<vmem>>, %arg5: memref<162x84xf32, #tpu.memory_space<vmem>>, %arg6: memref<25x60x160xf32, #tpu.memory_space<vmem>>, %arg7: memref<1x160xf32, #tpu.memory_space<vmem>>, %arg8: memref<5x9xf32, #tpu.memory_space<vmem>>, %arg9: memref<144x80xf32, #tpu.memory_space<vmem>>, %arg10: memref<5x80x120xf32, #tpu.memory_space<vmem>>, %arg11: memref<1x120xf32, #tpu.memory_space<vmem>>, %arg12: memref<120x84xf32, #tpu.memory_space<vmem>>, %arg13: memref<1x84xf32, #tpu.memory_space<vmem>>, %arg14: memref<84x10xf32, #tpu.memory_space<vmem>>, %arg15: memref<1x10xf32, #tpu.memory_space<vmem>>, %arg16: memref<1x1x10xf32, #tpu.memory_space<vmem>>, %arg17: memref<28x168xf32, #tpu.memory_space<vmem>>, %arg18: memref<14x84xf32, #tpu.memory_space<vmem>>, %arg19: memref<10x160xf32, #tpu.memory_space<vmem>>, %arg20: memref<5x80xf32, #tpu.memory_space<vmem>>) attributes {dimension_semantics = [#tpu.dimension_semantics<parallel>], iteration_bounds = array<i64: 2>, scalar_prefetch = 0 : i64, scratch_operands = 4 : i64, tpu.core_type = #tpu.core_type<tc>, window_params = [{transform_indices = @transform_0, window_bounds = array<i64: 1, 32, 96>}, {pipeline_mode = #tpu.pipeline_mode<synchronous>, transform_indices = @transform_1, window_bounds = array<i64: 25, 84, 168>}, {pipeline_mode = #tpu.pipeline_mode<synchronous>, transform_indices = @transform_2, window_bounds = array<i64: 1, 168>}, {pipeline_mode = #tpu.pipeline_mode<synchronous>, transform_indices = @transform_3, window_bounds = array<i64: 14, 27>}, {pipeline_mode = #tpu.pipeline_mode<synchronous>, transform_indices = @transform_4, window_bounds = array<i64: 162, 84>}, {pipeline_mode = #tpu.pipeline_mode<synchronous>, transform_indices = @transform_5, window_bounds = array<i64: 25, 60, 160>}, {pipeline_mode = #tpu.pipeline_mode<synchronous>, transform_indices = @transform_6, window_bounds = array<i64: 1, 160>}, {pipeline_mode = #tpu.pipeline_mode<synchronous>, transform_indices = @transform_7, window_bounds = array<i64: 5, 9>}, {pipeline_mode = #tpu.pipeline_mode<synchronous>, transform_indices = @transform_8, window_bounds = array<i64: 144, 80>}, {pipeline_mode = #tpu.pipeline_mode<synchronous>, transform_indices = @transform_9, window_bounds = array<i64: 5, 80, 120>}, {pipeline_mode = #tpu.pipeline_mode<synchronous>, transform_indices = @transform_10, window_bounds = array<i64: 1, 120>}, {pipeline_mode = #tpu.pipeline_mode<synchronous>, transform_indices = @transform_11, window_bounds = array<i64: 120, 84>}, {pipeline_mode = #tpu.pipeline_mode<synchronous>, transform_indices = @transform_12, window_bounds = array<i64: 1, 84>}, {pipeline_mode = #tpu.pipeline_mode<synchronous>, transform_indices = @transform_13, window_bounds = array<i64: 84, 10>}, {pipeline_mode = #tpu.pipeline_mode<synchronous>, transform_indices = @transform_14, window_bounds = array<i64: 1, 10>}, {transform_indices = @transform_15, window_bounds = array<i64: 1, 1, 10>}]} {
    %cst = arith.constant 0.000000e+00 : f32
    %0 = vector.broadcast %cst : f32 to vector<28x168xf32>
    %c0 = arith.constant 0 : index
    %c0_0 = arith.constant 0 : index
    %c0_1 = arith.constant 0 : index
    %1 = vector.load %arg1[%c0, %c0_0, %c0_1] : memref<1x32x96xf32, #tpu.memory_space<vmem>>, vector<1x28x84xf32>
    %2 = vector.shape_cast %1 : vector<1x28x84xf32> to vector<28x84xf32>
    %c0_2 = arith.constant 0 : index
    %c0_3 = arith.constant 0 : index
    %c0_4 = arith.constant 0 : index
    %3 = vector.load %arg2[%c0_2, %c0_3, %c0_4] : memref<25x84x168xf32, #tpu.memory_space<vmem>>, vector<1x84x168xf32>
    %4 = vector.shape_cast %3 : vector<1x84x168xf32> to vector<84x168xf32>
    %cst_5 = arith.constant dense<0.000000e+00> : vector<28x168xf32>
    %5 = tpu.matmul %2, %4, %cst_5 {dimension_numbers = #tpu.dot_dimension_numbers<[1], [0], [0], [1], [0, 0, 1, 1], [], []>} : vector<28x84xf32>, vector<84x168xf32>, vector<28x168xf32> -> vector<28x168xf32>
    %6 = arith.addf %0, %5 : vector<28x168xf32>
    %c0_6 = arith.constant 0 : index
    %c0_7 = arith.constant 0 : index
    %c3 = arith.constant 3 : index
    %7 = vector.load %arg1[%c0_6, %c0_7, %c3] : memref<1x32x96xf32, #tpu.memory_space<vmem>>, vector<1x28x84xf32>
    %8 = vector.shape_cast %7 : vector<1x28x84xf32> to vector<28x84xf32>
    %c1 = arith.constant 1 : index
    %c0_8 = arith.constant 0 : index
    %c0_9 = arith.constant 0 : index
    %9 = vector.load %arg2[%c1, %c0_8, %c0_9] : memref<25x84x168xf32, #tpu.memory_space<vmem>>, vector<1x84x168xf32>
    %10 = vector.shape_cast %9 : vector<1x84x168xf32> to vector<84x168xf32>
    %cst_10 = arith.constant dense<0.000000e+00> : vector<28x168xf32>
    %11 = tpu.matmul %8, %10, %cst_10 {dimension_numbers = #tpu.dot_dimension_numbers<[1], [0], [0], [1], [0, 0, 1, 1], [], []>} : vector<28x84xf32>, vector<84x168xf32>, vector<28x168xf32> -> vector<28x168xf32>
    %12 = arith.addf %6, %11 : vector<28x168xf32>
    %c0_11 = arith.constant 0 : index
    %c0_12 = arith.constant 0 : index
    %c6 = arith.constant 6 : index
    %13 = vector.load %arg1[%c0_11, %c0_12, %c6] : memref<1x32x96xf32, #tpu.memory_space<vmem>>, vector<1x28x84xf32>
    %14 = vector.shape_cast %13 : vector<1x28x84xf32> to vector<28x84xf32>
    %c2 = arith.constant 2 : index
    %c0_13 = arith.constant 0 : index
    %c0_14 = arith.constant 0 : index
    %15 = vector.load %arg2[%c2, %c0_13, %c0_14] : memref<25x84x168xf32, #tpu.memory_space<vmem>>, vector<1x84x168xf32>
    %16 = vector.shape_cast %15 : vector<1x84x168xf32> to vector<84x168xf32>
    %cst_15 = arith.constant dense<0.000000e+00> : vector<28x168xf32>
    %17 = tpu.matmul %14, %16, %cst_15 {dimension_numbers = #tpu.dot_dimension_numbers<[1], [0], [0], [1], [0, 0, 1, 1], [], []>} : vector<28x84xf32>, vector<84x168xf32>, vector<28x168xf32> -> vector<28x168xf32>
    %18 = arith.addf %12, %17 : vector<28x168xf32>
    %c0_16 = arith.constant 0 : index
    %c0_17 = arith.constant 0 : index
    %c9 = arith.constant 9 : index
    %19 = vector.load %arg1[%c0_16, %c0_17, %c9] : memref<1x32x96xf32, #tpu.memory_space<vmem>>, vector<1x28x84xf32>
    %20 = vector.shape_cast %19 : vector<1x28x84xf32> to vector<28x84xf32>
    %c3_18 = arith.constant 3 : index
    %c0_19 = arith.constant 0 : index
    %c0_20 = arith.constant 0 : index
    %21 = vector.load %arg2[%c3_18, %c0_19, %c0_20] : memref<25x84x168xf32, #tpu.memory_space<vmem>>, vector<1x84x168xf32>
    %22 = vector.shape_cast %21 : vector<1x84x168xf32> to vector<84x168xf32>
    %cst_21 = arith.constant dense<0.000000e+00> : vector<28x168xf32>
    %23 = tpu.matmul %20, %22, %cst_21 {dimension_numbers = #tpu.dot_dimension_numbers<[1], [0], [0], [1], [0, 0, 1, 1], [], []>} : vector<28x84xf32>, vector<84x168xf32>, vector<28x168xf32> -> vector<28x168xf32>
    %24 = arith.addf %18, %23 : vector<28x168xf32>
    %c0_22 = arith.constant 0 : index
    %c0_23 = arith.constant 0 : index
    %c12 = arith.constant 12 : index
    %25 = vector.load %arg1[%c0_22, %c0_23, %c12] : memref<1x32x96xf32, #tpu.memory_space<vmem>>, vector<1x28x84xf32>
    %26 = vector.shape_cast %25 : vector<1x28x84xf32> to vector<28x84xf32>
    %c4 = arith.constant 4 : index
    %c0_24 = arith.constant 0 : index
    %c0_25 = arith.constant 0 : index
    %27 = vector.load %arg2[%c4, %c0_24, %c0_25] : memref<25x84x168xf32, #tpu.memory_space<vmem>>, vector<1x84x168xf32>
    %28 = vector.shape_cast %27 : vector<1x84x168xf32> to vector<84x168xf32>
    %cst_26 = arith.constant dense<0.000000e+00> : vector<28x168xf32>
    %29 = tpu.matmul %26, %28, %cst_26 {dimension_numbers = #tpu.dot_dimension_numbers<[1], [0], [0], [1], [0, 0, 1, 1], [], []>} : vector<28x84xf32>, vector<84x168xf32>, vector<28x168xf32> -> vector<28x168xf32>
    %30 = arith.addf %24, %29 : vector<28x168xf32>
    %c0_27 = arith.constant 0 : index
    %c1_28 = arith.constant 1 : index
    %c0_29 = arith.constant 0 : index
    %31 = vector.load %arg1[%c0_27, %c1_28, %c0_29] : memref<1x32x96xf32, #tpu.memory_space<vmem>>, vector<1x28x84xf32>
    %32 = vector.shape_cast %31 : vector<1x28x84xf32> to vector<28x84xf32>
    %c5 = arith.constant 5 : index
    %c0_30 = arith.constant 0 : index
    %c0_31 = arith.constant 0 : index
    %33 = vector.load %arg2[%c5, %c0_30, %c0_31] : memref<25x84x168xf32, #tpu.memory_space<vmem>>, vector<1x84x168xf32>
    %34 = vector.shape_cast %33 : vector<1x84x168xf32> to vector<84x168xf32>
    %cst_32 = arith.constant dense<0.000000e+00> : vector<28x168xf32>
    %35 = tpu.matmul %32, %34, %cst_32 {dimension_numbers = #tpu.dot_dimension_numbers<[1], [0], [0], [1], [0, 0, 1, 1], [], []>} : vector<28x84xf32>, vector<84x168xf32>, vector<28x168xf32> -> vector<28x168xf32>
    %36 = arith.addf %30, %35 : vector<28x168xf32>
    %c0_33 = arith.constant 0 : index
    %c1_34 = arith.constant 1 : index
    %c3_35 = arith.constant 3 : index
    %37 = vector.load %arg1[%c0_33, %c1_34, %c3_35] : memref<1x32x96xf32, #tpu.memory_space<vmem>>, vector<1x28x84xf32>
    %38 = vector.shape_cast %37 : vector<1x28x84xf32> to vector<28x84xf32>
    %c6_36 = arith.constant 6 : index
    %c0_37 = arith.constant 0 : index
    %c0_38 = arith.constant 0 : index
    %39 = vector.load %arg2[%c6_36, %c0_37, %c0_38] : memref<25x84x168xf32, #tpu.memory_space<vmem>>, vector<1x84x168xf32>
    %40 = vector.shape_cast %39 : vector<1x84x168xf32> to vector<84x168xf32>
    %cst_39 = arith.constant dense<0.000000e+00> : vector<28x168xf32>
    %41 = tpu.matmul %38, %40, %cst_39 {dimension_numbers = #tpu.dot_dimension_numbers<[1], [0], [0], [1], [0, 0, 1, 1], [], []>} : vector<28x84xf32>, vector<84x168xf32>, vector<28x168xf32> -> vector<28x168xf32>
    %42 = arith.addf %36, %41 : vector<28x168xf32>
    %c0_40 = arith.constant 0 : index
    %c1_41 = arith.constant 1 : index
    %c6_42 = arith.constant 6 : index
    %43 = vector.load %arg1[%c0_40, %c1_41, %c6_42] : memref<1x32x96xf32, #tpu.memory_space<vmem>>, vector<1x28x84xf32>
    %44 = vector.shape_cast %43 : vector<1x28x84xf32> to vector<28x84xf32>
    %c7 = arith.constant 7 : index
    %c0_43 = arith.constant 0 : index
    %c0_44 = arith.constant 0 : index
    %45 = vector.load %arg2[%c7, %c0_43, %c0_44] : memref<25x84x168xf32, #tpu.memory_space<vmem>>, vector<1x84x168xf32>
    %46 = vector.shape_cast %45 : vector<1x84x168xf32> to vector<84x168xf32>
    %cst_45 = arith.constant dense<0.000000e+00> : vector<28x168xf32>
    %47 = tpu.matmul %44, %46, %cst_45 {dimension_numbers = #tpu.dot_dimension_numbers<[1], [0], [0], [1], [0, 0, 1, 1], [], []>} : vector<28x84xf32>, vector<84x168xf32>, vector<28x168xf32> -> vector<28x168xf32>
    %48 = arith.addf %42, %47 : vector<28x168xf32>
    %c0_46 = arith.constant 0 : index
    %c1_47 = arith.constant 1 : index
    %c9_48 = arith.constant 9 : index
    %49 = vector.load %arg1[%c0_46, %c1_47, %c9_48] : memref<1x32x96xf32, #tpu.memory_space<vmem>>, vector<1x28x84xf32>
    %50 = vector.shape_cast %49 : vector<1x28x84xf32> to vector<28x84xf32>
    %c8 = arith.constant 8 : index
    %c0_49 = arith.constant 0 : index
    %c0_50 = arith.constant 0 : index
    %51 = vector.load %arg2[%c8, %c0_49, %c0_50] : memref<25x84x168xf32, #tpu.memory_space<vmem>>, vector<1x84x168xf32>
    %52 = vector.shape_cast %51 : vector<1x84x168xf32> to vector<84x168xf32>
    %cst_51 = arith.constant dense<0.000000e+00> : vector<28x168xf32>
    %53 = tpu.matmul %50, %52, %cst_51 {dimension_numbers = #tpu.dot_dimension_numbers<[1], [0], [0], [1], [0, 0, 1, 1], [], []>} : vector<28x84xf32>, vector<84x168xf32>, vector<28x168xf32> -> vector<28x168xf32>
    %54 = arith.addf %48, %53 : vector<28x168xf32>
    %c0_52 = arith.constant 0 : index
    %c1_53 = arith.constant 1 : index
    %c12_54 = arith.constant 12 : index
    %55 = vector.load %arg1[%c0_52, %c1_53, %c12_54] : memref<1x32x96xf32, #tpu.memory_space<vmem>>, vector<1x28x84xf32>
    %56 = vector.shape_cast %55 : vector<1x28x84xf32> to vector<28x84xf32>
    %c9_55 = arith.constant 9 : index
    %c0_56 = arith.constant 0 : index
    %c0_57 = arith.constant 0 : index
    %57 = vector.load %arg2[%c9_55, %c0_56, %c0_57] : memref<25x84x168xf32, #tpu.memory_space<vmem>>, vector<1x84x168xf32>
    %58 = vector.shape_cast %57 : vector<1x84x168xf32> to vector<84x168xf32>
    %cst_58 = arith.constant dense<0.000000e+00> : vector<28x168xf32>
    %59 = tpu.matmul %56, %58, %cst_58 {dimension_numbers = #tpu.dot_dimension_numbers<[1], [0], [0], [1], [0, 0, 1, 1], [], []>} : vector<28x84xf32>, vector<84x168xf32>, vector<28x168xf32> -> vector<28x168xf32>
    %60 = arith.addf %54, %59 : vector<28x168xf32>
    %c0_59 = arith.constant 0 : index
    %c2_60 = arith.constant 2 : index
    %c0_61 = arith.constant 0 : index
    %61 = vector.load %arg1[%c0_59, %c2_60, %c0_61] : memref<1x32x96xf32, #tpu.memory_space<vmem>>, vector<1x28x84xf32>
    %62 = vector.shape_cast %61 : vector<1x28x84xf32> to vector<28x84xf32>
    %c10 = arith.constant 10 : index
    %c0_62 = arith.constant 0 : index
    %c0_63 = arith.constant 0 : index
    %63 = vector.load %arg2[%c10, %c0_62, %c0_63] : memref<25x84x168xf32, #tpu.memory_space<vmem>>, vector<1x84x168xf32>
    %64 = vector.shape_cast %63 : vector<1x84x168xf32> to vector<84x168xf32>
    %cst_64 = arith.constant dense<0.000000e+00> : vector<28x168xf32>
    %65 = tpu.matmul %62, %64, %cst_64 {dimension_numbers = #tpu.dot_dimension_numbers<[1], [0], [0], [1], [0, 0, 1, 1], [], []>} : vector<28x84xf32>, vector<84x168xf32>, vector<28x168xf32> -> vector<28x168xf32>
    %66 = arith.addf %60, %65 : vector<28x168xf32>
    %c0_65 = arith.constant 0 : index
    %c2_66 = arith.constant 2 : index
    %c3_67 = arith.constant 3 : index
    %67 = vector.load %arg1[%c0_65, %c2_66, %c3_67] : memref<1x32x96xf32, #tpu.memory_space<vmem>>, vector<1x28x84xf32>
    %68 = vector.shape_cast %67 : vector<1x28x84xf32> to vector<28x84xf32>
    %c11 = arith.constant 11 : index
    %c0_68 = arith.constant 0 : index
    %c0_69 = arith.constant 0 : index
    %69 = vector.load %arg2[%c11, %c0_68, %c0_69] : memref<25x84x168xf32, #tpu.memory_space<vmem>>, vector<1x84x168xf32>
    %70 = vector.shape_cast %69 : vector<1x84x168xf32> to vector<84x168xf32>
    %cst_70 = arith.constant dense<0.000000e+00> : vector<28x168xf32>
    %71 = tpu.matmul %68, %70, %cst_70 {dimension_numbers = #tpu.dot_dimension_numbers<[1], [0], [0], [1], [0, 0, 1, 1], [], []>} : vector<28x84xf32>, vector<84x168xf32>, vector<28x168xf32> -> vector<28x168xf32>
    %72 = arith.addf %66, %71 : vector<28x168xf32>
    %c0_71 = arith.constant 0 : index
    %c2_72 = arith.constant 2 : index
    %c6_73 = arith.constant 6 : index
    %73 = vector.load %arg1[%c0_71, %c2_72, %c6_73] : memref<1x32x96xf32, #tpu.memory_space<vmem>>, vector<1x28x84xf32>
    %74 = vector.shape_cast %73 : vector<1x28x84xf32> to vector<28x84xf32>
    %c12_74 = arith.constant 12 : index
    %c0_75 = arith.constant 0 : index
    %c0_76 = arith.constant 0 : index
    %75 = vector.load %arg2[%c12_74, %c0_75, %c0_76] : memref<25x84x168xf32, #tpu.memory_space<vmem>>, vector<1x84x168xf32>
    %76 = vector.shape_cast %75 : vector<1x84x168xf32> to vector<84x168xf32>
    %cst_77 = arith.constant dense<0.000000e+00> : vector<28x168xf32>
    %77 = tpu.matmul %74, %76, %cst_77 {dimension_numbers = #tpu.dot_dimension_numbers<[1], [0], [0], [1], [0, 0, 1, 1], [], []>} : vector<28x84xf32>, vector<84x168xf32>, vector<28x168xf32> -> vector<28x168xf32>
    %78 = arith.addf %72, %77 : vector<28x168xf32>
    %c0_78 = arith.constant 0 : index
    %c2_79 = arith.constant 2 : index
    %c9_80 = arith.constant 9 : index
    %79 = vector.load %arg1[%c0_78, %c2_79, %c9_80] : memref<1x32x96xf32, #tpu.memory_space<vmem>>, vector<1x28x84xf32>
    %80 = vector.shape_cast %79 : vector<1x28x84xf32> to vector<28x84xf32>
    %c13 = arith.constant 13 : index
    %c0_81 = arith.constant 0 : index
    %c0_82 = arith.constant 0 : index
    %81 = vector.load %arg2[%c13, %c0_81, %c0_82] : memref<25x84x168xf32, #tpu.memory_space<vmem>>, vector<1x84x168xf32>
    %82 = vector.shape_cast %81 : vector<1x84x168xf32> to vector<84x168xf32>
    %cst_83 = arith.constant dense<0.000000e+00> : vector<28x168xf32>
    %83 = tpu.matmul %80, %82, %cst_83 {dimension_numbers = #tpu.dot_dimension_numbers<[1], [0], [0], [1], [0, 0, 1, 1], [], []>} : vector<28x84xf32>, vector<84x168xf32>, vector<28x168xf32> -> vector<28x168xf32>
    %84 = arith.addf %78, %83 : vector<28x168xf32>
    %c0_84 = arith.constant 0 : index
    %c2_85 = arith.constant 2 : index
    %c12_86 = arith.constant 12 : index
    %85 = vector.load %arg1[%c0_84, %c2_85, %c12_86] : memref<1x32x96xf32, #tpu.memory_space<vmem>>, vector<1x28x84xf32>
    %86 = vector.shape_cast %85 : vector<1x28x84xf32> to vector<28x84xf32>
    %c14 = arith.constant 14 : index
    %c0_87 = arith.constant 0 : index
    %c0_88 = arith.constant 0 : index
    %87 = vector.load %arg2[%c14, %c0_87, %c0_88] : memref<25x84x168xf32, #tpu.memory_space<vmem>>, vector<1x84x168xf32>
    %88 = vector.shape_cast %87 : vector<1x84x168xf32> to vector<84x168xf32>
    %cst_89 = arith.constant dense<0.000000e+00> : vector<28x168xf32>
    %89 = tpu.matmul %86, %88, %cst_89 {dimension_numbers = #tpu.dot_dimension_numbers<[1], [0], [0], [1], [0, 0, 1, 1], [], []>} : vector<28x84xf32>, vector<84x168xf32>, vector<28x168xf32> -> vector<28x168xf32>
    %90 = arith.addf %84, %89 : vector<28x168xf32>
    %c0_90 = arith.constant 0 : index
    %c3_91 = arith.constant 3 : index
    %c0_92 = arith.constant 0 : index
    %91 = vector.load %arg1[%c0_90, %c3_91, %c0_92] : memref<1x32x96xf32, #tpu.memory_space<vmem>>, vector<1x28x84xf32>
    %92 = vector.shape_cast %91 : vector<1x28x84xf32> to vector<28x84xf32>
    %c15 = arith.constant 15 : index
    %c0_93 = arith.constant 0 : index
    %c0_94 = arith.constant 0 : index
    %93 = vector.load %arg2[%c15, %c0_93, %c0_94] : memref<25x84x168xf32, #tpu.memory_space<vmem>>, vector<1x84x168xf32>
    %94 = vector.shape_cast %93 : vector<1x84x168xf32> to vector<84x168xf32>
    %cst_95 = arith.constant dense<0.000000e+00> : vector<28x168xf32>
    %95 = tpu.matmul %92, %94, %cst_95 {dimension_numbers = #tpu.dot_dimension_numbers<[1], [0], [0], [1], [0, 0, 1, 1], [], []>} : vector<28x84xf32>, vector<84x168xf32>, vector<28x168xf32> -> vector<28x168xf32>
    %96 = arith.addf %90, %95 : vector<28x168xf32>
    %c0_96 = arith.constant 0 : index
    %c3_97 = arith.constant 3 : index
    %c3_98 = arith.constant 3 : index
    %97 = vector.load %arg1[%c0_96, %c3_97, %c3_98] : memref<1x32x96xf32, #tpu.memory_space<vmem>>, vector<1x28x84xf32>
    %98 = vector.shape_cast %97 : vector<1x28x84xf32> to vector<28x84xf32>
    %c16 = arith.constant 16 : index
    %c0_99 = arith.constant 0 : index
    %c0_100 = arith.constant 0 : index
    %99 = vector.load %arg2[%c16, %c0_99, %c0_100] : memref<25x84x168xf32, #tpu.memory_space<vmem>>, vector<1x84x168xf32>
    %100 = vector.shape_cast %99 : vector<1x84x168xf32> to vector<84x168xf32>
    %cst_101 = arith.constant dense<0.000000e+00> : vector<28x168xf32>
    %101 = tpu.matmul %98, %100, %cst_101 {dimension_numbers = #tpu.dot_dimension_numbers<[1], [0], [0], [1], [0, 0, 1, 1], [], []>} : vector<28x84xf32>, vector<84x168xf32>, vector<28x168xf32> -> vector<28x168xf32>
    %102 = arith.addf %96, %101 : vector<28x168xf32>
    %c0_102 = arith.constant 0 : index
    %c3_103 = arith.constant 3 : index
    %c6_104 = arith.constant 6 : index
    %103 = vector.load %arg1[%c0_102, %c3_103, %c6_104] : memref<1x32x96xf32, #tpu.memory_space<vmem>>, vector<1x28x84xf32>
    %104 = vector.shape_cast %103 : vector<1x28x84xf32> to vector<28x84xf32>
    %c17 = arith.constant 17 : index
    %c0_105 = arith.constant 0 : index
    %c0_106 = arith.constant 0 : index
    %105 = vector.load %arg2[%c17, %c0_105, %c0_106] : memref<25x84x168xf32, #tpu.memory_space<vmem>>, vector<1x84x168xf32>
    %106 = vector.shape_cast %105 : vector<1x84x168xf32> to vector<84x168xf32>
    %cst_107 = arith.constant dense<0.000000e+00> : vector<28x168xf32>
    %107 = tpu.matmul %104, %106, %cst_107 {dimension_numbers = #tpu.dot_dimension_numbers<[1], [0], [0], [1], [0, 0, 1, 1], [], []>} : vector<28x84xf32>, vector<84x168xf32>, vector<28x168xf32> -> vector<28x168xf32>
    %108 = arith.addf %102, %107 : vector<28x168xf32>
    %c0_108 = arith.constant 0 : index
    %c3_109 = arith.constant 3 : index
    %c9_110 = arith.constant 9 : index
    %109 = vector.load %arg1[%c0_108, %c3_109, %c9_110] : memref<1x32x96xf32, #tpu.memory_space<vmem>>, vector<1x28x84xf32>
    %110 = vector.shape_cast %109 : vector<1x28x84xf32> to vector<28x84xf32>
    %c18 = arith.constant 18 : index
    %c0_111 = arith.constant 0 : index
    %c0_112 = arith.constant 0 : index
    %111 = vector.load %arg2[%c18, %c0_111, %c0_112] : memref<25x84x168xf32, #tpu.memory_space<vmem>>, vector<1x84x168xf32>
    %112 = vector.shape_cast %111 : vector<1x84x168xf32> to vector<84x168xf32>
    %cst_113 = arith.constant dense<0.000000e+00> : vector<28x168xf32>
    %113 = tpu.matmul %110, %112, %cst_113 {dimension_numbers = #tpu.dot_dimension_numbers<[1], [0], [0], [1], [0, 0, 1, 1], [], []>} : vector<28x84xf32>, vector<84x168xf32>, vector<28x168xf32> -> vector<28x168xf32>
    %114 = arith.addf %108, %113 : vector<28x168xf32>
    %c0_114 = arith.constant 0 : index
    %c3_115 = arith.constant 3 : index
    %c12_116 = arith.constant 12 : index
    %115 = vector.load %arg1[%c0_114, %c3_115, %c12_116] : memref<1x32x96xf32, #tpu.memory_space<vmem>>, vector<1x28x84xf32>
    %116 = vector.shape_cast %115 : vector<1x28x84xf32> to vector<28x84xf32>
    %c19 = arith.constant 19 : index
    %c0_117 = arith.constant 0 : index
    %c0_118 = arith.constant 0 : index
    %117 = vector.load %arg2[%c19, %c0_117, %c0_118] : memref<25x84x168xf32, #tpu.memory_space<vmem>>, vector<1x84x168xf32>
    %118 = vector.shape_cast %117 : vector<1x84x168xf32> to vector<84x168xf32>
    %cst_119 = arith.constant dense<0.000000e+00> : vector<28x168xf32>
    %119 = tpu.matmul %116, %118, %cst_119 {dimension_numbers = #tpu.dot_dimension_numbers<[1], [0], [0], [1], [0, 0, 1, 1], [], []>} : vector<28x84xf32>, vector<84x168xf32>, vector<28x168xf32> -> vector<28x168xf32>
    %120 = arith.addf %114, %119 : vector<28x168xf32>
    %c0_120 = arith.constant 0 : index
    %c4_121 = arith.constant 4 : index
    %c0_122 = arith.constant 0 : index
    %121 = vector.load %arg1[%c0_120, %c4_121, %c0_122] : memref<1x32x96xf32, #tpu.memory_space<vmem>>, vector<1x28x84xf32>
    %122 = vector.shape_cast %121 : vector<1x28x84xf32> to vector<28x84xf32>
    %c20 = arith.constant 20 : index
    %c0_123 = arith.constant 0 : index
    %c0_124 = arith.constant 0 : index
    %123 = vector.load %arg2[%c20, %c0_123, %c0_124] : memref<25x84x168xf32, #tpu.memory_space<vmem>>, vector<1x84x168xf32>
    %124 = vector.shape_cast %123 : vector<1x84x168xf32> to vector<84x168xf32>
    %cst_125 = arith.constant dense<0.000000e+00> : vector<28x168xf32>
    %125 = tpu.matmul %122, %124, %cst_125 {dimension_numbers = #tpu.dot_dimension_numbers<[1], [0], [0], [1], [0, 0, 1, 1], [], []>} : vector<28x84xf32>, vector<84x168xf32>, vector<28x168xf32> -> vector<28x168xf32>
    %126 = arith.addf %120, %125 : vector<28x168xf32>
    %c0_126 = arith.constant 0 : index
    %c4_127 = arith.constant 4 : index
    %c3_128 = arith.constant 3 : index
    %127 = vector.load %arg1[%c0_126, %c4_127, %c3_128] : memref<1x32x96xf32, #tpu.memory_space<vmem>>, vector<1x28x84xf32>
    %128 = vector.shape_cast %127 : vector<1x28x84xf32> to vector<28x84xf32>
    %c21 = arith.constant 21 : index
    %c0_129 = arith.constant 0 : index
    %c0_130 = arith.constant 0 : index
    %129 = vector.load %arg2[%c21, %c0_129, %c0_130] : memref<25x84x168xf32, #tpu.memory_space<vmem>>, vector<1x84x168xf32>
    %130 = vector.shape_cast %129 : vector<1x84x168xf32> to vector<84x168xf32>
    %cst_131 = arith.constant dense<0.000000e+00> : vector<28x168xf32>
    %131 = tpu.matmul %128, %130, %cst_131 {dimension_numbers = #tpu.dot_dimension_numbers<[1], [0], [0], [1], [0, 0, 1, 1], [], []>} : vector<28x84xf32>, vector<84x168xf32>, vector<28x168xf32> -> vector<28x168xf32>
    %132 = arith.addf %126, %131 : vector<28x168xf32>
    %c0_132 = arith.constant 0 : index
    %c4_133 = arith.constant 4 : index
    %c6_134 = arith.constant 6 : index
    %133 = vector.load %arg1[%c0_132, %c4_133, %c6_134] : memref<1x32x96xf32, #tpu.memory_space<vmem>>, vector<1x28x84xf32>
    %134 = vector.shape_cast %133 : vector<1x28x84xf32> to vector<28x84xf32>
    %c22 = arith.constant 22 : index
    %c0_135 = arith.constant 0 : index
    %c0_136 = arith.constant 0 : index
    %135 = vector.load %arg2[%c22, %c0_135, %c0_136] : memref<25x84x168xf32, #tpu.memory_space<vmem>>, vector<1x84x168xf32>
    %136 = vector.shape_cast %135 : vector<1x84x168xf32> to vector<84x168xf32>
    %cst_137 = arith.constant dense<0.000000e+00> : vector<28x168xf32>
    %137 = tpu.matmul %134, %136, %cst_137 {dimension_numbers = #tpu.dot_dimension_numbers<[1], [0], [0], [1], [0, 0, 1, 1], [], []>} : vector<28x84xf32>, vector<84x168xf32>, vector<28x168xf32> -> vector<28x168xf32>
    %138 = arith.addf %132, %137 : vector<28x168xf32>
    %c0_138 = arith.constant 0 : index
    %c4_139 = arith.constant 4 : index
    %c9_140 = arith.constant 9 : index
    %139 = vector.load %arg1[%c0_138, %c4_139, %c9_140] : memref<1x32x96xf32, #tpu.memory_space<vmem>>, vector<1x28x84xf32>
    %140 = vector.shape_cast %139 : vector<1x28x84xf32> to vector<28x84xf32>
    %c23 = arith.constant 23 : index
    %c0_141 = arith.constant 0 : index
    %c0_142 = arith.constant 0 : index
    %141 = vector.load %arg2[%c23, %c0_141, %c0_142] : memref<25x84x168xf32, #tpu.memory_space<vmem>>, vector<1x84x168xf32>
    %142 = vector.shape_cast %141 : vector<1x84x168xf32> to vector<84x168xf32>
    %cst_143 = arith.constant dense<0.000000e+00> : vector<28x168xf32>
    %143 = tpu.matmul %140, %142, %cst_143 {dimension_numbers = #tpu.dot_dimension_numbers<[1], [0], [0], [1], [0, 0, 1, 1], [], []>} : vector<28x84xf32>, vector<84x168xf32>, vector<28x168xf32> -> vector<28x168xf32>
    %144 = arith.addf %138, %143 : vector<28x168xf32>
    %c0_144 = arith.constant 0 : index
    %c4_145 = arith.constant 4 : index
    %c12_146 = arith.constant 12 : index
    %145 = vector.load %arg1[%c0_144, %c4_145, %c12_146] : memref<1x32x96xf32, #tpu.memory_space<vmem>>, vector<1x28x84xf32>
    %146 = vector.shape_cast %145 : vector<1x28x84xf32> to vector<28x84xf32>
    %c24 = arith.constant 24 : index
    %c0_147 = arith.constant 0 : index
    %c0_148 = arith.constant 0 : index
    %147 = vector.load %arg2[%c24, %c0_147, %c0_148] : memref<25x84x168xf32, #tpu.memory_space<vmem>>, vector<1x84x168xf32>
    %148 = vector.shape_cast %147 : vector<1x84x168xf32> to vector<84x168xf32>
    %cst_149 = arith.constant dense<0.000000e+00> : vector<28x168xf32>
    %149 = tpu.matmul %146, %148, %cst_149 {dimension_numbers = #tpu.dot_dimension_numbers<[1], [0], [0], [1], [0, 0, 1, 1], [], []>} : vector<28x84xf32>, vector<84x168xf32>, vector<28x168xf32> -> vector<28x168xf32>
    %150 = arith.addf %144, %149 : vector<28x168xf32>
    %c0_150 = arith.constant 0 : index
    %c0_151 = arith.constant 0 : index
    %151 = vector.load %arg3[%c0_150, %c0_151] : memref<1x168xf32, #tpu.memory_space<vmem>>, vector<1x168xf32>
    %152 = vector.broadcast %151 : vector<1x168xf32> to vector<28x168xf32>
    %153 = arith.addf %150, %152 : vector<28x168xf32>
    %cst_152 = arith.constant 0.000000e+00 : f32
    %154 = vector.broadcast %cst_152 : f32 to vector<28x168xf32>
    %155 = arith.maximumf %153, %154 : vector<28x168xf32>
    %c0_153 = arith.constant 0 : index
    %c0_154 = arith.constant 0 : index
    %156 = vector.load %arg17[%c0_153, %c0_154] : memref<28x168xf32, #tpu.memory_space<vmem>>, vector<28x168xf32>
    tpu.vector_store %arg17[%c0_153, %c0_154], %155 {strides = array<i32>} : memref<28x168xf32, #tpu.memory_space<vmem>>, vector<28x168xf32>,
    %c0_155 = arith.constant 0 : index
    %c0_156 = arith.constant 0 : index
    %157 = vector.load %arg17[%c0_155, %c0_156] : memref<28x168xf32, #tpu.memory_space<vmem>>, vector<27x162xf32>
    %c0_157 = arith.constant 0 : index
    %c6_158 = arith.constant 6 : index
    %158 = vector.load %arg17[%c0_157, %c6_158] : memref<28x168xf32, #tpu.memory_space<vmem>>, vector<27x162xf32>
    %159 = arith.maximumf %157, %158 : vector<27x162xf32>
    %c1_159 = arith.constant 1 : index
    %c0_160 = arith.constant 0 : index
    %160 = vector.load %arg17[%c1_159, %c0_160] : memref<28x168xf32, #tpu.memory_space<vmem>>, vector<27x162xf32>
    %c1_161 = arith.constant 1 : index
    %c6_162 = arith.constant 6 : index
    %161 = vector.load %arg17[%c1_161, %c6_162] : memref<28x168xf32, #tpu.memory_space<vmem>>, vector<27x162xf32>
    %162 = arith.maximumf %160, %161 : vector<27x162xf32>
    %163 = arith.maximumf %159, %162 : vector<27x162xf32>
    %c0_163 = arith.constant 0 : index
    %c0_164 = arith.constant 0 : index
    %164 = vector.load %arg4[%c0_163, %c0_164] : memref<14x27xf32, #tpu.memory_space<vmem>>, vector<14x27xf32>
    %cst_165 = arith.constant dense<0.000000e+00> : vector<14x162xf32>
    %165 = tpu.matmul %164, %163, %cst_165 {dimension_numbers = #tpu.dot_dimension_numbers<[1], [0], [0], [1], [0, 0, 1, 1], [], []>} : vector<14x27xf32>, vector<27x162xf32>, vector<14x162xf32> -> vector<14x162xf32>
    %c0_166 = arith.constant 0 : index
    %c0_167 = arith.constant 0 : index
    %166 = vector.load %arg5[%c0_166, %c0_167] : memref<162x84xf32, #tpu.memory_space<vmem>>, vector<162x84xf32>
    %cst_168 = arith.constant dense<0.000000e+00> : vector<14x84xf32>
    %167 = tpu.matmul %165, %166, %cst_168 {dimension_numbers = #tpu.dot_dimension_numbers<[1], [0], [0], [1], [0, 0, 1, 1], [], []>} : vector<14x162xf32>, vector<162x84xf32>, vector<14x84xf32> -> vector<14x84xf32>
    %c0_169 = arith.constant 0 : index
    %c0_170 = arith.constant 0 : index
    %168 = vector.load %arg18[%c0_169, %c0_170] : memref<14x84xf32, #tpu.memory_space<vmem>>, vector<14x84xf32>
    tpu.vector_store %arg18[%c0_169, %c0_170], %167 {strides = array<i32>} : memref<14x84xf32, #tpu.memory_space<vmem>>, vector<14x84xf32>,
    %cst_171 = arith.constant 0.000000e+00 : f32
    %169 = vector.broadcast %cst_171 : f32 to vector<10x160xf32>
    %c0_172 = arith.constant 0 : index
    %c0_173 = arith.constant 0 : index
    %170 = vector.load %arg18[%c0_172, %c0_173] : memref<14x84xf32, #tpu.memory_space<vmem>>, vector<10x60xf32>
    %c0_174 = arith.constant 0 : index
    %c0_175 = arith.constant 0 : index
    %c0_176 = arith.constant 0 : index
    %171 = vector.load %arg6[%c0_174, %c0_175, %c0_176] : memref<25x60x160xf32, #tpu.memory_space<vmem>>, vector<1x60x160xf32>
    %172 = vector.shape_cast %171 : vector<1x60x160xf32> to vector<60x160xf32>
    %cst_177 = arith.constant dense<0.000000e+00> : vector<10x160xf32>
    %173 = tpu.matmul %170, %172, %cst_177 {dimension_numbers = #tpu.dot_dimension_numbers<[1], [0], [0], [1], [0, 0, 1, 1], [], []>} : vector<10x60xf32>, vector<60x160xf32>, vector<10x160xf32> -> vector<10x160xf32>
    %174 = arith.addf %169, %173 : vector<10x160xf32>
    %c0_178 = arith.constant 0 : index
    %c6_179 = arith.constant 6 : index
    %175 = vector.load %arg18[%c0_178, %c6_179] : memref<14x84xf32, #tpu.memory_space<vmem>>, vector<10x60xf32>
    %c1_180 = arith.constant 1 : index
    %c0_181 = arith.constant 0 : index
    %c0_182 = arith.constant 0 : index
    %176 = vector.load %arg6[%c1_180, %c0_181, %c0_182] : memref<25x60x160xf32, #tpu.memory_space<vmem>>, vector<1x60x160xf32>
    %177 = vector.shape_cast %176 : vector<1x60x160xf32> to vector<60x160xf32>
    %cst_183 = arith.constant dense<0.000000e+00> : vector<10x160xf32>
    %178 = tpu.matmul %175, %177, %cst_183 {dimension_numbers = #tpu.dot_dimension_numbers<[1], [0], [0], [1], [0, 0, 1, 1], [], []>} : vector<10x60xf32>, vector<60x160xf32>, vector<10x160xf32> -> vector<10x160xf32>
    %179 = arith.addf %174, %178 : vector<10x160xf32>
    %c0_184 = arith.constant 0 : index
    %c12_185 = arith.constant 12 : index
    %180 = vector.load %arg18[%c0_184, %c12_185] : memref<14x84xf32, #tpu.memory_space<vmem>>, vector<10x60xf32>
    %c2_186 = arith.constant 2 : index
    %c0_187 = arith.constant 0 : index
    %c0_188 = arith.constant 0 : index
    %181 = vector.load %arg6[%c2_186, %c0_187, %c0_188] : memref<25x60x160xf32, #tpu.memory_space<vmem>>, vector<1x60x160xf32>
    %182 = vector.shape_cast %181 : vector<1x60x160xf32> to vector<60x160xf32>
    %cst_189 = arith.constant dense<0.000000e+00> : vector<10x160xf32>
    %183 = tpu.matmul %180, %182, %cst_189 {dimension_numbers = #tpu.dot_dimension_numbers<[1], [0], [0], [1], [0, 0, 1, 1], [], []>} : vector<10x60xf32>, vector<60x160xf32>, vector<10x160xf32> -> vector<10x160xf32>
    %184 = arith.addf %179, %183 : vector<10x160xf32>
    %c0_190 = arith.constant 0 : index
    %c18_191 = arith.constant 18 : index
    %185 = vector.load %arg18[%c0_190, %c18_191] : memref<14x84xf32, #tpu.memory_space<vmem>>, vector<10x60xf32>
    %c3_192 = arith.constant 3 : index
    %c0_193 = arith.constant 0 : index
    %c0_194 = arith.constant 0 : index
    %186 = vector.load %arg6[%c3_192, %c0_193, %c0_194] : memref<25x60x160xf32, #tpu.memory_space<vmem>>, vector<1x60x160xf32>
    %187 = vector.shape_cast %186 : vector<1x60x160xf32> to vector<60x160xf32>
    %cst_195 = arith.constant dense<0.000000e+00> : vector<10x160xf32>
    %188 = tpu.matmul %185, %187, %cst_195 {dimension_numbers = #tpu.dot_dimension_numbers<[1], [0], [0], [1], [0, 0, 1, 1], [], []>} : vector<10x60xf32>, vector<60x160xf32>, vector<10x160xf32> -> vector<10x160xf32>
    %189 = arith.addf %184, %188 : vector<10x160xf32>
    %c0_196 = arith.constant 0 : index
    %c24_197 = arith.constant 24 : index
    %190 = vector.load %arg18[%c0_196, %c24_197] : memref<14x84xf32, #tpu.memory_space<vmem>>, vector<10x60xf32>
    %c4_198 = arith.constant 4 : index
    %c0_199 = arith.constant 0 : index
    %c0_200 = arith.constant 0 : index
    %191 = vector.load %arg6[%c4_198, %c0_199, %c0_200] : memref<25x60x160xf32, #tpu.memory_space<vmem>>, vector<1x60x160xf32>
    %192 = vector.shape_cast %191 : vector<1x60x160xf32> to vector<60x160xf32>
    %cst_201 = arith.constant dense<0.000000e+00> : vector<10x160xf32>
    %193 = tpu.matmul %190, %192, %cst_201 {dimension_numbers = #tpu.dot_dimension_numbers<[1], [0], [0], [1], [0, 0, 1, 1], [], []>} : vector<10x60xf32>, vector<60x160xf32>, vector<10x160xf32> -> vector<10x160xf32>
    %194 = arith.addf %189, %193 : vector<10x160xf32>
    %c1_202 = arith.constant 1 : index
    %c0_203 = arith.constant 0 : index
    %195 = vector.load %arg18[%c1_202, %c0_203] : memref<14x84xf32, #tpu.memory_space<vmem>>, vector<10x60xf32>
    %c5_204 = arith.constant 5 : index
    %c0_205 = arith.constant 0 : index
    %c0_206 = arith.constant 0 : index
    %196 = vector.load %arg6[%c5_204, %c0_205, %c0_206] : memref<25x60x160xf32, #tpu.memory_space<vmem>>, vector<1x60x160xf32>
    %197 = vector.shape_cast %196 : vector<1x60x160xf32> to vector<60x160xf32>
    %cst_207 = arith.constant dense<0.000000e+00> : vector<10x160xf32>
    %198 = tpu.matmul %195, %197, %cst_207 {dimension_numbers = #tpu.dot_dimension_numbers<[1], [0], [0], [1], [0, 0, 1, 1], [], []>} : vector<10x60xf32>, vector<60x160xf32>, vector<10x160xf32> -> vector<10x160xf32>
    %199 = arith.addf %194, %198 : vector<10x160xf32>
    %c1_208 = arith.constant 1 : index
    %c6_209 = arith.constant 6 : index
    %200 = vector.load %arg18[%c1_208, %c6_209] : memref<14x84xf32, #tpu.memory_space<vmem>>, vector<10x60xf32>
    %c6_210 = arith.constant 6 : index
    %c0_211 = arith.constant 0 : index
    %c0_212 = arith.constant 0 : index
    %201 = vector.load %arg6[%c6_210, %c0_211, %c0_212] : memref<25x60x160xf32, #tpu.memory_space<vmem>>, vector<1x60x160xf32>
    %202 = vector.shape_cast %201 : vector<1x60x160xf32> to vector<60x160xf32>
    %cst_213 = arith.constant dense<0.000000e+00> : vector<10x160xf32>
    %203 = tpu.matmul %200, %202, %cst_213 {dimension_numbers = #tpu.dot_dimension_numbers<[1], [0], [0], [1], [0, 0, 1, 1], [], []>} : vector<10x60xf32>, vector<60x160xf32>, vector<10x160xf32> -> vector<10x160xf32>
    %204 = arith.addf %199, %203 : vector<10x160xf32>
    %c1_214 = arith.constant 1 : index
    %c12_215 = arith.constant 12 : index
    %205 = vector.load %arg18[%c1_214, %c12_215] : memref<14x84xf32, #tpu.memory_space<vmem>>, vector<10x60xf32>
    %c7_216 = arith.constant 7 : index
    %c0_217 = arith.constant 0 : index
    %c0_218 = arith.constant 0 : index
    %206 = vector.load %arg6[%c7_216, %c0_217, %c0_218] : memref<25x60x160xf32, #tpu.memory_space<vmem>>, vector<1x60x160xf32>
    %207 = vector.shape_cast %206 : vector<1x60x160xf32> to vector<60x160xf32>
    %cst_219 = arith.constant dense<0.000000e+00> : vector<10x160xf32>
    %208 = tpu.matmul %205, %207, %cst_219 {dimension_numbers = #tpu.dot_dimension_numbers<[1], [0], [0], [1], [0, 0, 1, 1], [], []>} : vector<10x60xf32>, vector<60x160xf32>, vector<10x160xf32> -> vector<10x160xf32>
    %209 = arith.addf %204, %208 : vector<10x160xf32>
    %c1_220 = arith.constant 1 : index
    %c18_221 = arith.constant 18 : index
    %210 = vector.load %arg18[%c1_220, %c18_221] : memref<14x84xf32, #tpu.memory_space<vmem>>, vector<10x60xf32>
    %c8_222 = arith.constant 8 : index
    %c0_223 = arith.constant 0 : index
    %c0_224 = arith.constant 0 : index
    %211 = vector.load %arg6[%c8_222, %c0_223, %c0_224] : memref<25x60x160xf32, #tpu.memory_space<vmem>>, vector<1x60x160xf32>
    %212 = vector.shape_cast %211 : vector<1x60x160xf32> to vector<60x160xf32>
    %cst_225 = arith.constant dense<0.000000e+00> : vector<10x160xf32>
    %213 = tpu.matmul %210, %212, %cst_225 {dimension_numbers = #tpu.dot_dimension_numbers<[1], [0], [0], [1], [0, 0, 1, 1], [], []>} : vector<10x60xf32>, vector<60x160xf32>, vector<10x160xf32> -> vector<10x160xf32>
    %214 = arith.addf %209, %213 : vector<10x160xf32>
    %c1_226 = arith.constant 1 : index
    %c24_227 = arith.constant 24 : index
    %215 = vector.load %arg18[%c1_226, %c24_227] : memref<14x84xf32, #tpu.memory_space<vmem>>, vector<10x60xf32>
    %c9_228 = arith.constant 9 : index
    %c0_229 = arith.constant 0 : index
    %c0_230 = arith.constant 0 : index
    %216 = vector.load %arg6[%c9_228, %c0_229, %c0_230] : memref<25x60x160xf32, #tpu.memory_space<vmem>>, vector<1x60x160xf32>
    %217 = vector.shape_cast %216 : vector<1x60x160xf32> to vector<60x160xf32>
    %cst_231 = arith.constant dense<0.000000e+00> : vector<10x160xf32>
    %218 = tpu.matmul %215, %217, %cst_231 {dimension_numbers = #tpu.dot_dimension_numbers<[1], [0], [0], [1], [0, 0, 1, 1], [], []>} : vector<10x60xf32>, vector<60x160xf32>, vector<10x160xf32> -> vector<10x160xf32>
    %219 = arith.addf %214, %218 : vector<10x160xf32>
    %c2_232 = arith.constant 2 : index
    %c0_233 = arith.constant 0 : index
    %220 = vector.load %arg18[%c2_232, %c0_233] : memref<14x84xf32, #tpu.memory_space<vmem>>, vector<10x60xf32>
    %c10_234 = arith.constant 10 : index
    %c0_235 = arith.constant 0 : index
    %c0_236 = arith.constant 0 : index
    %221 = vector.load %arg6[%c10_234, %c0_235, %c0_236] : memref<25x60x160xf32, #tpu.memory_space<vmem>>, vector<1x60x160xf32>
    %222 = vector.shape_cast %221 : vector<1x60x160xf32> to vector<60x160xf32>
    %cst_237 = arith.constant dense<0.000000e+00> : vector<10x160xf32>
    %223 = tpu.matmul %220, %222, %cst_237 {dimension_numbers = #tpu.dot_dimension_numbers<[1], [0], [0], [1], [0, 0, 1, 1], [], []>} : vector<10x60xf32>, vector<60x160xf32>, vector<10x160xf32> -> vector<10x160xf32>
    %224 = arith.addf %219, %223 : vector<10x160xf32>
    %c2_238 = arith.constant 2 : index
    %c6_239 = arith.constant 6 : index
    %225 = vector.load %arg18[%c2_238, %c6_239] : memref<14x84xf32, #tpu.memory_space<vmem>>, vector<10x60xf32>
    %c11_240 = arith.constant 11 : index
    %c0_241 = arith.constant 0 : index
    %c0_242 = arith.constant 0 : index
    %226 = vector.load %arg6[%c11_240, %c0_241, %c0_242] : memref<25x60x160xf32, #tpu.memory_space<vmem>>, vector<1x60x160xf32>
    %227 = vector.shape_cast %226 : vector<1x60x160xf32> to vector<60x160xf32>
    %cst_243 = arith.constant dense<0.000000e+00> : vector<10x160xf32>
    %228 = tpu.matmul %225, %227, %cst_243 {dimension_numbers = #tpu.dot_dimension_numbers<[1], [0], [0], [1], [0, 0, 1, 1], [], []>} : vector<10x60xf32>, vector<60x160xf32>, vector<10x160xf32> -> vector<10x160xf32>
    %229 = arith.addf %224, %228 : vector<10x160xf32>
    %c2_244 = arith.constant 2 : index
    %c12_245 = arith.constant 12 : index
    %230 = vector.load %arg18[%c2_244, %c12_245] : memref<14x84xf32, #tpu.memory_space<vmem>>, vector<10x60xf32>
    %c12_246 = arith.constant 12 : index
    %c0_247 = arith.constant 0 : index
    %c0_248 = arith.constant 0 : index
    %231 = vector.load %arg6[%c12_246, %c0_247, %c0_248] : memref<25x60x160xf32, #tpu.memory_space<vmem>>, vector<1x60x160xf32>
    %232 = vector.shape_cast %231 : vector<1x60x160xf32> to vector<60x160xf32>
    %cst_249 = arith.constant dense<0.000000e+00> : vector<10x160xf32>
    %233 = tpu.matmul %230, %232, %cst_249 {dimension_numbers = #tpu.dot_dimension_numbers<[1], [0], [0], [1], [0, 0, 1, 1], [], []>} : vector<10x60xf32>, vector<60x160xf32>, vector<10x160xf32> -> vector<10x160xf32>
    %234 = arith.addf %229, %233 : vector<10x160xf32>
    %c2_250 = arith.constant 2 : index
    %c18_251 = arith.constant 18 : index
    %235 = vector.load %arg18[%c2_250, %c18_251] : memref<14x84xf32, #tpu.memory_space<vmem>>, vector<10x60xf32>
    %c13_252 = arith.constant 13 : index
    %c0_253 = arith.constant 0 : index
    %c0_254 = arith.constant 0 : index
    %236 = vector.load %arg6[%c13_252, %c0_253, %c0_254] : memref<25x60x160xf32, #tpu.memory_space<vmem>>, vector<1x60x160xf32>
    %237 = vector.shape_cast %236 : vector<1x60x160xf32> to vector<60x160xf32>
    %cst_255 = arith.constant dense<0.000000e+00> : vector<10x160xf32>
    %238 = tpu.matmul %235, %237, %cst_255 {dimension_numbers = #tpu.dot_dimension_numbers<[1], [0], [0], [1], [0, 0, 1, 1], [], []>} : vector<10x60xf32>, vector<60x160xf32>, vector<10x160xf32> -> vector<10x160xf32>
    %239 = arith.addf %234, %238 : vector<10x160xf32>
    %c2_256 = arith.constant 2 : index
    %c24_257 = arith.constant 24 : index
    %240 = vector.load %arg18[%c2_256, %c24_257] : memref<14x84xf32, #tpu.memory_space<vmem>>, vector<10x60xf32>
    %c14_258 = arith.constant 14 : index
    %c0_259 = arith.constant 0 : index
    %c0_260 = arith.constant 0 : index
    %241 = vector.load %arg6[%c14_258, %c0_259, %c0_260] : memref<25x60x160xf32, #tpu.memory_space<vmem>>, vector<1x60x160xf32>
    %242 = vector.shape_cast %241 : vector<1x60x160xf32> to vector<60x160xf32>
    %cst_261 = arith.constant dense<0.000000e+00> : vector<10x160xf32>
    %243 = tpu.matmul %240, %242, %cst_261 {dimension_numbers = #tpu.dot_dimension_numbers<[1], [0], [0], [1], [0, 0, 1, 1], [], []>} : vector<10x60xf32>, vector<60x160xf32>, vector<10x160xf32> -> vector<10x160xf32>
    %244 = arith.addf %239, %243 : vector<10x160xf32>
    %c3_262 = arith.constant 3 : index
    %c0_263 = arith.constant 0 : index
    %245 = vector.load %arg18[%c3_262, %c0_263] : memref<14x84xf32, #tpu.memory_space<vmem>>, vector<10x60xf32>
    %c15_264 = arith.constant 15 : index
    %c0_265 = arith.constant 0 : index
    %c0_266 = arith.constant 0 : index
    %246 = vector.load %arg6[%c15_264, %c0_265, %c0_266] : memref<25x60x160xf32, #tpu.memory_space<vmem>>, vector<1x60x160xf32>
    %247 = vector.shape_cast %246 : vector<1x60x160xf32> to vector<60x160xf32>
    %cst_267 = arith.constant dense<0.000000e+00> : vector<10x160xf32>
    %248 = tpu.matmul %245, %247, %cst_267 {dimension_numbers = #tpu.dot_dimension_numbers<[1], [0], [0], [1], [0, 0, 1, 1], [], []>} : vector<10x60xf32>, vector<60x160xf32>, vector<10x160xf32> -> vector<10x160xf32>
    %249 = arith.addf %244, %248 : vector<10x160xf32>
    %c3_268 = arith.constant 3 : index
    %c6_269 = arith.constant 6 : index
    %250 = vector.load %arg18[%c3_268, %c6_269] : memref<14x84xf32, #tpu.memory_space<vmem>>, vector<10x60xf32>
    %c16_270 = arith.constant 16 : index
    %c0_271 = arith.constant 0 : index
    %c0_272 = arith.constant 0 : index
    %251 = vector.load %arg6[%c16_270, %c0_271, %c0_272] : memref<25x60x160xf32, #tpu.memory_space<vmem>>, vector<1x60x160xf32>
    %252 = vector.shape_cast %251 : vector<1x60x160xf32> to vector<60x160xf32>
    %cst_273 = arith.constant dense<0.000000e+00> : vector<10x160xf32>
    %253 = tpu.matmul %250, %252, %cst_273 {dimension_numbers = #tpu.dot_dimension_numbers<[1], [0], [0], [1], [0, 0, 1, 1], [], []>} : vector<10x60xf32>, vector<60x160xf32>, vector<10x160xf32> -> vector<10x160xf32>
    %254 = arith.addf %249, %253 : vector<10x160xf32>
    %c3_274 = arith.constant 3 : index
    %c12_275 = arith.constant 12 : index
    %255 = vector.load %arg18[%c3_274, %c12_275] : memref<14x84xf32, #tpu.memory_space<vmem>>, vector<10x60xf32>
    %c17_276 = arith.constant 17 : index
    %c0_277 = arith.constant 0 : index
    %c0_278 = arith.constant 0 : index
    %256 = vector.load %arg6[%c17_276, %c0_277, %c0_278] : memref<25x60x160xf32, #tpu.memory_space<vmem>>, vector<1x60x160xf32>
    %257 = vector.shape_cast %256 : vector<1x60x160xf32> to vector<60x160xf32>
    %cst_279 = arith.constant dense<0.000000e+00> : vector<10x160xf32>
    %258 = tpu.matmul %255, %257, %cst_279 {dimension_numbers = #tpu.dot_dimension_numbers<[1], [0], [0], [1], [0, 0, 1, 1], [], []>} : vector<10x60xf32>, vector<60x160xf32>, vector<10x160xf32> -> vector<10x160xf32>
    %259 = arith.addf %254, %258 : vector<10x160xf32>
    %c3_280 = arith.constant 3 : index
    %c18_281 = arith.constant 18 : index
    %260 = vector.load %arg18[%c3_280, %c18_281] : memref<14x84xf32, #tpu.memory_space<vmem>>, vector<10x60xf32>
    %c18_282 = arith.constant 18 : index
    %c0_283 = arith.constant 0 : index
    %c0_284 = arith.constant 0 : index
    %261 = vector.load %arg6[%c18_282, %c0_283, %c0_284] : memref<25x60x160xf32, #tpu.memory_space<vmem>>, vector<1x60x160xf32>
    %262 = vector.shape_cast %261 : vector<1x60x160xf32> to vector<60x160xf32>
    %cst_285 = arith.constant dense<0.000000e+00> : vector<10x160xf32>
    %263 = tpu.matmul %260, %262, %cst_285 {dimension_numbers = #tpu.dot_dimension_numbers<[1], [0], [0], [1], [0, 0, 1, 1], [], []>} : vector<10x60xf32>, vector<60x160xf32>, vector<10x160xf32> -> vector<10x160xf32>
    %264 = arith.addf %259, %263 : vector<10x160xf32>
    %c3_286 = arith.constant 3 : index
    %c24_287 = arith.constant 24 : index
    %265 = vector.load %arg18[%c3_286, %c24_287] : memref<14x84xf32, #tpu.memory_space<vmem>>, vector<10x60xf32>
    %c19_288 = arith.constant 19 : index
    %c0_289 = arith.constant 0 : index
    %c0_290 = arith.constant 0 : index
    %266 = vector.load %arg6[%c19_288, %c0_289, %c0_290] : memref<25x60x160xf32, #tpu.memory_space<vmem>>, vector<1x60x160xf32>
    %267 = vector.shape_cast %266 : vector<1x60x160xf32> to vector<60x160xf32>
    %cst_291 = arith.constant dense<0.000000e+00> : vector<10x160xf32>
    %268 = tpu.matmul %265, %267, %cst_291 {dimension_numbers = #tpu.dot_dimension_numbers<[1], [0], [0], [1], [0, 0, 1, 1], [], []>} : vector<10x60xf32>, vector<60x160xf32>, vector<10x160xf32> -> vector<10x160xf32>
    %269 = arith.addf %264, %268 : vector<10x160xf32>
    %c4_292 = arith.constant 4 : index
    %c0_293 = arith.constant 0 : index
    %270 = vector.load %arg18[%c4_292, %c0_293] : memref<14x84xf32, #tpu.memory_space<vmem>>, vector<10x60xf32>
    %c20_294 = arith.constant 20 : index
    %c0_295 = arith.constant 0 : index
    %c0_296 = arith.constant 0 : index
    %271 = vector.load %arg6[%c20_294, %c0_295, %c0_296] : memref<25x60x160xf32, #tpu.memory_space<vmem>>, vector<1x60x160xf32>
    %272 = vector.shape_cast %271 : vector<1x60x160xf32> to vector<60x160xf32>
    %cst_297 = arith.constant dense<0.000000e+00> : vector<10x160xf32>
    %273 = tpu.matmul %270, %272, %cst_297 {dimension_numbers = #tpu.dot_dimension_numbers<[1], [0], [0], [1], [0, 0, 1, 1], [], []>} : vector<10x60xf32>, vector<60x160xf32>, vector<10x160xf32> -> vector<10x160xf32>
    %274 = arith.addf %269, %273 : vector<10x160xf32>
    %c4_298 = arith.constant 4 : index
    %c6_299 = arith.constant 6 : index
    %275 = vector.load %arg18[%c4_298, %c6_299] : memref<14x84xf32, #tpu.memory_space<vmem>>, vector<10x60xf32>
    %c21_300 = arith.constant 21 : index
    %c0_301 = arith.constant 0 : index
    %c0_302 = arith.constant 0 : index
    %276 = vector.load %arg6[%c21_300, %c0_301, %c0_302] : memref<25x60x160xf32, #tpu.memory_space<vmem>>, vector<1x60x160xf32>
    %277 = vector.shape_cast %276 : vector<1x60x160xf32> to vector<60x160xf32>
    %cst_303 = arith.constant dense<0.000000e+00> : vector<10x160xf32>
    %278 = tpu.matmul %275, %277, %cst_303 {dimension_numbers = #tpu.dot_dimension_numbers<[1], [0], [0], [1], [0, 0, 1, 1], [], []>} : vector<10x60xf32>, vector<60x160xf32>, vector<10x160xf32> -> vector<10x160xf32>
    %279 = arith.addf %274, %278 : vector<10x160xf32>
    %c4_304 = arith.constant 4 : index
    %c12_305 = arith.constant 12 : index
    %280 = vector.load %arg18[%c4_304, %c12_305] : memref<14x84xf32, #tpu.memory_space<vmem>>, vector<10x60xf32>
    %c22_306 = arith.constant 22 : index
    %c0_307 = arith.constant 0 : index
    %c0_308 = arith.constant 0 : index
    %281 = vector.load %arg6[%c22_306, %c0_307, %c0_308] : memref<25x60x160xf32, #tpu.memory_space<vmem>>, vector<1x60x160xf32>
    %282 = vector.shape_cast %281 : vector<1x60x160xf32> to vector<60x160xf32>
    %cst_309 = arith.constant dense<0.000000e+00> : vector<10x160xf32>
    %283 = tpu.matmul %280, %282, %cst_309 {dimension_numbers = #tpu.dot_dimension_numbers<[1], [0], [0], [1], [0, 0, 1, 1], [], []>} : vector<10x60xf32>, vector<60x160xf32>, vector<10x160xf32> -> vector<10x160xf32>
    %284 = arith.addf %279, %283 : vector<10x160xf32>
    %c4_310 = arith.constant 4 : index
    %c18_311 = arith.constant 18 : index
    %285 = vector.load %arg18[%c4_310, %c18_311] : memref<14x84xf32, #tpu.memory_space<vmem>>, vector<10x60xf32>
    %c23_312 = arith.constant 23 : index
    %c0_313 = arith.constant 0 : index
    %c0_314 = arith.constant 0 : index
    %286 = vector.load %arg6[%c23_312, %c0_313, %c0_314] : memref<25x60x160xf32, #tpu.memory_space<vmem>>, vector<1x60x160xf32>
    %287 = vector.shape_cast %286 : vector<1x60x160xf32> to vector<60x160xf32>
    %cst_315 = arith.constant dense<0.000000e+00> : vector<10x160xf32>
    %288 = tpu.matmul %285, %287, %cst_315 {dimension_numbers = #tpu.dot_dimension_numbers<[1], [0], [0], [1], [0, 0, 1, 1], [], []>} : vector<10x60xf32>, vector<60x160xf32>, vector<10x160xf32> -> vector<10x160xf32>
    %289 = arith.addf %284, %288 : vector<10x160xf32>
    %c4_316 = arith.constant 4 : index
    %c24_317 = arith.constant 24 : index
    %290 = vector.load %arg18[%c4_316, %c24_317] : memref<14x84xf32, #tpu.memory_space<vmem>>, vector<10x60xf32>
    %c24_318 = arith.constant 24 : index
    %c0_319 = arith.constant 0 : index
    %c0_320 = arith.constant 0 : index
    %291 = vector.load %arg6[%c24_318, %c0_319, %c0_320] : memref<25x60x160xf32, #tpu.memory_space<vmem>>, vector<1x60x160xf32>
    %292 = vector.shape_cast %291 : vector<1x60x160xf32> to vector<60x160xf32>
    %cst_321 = arith.constant dense<0.000000e+00> : vector<10x160xf32>
    %293 = tpu.matmul %290, %292, %cst_321 {dimension_numbers = #tpu.dot_dimension_numbers<[1], [0], [0], [1], [0, 0, 1, 1], [], []>} : vector<10x60xf32>, vector<60x160xf32>, vector<10x160xf32> -> vector<10x160xf32>
    %294 = arith.addf %289, %293 : vector<10x160xf32>
    %c0_322 = arith.constant 0 : index
    %c0_323 = arith.constant 0 : index
    %295 = vector.load %arg7[%c0_322, %c0_323] : memref<1x160xf32, #tpu.memory_space<vmem>>, vector<1x160xf32>
    %296 = vector.broadcast %295 : vector<1x160xf32> to vector<10x160xf32>
    %297 = arith.addf %294, %296 : vector<10x160xf32>
    %cst_324 = arith.constant 0.000000e+00 : f32
    %298 = vector.broadcast %cst_324 : f32 to vector<10x160xf32>
    %299 = arith.maximumf %297, %298 : vector<10x160xf32>
    %c0_325 = arith.constant 0 : index
    %c0_326 = arith.constant 0 : index
    %300 = vector.load %arg19[%c0_325, %c0_326] : memref<10x160xf32, #tpu.memory_space<vmem>>, vector<10x160xf32>
    tpu.vector_store %arg19[%c0_325, %c0_326], %299 {strides = array<i32>} : memref<10x160xf32, #tpu.memory_space<vmem>>, vector<10x160xf32>,
    %c0_327 = arith.constant 0 : index
    %c0_328 = arith.constant 0 : index
    %301 = vector.load %arg19[%c0_327, %c0_328] : memref<10x160xf32, #tpu.memory_space<vmem>>, vector<9x144xf32>
    %c0_329 = arith.constant 0 : index
    %c16_330 = arith.constant 16 : index
    %302 = vector.load %arg19[%c0_329, %c16_330] : memref<10x160xf32, #tpu.memory_space<vmem>>, vector<9x144xf32>
    %303 = arith.maximumf %301, %302 : vector<9x144xf32>
    %c1_331 = arith.constant 1 : index
    %c0_332 = arith.constant 0 : index
    %304 = vector.load %arg19[%c1_331, %c0_332] : memref<10x160xf32, #tpu.memory_space<vmem>>, vector<9x144xf32>
    %c1_333 = arith.constant 1 : index
    %c16_334 = arith.constant 16 : index
    %305 = vector.load %arg19[%c1_333, %c16_334] : memref<10x160xf32, #tpu.memory_space<vmem>>, vector<9x144xf32>
    %306 = arith.maximumf %304, %305 : vector<9x144xf32>
    %307 = arith.maximumf %303, %306 : vector<9x144xf32>
    %c0_335 = arith.constant 0 : index
    %c0_336 = arith.constant 0 : index
    %308 = vector.load %arg8[%c0_335, %c0_336] : memref<5x9xf32, #tpu.memory_space<vmem>>, vector<5x9xf32>
    %cst_337 = arith.constant dense<0.000000e+00> : vector<5x144xf32>
    %309 = tpu.matmul %308, %307, %cst_337 {dimension_numbers = #tpu.dot_dimension_numbers<[1], [0], [0], [1], [0, 0, 1, 1], [], []>} : vector<5x9xf32>, vector<9x144xf32>, vector<5x144xf32> -> vector<5x144xf32>
    %c0_338 = arith.constant 0 : index
    %c0_339 = arith.constant 0 : index
    %310 = vector.load %arg9[%c0_338, %c0_339] : memref<144x80xf32, #tpu.memory_space<vmem>>, vector<144x80xf32>
    %cst_340 = arith.constant dense<0.000000e+00> : vector<5x80xf32>
    %311 = tpu.matmul %309, %310, %cst_340 {dimension_numbers = #tpu.dot_dimension_numbers<[1], [0], [0], [1], [0, 0, 1, 1], [], []>} : vector<5x144xf32>, vector<144x80xf32>, vector<5x80xf32> -> vector<5x80xf32>
    %c0_341 = arith.constant 0 : index
    %c0_342 = arith.constant 0 : index
    %312 = vector.load %arg20[%c0_341, %c0_342] : memref<5x80xf32, #tpu.memory_space<vmem>>, vector<5x80xf32>
    tpu.vector_store %arg20[%c0_341, %c0_342], %311 {strides = array<i32>} : memref<5x80xf32, #tpu.memory_space<vmem>>, vector<5x80xf32>,
    %c0_343 = arith.constant 0 : index
    %c0_344 = arith.constant 0 : index
    %313 = vector.load %arg11[%c0_343, %c0_344] : memref<1x120xf32, #tpu.memory_space<vmem>>, vector<1x120xf32>
    %c0_345 = arith.constant 0 : index
    %c0_346 = arith.constant 0 : index
    %314 = vector.load %arg20[%c0_345, %c0_346] : memref<5x80xf32, #tpu.memory_space<vmem>>, vector<1x80xf32>
    %c0_347 = arith.constant 0 : index
    %c0_348 = arith.constant 0 : index
    %c0_349 = arith.constant 0 : index
    %315 = vector.load %arg10[%c0_347, %c0_348, %c0_349] : memref<5x80x120xf32, #tpu.memory_space<vmem>>, vector<1x80x120xf32>
    %316 = vector.shape_cast %315 : vector<1x80x120xf32> to vector<80x120xf32>
    %cst_350 = arith.constant dense<0.000000e+00> : vector<1x120xf32>
    %317 = tpu.matmul %314, %316, %cst_350 {dimension_numbers = #tpu.dot_dimension_numbers<[1], [0], [0], [1], [0, 0, 1, 1], [], []>} : vector<1x80xf32>, vector<80x120xf32>, vector<1x120xf32> -> vector<1x120xf32>
    %318 = arith.addf %313, %317 : vector<1x120xf32>
    %c1_351 = arith.constant 1 : index
    %c0_352 = arith.constant 0 : index
    %319 = vector.load %arg20[%c1_351, %c0_352] : memref<5x80xf32, #tpu.memory_space<vmem>>, vector<1x80xf32>
    %c1_353 = arith.constant 1 : index
    %c0_354 = arith.constant 0 : index
    %c0_355 = arith.constant 0 : index
    %320 = vector.load %arg10[%c1_353, %c0_354, %c0_355] : memref<5x80x120xf32, #tpu.memory_space<vmem>>, vector<1x80x120xf32>
    %321 = vector.shape_cast %320 : vector<1x80x120xf32> to vector<80x120xf32>
    %cst_356 = arith.constant dense<0.000000e+00> : vector<1x120xf32>
    %322 = tpu.matmul %319, %321, %cst_356 {dimension_numbers = #tpu.dot_dimension_numbers<[1], [0], [0], [1], [0, 0, 1, 1], [], []>} : vector<1x80xf32>, vector<80x120xf32>, vector<1x120xf32> -> vector<1x120xf32>
    %323 = arith.addf %318, %322 : vector<1x120xf32>
    %c2_357 = arith.constant 2 : index
    %c0_358 = arith.constant 0 : index
    %324 = vector.load %arg20[%c2_357, %c0_358] : memref<5x80xf32, #tpu.memory_space<vmem>>, vector<1x80xf32>
    %c2_359 = arith.constant 2 : index
    %c0_360 = arith.constant 0 : index
    %c0_361 = arith.constant 0 : index
    %325 = vector.load %arg10[%c2_359, %c0_360, %c0_361] : memref<5x80x120xf32, #tpu.memory_space<vmem>>, vector<1x80x120xf32>
    %326 = vector.shape_cast %325 : vector<1x80x120xf32> to vector<80x120xf32>
    %cst_362 = arith.constant dense<0.000000e+00> : vector<1x120xf32>
    %327 = tpu.matmul %324, %326, %cst_362 {dimension_numbers = #tpu.dot_dimension_numbers<[1], [0], [0], [1], [0, 0, 1, 1], [], []>} : vector<1x80xf32>, vector<80x120xf32>, vector<1x120xf32> -> vector<1x120xf32>
    %328 = arith.addf %323, %327 : vector<1x120xf32>
    %c3_363 = arith.constant 3 : index
    %c0_364 = arith.constant 0 : index
    %329 = vector.load %arg20[%c3_363, %c0_364] : memref<5x80xf32, #tpu.memory_space<vmem>>, vector<1x80xf32>
    %c3_365 = arith.constant 3 : index
    %c0_366 = arith.constant 0 : index
    %c0_367 = arith.constant 0 : index
    %330 = vector.load %arg10[%c3_365, %c0_366, %c0_367] : memref<5x80x120xf32, #tpu.memory_space<vmem>>, vector<1x80x120xf32>
    %331 = vector.shape_cast %330 : vector<1x80x120xf32> to vector<80x120xf32>
    %cst_368 = arith.constant dense<0.000000e+00> : vector<1x120xf32>
    %332 = tpu.matmul %329, %331, %cst_368 {dimension_numbers = #tpu.dot_dimension_numbers<[1], [0], [0], [1], [0, 0, 1, 1], [], []>} : vector<1x80xf32>, vector<80x120xf32>, vector<1x120xf32> -> vector<1x120xf32>
    %333 = arith.addf %328, %332 : vector<1x120xf32>
    %c4_369 = arith.constant 4 : index
    %c0_370 = arith.constant 0 : index
    %334 = vector.load %arg20[%c4_369, %c0_370] : memref<5x80xf32, #tpu.memory_space<vmem>>, vector<1x80xf32>
    %c4_371 = arith.constant 4 : index
    %c0_372 = arith.constant 0 : index
    %c0_373 = arith.constant 0 : index
    %335 = vector.load %arg10[%c4_371, %c0_372, %c0_373] : memref<5x80x120xf32, #tpu.memory_space<vmem>>, vector<1x80x120xf32>
    %336 = vector.shape_cast %335 : vector<1x80x120xf32> to vector<80x120xf32>
    %cst_374 = arith.constant dense<0.000000e+00> : vector<1x120xf32>
    %337 = tpu.matmul %334, %336, %cst_374 {dimension_numbers = #tpu.dot_dimension_numbers<[1], [0], [0], [1], [0, 0, 1, 1], [], []>} : vector<1x80xf32>, vector<80x120xf32>, vector<1x120xf32> -> vector<1x120xf32>
    %338 = arith.addf %333, %337 : vector<1x120xf32>
    %cst_375 = arith.constant 0.000000e+00 : f32
    %339 = vector.broadcast %cst_375 : f32 to vector<1x120xf32>
    %340 = arith.maximumf %338, %339 : vector<1x120xf32>
    %c0_376 = arith.constant 0 : index
    %c0_377 = arith.constant 0 : index
    %341 = vector.load %arg12[%c0_376, %c0_377] : memref<120x84xf32, #tpu.memory_space<vmem>>, vector<120x84xf32>
    %cst_378 = arith.constant dense<0.000000e+00> : vector<1x84xf32>
    %342 = tpu.matmul %340, %341, %cst_378 {dimension_numbers = #tpu.dot_dimension_numbers<[1], [0], [0], [1], [0, 0, 1, 1], [], []>} : vector<1x120xf32>, vector<120x84xf32>, vector<1x84xf32> -> vector<1x84xf32>
    %c0_379 = arith.constant 0 : index
    %c0_380 = arith.constant 0 : index
    %343 = vector.load %arg13[%c0_379, %c0_380] : memref<1x84xf32, #tpu.memory_space<vmem>>, vector<1x84xf32>
    %344 = arith.addf %342, %343 : vector<1x84xf32>
    %cst_381 = arith.constant 0.000000e+00 : f32
    %345 = vector.broadcast %cst_381 : f32 to vector<1x84xf32>
    %346 = arith.maximumf %344, %345 : vector<1x84xf32>
    %c0_382 = arith.constant 0 : index
    %c0_383 = arith.constant 0 : index
    %347 = vector.load %arg14[%c0_382, %c0_383] : memref<84x10xf32, #tpu.memory_space<vmem>>, vector<84x10xf32>
    %cst_384 = arith.constant dense<0.000000e+00> : vector<1x10xf32>
    %348 = tpu.matmul %346, %347, %cst_384 {dimension_numbers = #tpu.dot_dimension_numbers<[1], [0], [0], [1], [0, 0, 1, 1], [], []>} : vector<1x84xf32>, vector<84x10xf32>, vector<1x10xf32> -> vector<1x10xf32>
    %c0_385 = arith.constant 0 : index
    %c0_386 = arith.constant 0 : index
    %349 = vector.load %arg15[%c0_385, %c0_386] : memref<1x10xf32, #tpu.memory_space<vmem>>, vector<1x10xf32>
    %350 = arith.addf %348, %349 : vector<1x10xf32>
    %c0_387 = arith.constant 0 : index
    %c0_388 = arith.constant 0 : index
    %c0_389 = arith.constant 0 : index
    %351 = vector.load %arg16[%c0_387, %c0_388, %c0_389] : memref<1x1x10xf32, #tpu.memory_space<vmem>>, vector<1x1x10xf32>
    %352 = vector.shape_cast %351 : vector<1x1x10xf32> to vector<1x10xf32>
    %353 = vector.shape_cast %350 : vector<1x10xf32> to vector<1x1x10xf32>
    tpu.vector_store %arg16[%c0_387, %c0_388, %c0_389], %353 {strides = array<i32>} : memref<1x1x10xf32, #tpu.memory_space<vmem>>, vector<1x1x10xf32>,
    return
  }
  func.func @transform_0(%arg0: i32) -> (i32, i32, i32) {
    %c0_i32 = arith.constant 0 : i32
    %c0_i32_0 = arith.constant 0 : i32
    %c0_i32_1 = arith.constant 0 : i32
    return %arg0, %c0_i32, %c0_i32_0 : i32, i32, i32
  }
  func.func @transform_1(%arg0: i32) -> (i32, i32, i32) {
    %c0_i32 = arith.constant 0 : i32
    %c0_i32_0 = arith.constant 0 : i32
    %c0_i32_1 = arith.constant 0 : i32
    %c0_i32_2 = arith.constant 0 : i32
    return %c0_i32, %c0_i32_0, %c0_i32_1 : i32, i32, i32
  }
  func.func @transform_2(%arg0: i32) -> (i32, i32) {
    %c0_i32 = arith.constant 0 : i32
    %c0_i32_0 = arith.constant 0 : i32
    %c0_i32_1 = arith.constant 0 : i32
    return %c0_i32, %c0_i32_0 : i32, i32
  }
  func.func @transform_3(%arg0: i32) -> (i32, i32) {
    %c0_i32 = arith.constant 0 : i32
    %c0_i32_0 = arith.constant 0 : i32
    %c0_i32_1 = arith.constant 0 : i32
    return %c0_i32, %c0_i32_0 : i32, i32
  }
  func.func @transform_4(%arg0: i32) -> (i32, i32) {
    %c0_i32 = arith.constant 0 : i32
    %c0_i32_0 = arith.constant 0 : i32
    %c0_i32_1 = arith.constant 0 : i32
    return %c0_i32, %c0_i32_0 : i32, i32
  }
  func.func @transform_5(%arg0: i32) -> (i32, i32, i32) {
    %c0_i32 = arith.constant 0 : i32
    %c0_i32_0 = arith.constant 0 : i32
    %c0_i32_1 = arith.constant 0 : i32
    %c0_i32_2 = arith.constant 0 : i32
    return %c0_i32, %c0_i32_0, %c0_i32_1 : i32, i32, i32
  }
  func.func @transform_6(%arg0: i32) -> (i32, i32) {
    %c0_i32 = arith.constant 0 : i32
    %c0_i32_0 = arith.constant 0 : i32
    %c0_i32_1 = arith.constant 0 : i32
    return %c0_i32, %c0_i32_0 : i32, i32
  }
  func.func @transform_7(%arg0: i32) -> (i32, i32) {
    %c0_i32 = arith.constant 0 : i32
    %c0_i32_0 = arith.constant 0 : i32
    %c0_i32_1 = arith.constant 0 : i32
    return %c0_i32, %c0_i32_0 : i32, i32
  }
  func.func @transform_8(%arg0: i32) -> (i32, i32) {
    %c0_i32 = arith.constant 0 : i32
    %c0_i32_0 = arith.constant 0 : i32
    %c0_i32_1 = arith.constant 0 : i32
    return %c0_i32, %c0_i32_0 : i32, i32
  }
  func.func @transform_9(%arg0: i32) -> (i32, i32, i32) {
    %c0_i32 = arith.constant 0 : i32
    %c0_i32_0 = arith.constant 0 : i32
    %c0_i32_1 = arith.constant 0 : i32
    %c0_i32_2 = arith.constant 0 : i32
    return %c0_i32, %c0_i32_0, %c0_i32_1 : i32, i32, i32
  }
  func.func @transform_10(%arg0: i32) -> (i32, i32) {
    %c0_i32 = arith.constant 0 : i32
    %c0_i32_0 = arith.constant 0 : i32
    %c0_i32_1 = arith.constant 0 : i32
    return %c0_i32, %c0_i32_0 : i32, i32
  }
  func.func @transform_11(%arg0: i32) -> (i32, i32) {
    %c0_i32 = arith.constant 0 : i32
    %c0_i32_0 = arith.constant 0 : i32
    %c0_i32_1 = arith.constant 0 : i32
    return %c0_i32, %c0_i32_0 : i32, i32
  }
  func.func @transform_12(%arg0: i32) -> (i32, i32) {
    %c0_i32 = arith.constant 0 : i32
    %c0_i32_0 = arith.constant 0 : i32
    %c0_i32_1 = arith.constant 0 : i32
    return %c0_i32, %c0_i32_0 : i32, i32
  }
  func.func @transform_13(%arg0: i32) -> (i32, i32) {
    %c0_i32 = arith.constant 0 : i32
    %c0_i32_0 = arith.constant 0 : i32
    %c0_i32_1 = arith.constant 0 : i32
    return %c0_i32, %c0_i32_0 : i32, i32
  }
  func.func @transform_14(%arg0: i32) -> (i32, i32) {
    %c0_i32 = arith.constant 0 : i32
    %c0_i32_0 = arith.constant 0 : i32
    %c0_i32_1 = arith.constant 0 : i32
    return %c0_i32, %c0_i32_0 : i32, i32
  }
  func.func @transform_15(%arg0: i32) -> (i32, i32, i32) {
    %c0_i32 = arith.constant 0 : i32
    %c0_i32_0 = arith.constant 0 : i32
    %c0_i32_1 = arith.constant 0 : i32
    return %arg0, %c0_i32, %c0_i32_0 : i32, i32, i32
  }
}

</mosaic_0001>

<bundles_post_ra>
// kernel: net_forward.1
= control target key start
LH: loop header
LB: loop body
LE: loop exit
PB: predicated region body
PF: predicated region fallthrough
CT: control target
= control target key end

     0   :  { %s15569_s0 = inlined_call_operand.vmem [shape: f32[2,32,96], index: 0, kind: input, shape index: {}]   ;;  %s15570_s1 = inlined_call_operand.vmem [shape: f32[25,84,168], index: 1, kind: input, shape index: {}]   ;;  %s15571_s2 = inlined_call_operand.vmem [shape: f32[1,168], index: 2, kind: input, shape index: {}]   ;;  %s15572_s3 = inlined_call_operand.vmem [shape: f32[14,27], index: 3, kind: input, shape index: {}]   ;;  %s15573_s4 = inlined_call_operand.vmem [shape: f32[162,84], index: 4, kind: input, shape index: {}]   ;;  %s15574_s5 = inlined_call_operand.vmem [shape: f32[25,60,160], index: 5, kind: input, shape index: {}]   ;;  %s15575_s6 = inlined_call_operand.vmem [shape: f32[1,160], index: 6, kind: input, shape index: {}]   ;;  %s15576_s7 = inlined_call_operand.vmem [shape: f32[5,9], index: 7, kind: input, shape index: {}]   ;;  %s15577_s8 = inlined_call_operand.vmem [shape: f32[144,80], index: 8, kind: input, shape index: {}]   ;;  %s15578_s9 = inlined_call_operand.vmem [shape: f32[5,80,120], index: 9, kind: input, shape index: {}]   ;;  %s15579_s10 = inlined_call_operand.vmem [shape: f32[1,120], index: 10, kind: input, shape index: {}]   ;;  %s15580_s11 = inlined_call_operand.vmem [shape: f32[120,84], index: 11, kind: input, shape index: {}]   ;;  %s15581_s12 = inlined_call_operand.vmem [shape: f32[1,84], index: 12, kind: input, shape index: {}]   ;;  %s15582_s13 = inlined_call_operand.vmem [shape: f32[84,10], index: 13, kind: input, shape index: {}]   ;;  %s15583_s14 = inlined_call_operand.vmem [shape: f32[1,10], index: 14, kind: input, shape index: {}]   ;;  %s15584_s15 = inlined_call_operand.hbm [shape: f32[2,1,10], index: 15, kind: output, shape index: {}]  }
   0x1   :  { %15602 = sst [smem:[#allocation16_spill]] %s15569_s0 }
   0x2   :  { %15603 = sst [smem:[#allocation17_spill]] %s15583_s14 }
   0x3   :  { %15604 = sst [smem:[#allocation18_spill]] %s15584_s15 }
   0x4   :  { %20 = vsyncpa [#allocation7], 0 }
   0x5   :  { %22 = vsyncpa [#allocation7 + $0x1], 0  ;;  %s11323_s18 = smov 0   ;;  %s11325_s19 = smov 0  }
   0x6   :  { %s11327_s20 = smov 0   ;;  %s11329_s21 = smov 0  }
   0x7 LB: > { %15605 = sst [smem:[#allocation9_spill]] %s11217_s18  ;;  %s11344_s22 = sadd.s32 4294967295, %s11229_s21   ;;  %s11229_s21 = sphi %s11329_s21, %s15628_s21   ;;  %s11225_s20 = sphi %s11327_s20, %s15630_s20   ;;  %s11221_s19 = sphi %s11325_s19, %s15632_s19   ;;  %s11217_s18 = sphi %s11323_s18, %s15631_s18  }
   0x8   : > { %15606 = sst [smem:[#allocation10_spill]] %s11225_s20  ;;  %s8133_s23 = sadd.s32 4294967294, %s11229_s21  }
   0x9   : > { %15607 = sst [smem:[#allocation11_spill]] %s11229_s21  ;;  %s11348_s24 = sadd.s32 1, %s11229_s21  }
   0xa   : > { %15608 = sst [smem:[#allocation12_spill]] %s11348_s24  ;;  %s355_s25 = sadd.s32 1, %s11225_s20 }
   0xb   : > { %s352_s26 = ssub.s32 %s11229_s21, %s11348_s24  ;;  %p365_p0 = scmp.ne.s32.totalorder %s11225_s20, %s11221_s19 }
   0xc   : > { %p353_p1 = scmp.eq.s32.totalorder %s352_s26, 0  ;;  %p366_p2 = scmp.eq.s32.totalorder %s11344_s22, 1 }
   0xd   : > { %p371_p3 = scmp.ne.s32.totalorder %s11221_s19, %s11217_s18  ;;  %p372_p4 = scmp.eq.s32.totalorder %s8133_s23, 1 }
   0xe   : > { %s11359_s27 = scalar_select %p353_p1, %s11225_s20, %s355_s25  }
   0xf   : > { %p11361_p5 = por %p366_p2, %p365_p0  ;;  %p11365_p6 = por %p372_p4, %p371_p3 }
  0x10   : > { %15609 = sst [smem:[#allocation13_spill]] %s11359_s27  ;;  %p8136_p7 = scmp.ge.s32.totalorder %s11229_s21, 1 }
  0x11   : > { %s15610_s28 = scalar_select %p11361_p5, 1, 0 }
  0x12   : > { %s15612_s29 = scalar_select %p11365_p6, 1, 0 }
  0x13   : > { %15611 = sst [smem:[#allocation14_spill]] %s15610_s28  ;;  %p440_p8 = scmp.lt.s32.totalorder %s11229_s21, 3 }
  0x14   : > { %15613 = sst [smem:[#allocation15_spill]] %s15612_s29 }
  0x15   : > { %p441_p9 = pnand %p8136_p7, %p440_p8 }
  0x16   : > { %p487_p10 = scmp.lt.s32.totalorder (!%p441_p9), %s11344_s22, 1  ;;  %v8140_v0 = vld [vmem:[%s15570_s1 + $0xb8] sm:$0xff] (!%p441_p9)  ;;  %v8142_v1 = vld [vmem:[%s15570_s1 + $0xc8] sm:$0xff] (!%p441_p9)  ;;  %v8139_v2 = vld [vmem:[%s15570_s1 + $0xb0] sm:$0xff] (!%p441_p9)  ;;  %v11231_v12 = vmov (!%p441_p9), 0.0   ;;  %s15614_s0 = sld [smem:[#allocation16_spill]] (!%p441_p9) }
  0x17   : > { %444 = sbr.rel (%p441_p9) target bundleno = 3518 (0xdbe), region = 80  ;;  %v9620_v3 = vpack.c.bf16 (!%p441_p9), %v8142_v1, %v8140_v0  ;;  %v8141_v4 = vld [vmem:[%s15570_s1 + $0xc0] sm:$0xff] (!%p441_p9)  ;;  %v8144_v5 = vld [vmem:[%s15570_s1 + $0xd8] sm:$0xff] (!%p441_p9)  ;;  %v8146_v6 = vld [vmem:[%s15570_s1 + $0xe8] sm:$0xff] (!%p441_p9)  ;;  %633 = vmatprep.mubr.f32.mxu0 (!%p441_p9), %v11231_v12  ;;  %4263 = vmatprep.mubr.f32.mxu1 (!%p441_p9), %v11231_v12  ;;  %s15596_s30 = smov (!%p441_p9), 125   ;;  %vm562_vm0 = vcmask (!%p441_p9), 1043456  }
  0x18   : > { %v9622_v7 = vpack.c.bf16 (!%p441_p9), %v8141_v4, %v8139_v2  ;;  %v9624_v8 = vpack.c.bf16 (!%p441_p9), %v8146_v6, %v8144_v5  ;;  %v8143_v9 = vld [vmem:[%s15570_s1 + $0xd0] sm:$0xff] (!%p441_p9)  ;;  %v8145_v10 = vld [vmem:[%s15570_s1 + $0xe0] sm:$0xff] (!%p441_p9)  ;;  %v8148_v11 = vld [vmem:[%s15570_s1 + $0xf8] sm:$0xff] (!%p441_p9)  ;;  %s15592_s20 = smov (!%p441_p9), 122   ;;  %s15590_s27 = smov (!%p441_p9), 119   ;;  %vm553_vm1 = vcmask (!%p441_p9), 687104  }
  0x19   : > { %9621 = vmatprep.subr.bf16.mxu0 (!%p441_p9), %v9620_v3  ;;  %v8150_v13 = vld [vmem:[%s15570_s1 + $0x108] sm:$0xff] (!%p441_p9)  ;;  %v9626_v14 = vpack.c.bf16 (!%p441_p9), %v8145_v10, %v8143_v9  ;;  %v8147_v16 = vld [vmem:[%s15570_s1 + $0xf0] sm:$0xff] (!%p441_p9)  ;;  %v8149_v17 = vld [vmem:[%s15570_s1 + $0x100] sm:$0xff] (!%p441_p9)  ;;  %s15618_s18 = smov (!%p441_p9), 116   ;;  %vm4056_vm2 = vcmask (!%p441_p9), 326656   ;;  %vm4063_vm3 = vcmask (!%p441_p9), 322560  }
  0x1a   : > { %9623 = vmatpush1.bf16.msra.mxu0 (!%p441_p9), %v9622_v7  ;;  %v9628_v15 = vpack.c.bf16 (!%p441_p9), %v8150_v13, %v8148_v11  ;;  %v8152_v18 = vld [vmem:[%s15570_s1 + $0x118] sm:$0xff] (!%p441_p9)  ;;  %v8154_v21 = vld [vmem:[%s15570_s1 + $0x128] sm:$0xff] (!%p441_p9)  ;;  %v9630_v24 = vpack.c.bf16 (!%p441_p9), %v8149_v17, %v8147_v16  ;;  %v8151_v26 = vld [vmem:[%s15570_s1 + $0x110] sm:$0xff] (!%p441_p9)  ;;  %vm4097_vm4 = vcmask (!%p441_p9), 998400   ;;  %vm4152_vm5 = vcmask (!%p441_p9), 1046528   ;;  %s485_s15 = sand.u32 (!%p441_p9), 1, %s11221_s19  }
  0x1b   : > { %9625 = vmatprep.subr.bf16.mxu0 (!%p441_p9), %v9624_v8  ;;  %v9632_v25 = vpack.c.bf16 (!%p441_p9), %v8154_v21, %v8152_v18  ;;  %v8153_v27 = vld [vmem:[%s15570_s1 + $0x120] sm:$0xff] (!%p441_p9)  ;;  %v8156_v28 = vld [vmem:[%s15570_s1 + $0x138] sm:$0xff] (!%p441_p9)  ;;  %v8158_v29 = vld [vmem:[%s15570_s1 + $0x148] sm:$0xff] (!%p441_p9)  ;;  %vm4192_vm6 = vcmask (!%p441_p9), 1042432   ;;  %vm11237_vm7 = vmmov (!%p441_p9), 1   ;;  %vm4185_vm9 = vcmask (!%p441_p9), 220160  }
  0x1c   : > { %v9634_v30 = vpack.c.bf16 (!%p441_p9), %v8153_v27, %v8151_v26  ;;  %v9636_v31 = vpack.c.bf16 (!%p441_p9), %v8158_v29, %v8156_v28  ;;  %v8155_v32 = vld [vmem:[%s15570_s1 + $0x130] sm:$0xff] (!%p441_p9)  ;;  %v8157_v33 = vld [vmem:[%s15570_s1 + $0x140] sm:$0xff] (!%p441_p9)  ;;  %v8160_v35 = vld [vmem:[%s15570_s1 + $0x158] sm:$0xf] (!%p441_p9)  ;;  %vm4304_vm10 = vcmask (!%p441_p9), 1041408   ;;  %vm4297_vm11 = vcmask (!%p441_p9), 277504  }
  0x1d   : > { %v9638_v34 = vpack.c.bf16 (!%p441_p9), %v8157_v33, %v8155_v32  ;;  %v497_v36 = vld [vmem:[%s15570_s1 + $0x8] sm:$0xff] (!%p441_p9)  ;;  %v499_v37 = vld [vmem:[%s15570_s1 + $0x18] sm:$0xff] (!%p441_p9)  ;;  %v8159_v38 = vld [vmem:[%s15570_s1 + $0x150] sm:$0xf] (!%p441_p9)  ;;  %vm4384_vm13 = vcmask (!%p441_p9), 685056   ;;  %vm4427_vm14 = vcmask (!%p441_p9), 490496  }
  0x1e   : > { %s488_s16 = scalar_select %p487_p10, %s11344_s22, 1  ;;  %9627 = vmatpush1.bf16.msra.mxu0 %v9626_v14  ;;  %v9640_v39 = vpack.c.bf16 %v499_v37, %v497_v36  ;;  %v496_v44 = vld [vmem:[%s15570_s1] sm:$0xff]  ;;  %v498_v45 = vld [vmem:[%s15570_s1 + $0x10] sm:$0xff]  ;;  %v501_v46 = vld [vmem:[%s15570_s1 + $0x28] sm:$0xff]  ;;  %vm7199_vm15 = vcmask 261120  }
  0x1f   : > { %9629 = vmatprep.subr.bf16.mxu0 %v9628_v15  ;;  %v503_v47 = vld [vmem:[%s15570_s1 + $0x38] sm:$0xff]  ;;  %v9642_v48 = vpack.c.bf16 %v498_v45, %v496_v44  ;;  %v500_v50 = vld [vmem:[%s15570_s1 + $0x20] sm:$0xff]  ;;  %v502_v51 = vld [vmem:[%s15570_s1 + $0x30] sm:$0xff]  ;;  %s15623_s21 = sld [smem:[#allocation18_spill]] }
  0x20   : > { %s9363_s29 = sshll.u32 %s488_s16, 5  ;;  %s15594_s16 = smov 116   ;;  %v9644_v49 = vpack.c.bf16 %v503_v47, %v501_v46  ;;  %v505_v53 = vld [vmem:[%s15570_s1 + $0x48] sm:$0xff]  ;;  %v507_v54 = vld [vmem:[%s15570_s1 + $0x58] sm:$0xff]  ;;  %v9646_v56 = vpack.c.bf16 %v502_v51, %v500_v50  ;;  %v504_v58 = vld [vmem:[%s15570_s1 + $0x40] sm:$0xff] }
  0x21   : > { %s11408_s23 = scalar_lea.vmem %s15614_s0, %s9363_s29  ;;  %v9648_v57 = vpack.c.bf16 %v507_v54, %v505_v53  ;;  %v506_v59 = vld [vmem:[%s15570_s1 + $0x50] sm:$0xff]  ;;  %v509_v61 = vld [vmem:[%s15570_s1 + $0x68] sm:$0xff]  ;;  %v511_v62 = vld [vmem:[%s15570_s1 + $0x78] sm:$0xff]  ;;  %s15616_s0 = smov 122  }
  0x22   : > { %v11420_v19 = vld [vmem:[%s11408_s23] sm:$0xff]  ;;  %v11423_v20 = vld [vmem:[%s11408_s23 + $0x10] sm:$0xff]  ;;  %v11433_v22 = vld [vmem:[%s11408_s23 + $0x8] sm:$0xff]  ;;  %9631 = vmatpush1.bf16.msra.mxu0 %v9630_v24  ;;  %v9650_v0 = vpack.c.bf16 %v506_v59, %v504_v58  ;;  %v9652_v1 = vpack.c.bf16 %v511_v62, %v509_v61  ;;  %s9360_s29 = sshll.u32 %s11344_s22, 4  ;;  %s11242_s22 = smov [#allocation6]  }
  0x23   : > { %545 = vrot.lane.b32.xlu0 %v11420_v19, %s15596_s30  ;;  %549 = vrot.lane.b32.xlu1 %v11423_v20, %s15596_s30  ;;  %v11436_v23 = vld [vmem:[%s11408_s23 + $0x18] sm:$0xf]  ;;  %v11499_v40 = vld [vmem:[%s11408_s23 + $0x1] sm:$0xff]  ;;  %vm10125_vm8 = vmpackc.low %vm4192_vm6, %vm11237_vm7 }
  0x24   : > { %9633 = vmatprep.subr.bf16.mxu0 %v9632_v25  ;;  %v11502_v41 = vld [vmem:[%s11408_s23 + $0x9] sm:$0xff]  ;;  %v11509_v42 = vld [vmem:[%s11408_s23 + $0x11] sm:$0xff]  ;;  %v11512_v43 = vld [vmem:[%s11408_s23 + $0x19] sm:$0xf] }
  0x25   : > { %v11567_v55 = vld [vmem:[%s11408_s23 + $0x2] sm:$0xff]  ;;  %v510_v3 = vld [vmem:[%s15570_s1 + $0x70] sm:$0xff]  ;;  %v515_v5 = vld [vmem:[%s15570_s1 + $0x98] sm:$0xff]  ;;  %s15624_s25 = smov %s15623_s21  ;;  %s15527_s26 = scalar_lea.hbm %s15623_s21, %s9360_s29 }
  0x26   : > { %9635 = vmatpush1.bf16.msra.mxu0 %v9634_v30  ;;  %v508_v2 = vld [vmem:[%s15570_s1 + $0x60] sm:$0xff]  ;;  %v513_v4 = vld [vmem:[%s15570_s1 + $0x88] sm:$0xff]  ;;  %v514_v11 = vld [vmem:[%s15570_s1 + $0x90] sm:$0xff] }
  0x27   : > { %547 = vrot.lane.b32.xlu0 %v11433_v22, %s15596_s30  ;;  %551 = vrot.lane.b32.xlu1 %v11436_v23, %s15596_s30  ;;  %v9654_v6 = vpack.c.bf16 %v510_v3, %v508_v2  ;;  %v11602_v8 = vld [vmem:[%s11408_s23 + $0xa] sm:$0xff]  ;;  %v9656_v9 = vpack.c.bf16 %v515_v5, %v513_v4  ;;  %v512_v10 = vld [vmem:[%s15570_s1 + $0x80] sm:$0xff]  ;;  %vm13702_vm12 = vmpackc.low %vm562_vm0, %vm11237_vm7 }
  0x28   : > { %9637 = vmatprep.subr.bf16.mxu0 %v9636_v31  ;;  %v9658_v13 = vpack.c.bf16 %v514_v11, %v512_v10  ;;  %v11615_v14 = vld [vmem:[%s11408_s23 + $0x12] sm:$0xff]  ;;  %v517_v15 = vld [vmem:[%s15570_s1 + $0xa8] sm:$0xf]  ;;  %v8173_v18 = vld [vmem:[%s15570_s1 + $0x160] sm:$0xff] }
  0x29   : > { %v8174_v16 = vld [vmem:[%s15570_s1 + $0x168] sm:$0xff]  ;;  %v8176_v17 = vld [vmem:[%s15570_s1 + $0x178] sm:$0xff]  ;;  %v8175_v21 = vld [vmem:[%s15570_s1 + $0x170] sm:$0xff] }
  0x2a   : > { %9639 = vmatpush1.bf16.msra.mxu0 %v9638_v34  ;;  %v8178_v24 = vld [vmem:[%s15570_s1 + $0x188] sm:$0xff]  ;;  %v8180_v25 = vld [vmem:[%s15570_s1 + $0x198] sm:$0xff]  ;;  %v516_v27 = vld [vmem:[%s15570_s1 + $0xa0] sm:$0xf]  ;;  %v9660_v28 = vpack.c.bf16 %v8176_v17, %v8174_v16  ;;  %v9662_v29 = vpack.c.bf16 %v8175_v21, %v8173_v18 }
  0x2b   : > { %784 = vrot.lane.b32.xlu0 %v11420_v19, %s15592_s20  ;;  %786 = vrot.lane.b32.xlu1 %v11433_v22, %s15592_s20  ;;  %v11641_v26 = vld [vmem:[%s11408_s23 + $0x1a] sm:$0xf]  ;;  %v9664_v30 = vpack.c.bf16 %v8180_v25, %v8178_v24  ;;  %v8177_v31 = vld [vmem:[%s15570_s1 + $0x180] sm:$0xff] }
  0x2c   : > { %8161 = vmatprep.subr.msk.mxu0 %vm562_vm0, %v8160_v35  ;;  %v8179_v32 = vld [vmem:[%s15570_s1 + $0x190] sm:$0xff]  ;;  %v8182_v33 = vld [vmem:[%s15570_s1 + $0x1a8] sm:$0xff]  ;;  %v8184_v34 = vld [vmem:[%s15570_s1 + $0x1b8] sm:$0xff] }
  0x2d   : > { %v9666_v35 = vpack.c.bf16 %v8179_v32, %v8177_v31  ;;  %v9668_v36 = vpack.c.bf16 %v8184_v34, %v8182_v33  ;;  %v8181_v37 = vld [vmem:[%s15570_s1 + $0x1a0] sm:$0xff]  ;;  %v8187_v47 = vld [vmem:[%s15570_s1 + $0x1d0] sm:$0xff]  ;;  %v8194_v53 = vld [vmem:[%s15570_s1 + $0x208] sm:$0xf] }
  0x2e   : > { %8162 = vmatpush1.msk.msra.mxu0 %vm562_vm0, %v8159_v38  ;;  %v8183_v38 = vld [vmem:[%s15570_s1 + $0x1b0] sm:$0xff]  ;;  %v8185_v46 = vld [vmem:[%s15570_s1 + $0x1c0] sm:$0xff]  ;;  %v8202_v54 = vld [vmem:[%s15570_s1 + $0x218] sm:$0xff] }
  0x2f   : > { %788 = vrot.lane.b32.xlu0 %v11423_v20, %s15592_s20  ;;  %790 = vrot.lane.b32.xlu1 %v11436_v23, %s15592_s20  ;;  %v9670_v44 = vpack.c.bf16 %v8183_v38, %v8181_v37  ;;  %v8189_v51 = vld [vmem:[%s15570_s1 + $0x1e0] sm:$0xff]  ;;  %v8206_v58 = vld [vmem:[%s15570_s1 + $0x238] sm:$0xff] }
  0x30   : > { %9641 = vmatprep.subr.bf16.mxu0 %v9640_v39  ;;  %v8188_v39 = vld [vmem:[%s15570_s1 + $0x1d8] sm:$0xff]  ;;  %v8208_v59 = vld [vmem:[%s15570_s1 + $0x248] sm:$0xff]  ;;  %v8215_v16 = vld [vmem:[%s15570_s1 + $0x280] sm:$0xff] }
  0x31   : > { %v8210_v2 = vld [vmem:[%s15570_s1 + $0x258] sm:$0xff]  ;;  %v8212_v3 = vld [vmem:[%s15570_s1 + $0x268] sm:$0xff]  ;;  %v8229_v32 = vld [vmem:[%s15570_s1 + $0x2c0] sm:$0xff] }
  0x32   : > { %v8216_v10 = vld [vmem:[%s15570_s1 + $0x288] sm:$0xff]  ;;  %v8218_v17 = vld [vmem:[%s15570_s1 + $0x298] sm:$0xff]  ;;  %v8231_v33 = vld [vmem:[%s15570_s1 + $0x2d0] sm:$0xff] }
  0x33   : > { %926 = vrot.lane.b32.xlu0 %v11420_v19, %s15590_s27  ;;  %928 = vrot.lane.b32.xlu1 %v11433_v22, %s15590_s27  ;;  %v8220_v18 = vld [vmem:[%s15570_s1 + $0x2a8] sm:$0xff]  ;;  %v8232_v31 = vld [vmem:[%s15570_s1 + $0x2d8] sm:$0xff] }
  0x34   : > { %v9696_v25 = vpack.c.bf16 %v8220_v18, %v8218_v17  ;;  %v8234_v34 = vld [vmem:[%s15570_s1 + $0x2e8] sm:$0xff] }
  0x35   : > { %v8268_v17 = vld [vmem:[%s15570_s1 + $0x3c8] sm:$0xff] }
  0x37   : > { %930 = vrot.lane.b32.xlu0 %v11423_v20, %s15590_s27  ;;  %932 = vrot.lane.b32.xlu1 %v11436_v23, %s15590_s27 }
  0x3b   : > { %1068 = vrot.lane.b32.xlu0 %v11420_v19, %s15594_s16  ;;  %1070 = vrot.lane.b32.xlu1 %v11433_v22, %s15594_s16 }
  0x3f   : > { %1072 = vrot.lane.b32.xlu0 %v11423_v20, %s15594_s16  ;;  %1074 = vrot.lane.b32.xlu1 %v11436_v23, %s15594_s16 }
  0x43   : > { %1352 = vrot.lane.b32.xlu0 %v11499_v40, %s15596_s30  ;;  %1354 = vrot.lane.b32.xlu1 %v11502_v41, %s15596_s30 }
  0x47   : > { %1356 = vrot.lane.b32.xlu0 %v11509_v42, %s15596_s30  ;;  %1358 = vrot.lane.b32.xlu1 %v11512_v43, %s15596_s30  ;;  %s11239_s30 = smov 104  }
  0x4b   : > { %1494 = vrot.lane.b32.xlu0 %v11499_v40, %s15592_s20  ;;  %1496 = vrot.lane.b32.xlu1 %v11502_v41, %s15592_s20 }
  0x4f   : > { %1498 = vrot.lane.b32.xlu0 %v11509_v42, %s15592_s20  ;;  %1500 = vrot.lane.b32.xlu1 %v11512_v43, %s15592_s20  ;;  %s15615_s20 = smov 125  }
  0x53   : > { %1636 = vrot.lane.b32.xlu0 %v11499_v40, %s15590_s27  ;;  %1638 = vrot.lane.b32.xlu1 %v11502_v41, %s15590_s27 }
  0x57   : > { %1640 = vrot.lane.b32.xlu0 %v11509_v42, %s15590_s27  ;;  %1642 = vrot.lane.b32.xlu1 %v11512_v43, %s15590_s27  ;;  %s15617_s27 = smov 119  }
  0x5b   : > { %1778 = vrot.lane.b32.xlu0 %v11499_v40, %s15594_s16  ;;  %1780 = vrot.lane.b32.xlu1 %v11502_v41, %s15594_s16 }
  0x5f   : > { %1782 = vrot.lane.b32.xlu0 %v11509_v42, %s15594_s16  ;;  %1784 = vrot.lane.b32.xlu1 %v11512_v43, %s15594_s16  ;;  %s11171_s16 = sshll.u32 %s11242_s22, 4  ;;  %s11172_s16 = int_to_ptr.vmem [resolvable:$false] %s11171_s16 }
  0x60   : > { %s11173_s24 = scalar_lea.vmem %s11172_s16, 32 }
  0x63   : > { %2062 = vrot.lane.b32.xlu0 %v11567_v55, %s15615_s20  ;;  %2064 = vrot.lane.b32.xlu1 %v11602_v8, %s15615_s20 }
  0x67   : > { %2066 = vrot.lane.b32.xlu0 %v11615_v14, %s15615_s20  ;;  %2068 = vrot.lane.b32.xlu1 %v11641_v26, %s15615_s20 }
  0x6b   : > { %2204 = vrot.lane.b32.xlu0 %v11567_v55, %s15616_s0  ;;  %2206 = vrot.lane.b32.xlu1 %v11602_v8, %s15616_s0 }
  0x6f   : > { %2208 = vrot.lane.b32.xlu0 %v11615_v14, %s15616_s0  ;;  %2210 = vrot.lane.b32.xlu1 %v11641_v26, %s15616_s0 }
  0x73   : > { %2346 = vrot.lane.b32.xlu0 %v11567_v55, %s15617_s27  ;;  %2348 = vrot.lane.b32.xlu1 %v11602_v8, %s15617_s27 }
  0x77   : > { %2350 = vrot.lane.b32.xlu0 %v11615_v14, %s15617_s27  ;;  %2352 = vrot.lane.b32.xlu1 %v11641_v26, %s15617_s27 }
  0x7b   : > { %2488 = vrot.lane.b32.xlu0 %v11567_v55, %s15618_s18  ;;  %v8193_v55 = vld [vmem:[%s15570_s1 + $0x200] sm:$0xf]  ;;  %2490 = vrot.lane.b32.xlu1 %v11602_v8, %s15618_s18 }
  0x7c   : > { %v8211_v8 = vld [vmem:[%s15570_s1 + $0x260] sm:$0xff] }
  0x7f   : > { %2492 = vrot.lane.b32.xlu0 %v11615_v14, %s15618_s18  ;;  %2494 = vrot.lane.b32.xlu1 %v11641_v26, %s15618_s18  ;;  %v8217_v26 = vld [vmem:[%s15570_s1 + $0x290] sm:$0xff] }
  0x95   : > { %v546_v52 = vpop.permute.xlu0 %545  ;;  %v550_v63 = vpop.permute.xlu1 %549 }
  0x96   : > { %8163 = vmatmul.mubr.msk.f32.vlgmr.msra.gmra.mrb[0].mxu0 %vm553_vm1, %v546_v52  ;;  %v8191_v52 = vld [vmem:[%s15570_s1 + $0x1f0] sm:$0xff] }
  0x97   : > { %9643 = vmatpush1.bf16.msra.mxu0 %v9642_v48  ;;  %639 = vmatprep.mubr.f32.mxu0 %v11231_v12  ;;  %v8192_v48 = vld [vmem:[%s15570_s1 + $0x1f8] sm:$0xff] }
  0x98   : > { %9645 = vmatprep.subr.bf16.mxu0 %v9644_v49  ;;  %v9674_v49 = vpack.c.bf16 %v8187_v47, %v8185_v46  ;;  %v8238_v46 = vld [vmem:[%s15570_s1 + $0x308] sm:$0xff]  ;;  %v8240_v47 = vld [vmem:[%s15570_s1 + $0x318] sm:$0xff] }
  0x99   : > { %v548_v60 = vpop.permute.xlu0 %547  ;;  %v552_v7 = vpop.permute.xlu1 %551 }
  0x9a   : > { %8164 = vmatmul.mubr.msk.f32.gmra.mrb[2].mxu0 %vm553_vm1, %v548_v60 }
  0x9b   : > { %9647 = vmatpush1.bf16.msra.mxu0 %v9646_v56  ;;  %645 = vmatprep.mubr.f32.mxu0 %v11231_v12  ;;  %v8201_v56 = vld [vmem:[%s15570_s1 + $0x210] sm:$0xff] }
  0x9c   : > { %9649 = vmatprep.subr.bf16.mxu0 %v9648_v57  ;;  %v8203_v57 = vld [vmem:[%s15570_s1 + $0x220] sm:$0xff] }
  0x9d   : > { %v785_v61 = vpop.permute.xlu0 %784  ;;  %v9682_v62 = vpack.c.bf16 %v8203_v57, %v8201_v56  ;;  %v787_v5 = vpop.permute.xlu1 %786  ;;  %v8241_v56 = vld [vmem:[%s15570_s1 + $0x320] sm:$0xff]  ;;  %v8243_v57 = vld [vmem:[%s15570_s1 + $0x330] sm:$0xff] }
  0x9e   : > { %8165 = vmatmul.mubr.msk.f32.gmra.mrb[4].mxu0 %vm553_vm1, %v550_v63  ;;  %v9684_v63 = vpack.c.bf16 %v8208_v59, %v8206_v58  ;;  %v8246_v58 = vld [vmem:[%s15570_s1 + $0x348] sm:$0xff]  ;;  %v8248_v59 = vld [vmem:[%s15570_s1 + $0x358] sm:$0xff] }
  0x9f   : > { %9651 = vmatpush1.bf16.msra.mxu0 %v9650_v0  ;;  %651 = vmatprep.mubr.f32.mxu0 %v11231_v12  ;;  %v8205_v0 = vld [vmem:[%s15570_s1 + $0x230] sm:$0xff] }
  0xa0   : > { %9653 = vmatprep.subr.bf16.mxu0 %v9652_v1  ;;  %v8207_v1 = vld [vmem:[%s15570_s1 + $0x240] sm:$0xff] }
  0xa1   : > { %v9686_v4 = vpack.c.bf16 %v8207_v1, %v8205_v0  ;;  %v791_v24 = vpop.permute.xlu1 %790  ;;  %v8250_v1 = vld [vmem:[%s15570_s1 + $0x368] sm:$0xf] }
  0xa2   : > { %8166 = vmatmul.mubr.msk.f32.gmra.mrb[6].mxu0 %vm553_vm1, %v552_v7  ;;  %v8209_v7 = vld [vmem:[%s15570_s1 + $0x250] sm:$0xff] }
  0xa3   : > { %9655 = vmatpush1.bf16.msra.mxu0 %v9654_v6  ;;  %736 = vmatprep.mubr.f32.mxu0 %v11231_v12  ;;  %v9688_v6 = vpack.c.bf16 %v8212_v3, %v8210_v2  ;;  %v9690_v11 = vpack.c.bf16 %v8211_v8, %v8209_v7  ;;  %v8258_v2 = vld [vmem:[%s15570_s1 + $0x378] sm:$0xff]  ;;  %v8260_v3 = vld [vmem:[%s15570_s1 + $0x388] sm:$0xff]  ;;  %v8249_v8 = vld [vmem:[%s15570_s1 + $0x360] sm:$0xf] }
  0xa4   : > { %9657 = vmatprep.subr.bf16.mxu0 %v9656_v9  ;;  %v8214_v9 = vld [vmem:[%s15570_s1 + $0x278] sm:$0xff]  ;;  %v8264_v7 = vld [vmem:[%s15570_s1 + $0x3a8] sm:$0xff] }
  0xa5   : > { %v9692_v14 = vpack.c.bf16 %v8216_v10, %v8214_v9  ;;  %v9720_v9 = vpack.c.bf16 %v8260_v3, %v8258_v2  ;;  %v8299_v2 = vld [vmem:[%s15570_s1 + $0x490] sm:$0xff]  ;;  %v8302_v3 = vld [vmem:[%s15570_s1 + $0x4a8] sm:$0xff] }
  0xa7   : > { %9659 = vmatpush1.bf16.msra.mxu0 %v9658_v13  ;;  %v789_v13 = vpop.permute.xlu0 %788 }
  0xa8   : > { %8167 = vmatprep.subr.msk.mxu0 %vm562_vm0, %v517_v15  ;;  %v8213_v15 = vld [vmem:[%s15570_s1 + $0x270] sm:$0xff] }
  0xa9   : > { %v9694_v21 = vpack.c.bf16 %v8215_v16, %v8213_v15  ;;  %v8263_v15 = vld [vmem:[%s15570_s1 + $0x3a0] sm:$0xff]  ;;  %v8266_v16 = vld [vmem:[%s15570_s1 + $0x3b8] sm:$0xff] }
  0xab   : > { %8168 = vmatpush1.msk.msra.mxu0 %vm562_vm0, %v516_v27  ;;  %v8219_v27 = vld [vmem:[%s15570_s1 + $0x2a0] sm:$0xff]  ;;  %v927_v38 = vpop.permute.xlu0 %926 }
  0xac   : > { %9661 = vmatprep.subr.bf16.mxu0 %v9660_v28  ;;  %8169 = vmatmul.mubr.msk.f32.vlgmr.msra.gmra.mrb[0].mxu0 %vm553_vm1, %v11420_v19  ;;  %v8186_v19 = vld [vmem:[%s15570_s1 + $0x1c8] sm:$0xff]  ;;  %v9698_v28 = vpack.c.bf16 %v8219_v27, %v8217_v26  ;;  %v8267_v26 = vld [vmem:[%s15570_s1 + $0x3c0] sm:$0xff]  ;;  %v8270_v27 = vld [vmem:[%s15570_s1 + $0x3d8] sm:$0xff] }
  0xad   : > { %9663 = vmatpush1.bf16.msra.mxu0 %v9662_v29  ;;  %742 = vmatprep.mubr.f32.mxu0 %v11231_v12  ;;  %v9672_v45 = vpack.c.bf16 %v8188_v39, %v8186_v19  ;;  %v8222_v29 = vld [vmem:[%s15570_s1 + $0x2b8] sm:$0xf]  ;;  %v9702_v19 = vpack.c.bf16 %v8231_v33, %v8229_v32  ;;  %v8269_v32 = vld [vmem:[%s15570_s1 + $0x3d0] sm:$0xff]  ;;  %v8271_v33 = vld [vmem:[%s15570_s1 + $0x3e0] sm:$0xff] }
  0xae   : > { %9665 = vmatprep.subr.bf16.mxu0 %v9664_v30  ;;  %v8230_v30 = vld [vmem:[%s15570_s1 + $0x2c8] sm:$0xff] }
  0xaf   : > { %v9700_v37 = vpack.c.bf16 %v8232_v31, %v8230_v30 }
  0xb0   : > { %8170 = vmatmul.mubr.msk.f32.gmra.mrb[2].mxu0 %vm553_vm1, %v11433_v22  ;;  %v8190_v22 = vld [vmem:[%s15570_s1 + $0x1e8] sm:$0xff] }
  0xb1   : > { %9667 = vmatpush1.bf16.msra.mxu0 %v9666_v35  ;;  %748 = vmatprep.mubr.f32.mxu0 %v11231_v12  ;;  %v9676_v50 = vpack.c.bf16 %v8192_v48, %v8190_v22  ;;  %v8236_v35 = vld [vmem:[%s15570_s1 + $0x2f8] sm:$0xff]  ;;  %v929_v48 = vpop.permute.xlu1 %928 }
  0xb2   : > { %9669 = vmatprep.subr.bf16.mxu0 %v9668_v36  ;;  %v8221_v36 = vld [vmem:[%s15570_s1 + $0x2b0] sm:$0xf]  ;;  %v9704_v39 = vpack.c.bf16 %v8236_v35, %v8234_v34  ;;  %v8274_v34 = vld [vmem:[%s15570_s1 + $0x3f8] sm:$0xff]  ;;  %v8276_v35 = vld [vmem:[%s15570_s1 + $0x408] sm:$0xff] }
  0xb4   : > { %8171 = vmatmul.mubr.msk.f32.gmra.mrb[4].mxu0 %vm553_vm1, %v11423_v20  ;;  %v9678_v20 = vpack.c.bf16 %v8191_v52, %v8189_v51  ;;  %v8239_v51 = vld [vmem:[%s15570_s1 + $0x310] sm:$0xff]  ;;  %v8242_v52 = vld [vmem:[%s15570_s1 + $0x328] sm:$0xff] }
  0xb5   : > { %9671 = vmatpush1.bf16.msra.mxu0 %v9670_v44  ;;  %754 = vmatprep.mubr.f32.mxu0 %v11231_v12  ;;  %v8233_v44 = vld [vmem:[%s15570_s1 + $0x2e0] sm:$0xff] }
  0xb6   : > { %9673 = vmatprep.subr.bf16.mxu0 %v9672_v45  ;;  %v8235_v45 = vld [vmem:[%s15570_s1 + $0x2f0] sm:$0xff] }
  0xb7   : > { %v9706_v22 = vpack.c.bf16 %v8235_v45, %v8233_v44  ;;  %v8278_v45 = vld [vmem:[%s15570_s1 + $0x418] sm:$0xf] }
  0xb8   : > { %8172 = vmatmul.mubr.msk.f32.gmra.mrb[6].mxu0 %vm553_vm1, %v11436_v23  ;;  %v8204_v23 = vld [vmem:[%s15570_s1 + $0x228] sm:$0xff] }
  0xb9   : > { %9675 = vmatpush1.bf16.msra.mxu0 %v9674_v49  ;;  %870 = vmatprep.mubr.f32.mxu0 %v11231_v12  ;;  %v9680_v60 = vpack.c.bf16 %v8204_v23, %v8202_v54  ;;  %v9708_v49 = vpack.c.bf16 %v8240_v47, %v8238_v46  ;;  %v931_v54 = vpop.permute.xlu0 %930  ;;  %v8286_v46 = vld [vmem:[%s15570_s1 + $0x428] sm:$0xff]  ;;  %v8288_v47 = vld [vmem:[%s15570_s1 + $0x438] sm:$0xff] }
  0xba   : > { %9677 = vmatprep.subr.bf16.mxu0 %v9676_v50  ;;  %v8237_v50 = vld [vmem:[%s15570_s1 + $0x300] sm:$0xff] }
  0xbd   : > { %9679 = vmatpush1.bf16.msra.mxu0 %v9678_v20  ;;  %v8244_v20 = vld [vmem:[%s15570_s1 + $0x338] sm:$0xff]  ;;  %v1069_v10 = vpop.permute.xlu0 %1068 }
  0xbe   : > { %8195 = vmatprep.subr.msk.mxu0 %vm562_vm0, %v8194_v53  ;;  %v9710_v53 = vpack.c.bf16 %v8239_v51, %v8237_v50  ;;  %v9712_v23 = vpack.c.bf16 %v8244_v20, %v8242_v52  ;;  %v8292_v50 = vld [vmem:[%s15570_s1 + $0x458] sm:$0xff]  ;;  %v8277_v51 = vld [vmem:[%s15570_s1 + $0x410] sm:$0xf]  ;;  %v9740_v52 = vpack.c.bf16 %v8288_v47, %v8286_v46  ;;  %v8332_v47 = vld [vmem:[%s15570_s1 + $0x568] sm:$0xff] }
  0xbf   : > { %v8330_v46 = vld [vmem:[%s15570_s1 + $0x558] sm:$0xff] }
  0xc1   : > { %8196 = vmatpush1.msk.msra.mxu0 %vm562_vm0, %v8193_v55  ;;  %v9714_v55 = vpack.c.bf16 %v8243_v57, %v8241_v56  ;;  %v1073_v30 = vpop.permute.xlu0 %1072  ;;  %v8294_v56 = vld [vmem:[%s15570_s1 + $0x468] sm:$0xff]  ;;  %v8296_v57 = vld [vmem:[%s15570_s1 + $0x478] sm:$0xff] }
  0xc2   : > { %9681 = vmatprep.subr.bf16.mxu0 %v9680_v60  ;;  %8197 = vmatmul.mubr.msk.f32.vlgmr.msra.gmra.mrb[0].mxu0 %vm553_vm1, %v785_v61  ;;  %v933_v60 = vpop.permute.xlu1 %932  ;;  %v9716_v61 = vpack.c.bf16 %v8248_v59, %v8246_v58  ;;  %v11995_v58 = vld [vmem:[%s11408_s23 + $0x3] sm:$0xff] }
  0xc3   : > { %9683 = vmatpush1.bf16.msra.mxu0 %v9682_v62  ;;  %876 = vmatprep.mubr.f32.mxu0 %v11231_v12  ;;  %v8245_v62 = vld [vmem:[%s15570_s1 + $0x340] sm:$0xff] }
  0xc4   : > { %9685 = vmatprep.subr.bf16.mxu0 %v9684_v63  ;;  %v8247_v63 = vld [vmem:[%s15570_s1 + $0x350] sm:$0xff]  ;;  %2772 = vrot.lane.b32.xlu0 %v11995_v58, %s15615_s20 }
  0xc5   : > { %v9718_v0 = vpack.c.bf16 %v8247_v63, %v8245_v62  ;;  %v8300_v62 = vld [vmem:[%s15570_s1 + $0x498] sm:$0xff] }
  0xc6   : > { %8198 = vmatmul.mubr.msk.f32.gmra.mrb[2].mxu0 %vm553_vm1, %v787_v5  ;;  %v8259_v5 = vld [vmem:[%s15570_s1 + $0x380] sm:$0xff] }
  0xc7   : > { %9687 = vmatpush1.bf16.msra.mxu0 %v9686_v4  ;;  %882 = vmatprep.mubr.f32.mxu0 %v11231_v12  ;;  %v8257_v4 = vld [vmem:[%s15570_s1 + $0x370] sm:$0xff] }
  0xc8   : > { %9689 = vmatprep.subr.bf16.mxu0 %v9688_v6  ;;  %v8262_v6 = vld [vmem:[%s15570_s1 + $0x398] sm:$0xff] }
  0xca   : > { %8199 = vmatmul.mubr.msk.f32.gmra.mrb[4].mxu0 %vm553_vm1, %v789_v13  ;;  %v9724_v13 = vpack.c.bf16 %v8264_v7, %v8262_v6  ;;  %v8301_v7 = vld [vmem:[%s15570_s1 + $0x4a0] sm:$0xff] }
  0xcb   : > { %9691 = vmatpush1.bf16.msra.mxu0 %v9690_v11  ;;  %888 = vmatprep.mubr.f32.mxu0 %v11231_v12  ;;  %v9722_v11 = vpack.c.bf16 %v8259_v5, %v8257_v4  ;;  %v12033_v5 = vld [vmem:[%s11408_s23 + $0xb] sm:$0xff] }
  0xcc   : > { %9693 = vmatprep.subr.bf16.mxu0 %v9692_v14  ;;  %v8261_v14 = vld [vmem:[%s15570_s1 + $0x390] sm:$0xff]  ;;  %2774 = vrot.lane.b32.xlu1 %v12033_v5, %s15615_s20 }
  0xcd   : > { %v9726_v18 = vpack.c.bf16 %v8263_v15, %v8261_v14  ;;  %v8315_v14 = vld [vmem:[%s15570_s1 + $0x4e0] sm:$0xff]  ;;  %v8318_v15 = vld [vmem:[%s15570_s1 + $0x4f8] sm:$0xff] }
  0xce   : > { %8200 = vmatmul.mubr.msk.f32.gmra.mrb[6].mxu0 %vm553_vm1, %v791_v24  ;;  %v9728_v24 = vpack.c.bf16 %v8268_v17, %v8266_v16  ;;  %v8320_v16 = vld [vmem:[%s15570_s1 + $0x508] sm:$0xff]  ;;  %v12073_v17 = vld [vmem:[%s11408_s23 + $0x1b] sm:$0xf] }
  0xcf   : > { %9695 = vmatpush1.bf16.msra.mxu0 %v9694_v21  ;;  %1012 = vmatprep.mubr.f32.mxu0 %v11231_v12  ;;  %v1071_v21 = vpop.permute.xlu1 %1070 }
  0xd0   : > { %9697 = vmatprep.subr.bf16.mxu0 %v9696_v25  ;;  %v8265_v25 = vld [vmem:[%s15570_s1 + $0x3b0] sm:$0xff]  ;;  %2778 = vrot.lane.b32.xlu1 %v12073_v17, %s15615_s20 }
  0xd3   : > { %9699 = vmatpush1.bf16.msra.mxu0 %v9698_v28  ;;  %v8272_v28 = vld [vmem:[%s15570_s1 + $0x3e8] sm:$0xff] }
  0xd4   : > { %8223 = vmatprep.subr.msk.mxu0 %vm562_vm0, %v8222_v29  ;;  %v9730_v29 = vpack.c.bf16 %v8267_v26, %v8265_v25  ;;  %v9732_v31 = vpack.c.bf16 %v8272_v28, %v8270_v27  ;;  %v9764_v26 = vpack.c.bf16 %v8320_v16, %v8318_v15  ;;  %v8317_v27 = vld [vmem:[%s15570_s1 + $0x4f0] sm:$0xff]  ;;  %v8319_v28 = vld [vmem:[%s15570_s1 + $0x500] sm:$0xff]  ;;  %2916 = vrot.lane.b32.xlu1 %v12033_v5, %s15616_s0 }
  0xd7   : > { %8224 = vmatpush1.msk.msra.mxu0 %vm562_vm0, %v8221_v36  ;;  %v9734_v36 = vpack.c.bf16 %v8271_v33, %v8269_v32 }
  0xd8   : > { %9701 = vmatprep.subr.bf16.mxu0 %v9700_v37  ;;  %8225 = vmatmul.mubr.msk.f32.vlgmr.msra.gmra.mrb[0].mxu0 %vm553_vm1, %v927_v38  ;;  %v1075_v37 = vpop.permute.xlu1 %1074  ;;  %v9736_v38 = vpack.c.bf16 %v8276_v35, %v8274_v34  ;;  %v8321_v34 = vld [vmem:[%s15570_s1 + $0x510] sm:$0xff]  ;;  %v8323_v35 = vld [vmem:[%s15570_s1 + $0x520] sm:$0xff] }
  0xd9   : > { %9703 = vmatpush1.bf16.msra.mxu0 %v9702_v19  ;;  %1018 = vmatprep.mubr.f32.mxu0 %v11231_v12  ;;  %v8273_v19 = vld [vmem:[%s15570_s1 + $0x3f0] sm:$0xff] }
  0xda   : > { %9705 = vmatprep.subr.bf16.mxu0 %v9704_v39  ;;  %v8275_v39 = vld [vmem:[%s15570_s1 + $0x400] sm:$0xff]  ;;  %2920 = vrot.lane.b32.xlu1 %v12073_v17, %s15616_s0 }
  0xdb   : > { %v9738_v44 = vpack.c.bf16 %v8275_v39, %v8273_v19 }
  0xdc   : > { %8226 = vmatmul.mubr.msk.f32.gmra.mrb[2].mxu0 %vm553_vm1, %v929_v48  ;;  %v8287_v48 = vld [vmem:[%s15570_s1 + $0x430] sm:$0xff]  ;;  %v1355_v32 = vpop.permute.xlu1 %1354 }
  0xdd   : > { %9707 = vmatpush1.bf16.msra.mxu0 %v9706_v22  ;;  %1024 = vmatprep.mubr.f32.mxu0 %v11231_v12  ;;  %v8285_v22 = vld [vmem:[%s15570_s1 + $0x420] sm:$0xff] }
  0xde   : > { %9709 = vmatprep.subr.bf16.mxu0 %v9708_v49  ;;  %v8290_v49 = vld [vmem:[%s15570_s1 + $0x448] sm:$0xff]  ;;  %v9742_v20 = vpack.c.bf16 %v8287_v48, %v8285_v22  ;;  %3058 = vrot.lane.b32.xlu1 %v12033_v5, %s15617_s27 }
  0xe0   : > { %8227 = vmatmul.mubr.msk.f32.gmra.mrb[4].mxu0 %vm553_vm1, %v931_v54  ;;  %v8289_v54 = vld [vmem:[%s15570_s1 + $0x440] sm:$0xff]  ;;  %v1359_v48 = vpop.permute.xlu1 %1358 }
  0xe1   : > { %9711 = vmatpush1.bf16.msra.mxu0 %v9710_v53  ;;  %1030 = vmatprep.mubr.f32.mxu0 %v11231_v12  ;;  %v9744_v53 = vpack.c.bf16 %v8292_v50, %v8290_v49  ;;  %v9776_v49 = vpack.c.bf16 %v8332_v47, %v8330_v46  ;;  %v8329_v50 = vld [vmem:[%s15570_s1 + $0x550] sm:$0xff]  ;;  %v8379_v47 = vld [vmem:[%s15570_s1 + $0x680] sm:$0xff] }
  0xe2   : > { %9713 = vmatprep.subr.bf16.mxu0 %v9712_v23  ;;  %v8291_v23 = vld [vmem:[%s15570_s1 + $0x450] sm:$0xff]  ;;  %3062 = vrot.lane.b32.xlu1 %v12073_v17, %s15617_s27 }
  0xe3   : > { %v9746_v59 = vpack.c.bf16 %v8291_v23, %v8289_v54  ;;  %v8344_v54 = vld [vmem:[%s15570_s1 + $0x598] sm:$0xff]  ;;  %v8341_v23 = vld [vmem:[%s15570_s1 + $0x580] sm:$0xff]  ;;  %v8377_v46 = vld [vmem:[%s15570_s1 + $0x670] sm:$0xff] }
  0xe4   : > { %8228 = vmatmul.mubr.msk.f32.gmra.mrb[6].mxu0 %vm553_vm1, %v933_v60  ;;  %v8293_v60 = vld [vmem:[%s15570_s1 + $0x460] sm:$0xff] }
  0xe5   : > { %9715 = vmatpush1.bf16.msra.mxu0 %v9714_v55  ;;  %1154 = vmatprep.mubr.f32.mxu0 %v11231_v12  ;;  %v9748_v55 = vpack.c.bf16 %v8296_v57, %v8294_v56  ;;  %v8343_v56 = vld [vmem:[%s15570_s1 + $0x590] sm:$0xff]  ;;  %v8346_v57 = vld [vmem:[%s15570_s1 + $0x5a8] sm:$0xff] }
  0xe6   : > { %9717 = vmatprep.subr.bf16.mxu0 %v9716_v61  ;;  %v8295_v61 = vld [vmem:[%s15570_s1 + $0x470] sm:$0xff]  ;;  %3200 = vrot.lane.b32.xlu1 %v12033_v5, %s15618_s18 }
  0xe7   : > { %v9750_v63 = vpack.c.bf16 %v8295_v61, %v8293_v60  ;;  %v9782_v61 = vpack.c.bf16 %v8343_v56, %v8341_v23  ;;  %v8351_v5 = vld [vmem:[%s15570_s1 + $0x5d0] sm:$0xff] }
  0xe9   : > { %9719 = vmatpush1.bf16.msra.mxu0 %v9718_v0 }
  0xea   : > { %8251 = vmatprep.subr.msk.mxu0 %vm562_vm0, %v8250_v1  ;;  %v8297_v1 = vld [vmem:[%s15570_s1 + $0x480] sm:$0xff]  ;;  %3204 = vrot.lane.b32.xlu1 %v12073_v17, %s15618_s18 }
  0xeb   : > { %v9754_v4 = vpack.c.bf16 %v8299_v2, %v8297_v1  ;;  %v8352_v1 = vld [vmem:[%s15570_s1 + $0x5d8] sm:$0xff]  ;;  %v8357_v17 = vld [vmem:[%s15570_s1 + $0x600] sm:$0xff] }
  0xed   : > { %8252 = vmatpush1.msk.msra.mxu0 %vm562_vm0, %v8249_v8  ;;  %v8303_v8 = vld [vmem:[%s15570_s1 + $0x4b0] sm:$0xff] }
  0xee   : > { %9721 = vmatprep.subr.bf16.mxu0 %v9720_v9  ;;  %8253 = vmatmul.mubr.msk.f32.vlgmr.msra.gmra.mrb[0].mxu0 %vm553_vm1, %v1069_v10  ;;  %v12047_v9 = vld [vmem:[%s11408_s23 + $0x13] sm:$0xff]  ;;  %v8306_v10 = vld [vmem:[%s15570_s1 + $0x4c8] sm:$0xf] }
  0xef   : > { %9723 = vmatpush1.bf16.msra.mxu0 %v9722_v11  ;;  %1160 = vmatprep.mubr.f32.mxu0 %v11231_v12  ;;  %v8314_v11 = vld [vmem:[%s15570_s1 + $0x4d8] sm:$0xff] }
  0xf0   : > { %9725 = vmatprep.subr.bf16.mxu0 %v9724_v13  ;;  %2776 = vrot.lane.b32.xlu0 %v12047_v9, %s15615_s20  ;;  %v8313_v13 = vld [vmem:[%s15570_s1 + $0x4d0] sm:$0xff] }
  0xf1   : > { %v9762_v25 = vpack.c.bf16 %v8315_v14, %v8313_v13  ;;  %v8360_v13 = vld [vmem:[%s15570_s1 + $0x618] sm:$0xff] }
  0xf2   : > { %8254 = vmatmul.mubr.msk.f32.gmra.mrb[2].mxu0 %vm553_vm1, %v1071_v21 }
  0xf3   : > { %9727 = vmatpush1.bf16.msra.mxu0 %v9726_v18  ;;  %1166 = vmatprep.mubr.f32.mxu0 %v11231_v12  ;;  %v8305_v18 = vld [vmem:[%s15570_s1 + $0x4c0] sm:$0xf] }
  0xf4   : > { %9729 = vmatprep.subr.bf16.mxu0 %v9728_v24  ;;  %v1353_v24 = vpop.permute.xlu0 %1352  ;;  %2914 = vrot.lane.b32.xlu0 %v11995_v58, %s15616_s0 }
  0xf6   : > { %8255 = vmatmul.mubr.msk.f32.gmra.mrb[4].mxu0 %vm553_vm1, %v1073_v30  ;;  %v8324_v30 = vld [vmem:[%s15570_s1 + $0x528] sm:$0xff] }
  0xf7   : > { %9731 = vmatpush1.bf16.msra.mxu0 %v9730_v29  ;;  %1172 = vmatprep.mubr.f32.mxu0 %v11231_v12  ;;  %v8322_v29 = vld [vmem:[%s15570_s1 + $0x518] sm:$0xff] }
  0xf8   : > { %9733 = vmatprep.subr.bf16.mxu0 %v9732_v31  ;;  %v9766_v31 = vpack.c.bf16 %v8319_v28, %v8317_v27  ;;  %v9768_v33 = vpack.c.bf16 %v8324_v30, %v8322_v29  ;;  %2918 = vrot.lane.b32.xlu0 %v12047_v9, %s15616_s0  ;;  %v1357_v19 = vpop.permute.xlu0 %1356  ;;  %v8369_v27 = vld [vmem:[%s15570_s1 + $0x630] sm:$0xff]  ;;  %v8371_v28 = vld [vmem:[%s15570_s1 + $0x640] sm:$0xff]  ;;  %v8374_v29 = vld [vmem:[%s15570_s1 + $0x658] sm:$0xff] }
  0xf9   : > { %v8376_v30 = vld [vmem:[%s15570_s1 + $0x668] sm:$0xff] }
  0xfa   : > { %8256 = vmatmul.mubr.msk.f32.gmra.mrb[6].mxu0 %vm553_vm1, %v1075_v37  ;;  %v8328_v37 = vld [vmem:[%s15570_s1 + $0x548] sm:$0xff] }
  0xfb   : > { %9735 = vmatpush1.bf16.msra.mxu0 %v9734_v36  ;;  %1296 = vmatprep.mubr.f32.mxu0 %v11231_v12  ;;  %v8326_v36 = vld [vmem:[%s15570_s1 + $0x538] sm:$0xff] }
  0xfc   : > { %9737 = vmatprep.subr.bf16.mxu0 %v9736_v38  ;;  %v9770_v38 = vpack.c.bf16 %v8323_v35, %v8321_v34  ;;  %v9772_v39 = vpack.c.bf16 %v8328_v37, %v8326_v36  ;;  %3056 = vrot.lane.b32.xlu0 %v11995_v58, %s15617_s27  ;;  %v1495_v60 = vpop.permute.xlu0 %1494  ;;  %v9802_v34 = vpack.c.bf16 %v8371_v28, %v8369_v27  ;;  %v8373_v36 = vld [vmem:[%s15570_s1 + $0x650] sm:$0xff]  ;;  %v8375_v37 = vld [vmem:[%s15570_s1 + $0x660] sm:$0xff] }
  0xfd   : > { %v9804_v35 = vpack.c.bf16 %v8376_v30, %v8374_v29  ;;  %v8413_v30 = vld [vmem:[%s15570_s1 + $0x760] sm:$0xff] }
  0xff   : > { %9739 = vmatpush1.bf16.msra.mxu0 %v9738_v44  ;;  %v8325_v44 = vld [vmem:[%s15570_s1 + $0x530] sm:$0xff] }
 0x100   : > { %8279 = vmatprep.subr.msk.mxu0 %vm562_vm0, %v8278_v45  ;;  %v8327_v45 = vld [vmem:[%s15570_s1 + $0x540] sm:$0xff]  ;;  %3060 = vrot.lane.b32.xlu0 %v12047_v9, %s15617_s27 }
 0x101   : > { %v9774_v22 = vpack.c.bf16 %v8327_v45, %v8325_v44 }
 0x103   : > { %8280 = vmatpush1.msk.msra.mxu0 %vm562_vm0, %v8277_v51  ;;  %v8331_v51 = vld [vmem:[%s15570_s1 + $0x560] sm:$0xff] }
 0x104   : > { %9741 = vmatprep.subr.bf16.mxu0 %v9740_v52  ;;  %8281 = vmatmul.mubr.msk.f32.vlgmr.msra.gmra.mrb[0].mxu0 %vm553_vm1, %v11499_v40  ;;  %v8298_v40 = vld [vmem:[%s15570_s1 + $0x488] sm:$0xff]  ;;  %v9778_v52 = vpack.c.bf16 %v8331_v51, %v8329_v50 }
 0x105   : > { %9743 = vmatpush1.bf16.msra.mxu0 %v9742_v20  ;;  %1302 = vmatprep.mubr.f32.mxu0 %v11231_v12  ;;  %v9752_v0 = vpack.c.bf16 %v8300_v62, %v8298_v40  ;;  %v8334_v20 = vld [vmem:[%s15570_s1 + $0x578] sm:$0xf]  ;;  %v8345_v62 = vld [vmem:[%s15570_s1 + $0x5a0] sm:$0xff] }
 0x106   : > { %9745 = vmatprep.subr.bf16.mxu0 %v9744_v53  ;;  %v8342_v53 = vld [vmem:[%s15570_s1 + $0x588] sm:$0xff]  ;;  %3198 = vrot.lane.b32.xlu0 %v11995_v58, %s15618_s18  ;;  %v8333_v58 = vld [vmem:[%s15570_s1 + $0x570] sm:$0xf] }
 0x108   : > { %8282 = vmatmul.mubr.msk.f32.gmra.mrb[2].mxu0 %vm553_vm1, %v11502_v41  ;;  %v8304_v41 = vld [vmem:[%s15570_s1 + $0x4b8] sm:$0xff] }
 0x109   : > { %9747 = vmatpush1.bf16.msra.mxu0 %v9746_v59  ;;  %1308 = vmatprep.mubr.f32.mxu0 %v11231_v12  ;;  %v9756_v6 = vpack.c.bf16 %v8304_v41, %v8302_v3  ;;  %v8348_v59 = vld [vmem:[%s15570_s1 + $0x5b8] sm:$0xff]  ;;  %v1497_v3 = vpop.permute.xlu1 %1496 }
 0x10a   : > { %9749 = vmatprep.subr.bf16.mxu0 %v9748_v55  ;;  %v9780_v55 = vpack.c.bf16 %v8344_v54, %v8342_v53  ;;  %3202 = vrot.lane.b32.xlu0 %v12047_v9, %s15618_s18  ;;  %v9784_v40 = vpack.c.bf16 %v8348_v59, %v8346_v57  ;;  %v8386_v53 = vld [vmem:[%s15570_s1 + $0x6b8] sm:$0xff]  ;;  %v8388_v54 = vld [vmem:[%s15570_s1 + $0x6c8] sm:$0xff]  ;;  %v8385_v59 = vld [vmem:[%s15570_s1 + $0x6b0] sm:$0xff] }
 0x10b   : > { %v9816_v57 = vpack.c.bf16 %v8388_v54, %v8386_v53  ;;  %v8433_v53 = vld [vmem:[%s15570_s1 + $0x7d0] sm:$0xff]  ;;  %v8435_v54 = vld [vmem:[%s15570_s1 + $0x7e0] sm:$0xff] }
 0x10c   : > { %8283 = vmatmul.mubr.msk.f32.gmra.mrb[4].mxu0 %vm553_vm1, %v11509_v42  ;;  %v9758_v42 = vpack.c.bf16 %v8303_v8, %v8301_v7  ;;  %v8356_v7 = vld [vmem:[%s15570_s1 + $0x5f8] sm:$0xff] }
 0x10d   : > { %9751 = vmatpush1.bf16.msra.mxu0 %v9750_v63  ;;  %1314 = vmatprep.mubr.f32.mxu0 %v11231_v12  ;;  %v8347_v63 = vld [vmem:[%s15570_s1 + $0x5b0] sm:$0xff]  ;;  %v1501_v15 = vpop.permute.xlu1 %1500 }
 0x10e   : > { %9753 = vmatprep.subr.bf16.mxu0 %v9752_v0  ;;  %v8350_v0 = vld [vmem:[%s15570_s1 + $0x5c8] sm:$0xff]  ;;  %v9786_v2 = vpack.c.bf16 %v8347_v63, %v8345_v62  ;;  %v8397_v62 = vld [vmem:[%s15570_s1 + $0x6e0] sm:$0xff]  ;;  %v8399_v63 = vld [vmem:[%s15570_s1 + $0x6f0] sm:$0xff] }
 0x10f   : > { %v9788_v41 = vpack.c.bf16 %v8352_v1, %v8350_v0  ;;  %v8402_v0 = vld [vmem:[%s15570_s1 + $0x708] sm:$0xff]  ;;  %v8404_v1 = vld [vmem:[%s15570_s1 + $0x718] sm:$0xff] }
 0x110   : > { %8284 = vmatmul.mubr.msk.f32.gmra.mrb[6].mxu0 %vm553_vm1, %v11512_v43  ;;  %v8316_v43 = vld [vmem:[%s15570_s1 + $0x4e8] sm:$0xff] }
 0x111   : > { %9755 = vmatpush1.bf16.msra.mxu0 %v9754_v4  ;;  %1438 = vmatprep.mubr.f32.mxu0 %v11231_v12  ;;  %v9760_v21 = vpack.c.bf16 %v8316_v43, %v8314_v11  ;;  %v8349_v4 = vld [vmem:[%s15570_s1 + $0x5c0] sm:$0xff]  ;;  %v8355_v11 = vld [vmem:[%s15570_s1 + $0x5f0] sm:$0xff]  ;;  %v8358_v43 = vld [vmem:[%s15570_s1 + $0x608] sm:$0xff]  ;;  %v1639_v44 = vpop.permute.xlu1 %1638 }
 0x112   : > { %9757 = vmatprep.subr.bf16.mxu0 %v9756_v6  ;;  %v8354_v6 = vld [vmem:[%s15570_s1 + $0x5e8] sm:$0xff]  ;;  %v9790_v8 = vpack.c.bf16 %v8351_v5, %v8349_v4  ;;  %v9796_v16 = vpack.c.bf16 %v8360_v13, %v8358_v43  ;;  %v9822_v4 = vpack.c.bf16 %v8399_v63, %v8397_v62  ;;  %v9824_v5 = vpack.c.bf16 %v8404_v1, %v8402_v0  ;;  %v8405_v43 = vld [vmem:[%s15570_s1 + $0x720] sm:$0xff]  ;;  %v8407_v13 = vld [vmem:[%s15570_s1 + $0x730] sm:$0xff] }
 0x113   : > { %v9792_v9 = vpack.c.bf16 %v8356_v7, %v8354_v6  ;;  %v8401_v6 = vld [vmem:[%s15570_s1 + $0x700] sm:$0xff]  ;;  %v8403_v7 = vld [vmem:[%s15570_s1 + $0x710] sm:$0xff] }
 0x114   : > { %v11153_v62 = vld [vmem:[%s11408_s23 + $0x12] sm:$0xff] }
 0x115   : > { %9759 = vmatpush1.bf16.msra.mxu0 %v9758_v42  ;;  %v1499_v42 = vpop.permute.xlu0 %1498  ;;  %v1643_v56 = vpop.permute.xlu1 %1642  ;;  %v12461_v0 = vld [vmem:[%s11408_s23 + $0xc] sm:$0xff] }
 0x116   : > { %8307 = vmatprep.subr.msk.mxu0 %vm562_vm0, %v8306_v10  ;;  %v8353_v10 = vld [vmem:[%s15570_s1 + $0x5e0] sm:$0xff]  ;;  %3484 = vrot.lane.b32.xlu1 %v12461_v0, %s15615_s20 }
 0x117   : > { %v9794_v14 = vpack.c.bf16 %v8355_v11, %v8353_v10 }
 0x119   : > { %8308 = vmatpush1.msk.msra.mxu0 %vm562_vm0, %v8305_v18  ;;  %v8359_v18 = vld [vmem:[%s15570_s1 + $0x610] sm:$0xff]  ;;  %v1781_v10 = vpop.permute.xlu1 %1780 }
 0x11a   : > { %9761 = vmatprep.subr.bf16.mxu0 %v9760_v21  ;;  %8309 = vmatmul.mubr.msk.f32.vlgmr.msra.gmra.mrb[0].mxu0 %vm553_vm1, %v1353_v24  ;;  %v9798_v21 = vpack.c.bf16 %v8359_v18, %v8357_v17  ;;  %v8362_v24 = vld [vmem:[%s15570_s1 + $0x628] sm:$0xf] }
 0x11b   : > { %9763 = vmatpush1.bf16.msra.mxu0 %v9762_v25  ;;  %1444 = vmatprep.mubr.f32.mxu0 %v11231_v12  ;;  %v8370_v25 = vld [vmem:[%s15570_s1 + $0x638] sm:$0xff] }
 0x11c   : > { %9765 = vmatprep.subr.bf16.mxu0 %v9764_v26  ;;  %v8372_v26 = vld [vmem:[%s15570_s1 + $0x648] sm:$0xff] }
 0x11d   : > { %v1785_v28 = vpop.permute.xlu1 %1784 }
 0x11e   : > { %8310 = vmatmul.mubr.msk.f32.gmra.mrb[2].mxu0 %vm553_vm1, %v1355_v32  ;;  %v9800_v32 = vpack.c.bf16 %v8372_v26, %v8370_v25  ;;  %v8414_v25 = vld [vmem:[%s15570_s1 + $0x768] sm:$0xff]  ;;  %v8416_v26 = vld [vmem:[%s15570_s1 + $0x778] sm:$0xff] }
 0x11f   : > { %9767 = vmatpush1.bf16.msra.mxu0 %v9766_v31  ;;  %1450 = vmatprep.mubr.f32.mxu0 %v11231_v12  ;;  %v8361_v31 = vld [vmem:[%s15570_s1 + $0x620] sm:$0xf]  ;;  %v9836_v29 = vpack.c.bf16 %v8416_v26, %v8414_v25  ;;  %v8464_v25 = vld [vmem:[%s15570_s1 + $0x898] sm:$0xff] }
 0x120   : > { %9769 = vmatprep.subr.bf16.mxu0 %v9768_v33  ;;  %v1637_v33 = vpop.permute.xlu0 %1636 }
 0x122   : > { %8311 = vmatmul.mubr.msk.f32.gmra.mrb[4].mxu0 %vm553_vm1, %v1357_v19  ;;  %v8380_v19 = vld [vmem:[%s15570_s1 + $0x688] sm:$0xff] }
 0x123   : > { %9771 = vmatpush1.bf16.msra.mxu0 %v9770_v38  ;;  %1456 = vmatprep.mubr.f32.mxu0 %v11231_v12  ;;  %v8378_v38 = vld [vmem:[%s15570_s1 + $0x678] sm:$0xff] }
 0x124   : > { %9773 = vmatprep.subr.bf16.mxu0 %v9772_v39  ;;  %v9806_v39 = vpack.c.bf16 %v8375_v37, %v8373_v36  ;;  %v9808_v45 = vpack.c.bf16 %v8380_v19, %v8378_v38  ;;  %v1641_v50 = vpop.permute.xlu0 %1640  ;;  %v8425_v36 = vld [vmem:[%s15570_s1 + $0x790] sm:$0xff]  ;;  %v8427_v37 = vld [vmem:[%s15570_s1 + $0x7a0] sm:$0xff]  ;;  %v8430_v38 = vld [vmem:[%s15570_s1 + $0x7b8] sm:$0xff] }
 0x125   : > { %v8432_v19 = vld [vmem:[%s15570_s1 + $0x7c8] sm:$0xff] }
 0x126   : > { %8312 = vmatmul.mubr.msk.f32.gmra.mrb[6].mxu0 %vm553_vm1, %v1359_v48  ;;  %v8384_v48 = vld [vmem:[%s15570_s1 + $0x6a8] sm:$0xff] }
 0x127   : > { %9775 = vmatpush1.bf16.msra.mxu0 %v9774_v22  ;;  %1580 = vmatprep.mubr.f32.mxu0 %v11231_v12  ;;  %v8382_v22 = vld [vmem:[%s15570_s1 + $0x698] sm:$0xff] }
 0x128   : > { %9777 = vmatprep.subr.bf16.mxu0 %v9776_v49  ;;  %v9810_v49 = vpack.c.bf16 %v8379_v47, %v8377_v46  ;;  %v9812_v51 = vpack.c.bf16 %v8384_v48, %v8382_v22  ;;  %v9844_v46 = vpack.c.bf16 %v8432_v19, %v8430_v38  ;;  %v8429_v47 = vld [vmem:[%s15570_s1 + $0x7b0] sm:$0xff]  ;;  %v8431_v22 = vld [vmem:[%s15570_s1 + $0x7c0] sm:$0xff]  ;;  %v8434_v48 = vld [vmem:[%s15570_s1 + $0x7d8] sm:$0xff] }
 0x129   : > { %v8470_v38 = vld [vmem:[%s15570_s1 + $0x8c8] sm:$0xff]  ;;  %v8472_v19 = vld [vmem:[%s15570_s1 + $0x8d8] sm:$0xff] }
 0x12b   : > { %9779 = vmatpush1.bf16.msra.mxu0 %v9778_v52  ;;  %v8381_v52 = vld [vmem:[%s15570_s1 + $0x690] sm:$0xff] }
 0x12c   : > { %8335 = vmatprep.subr.msk.mxu0 %vm562_vm0, %v8334_v20  ;;  %v8383_v20 = vld [vmem:[%s15570_s1 + $0x6a0] sm:$0xff] }
 0x12d   : > { %v9814_v23 = vpack.c.bf16 %v8383_v20, %v8381_v52  ;;  %v9846_v52 = vpack.c.bf16 %v8431_v22, %v8429_v47  ;;  %v8471_v47 = vld [vmem:[%s15570_s1 + $0x8d0] sm:$0xff] }
 0x12f   : > { %8336 = vmatpush1.msk.msra.mxu0 %vm562_vm0, %v8333_v58  ;;  %v8387_v58 = vld [vmem:[%s15570_s1 + $0x6c0] sm:$0xff] }
 0x130   : > { %9781 = vmatprep.subr.bf16.mxu0 %v9780_v55  ;;  %8337 = vmatmul.mubr.msk.f32.vlgmr.msra.gmra.mrb[0].mxu0 %vm553_vm1, %v1495_v60  ;;  %v9818_v55 = vpack.c.bf16 %v8387_v58, %v8385_v59  ;;  %v8390_v60 = vld [vmem:[%s15570_s1 + $0x6d8] sm:$0xf]  ;;  %v9850_v59 = vpack.c.bf16 %v8435_v54, %v8433_v53  ;;  %v8488_v54 = vld [vmem:[%s15570_s1 + $0x928] sm:$0xff] }
 0x131   : > { %9783 = vmatpush1.bf16.msra.mxu0 %v9782_v61  ;;  %1586 = vmatprep.mubr.f32.mxu0 %v11231_v12  ;;  %v8398_v61 = vld [vmem:[%s15570_s1 + $0x6e8] sm:$0xff]  ;;  %v8486_v53 = vld [vmem:[%s15570_s1 + $0x918] sm:$0xff] }
 0x132   : > { %9785 = vmatprep.subr.bf16.mxu0 %v9784_v40  ;;  %v8400_v40 = vld [vmem:[%s15570_s1 + $0x6f8] sm:$0xff] }
 0x134   : > { %8338 = vmatmul.mubr.msk.f32.gmra.mrb[2].mxu0 %vm553_vm1, %v1497_v3  ;;  %v9820_v3 = vpack.c.bf16 %v8400_v40, %v8398_v61  ;;  %v8442_v61 = vld [vmem:[%s15570_s1 + $0x818] sm:$0xff]  ;;  %v8444_v40 = vld [vmem:[%s15570_s1 + $0x828] sm:$0xff] }
 0x135   : > { %9787 = vmatpush1.bf16.msra.mxu0 %v9786_v2  ;;  %1592 = vmatprep.mubr.f32.mxu0 %v11231_v12  ;;  %v8389_v2 = vld [vmem:[%s15570_s1 + $0x6d0] sm:$0xf]  ;;  %v9856_v1 = vpack.c.bf16 %v8444_v40, %v8442_v61  ;;  %v8492_v61 = vld [vmem:[%s15570_s1 + $0x948] sm:$0xff] }
 0x136   : > { %9789 = vmatprep.subr.bf16.mxu0 %v9788_v41  ;;  %v1779_v41 = vpop.permute.xlu0 %1778 }
 0x138   : > { %8339 = vmatmul.mubr.msk.f32.gmra.mrb[4].mxu0 %vm553_vm1, %v1499_v42  ;;  %v8408_v42 = vld [vmem:[%s15570_s1 + $0x738] sm:$0xff] }
 0x139   : > { %9791 = vmatpush1.bf16.msra.mxu0 %v9790_v8  ;;  %1598 = vmatprep.mubr.f32.mxu0 %v11231_v12  ;;  %v8406_v8 = vld [vmem:[%s15570_s1 + $0x728] sm:$0xff] }
 0x13a   : > { %9793 = vmatprep.subr.bf16.mxu0 %v9792_v9  ;;  %v9826_v9 = vpack.c.bf16 %v8403_v7, %v8401_v6  ;;  %v9828_v11 = vpack.c.bf16 %v8408_v42, %v8406_v8  ;;  %v1783_v17 = vpop.permute.xlu0 %1782  ;;  %v8446_v6 = vld [vmem:[%s15570_s1 + $0x838] sm:$0xf]  ;;  %v8454_v7 = vld [vmem:[%s15570_s1 + $0x848] sm:$0xff]  ;;  %v8453_v42 = vld [vmem:[%s15570_s1 + $0x840] sm:$0xff] }
 0x13b   : > { %v8456_v8 = vld [vmem:[%s15570_s1 + $0x858] sm:$0xff] }
 0x13c   : > { %8340 = vmatmul.mubr.msk.f32.gmra.mrb[6].mxu0 %vm553_vm1, %v1501_v15  ;;  %v8412_v15 = vld [vmem:[%s15570_s1 + $0x758] sm:$0xff] }
 0x13d   : > { %9795 = vmatpush1.bf16.msra.mxu0 %v9794_v14  ;;  %1722 = vmatprep.mubr.f32.mxu0 %v11231_v12  ;;  %v8410_v14 = vld [vmem:[%s15570_s1 + $0x748] sm:$0xff] }
 0x13e   : > { %9797 = vmatprep.subr.bf16.mxu0 %v9796_v16  ;;  %v9830_v16 = vpack.c.bf16 %v8407_v13, %v8405_v43  ;;  %v9832_v18 = vpack.c.bf16 %v8412_v15, %v8410_v14  ;;  %v12501_v43 = vld [vmem:[%s11408_s23 + $0x1c] sm:$0xf]  ;;  %v8445_v13 = vld [vmem:[%s15570_s1 + $0x830] sm:$0xf]  ;;  %v9860_v14 = vpack.c.bf16 %v8456_v8, %v8454_v7  ;;  %v2063_v15 = vpop.permute.xlu0 %2062  ;;  %v8495_v7 = vld [vmem:[%s15570_s1 + $0x960] sm:$0xff] }
 0x13f   : > { %3488 = vrot.lane.b32.xlu1 %v12501_v43, %s15615_s20  ;;  %v8498_v8 = vld [vmem:[%s15570_s1 + $0x978] sm:$0xff] }
 0x141   : > { %9799 = vmatpush1.bf16.msra.mxu0 %v9798_v21  ;;  %v8409_v21 = vld [vmem:[%s15570_s1 + $0x740] sm:$0xff] }
 0x142   : > { %8363 = vmatprep.subr.msk.mxu0 %vm562_vm0, %v8362_v24  ;;  %v8411_v24 = vld [vmem:[%s15570_s1 + $0x750] sm:$0xff] }
 0x143   : > { %v9834_v27 = vpack.c.bf16 %v8411_v24, %v8409_v21  ;;  %v8459_v21 = vld [vmem:[%s15570_s1 + $0x870] sm:$0xff]  ;;  %v8462_v24 = vld [vmem:[%s15570_s1 + $0x888] sm:$0xff]  ;;  %3626 = vrot.lane.b32.xlu1 %v12461_v0, %s15616_s0 }
 0x145   : > { %8364 = vmatpush1.msk.msra.mxu0 %vm562_vm0, %v8361_v31  ;;  %v8415_v31 = vld [vmem:[%s15570_s1 + $0x770] sm:$0xff] }
 0x146   : > { %9801 = vmatprep.subr.bf16.mxu0 %v9800_v32  ;;  %8365 = vmatmul.mubr.msk.f32.vlgmr.msra.gmra.mrb[0].mxu0 %vm553_vm1, %v1637_v33  ;;  %v9838_v32 = vpack.c.bf16 %v8415_v31, %v8413_v30  ;;  %v8418_v33 = vld [vmem:[%s15570_s1 + $0x788] sm:$0xf]  ;;  %v8463_v30 = vld [vmem:[%s15570_s1 + $0x890] sm:$0xff] }
 0x147   : > { %9803 = vmatpush1.bf16.msra.mxu0 %v9802_v34  ;;  %1728 = vmatprep.mubr.f32.mxu0 %v11231_v12  ;;  %v8426_v34 = vld [vmem:[%s15570_s1 + $0x798] sm:$0xff]  ;;  %v8466_v31 = vld [vmem:[%s15570_s1 + $0x8a8] sm:$0xff] }
 0x148   : > { %9805 = vmatprep.subr.bf16.mxu0 %v9804_v35  ;;  %v8428_v35 = vld [vmem:[%s15570_s1 + $0x7a8] sm:$0xff]  ;;  %3630 = vrot.lane.b32.xlu1 %v12501_v43, %s15616_s0 }
 0x14a   : > { %8366 = vmatmul.mubr.msk.f32.gmra.mrb[2].mxu0 %vm553_vm1, %v1639_v44  ;;  %v9840_v44 = vpack.c.bf16 %v8428_v35, %v8426_v34  ;;  %v2067_v34 = vpop.permute.xlu0 %2066 }
 0x14b   : > { %9807 = vmatpush1.bf16.msra.mxu0 %v9806_v39  ;;  %1734 = vmatprep.mubr.f32.mxu0 %v11231_v12  ;;  %v8417_v39 = vld [vmem:[%s15570_s1 + $0x780] sm:$0xf] }
 0x14c   : > { %9809 = vmatprep.subr.bf16.mxu0 %v9808_v45  ;;  %v9842_v45 = vpack.c.bf16 %v8427_v37, %v8425_v36  ;;  %v8465_v36 = vld [vmem:[%s15570_s1 + $0x8a0] sm:$0xff]  ;;  %v8467_v37 = vld [vmem:[%s15570_s1 + $0x8b0] sm:$0xff]  ;;  %3768 = vrot.lane.b32.xlu1 %v12461_v0, %s15617_s27 }
 0x14e   : > { %8367 = vmatmul.mubr.msk.f32.gmra.mrb[4].mxu0 %vm553_vm1, %v1641_v50  ;;  %v12423_v50 = vld [vmem:[%s11408_s23 + $0x4] sm:$0xff] }
 0x14f   : > { %9811 = vmatpush1.bf16.msra.mxu0 %v9810_v49  ;;  %1740 = vmatprep.mubr.f32.mxu0 %v11231_v12  ;;  %v8436_v49 = vld [vmem:[%s15570_s1 + $0x7e8] sm:$0xff] }
 0x150   : > { %9813 = vmatprep.subr.bf16.mxu0 %v9812_v51  ;;  %v11151_v51 = vld [vmem:[%s11408_s23 + $0x2] sm:$0xff]  ;;  %v9848_v20 = vpack.c.bf16 %v8436_v49, %v8434_v48  ;;  %3482 = vrot.lane.b32.xlu0 %v12423_v50, %s15615_s20  ;;  %v8482_v49 = vld [vmem:[%s15570_s1 + $0x8f8] sm:$0xff] }
 0x151   : > { %3772 = vrot.lane.b32.xlu1 %v12501_v43, %s15617_s27  ;;  %v8474_v48 = vld [vmem:[%s15570_s1 + $0x8e8] sm:$0xf] }
 0x152   : > { %8368 = vmatmul.mubr.msk.f32.gmra.mrb[6].mxu0 %vm553_vm1, %v1643_v56  ;;  %v8440_v56 = vld [vmem:[%s15570_s1 + $0x808] sm:$0xff] }
 0x153   : > { %9815 = vmatpush1.bf16.msra.mxu0 %v9814_v23  ;;  %1864 = vmatprep.mubr.f32.mxu0 %v11231_v12  ;;  %v8438_v23 = vld [vmem:[%s15570_s1 + $0x7f8] sm:$0xff] }
 0x154   : > { %9817 = vmatprep.subr.bf16.mxu0 %v9816_v57  ;;  %v11152_v57 = vld [vmem:[%s11408_s23 + $0xa] sm:$0xff]  ;;  %v9852_v58 = vpack.c.bf16 %v8440_v56, %v8438_v23  ;;  %v2205_v56 = vpop.permute.xlu0 %2204 }
 0x155   : > { %3910 = vrot.lane.b32.xlu1 %v12461_v0, %s15618_s18  ;;  %v8489_v0 = vld [vmem:[%s15570_s1 + $0x930] sm:$0xff] }
 0x157   : > { %9819 = vmatpush1.bf16.msra.mxu0 %v9818_v55  ;;  %v8437_v55 = vld [vmem:[%s15570_s1 + $0x7f0] sm:$0xff] }
 0x158   : > { %8391 = vmatprep.subr.msk.mxu0 %vm562_vm0, %v8390_v60  ;;  %v8439_v60 = vld [vmem:[%s15570_s1 + $0x800] sm:$0xff] }
 0x159   : > { %v9854_v63 = vpack.c.bf16 %v8439_v60, %v8437_v55  ;;  %v8487_v55 = vld [vmem:[%s15570_s1 + $0x920] sm:$0xff]  ;;  %v8490_v60 = vld [vmem:[%s15570_s1 + $0x938] sm:$0xff]  ;;  %3914 = vrot.lane.b32.xlu1 %v12501_v43, %s15618_s18  ;;  %v8497_v43 = vld [vmem:[%s15570_s1 + $0x970] sm:$0xff] }
 0x15b   : > { %8392 = vmatpush1.msk.msra.mxu0 %vm562_vm0, %v8389_v2  ;;  %v8441_v2 = vld [vmem:[%s15570_s1 + $0x810] sm:$0xff] }
 0x15c   : > { %9821 = vmatprep.subr.bf16.mxu0 %v9820_v3  ;;  %8393 = vmatmul.mubr.msk.f32.vlgmr.msra.gmra.mrb[0].mxu0 %vm553_vm1, %v1779_v41  ;;  %v8443_v3 = vld [vmem:[%s15570_s1 + $0x820] sm:$0xff]  ;;  %v11154_v41 = vld [vmem:[%s11408_s23 + $0x1a] sm:$0xf] }
 0x15d   : > { %9823 = vmatpush1.bf16.msra.mxu0 %v9822_v4  ;;  %1870 = vmatprep.mubr.f32.mxu0 %v11231_v12  ;;  %v9858_v4 = vpack.c.bf16 %v8443_v3, %v8441_v2  ;;  %v8494_v2 = vld [vmem:[%s15570_s1 + $0x958] sm:$0xff]  ;;  %v8496_v3 = vld [vmem:[%s15570_s1 + $0x968] sm:$0xff] }
 0x15e   : > { %9825 = vmatprep.subr.bf16.mxu0 %v9824_v5  ;;  %v12475_v5 = vld [vmem:[%s11408_s23 + $0x14] sm:$0xff] }
 0x15f   : > { %3486 = vrot.lane.b32.xlu0 %v12475_v5, %s15615_s20  ;;  %s11238_s20 = smov 110  }
 0x160   : > { %8394 = vmatmul.mubr.msk.f32.gmra.mrb[2].mxu0 %vm553_vm1, %v1781_v10  ;;  %v8458_v10 = vld [vmem:[%s15570_s1 + $0x868] sm:$0xff] }
 0x161   : > { %9827 = vmatpush1.bf16.msra.mxu0 %v9826_v9  ;;  %1876 = vmatprep.mubr.f32.mxu0 %v11231_v12  ;;  %v8455_v9 = vld [vmem:[%s15570_s1 + $0x850] sm:$0xff] }
 0x162   : > { %9829 = vmatprep.subr.bf16.mxu0 %v9828_v11  ;;  %v8460_v11 = vld [vmem:[%s15570_s1 + $0x878] sm:$0xff] }
 0x163   : > { %3624 = vrot.lane.b32.xlu0 %v12423_v50, %s15616_s0 }
 0x164   : > { %8395 = vmatmul.mubr.msk.f32.gmra.mrb[4].mxu0 %vm553_vm1, %v1783_v17  ;;  %v9864_v17 = vpack.c.bf16 %v8460_v11, %v8458_v10 }
 0x165   : > { %9831 = vmatpush1.bf16.msra.mxu0 %v9830_v16  ;;  %1882 = vmatprep.mubr.f32.mxu0 %v11231_v12  ;;  %v9862_v16 = vpack.c.bf16 %v8455_v9, %v8453_v42  ;;  %v8500_v42 = vld [vmem:[%s15570_s1 + $0x988] sm:$0xff] }
 0x166   : > { %9833 = vmatprep.subr.bf16.mxu0 %v9832_v18  ;;  %v8457_v18 = vld [vmem:[%s15570_s1 + $0x860] sm:$0xff]  ;;  %v9896_v11 = vpack.c.bf16 %v8500_v42, %v8498_v8  ;;  %v8545_v8 = vld [vmem:[%s15570_s1 + $0xa90] sm:$0xff] }
 0x167   : > { %v9866_v26 = vpack.c.bf16 %v8459_v21, %v8457_v18  ;;  %3628 = vrot.lane.b32.xlu0 %v12475_v5, %s15616_s0  ;;  %v8509_v18 = vld [vmem:[%s15570_s1 + $0x9a0] sm:$0xff]  ;;  %v8511_v21 = vld [vmem:[%s15570_s1 + $0x9b0] sm:$0xff] }
 0x168   : > { %8396 = vmatmul.mubr.msk.f32.gmra.mrb[6].mxu0 %vm553_vm1, %v1785_v28  ;;  %v9868_v28 = vpack.c.bf16 %v8464_v25, %v8462_v24  ;;  %v8514_v24 = vld [vmem:[%s15570_s1 + $0x9c8] sm:$0xff]  ;;  %v8516_v25 = vld [vmem:[%s15570_s1 + $0x9d8] sm:$0xff]  ;;  %v8547_v42 = vld [vmem:[%s15570_s1 + $0xaa0] sm:$0xff] }
 0x169   : > { %9835 = vmatpush1.bf16.msra.mxu0 %v9834_v27  ;;  %2006 = vmatprep.mubr.f32.mxu0 %v11231_v12  ;;  %v2065_v27 = vpop.permute.xlu1 %2064 }
 0x16a   : > { %9837 = vmatprep.subr.bf16.mxu0 %v9836_v29  ;;  %v8461_v29 = vld [vmem:[%s15570_s1 + $0x880] sm:$0xff] }
 0x16b   : > { %3766 = vrot.lane.b32.xlu0 %v12423_v50, %s15617_s27 }
 0x16d   : > { %9839 = vmatpush1.bf16.msra.mxu0 %v9838_v32  ;;  %v8468_v32 = vld [vmem:[%s15570_s1 + $0x8b8] sm:$0xff] }
 0x16e   : > { %8419 = vmatprep.subr.msk.mxu0 %vm562_vm0, %v8418_v33  ;;  %v9870_v33 = vpack.c.bf16 %v8463_v30, %v8461_v29  ;;  %v9872_v35 = vpack.c.bf16 %v8468_v32, %v8466_v31  ;;  %v9902_v29 = vpack.c.bf16 %v8511_v21, %v8509_v18  ;;  %v9904_v30 = vpack.c.bf16 %v8516_v25, %v8514_v24  ;;  %v8513_v31 = vld [vmem:[%s15570_s1 + $0x9c0] sm:$0xff]  ;;  %v8515_v32 = vld [vmem:[%s15570_s1 + $0x9d0] sm:$0xff] }
 0x16f   : > { %3770 = vrot.lane.b32.xlu0 %v12475_v5, %s15617_s27  ;;  %v8553_v25 = vld [vmem:[%s15570_s1 + $0xad0] sm:$0xff] }
 0x171   : > { %8420 = vmatpush1.msk.msra.mxu0 %vm562_vm0, %v8417_v39  ;;  %v9874_v39 = vpack.c.bf16 %v8467_v37, %v8465_v36 }
 0x172   : > { %9841 = vmatprep.subr.bf16.mxu0 %v9840_v44  ;;  %8421 = vmatmul.mubr.msk.f32.vlgmr.msra.gmra.mrb[0].mxu0 %vm553_vm1, %v11151_v51  ;;  %v2069_v44 = vpop.permute.xlu1 %2068  ;;  %v8484_v51 = vld [vmem:[%s15570_s1 + $0x908] sm:$0xff] }
 0x173   : > { %9843 = vmatpush1.bf16.msra.mxu0 %v9842_v45  ;;  %2012 = vmatprep.mubr.f32.mxu0 %v11231_v12  ;;  %v9876_v45 = vpack.c.bf16 %v8472_v19, %v8470_v38  ;;  %v9880_v23 = vpack.c.bf16 %v8484_v51, %v8482_v49  ;;  %v8517_v38 = vld [vmem:[%s15570_s1 + $0x9e0] sm:$0xff]  ;;  %v8519_v19 = vld [vmem:[%s15570_s1 + $0x9f0] sm:$0xff]  ;;  %v8526_v49 = vld [vmem:[%s15570_s1 + $0xa28] sm:$0xff] }
 0x174   : > { %9845 = vmatprep.subr.bf16.mxu0 %v9844_v46  ;;  %v8469_v46 = vld [vmem:[%s15570_s1 + $0x8c0] sm:$0xff]  ;;  %3908 = vrot.lane.b32.xlu0 %v12423_v50, %s15618_s18  ;;  %v8528_v51 = vld [vmem:[%s15570_s1 + $0xa38] sm:$0xff] }
 0x175   : > { %v9878_v22 = vpack.c.bf16 %v8471_v47, %v8469_v46  ;;  %v8473_v50 = vld [vmem:[%s15570_s1 + $0x8e0] sm:$0xf] }
 0x176   : > { %8422 = vmatmul.mubr.msk.f32.gmra.mrb[2].mxu0 %vm553_vm1, %v11152_v57 }
 0x177   : > { %9847 = vmatpush1.bf16.msra.mxu0 %v9846_v52  ;;  %2018 = vmatprep.mubr.f32.mxu0 %v11231_v12  ;;  %v8481_v52 = vld [vmem:[%s15570_s1 + $0x8f0] sm:$0xff] }
 0x178   : > { %9849 = vmatprep.subr.bf16.mxu0 %v9848_v20  ;;  %v8483_v20 = vld [vmem:[%s15570_s1 + $0x900] sm:$0xff]  ;;  %3912 = vrot.lane.b32.xlu0 %v12475_v5, %s15618_s18  ;;  %v9892_v5 = vpack.c.bf16 %v8496_v3, %v8494_v2  ;;  %v8541_v2 = vld [vmem:[%s15570_s1 + $0xa70] sm:$0xff] }
 0x179   : > { %v9882_v57 = vpack.c.bf16 %v8483_v20, %v8481_v52  ;;  %v8543_v3 = vld [vmem:[%s15570_s1 + $0xa80] sm:$0xff] }
 0x17a   : > { %8423 = vmatmul.mubr.msk.f32.gmra.mrb[4].mxu0 %vm553_vm1, %v11153_v62  ;;  %v2207_v62 = vpop.permute.xlu1 %2206 }
 0x17b   : > { %9851 = vmatpush1.bf16.msra.mxu0 %v9850_v59  ;;  %2024 = vmatprep.mubr.f32.mxu0 %v11231_v12  ;;  %v9884_v59 = vpack.c.bf16 %v8488_v54, %v8486_v53  ;;  %v9916_v53 = vpack.c.bf16 %v8528_v51, %v8526_v49  ;;  %v8525_v54 = vld [vmem:[%s15570_s1 + $0xa20] sm:$0xff]  ;;  %v8575_v49 = vld [vmem:[%s15570_s1 + $0xb50] sm:$0xff]  ;;  %v8578_v51 = vld [vmem:[%s15570_s1 + $0xb68] sm:$0xff] }
 0x17c   : > { %9853 = vmatprep.subr.bf16.mxu0 %v9852_v58  ;;  %v8485_v58 = vld [vmem:[%s15570_s1 + $0x910] sm:$0xff] }
 0x17d   : > { %v9886_v40 = vpack.c.bf16 %v8487_v55, %v8485_v58  ;;  %v8537_v58 = vld [vmem:[%s15570_s1 + $0xa50] sm:$0xff]  ;;  %v8539_v55 = vld [vmem:[%s15570_s1 + $0xa60] sm:$0xff] }
 0x17e   : > { %8424 = vmatmul.mubr.msk.f32.gmra.mrb[6].mxu0 %vm553_vm1, %v11154_v41  ;;  %v2211_v10 = vpop.permute.xlu1 %2210 }
 0x17f   : > { %9855 = vmatpush1.bf16.msra.mxu0 %v9854_v63  ;;  %2148 = vmatprep.mubr.f32.mxu0 %v11231_v12  ;;  %v9888_v63 = vpack.c.bf16 %v8492_v61, %v8490_v60  ;;  %v8542_v60 = vld [vmem:[%s15570_s1 + $0xa78] sm:$0xff]  ;;  %v8544_v61 = vld [vmem:[%s15570_s1 + $0xa88] sm:$0xff] }
 0x180   : > { %9857 = vmatprep.subr.bf16.mxu0 %v9856_v1  ;;  %v8491_v1 = vld [vmem:[%s15570_s1 + $0x940] sm:$0xff] }
 0x181   : > { %v9890_v41 = vpack.c.bf16 %v8491_v1, %v8489_v0  ;;  %v9922_v0 = vpack.c.bf16 %v8539_v55, %v8537_v58  ;;  %v9924_v1 = vpack.c.bf16 %v8544_v61, %v8542_v60  ;;  %v8581_v60 = vld [vmem:[%s15570_s1 + $0xb80] sm:$0xff]  ;;  %v8583_v61 = vld [vmem:[%s15570_s1 + $0xb90] sm:$0xff] }
 0x182   : > { %v2349_v36 = vpop.permute.xlu1 %2348 }
 0x183   : > { %9859 = vmatpush1.bf16.msra.mxu0 %v9858_v4  ;;  %v2209_v4 = vpop.permute.xlu0 %2208 }
 0x184   : > { %8447 = vmatprep.subr.msk.mxu0 %vm562_vm0, %v8446_v6  ;;  %v8493_v6 = vld [vmem:[%s15570_s1 + $0x950] sm:$0xff] }
 0x185   : > { %v9894_v9 = vpack.c.bf16 %v8495_v7, %v8493_v6 }
 0x186   : > { %v2353_v20 = vpop.permute.xlu1 %2352 }
 0x187   : > { %8448 = vmatpush1.msk.msra.mxu0 %vm562_vm0, %v8445_v13  ;;  %v8499_v13 = vld [vmem:[%s15570_s1 + $0x980] sm:$0xff] }
 0x188   : > { %9861 = vmatprep.subr.bf16.mxu0 %v9860_v14  ;;  %8449 = vmatmul.mubr.msk.f32.vlgmr.msra.gmra.mrb[0].mxu0 %vm553_vm1, %v2063_v15  ;;  %v9898_v14 = vpack.c.bf16 %v8499_v13, %v8497_v43  ;;  %v8502_v15 = vld [vmem:[%s15570_s1 + $0x998] sm:$0xf] }
 0x189   : > { %9863 = vmatpush1.bf16.msra.mxu0 %v9862_v16  ;;  %2154 = vmatprep.mubr.f32.mxu0 %v11231_v12  ;;  %v8510_v16 = vld [vmem:[%s15570_s1 + $0x9a8] sm:$0xff] }
 0x18a   : > { %9865 = vmatprep.subr.bf16.mxu0 %v9864_v17  ;;  %v8512_v17 = vld [vmem:[%s15570_s1 + $0x9b8] sm:$0xff]  ;;  %v2491_v6 = vpop.permute.xlu1 %2490 }
 0x18c   : > { %8450 = vmatmul.mubr.msk.f32.gmra.mrb[2].mxu0 %vm553_vm1, %v2065_v27  ;;  %v9900_v27 = vpack.c.bf16 %v8512_v17, %v8510_v16  ;;  %v8554_v16 = vld [vmem:[%s15570_s1 + $0xad8] sm:$0xff]  ;;  %v8556_v17 = vld [vmem:[%s15570_s1 + $0xae8] sm:$0xff] }
 0x18d   : > { %9867 = vmatpush1.bf16.msra.mxu0 %v9866_v26  ;;  %2160 = vmatprep.mubr.f32.mxu0 %v11231_v12  ;;  %v8501_v26 = vld [vmem:[%s15570_s1 + $0x990] sm:$0xf]  ;;  %v9936_v24 = vpack.c.bf16 %v8556_v17, %v8554_v16  ;;  %v8603_v17 = vld [vmem:[%s15570_s1 + $0xc00] sm:$0xff] }
 0x18e   : > { %9869 = vmatprep.subr.bf16.mxu0 %v9868_v28  ;;  %v2347_v28 = vpop.permute.xlu0 %2346  ;;  %v2495_v21 = vpop.permute.xlu1 %2494  ;;  %v8601_v16 = vld [vmem:[%s15570_s1 + $0xbf0] sm:$0xff] }
 0x190   : > { %8451 = vmatmul.mubr.msk.f32.gmra.mrb[4].mxu0 %vm553_vm1, %v2067_v34  ;;  %v8520_v34 = vld [vmem:[%s15570_s1 + $0x9f8] sm:$0xff] }
 0x191   : > { %9871 = vmatpush1.bf16.msra.mxu0 %v9870_v33  ;;  %2166 = vmatprep.mubr.f32.mxu0 %v11231_v12  ;;  %v8518_v33 = vld [vmem:[%s15570_s1 + $0x9e8] sm:$0xff] }
 0x192   : > { %9873 = vmatprep.subr.bf16.mxu0 %v9872_v35  ;;  %v9906_v35 = vpack.c.bf16 %v8515_v32, %v8513_v31  ;;  %v9908_v37 = vpack.c.bf16 %v8520_v34, %v8518_v33  ;;  %v2351_v46 = vpop.permute.xlu0 %2350  ;;  %v8565_v31 = vld [vmem:[%s15570_s1 + $0xb00] sm:$0xff]  ;;  %v8567_v32 = vld [vmem:[%s15570_s1 + $0xb10] sm:$0xff]  ;;  %v8570_v33 = vld [vmem:[%s15570_s1 + $0xb28] sm:$0xff] }
 0x193   : > { %v8572_v34 = vld [vmem:[%s15570_s1 + $0xb38] sm:$0xff] }
 0x194   : > { %8452 = vmatmul.mubr.msk.f32.gmra.mrb[6].mxu0 %vm553_vm1, %v2069_v44  ;;  %v8524_v44 = vld [vmem:[%s15570_s1 + $0xa18] sm:$0xff] }
 0x195   : > { %9875 = vmatpush1.bf16.msra.mxu0 %v9874_v39  ;;  %2290 = vmatprep.mubr.f32.mxu0 %v11231_v12  ;;  %v8522_v39 = vld [vmem:[%s15570_s1 + $0xa08] sm:$0xff] }
 0x196   : > { %9877 = vmatprep.subr.bf16.mxu0 %v9876_v45  ;;  %v9910_v45 = vpack.c.bf16 %v8519_v19, %v8517_v38  ;;  %v9912_v47 = vpack.c.bf16 %v8524_v44, %v8522_v39  ;;  %v9944_v38 = vpack.c.bf16 %v8572_v34, %v8570_v33  ;;  %v8569_v19 = vld [vmem:[%s15570_s1 + $0xb20] sm:$0xff]  ;;  %v8571_v39 = vld [vmem:[%s15570_s1 + $0xb30] sm:$0xff]  ;;  %v8574_v44 = vld [vmem:[%s15570_s1 + $0xb48] sm:$0xff] }
 0x197   : > { %v8609_v34 = vld [vmem:[%s15570_s1 + $0xc30] sm:$0xff] }
 0x199   : > { %9879 = vmatpush1.bf16.msra.mxu0 %v9878_v22  ;;  %v8521_v22 = vld [vmem:[%s15570_s1 + $0xa00] sm:$0xff] }
 0x19a   : > { %8475 = vmatprep.subr.msk.mxu0 %vm562_vm0, %v8474_v48  ;;  %v8523_v48 = vld [vmem:[%s15570_s1 + $0xa10] sm:$0xff] }
 0x19b   : > { %v9914_v52 = vpack.c.bf16 %v8523_v48, %v8521_v22  ;;  %v8573_v48 = vld [vmem:[%s15570_s1 + $0xb40] sm:$0xff] }
 0x19d   : > { %8476 = vmatpush1.msk.msra.mxu0 %vm562_vm0, %v8473_v50  ;;  %v8527_v50 = vld [vmem:[%s15570_s1 + $0xa30] sm:$0xff] }
 0x19e   : > { %9881 = vmatprep.subr.bf16.mxu0 %v9880_v23  ;;  %8477 = vmatmul.mubr.msk.f32.vlgmr.msra.gmra.mrb[0].mxu0 %vm553_vm1, %v2205_v56  ;;  %v9918_v23 = vpack.c.bf16 %v8527_v50, %v8525_v54  ;;  %v8530_v56 = vld [vmem:[%s15570_s1 + $0xa48] sm:$0xf]  ;;  %v8577_v50 = vld [vmem:[%s15570_s1 + $0xb60] sm:$0xff] }
 0x19f   : > { %9883 = vmatpush1.bf16.msra.mxu0 %v9882_v57  ;;  %2296 = vmatprep.mubr.f32.mxu0 %v11231_v12  ;;  %v8538_v57 = vld [vmem:[%s15570_s1 + $0xa58] sm:$0xff] }
 0x1a0   : > { %9885 = vmatprep.subr.bf16.mxu0 %v9884_v59  ;;  %v8540_v59 = vld [vmem:[%s15570_s1 + $0xa68] sm:$0xff] }
 0x1a2   : > { %8478 = vmatmul.mubr.msk.f32.gmra.mrb[2].mxu0 %vm553_vm1, %v2207_v62  ;;  %v9920_v62 = vpack.c.bf16 %v8540_v59, %v8538_v57  ;;  %v8584_v57 = vld [vmem:[%s15570_s1 + $0xb98] sm:$0xff] }
 0x1a3   : > { %9887 = vmatpush1.bf16.msra.mxu0 %v9886_v40  ;;  %2302 = vmatprep.mubr.f32.mxu0 %v11231_v12  ;;  %v8529_v40 = vld [vmem:[%s15570_s1 + $0xa40] sm:$0xf]  ;;  %v11157_v59 = vld [vmem:[%s11408_s23 + $0x13] sm:$0xff] }
 0x1a4   : > { %9889 = vmatprep.subr.bf16.mxu0 %v9888_v63  ;;  %v2489_v63 = vpop.permute.xlu0 %2488 }
 0x1a6   : > { %8479 = vmatmul.mubr.msk.f32.gmra.mrb[4].mxu0 %vm553_vm1, %v2209_v4  ;;  %v8548_v4 = vld [vmem:[%s15570_s1 + $0xaa8] sm:$0xff] }
 0x1a7   : > { %9891 = vmatpush1.bf16.msra.mxu0 %v9890_v41  ;;  %2308 = vmatprep.mubr.f32.mxu0 %v11231_v12  ;;  %v8546_v41 = vld [vmem:[%s15570_s1 + $0xa98] sm:$0xff] }
 0x1a8   : > { %9893 = vmatprep.subr.bf16.mxu0 %v9892_v5  ;;  %v9926_v5 = vpack.c.bf16 %v8543_v3, %v8541_v2  ;;  %v9928_v7 = vpack.c.bf16 %v8548_v4, %v8546_v41  ;;  %v2493_v43 = vpop.permute.xlu0 %2492  ;;  %v8593_v2 = vld [vmem:[%s15570_s1 + $0xbb0] sm:$0xff]  ;;  %v8595_v3 = vld [vmem:[%s15570_s1 + $0xbc0] sm:$0xff]  ;;  %v8598_v41 = vld [vmem:[%s15570_s1 + $0xbd8] sm:$0xff] }
 0x1a9   : > { %v8600_v4 = vld [vmem:[%s15570_s1 + $0xbe8] sm:$0xff] }
 0x1aa   : > { %8480 = vmatmul.mubr.msk.f32.gmra.mrb[6].mxu0 %vm553_vm1, %v2211_v10  ;;  %v8552_v10 = vld [vmem:[%s15570_s1 + $0xac8] sm:$0xff] }
 0x1ab   : > { %9895 = vmatpush1.bf16.msra.mxu0 %v9894_v9  ;;  %2432 = vmatprep.mubr.f32.mxu0 %v11231_v12  ;;  %v8550_v9 = vld [vmem:[%s15570_s1 + $0xab8] sm:$0xff] }
 0x1ac   : > { %9897 = vmatprep.subr.bf16.mxu0 %v9896_v11  ;;  %v9930_v11 = vpack.c.bf16 %v8547_v42, %v8545_v8  ;;  %v9932_v13 = vpack.c.bf16 %v8552_v10, %v8550_v9  ;;  %v9962_v8 = vpack.c.bf16 %v8595_v3, %v8593_v2  ;;  %v9964_v42 = vpack.c.bf16 %v8600_v4, %v8598_v41  ;;  %v8597_v9 = vld [vmem:[%s15570_s1 + $0xbd0] sm:$0xff]  ;;  %v8599_v10 = vld [vmem:[%s15570_s1 + $0xbe0] sm:$0xff] }
 0x1ad   : > { %v8637_v4 = vld [vmem:[%s15570_s1 + $0xce0] sm:$0xff] }
 0x1af   : > { %9899 = vmatpush1.bf16.msra.mxu0 %v9898_v14  ;;  %v8549_v14 = vld [vmem:[%s15570_s1 + $0xab0] sm:$0xff] }
 0x1b0   : > { %8503 = vmatprep.subr.msk.mxu0 %vm562_vm0, %v8502_v15  ;;  %v8551_v15 = vld [vmem:[%s15570_s1 + $0xac0] sm:$0xff] }
 0x1b1   : > { %v9934_v18 = vpack.c.bf16 %v8551_v15, %v8549_v14  ;;  %v2775_v14 = vpop.permute.xlu1 %2774 }
 0x1b3   : > { %8504 = vmatpush1.msk.msra.mxu0 %vm562_vm0, %v8501_v26  ;;  %v8555_v26 = vld [vmem:[%s15570_s1 + $0xae0] sm:$0xff] }
 0x1b4   : > { %9901 = vmatprep.subr.bf16.mxu0 %v9900_v27  ;;  %8505 = vmatmul.mubr.msk.f32.vlgmr.msra.gmra.mrb[0].mxu0 %vm553_vm1, %v2347_v28  ;;  %v9938_v27 = vpack.c.bf16 %v8555_v26, %v8553_v25  ;;  %v8558_v28 = vld [vmem:[%s15570_s1 + $0xaf8] sm:$0xf] }
 0x1b5   : > { %9903 = vmatpush1.bf16.msra.mxu0 %v9902_v29  ;;  %2438 = vmatprep.mubr.f32.mxu0 %v11231_v12  ;;  %v8566_v29 = vld [vmem:[%s15570_s1 + $0xb08] sm:$0xff] }
 0x1b6   : > { %9905 = vmatprep.subr.bf16.mxu0 %v9904_v30  ;;  %v8568_v30 = vld [vmem:[%s15570_s1 + $0xb18] sm:$0xff] }
 0x1b8   : > { %8506 = vmatmul.mubr.msk.f32.gmra.mrb[2].mxu0 %vm553_vm1, %v2349_v36  ;;  %v9940_v36 = vpack.c.bf16 %v8568_v30, %v8566_v29  ;;  %v8610_v29 = vld [vmem:[%s15570_s1 + $0xc38] sm:$0xff]  ;;  %v8612_v30 = vld [vmem:[%s15570_s1 + $0xc48] sm:$0xff] }
 0x1b9   : > { %9907 = vmatpush1.bf16.msra.mxu0 %v9906_v35  ;;  %2444 = vmatprep.mubr.f32.mxu0 %v11231_v12  ;;  %v8557_v35 = vld [vmem:[%s15570_s1 + $0xaf0] sm:$0xf]  ;;  %v9976_v33 = vpack.c.bf16 %v8612_v30, %v8610_v29  ;;  %v8659_v30 = vld [vmem:[%s15570_s1 + $0xd60] sm:$0xff] }
 0x1ba   : > { %9909 = vmatprep.subr.bf16.mxu0 %v9908_v37  ;;  %v9942_v37 = vpack.c.bf16 %v8567_v32, %v8565_v31  ;;  %v2779_v32 = vpop.permute.xlu1 %2778  ;;  %v8657_v29 = vld [vmem:[%s15570_s1 + $0xd50] sm:$0xff] }
 0x1bc   : > { %8507 = vmatmul.mubr.msk.f32.gmra.mrb[4].mxu0 %vm553_vm1, %v2351_v46  ;;  %v11155_v46 = vld [vmem:[%s11408_s23 + $0x3] sm:$0xff] }
 0x1bd   : > { %9911 = vmatpush1.bf16.msra.mxu0 %v9910_v45  ;;  %2450 = vmatprep.mubr.f32.mxu0 %v11231_v12  ;;  %v8576_v45 = vld [vmem:[%s15570_s1 + $0xb58] sm:$0xff] }
 0x1be   : > { %9913 = vmatprep.subr.bf16.mxu0 %v9912_v47  ;;  %v9946_v47 = vpack.c.bf16 %v8571_v39, %v8569_v19  ;;  %v9948_v22 = vpack.c.bf16 %v8576_v45, %v8574_v44  ;;  %v8624_v19 = vld [vmem:[%s15570_s1 + $0xc78] sm:$0xff]  ;;  %v8621_v39 = vld [vmem:[%s15570_s1 + $0xc60] sm:$0xff]  ;;  %v8623_v44 = vld [vmem:[%s15570_s1 + $0xc70] sm:$0xff] }
 0x1bf   : > { %v8626_v45 = vld [vmem:[%s15570_s1 + $0xc88] sm:$0xff] }
 0x1c0   : > { %8508 = vmatmul.mubr.msk.f32.gmra.mrb[6].mxu0 %vm553_vm1, %v2353_v20  ;;  %v11156_v20 = vld [vmem:[%s11408_s23 + $0xb] sm:$0xff] }
 0x1c1   : > { %9915 = vmatpush1.bf16.msra.mxu0 %v9914_v52  ;;  %2574 = vmatprep.mubr.f32.mxu0 %v11231_v12  ;;  %v8580_v52 = vld [vmem:[%s15570_s1 + $0xb78] sm:$0xff] }
 0x1c2   : > { %9917 = vmatprep.subr.bf16.mxu0 %v9916_v53  ;;  %v9950_v53 = vpack.c.bf16 %v8575_v49, %v8573_v48  ;;  %v9952_v54 = vpack.c.bf16 %v8580_v52, %v8578_v51  ;;  %v9982_v49 = vpack.c.bf16 %v8623_v44, %v8621_v39  ;;  %v8625_v52 = vld [vmem:[%s15570_s1 + $0xc80] sm:$0xff] }
 0x1c5   : > { %9919 = vmatpush1.bf16.msra.mxu0 %v9918_v23  ;;  %v8579_v23 = vld [vmem:[%s15570_s1 + $0xb70] sm:$0xff] }
 0x1c6   : > { %8531 = vmatprep.subr.msk.mxu0 %vm562_vm0, %v8530_v56  ;;  %v8582_v56 = vld [vmem:[%s15570_s1 + $0xb88] sm:$0xff]  ;;  %v9954_v58 = vpack.c.bf16 %v8579_v23, %v8577_v50  ;;  %v2917_v23 = vpop.permute.xlu1 %2916 }
 0x1c7   : > { %v9956_v55 = vpack.c.bf16 %v8584_v57, %v8582_v56  ;;  %v8629_v57 = vld [vmem:[%s15570_s1 + $0xca0] sm:$0xff] }
 0x1c9   : > { %8532 = vmatpush1.msk.msra.mxu0 %vm562_vm0, %v8529_v40  ;;  %v11158_v40 = vld [vmem:[%s11408_s23 + $0x1b] sm:$0xf] }
 0x1ca   : > { %9921 = vmatprep.subr.bf16.mxu0 %v9920_v62  ;;  %8533 = vmatmul.mubr.msk.f32.vlgmr.msra.gmra.mrb[0].mxu0 %vm553_vm1, %v2489_v63  ;;  %v9958_v62 = vpack.c.bf16 %v8583_v61, %v8581_v60  ;;  %v8586_v63 = vld [vmem:[%s15570_s1 + $0xba8] sm:$0xf]  ;;  %v2921_v3 = vpop.permute.xlu1 %2920 }
 0x1cb   : > { %9923 = vmatpush1.bf16.msra.mxu0 %v9922_v0  ;;  %2580 = vmatprep.mubr.f32.mxu0 %v11231_v12  ;;  %v8594_v0 = vld [vmem:[%s15570_s1 + $0xbb8] sm:$0xff] }
 0x1cc   : > { %9925 = vmatprep.subr.bf16.mxu0 %v9924_v1  ;;  %v8596_v1 = vld [vmem:[%s15570_s1 + $0xbc8] sm:$0xff] }
 0x1ce   : > { %8534 = vmatmul.mubr.msk.f32.gmra.mrb[2].mxu0 %vm553_vm1, %v2491_v6  ;;  %v9960_v6 = vpack.c.bf16 %v8596_v1, %v8594_v0  ;;  %v8638_v0 = vld [vmem:[%s15570_s1 + $0xce8] sm:$0xff]  ;;  %v8640_v1 = vld [vmem:[%s15570_s1 + $0xcf8] sm:$0xff] }
 0x1cf   : > { %9927 = vmatpush1.bf16.msra.mxu0 %v9926_v5  ;;  %2586 = vmatprep.mubr.f32.mxu0 %v11231_v12  ;;  %v8585_v5 = vld [vmem:[%s15570_s1 + $0xba0] sm:$0xf]  ;;  %v9996_v41 = vpack.c.bf16 %v8640_v1, %v8638_v0  ;;  %v8687_v1 = vld [vmem:[%s15570_s1 + $0xe10] sm:$0xff] }
 0x1d0   : > { %9929 = vmatprep.subr.bf16.mxu0 %v9928_v7  ;;  %v2773_v7 = vpop.permute.xlu0 %2772  ;;  %v8685_v0 = vld [vmem:[%s15570_s1 + $0xe00] sm:$0xff] }
 0x1d2   : > { %8535 = vmatmul.mubr.msk.f32.gmra.mrb[4].mxu0 %vm553_vm1, %v2493_v43  ;;  %v8604_v43 = vld [vmem:[%s15570_s1 + $0xc08] sm:$0xff] }
 0x1d3   : > { %9931 = vmatpush1.bf16.msra.mxu0 %v9930_v11  ;;  %2592 = vmatprep.mubr.f32.mxu0 %v11231_v12  ;;  %v8602_v11 = vld [vmem:[%s15570_s1 + $0xbf8] sm:$0xff] }
 0x1d4   : > { %9933 = vmatprep.subr.bf16.mxu0 %v9932_v13  ;;  %v9966_v13 = vpack.c.bf16 %v8599_v10, %v8597_v9  ;;  %v9968_v15 = vpack.c.bf16 %v8604_v43, %v8602_v11  ;;  %v2777_v25 = vpop.permute.xlu0 %2776  ;;  %v8649_v9 = vld [vmem:[%s15570_s1 + $0xd10] sm:$0xff]  ;;  %v8651_v10 = vld [vmem:[%s15570_s1 + $0xd20] sm:$0xff]  ;;  %v8654_v11 = vld [vmem:[%s15570_s1 + $0xd38] sm:$0xff] }
 0x1d5   : > { %v8656_v43 = vld [vmem:[%s15570_s1 + $0xd48] sm:$0xff] }
 0x1d6   : > { %8536 = vmatmul.mubr.msk.f32.gmra.mrb[6].mxu0 %vm553_vm1, %v2495_v21  ;;  %v8608_v21 = vld [vmem:[%s15570_s1 + $0xc28] sm:$0xff] }
 0x1d7   : > { %9935 = vmatpush1.bf16.msra.mxu0 %v9934_v18  ;;  %2716 = vmatprep.mubr.f32.mxu0 %v11231_v12  ;;  %v8606_v18 = vld [vmem:[%s15570_s1 + $0xc18] sm:$0xff] }
 0x1d8   : > { %9937 = vmatprep.subr.bf16.mxu0 %v9936_v24  ;;  %v9970_v24 = vpack.c.bf16 %v8603_v17, %v8601_v16  ;;  %v9972_v26 = vpack.c.bf16 %v8608_v21, %v8606_v18  ;;  %v2915_v48 = vpop.permute.xlu0 %2914  ;;  %v10002_v16 = vpack.c.bf16 %v8651_v10, %v8649_v9  ;;  %v10004_v17 = vpack.c.bf16 %v8656_v43, %v8654_v11  ;;  %v8653_v18 = vld [vmem:[%s15570_s1 + $0xd30] sm:$0xff]  ;;  %v8655_v21 = vld [vmem:[%s15570_s1 + $0xd40] sm:$0xff] }
 0x1d9   : > { %v8693_v43 = vld [vmem:[%s15570_s1 + $0xe40] sm:$0xff] }
 0x1db   : > { %9939 = vmatpush1.bf16.msra.mxu0 %v9938_v27  ;;  %v8605_v27 = vld [vmem:[%s15570_s1 + $0xc10] sm:$0xff] }
 0x1dc   : > { %8559 = vmatprep.subr.msk.mxu0 %vm562_vm0, %v8558_v28  ;;  %v8607_v28 = vld [vmem:[%s15570_s1 + $0xc20] sm:$0xff]  ;;  %v2919_v61 = vpop.permute.xlu0 %2918 }
 0x1dd   : > { %v9974_v31 = vpack.c.bf16 %v8607_v28, %v8605_v27  ;;  %v3059_v27 = vpop.permute.xlu1 %3058 }
 0x1df   : > { %8560 = vmatpush1.msk.msra.mxu0 %vm562_vm0, %v8557_v35  ;;  %v8611_v35 = vld [vmem:[%s15570_s1 + $0xc40] sm:$0xff] }
 0x1e0   : > { %9941 = vmatprep.subr.bf16.mxu0 %v9940_v36  ;;  %8561 = vmatmul.mubr.msk.f32.vlgmr.msra.gmra.mrb[0].mxu0 %vm553_vm1, %v11155_v46  ;;  %v9978_v36 = vpack.c.bf16 %v8611_v35, %v8609_v34  ;;  %v8628_v46 = vld [vmem:[%s15570_s1 + $0xc98] sm:$0xff] }
 0x1e1   : > { %9943 = vmatpush1.bf16.msra.mxu0 %v9942_v37  ;;  %2722 = vmatprep.mubr.f32.mxu0 %v11231_v12  ;;  %v8614_v37 = vld [vmem:[%s15570_s1 + $0xc58] sm:$0xf]  ;;  %v9984_v51 = vpack.c.bf16 %v8628_v46, %v8626_v45  ;;  %v3063_v44 = vpop.permute.xlu1 %3062  ;;  %v8665_v46 = vld [vmem:[%s15570_s1 + $0xd90] sm:$0xff] }
 0x1e2   : > { %9945 = vmatprep.subr.bf16.mxu0 %v9944_v38  ;;  %v8622_v38 = vld [vmem:[%s15570_s1 + $0xc68] sm:$0xff] }
 0x1e4   : > { %8562 = vmatmul.mubr.msk.f32.gmra.mrb[2].mxu0 %vm553_vm1, %v11156_v20  ;;  %v8627_v20 = vld [vmem:[%s15570_s1 + $0xc90] sm:$0xff] }
 0x1e5   : > { %9947 = vmatpush1.bf16.msra.mxu0 %v9946_v47  ;;  %2728 = vmatprep.mubr.f32.mxu0 %v11231_v12  ;;  %v8613_v47 = vld [vmem:[%s15570_s1 + $0xc50] sm:$0xf]  ;;  %v9986_v50 = vpack.c.bf16 %v8627_v20, %v8625_v52  ;;  %v8677_v52 = vld [vmem:[%s15570_s1 + $0xdc0] sm:$0xff] }
 0x1e6   : > { %9949 = vmatprep.subr.bf16.mxu0 %v9948_v22  ;;  %v9980_v22 = vpack.c.bf16 %v8624_v19, %v8622_v38  ;;  %v8666_v38 = vld [vmem:[%s15570_s1 + $0xd98] sm:$0xff]  ;;  %v8668_v19 = vld [vmem:[%s15570_s1 + $0xda8] sm:$0xff]  ;;  %v8679_v20 = vld [vmem:[%s15570_s1 + $0xdd0] sm:$0xff] }
 0x1e7   : > { %v10016_v45 = vpack.c.bf16 %v8668_v19, %v8666_v38  ;;  %v8715_v38 = vld [vmem:[%s15570_s1 + $0xec0] sm:$0xff]  ;;  %v8718_v19 = vld [vmem:[%s15570_s1 + $0xed8] sm:$0xff] }
 0x1e8   : > { %8563 = vmatmul.mubr.msk.f32.gmra.mrb[4].mxu0 %vm553_vm1, %v11157_v59  ;;  %v8631_v59 = vld [vmem:[%s15570_s1 + $0xcb0] sm:$0xff] }
 0x1e9   : > { %9951 = vmatpush1.bf16.msra.mxu0 %v9950_v53  ;;  %2734 = vmatprep.mubr.f32.mxu0 %v11231_v12  ;;  %v8630_v53 = vld [vmem:[%s15570_s1 + $0xca8] sm:$0xff]  ;;  %v9990_v60 = vpack.c.bf16 %v8631_v59, %v8629_v57  ;;  %v10022_v57 = vpack.c.bf16 %v8679_v20, %v8677_v52 }
 0x1ea   : > { %9953 = vmatprep.subr.bf16.mxu0 %v9952_v54  ;;  %v8632_v54 = vld [vmem:[%s15570_s1 + $0xcb8] sm:$0xff] }
 0x1eb   : > { %v9988_v56 = vpack.c.bf16 %v8632_v54, %v8630_v53  ;;  %v8682_v53 = vld [vmem:[%s15570_s1 + $0xde8] sm:$0xff]  ;;  %v8684_v54 = vld [vmem:[%s15570_s1 + $0xdf8] sm:$0xff] }
 0x1ec   : > { %8564 = vmatmul.mubr.msk.f32.gmra.mrb[6].mxu0 %vm553_vm1, %v11158_v40  ;;  %v10024_v59 = vpack.c.bf16 %v8684_v54, %v8682_v53  ;;  %v8721_v53 = vld [vmem:[%s15570_s1 + $0xef0] sm:$0xff]  ;;  %v8723_v54 = vld [vmem:[%s15570_s1 + $0xf00] sm:$0xff] }
 0x1ed   : > { %9955 = vmatpush1.bf16.msra.mxu0 %v9954_v58  ;;  %2858 = vmatprep.mubr.f32.mxu0 %v11231_v12  ;;  %v8634_v58 = vld [vmem:[%s15570_s1 + $0xcc8] sm:$0xff] }
 0x1ee   : > { %9957 = vmatprep.subr.bf16.mxu0 %v9956_v55  ;;  %v8636_v55 = vld [vmem:[%s15570_s1 + $0xcd8] sm:$0xff] }
 0x1ef   : > { %v9992_v40 = vpack.c.bf16 %v8636_v55, %v8634_v58  ;;  %v8681_v58 = vld [vmem:[%s15570_s1 + $0xde0] sm:$0xff]  ;;  %v8683_v55 = vld [vmem:[%s15570_s1 + $0xdf0] sm:$0xff] }
 0x1f1   : > { %9959 = vmatpush1.bf16.msra.mxu0 %v9958_v62  ;;  %v8633_v62 = vld [vmem:[%s15570_s1 + $0xcc0] sm:$0xff] }
 0x1f2   : > { %8587 = vmatprep.subr.msk.mxu0 %vm562_vm0, %v8586_v63  ;;  %v8635_v63 = vld [vmem:[%s15570_s1 + $0xcd0] sm:$0xff] }
 0x1f3   : > { %v9994_v2 = vpack.c.bf16 %v8635_v63, %v8633_v62  ;;  %v3201_v62 = vpop.permute.xlu1 %3200 }
 0x1f5   : > { %8588 = vmatpush1.msk.msra.mxu0 %vm562_vm0, %v8585_v5  ;;  %v8639_v5 = vld [vmem:[%s15570_s1 + $0xcf0] sm:$0xff] }
 0x1f6   : > { %9961 = vmatprep.subr.bf16.mxu0 %v9960_v6  ;;  %8589 = vmatmul.mubr.msk.f32.vlgmr.msra.gmra.mrb[0].mxu0 %vm553_vm1, %v2773_v7  ;;  %v9998_v6 = vpack.c.bf16 %v8639_v5, %v8637_v4  ;;  %v8642_v7 = vld [vmem:[%s15570_s1 + $0xd08] sm:$0xf] }
 0x1f7   : > { %9963 = vmatpush1.bf16.msra.mxu0 %v9962_v8  ;;  %2864 = vmatprep.mubr.f32.mxu0 %v11231_v12  ;;  %v8650_v8 = vld [vmem:[%s15570_s1 + $0xd18] sm:$0xff]  ;;  %v3205_v10 = vpop.permute.xlu1 %3204 }
 0x1f8   : > { %9965 = vmatprep.subr.bf16.mxu0 %v9964_v42  ;;  %v8652_v42 = vld [vmem:[%s15570_s1 + $0xd28] sm:$0xff] }
 0x1fa   : > { %8590 = vmatmul.mubr.msk.f32.gmra.mrb[2].mxu0 %vm553_vm1, %v2775_v14  ;;  %v10000_v14 = vpack.c.bf16 %v8652_v42, %v8650_v8  ;;  %v8694_v8 = vld [vmem:[%s15570_s1 + $0xe48] sm:$0xff]  ;;  %v8696_v42 = vld [vmem:[%s15570_s1 + $0xe58] sm:$0xff] }
 0x1fb   : > { %9967 = vmatpush1.bf16.msra.mxu0 %v9966_v13  ;;  %2870 = vmatprep.mubr.f32.mxu0 %v11231_v12  ;;  %v8641_v13 = vld [vmem:[%s15570_s1 + $0xd00] sm:$0xf]  ;;  %v10036_v11 = vpack.c.bf16 %v8696_v42, %v8694_v8  ;;  %v8743_v42 = vld [vmem:[%s15570_s1 + $0xf70] sm:$0xff] }
 0x1fc   : > { %9969 = vmatprep.subr.bf16.mxu0 %v9968_v15  ;;  %v3057_v15 = vpop.permute.xlu0 %3056  ;;  %v8741_v8 = vld [vmem:[%s15570_s1 + $0xf60] sm:$0xff] }
 0x1fe   : > { %8591 = vmatmul.mubr.msk.f32.gmra.mrb[4].mxu0 %vm553_vm1, %v2777_v25  ;;  %v8660_v25 = vld [vmem:[%s15570_s1 + $0xd68] sm:$0xff] }
 0x1ff   : > { %9971 = vmatpush1.bf16.msra.mxu0 %v9970_v24  ;;  %2876 = vmatprep.mubr.f32.mxu0 %v11231_v12  ;;  %v8658_v24 = vld [vmem:[%s15570_s1 + $0xd58] sm:$0xff] }
 0x200   : > { %9973 = vmatprep.subr.bf16.mxu0 %v9972_v26  ;;  %v10006_v26 = vpack.c.bf16 %v8655_v21, %v8653_v18  ;;  %v10008_v28 = vpack.c.bf16 %v8660_v25, %v8658_v24  ;;  %v3061_v34 = vpop.permute.xlu0 %3060  ;;  %v8705_v18 = vld [vmem:[%s15570_s1 + $0xe70] sm:$0xff]  ;;  %v8707_v21 = vld [vmem:[%s15570_s1 + $0xe80] sm:$0xff]  ;;  %v8710_v24 = vld [vmem:[%s15570_s1 + $0xe98] sm:$0xff] }
 0x201   : > { %v8712_v25 = vld [vmem:[%s15570_s1 + $0xea8] sm:$0xff] }
 0x202   : > { %8592 = vmatmul.mubr.msk.f32.gmra.mrb[6].mxu0 %vm553_vm1, %v2779_v32  ;;  %v8664_v32 = vld [vmem:[%s15570_s1 + $0xd88] sm:$0xff] }
 0x203   : > { %9975 = vmatpush1.bf16.msra.mxu0 %v9974_v31  ;;  %3000 = vmatprep.mubr.f32.mxu0 %v11231_v12  ;;  %v8662_v31 = vld [vmem:[%s15570_s1 + $0xd78] sm:$0xff] }
 0x204   : > { %9977 = vmatprep.subr.bf16.mxu0 %v9976_v33  ;;  %v10010_v33 = vpack.c.bf16 %v8659_v30, %v8657_v29  ;;  %v10012_v35 = vpack.c.bf16 %v8664_v32, %v8662_v31  ;;  %v10044_v29 = vpack.c.bf16 %v8712_v25, %v8710_v24  ;;  %v8709_v30 = vld [vmem:[%s15570_s1 + $0xe90] sm:$0xff]  ;;  %v8711_v31 = vld [vmem:[%s15570_s1 + $0xea0] sm:$0xff]  ;;  %v8714_v32 = vld [vmem:[%s15570_s1 + $0xeb8] sm:$0xff] }
 0x205   : > { %v8749_v25 = vld [vmem:[%s15570_s1 + $0xfa0] sm:$0xff] }
 0x207   : > { %9979 = vmatpush1.bf16.msra.mxu0 %v9978_v36  ;;  %v8661_v36 = vld [vmem:[%s15570_s1 + $0xd70] sm:$0xff] }
 0x208   : > { %8615 = vmatprep.subr.msk.mxu0 %vm562_vm0, %v8614_v37  ;;  %v8663_v37 = vld [vmem:[%s15570_s1 + $0xd80] sm:$0xff] }
 0x209   : > { %v10014_v39 = vpack.c.bf16 %v8663_v37, %v8661_v36  ;;  %v8713_v37 = vld [vmem:[%s15570_s1 + $0xeb0] sm:$0xff] }
 0x20b   : > { %8616 = vmatpush1.msk.msra.mxu0 %vm562_vm0, %v8613_v47  ;;  %v8667_v47 = vld [vmem:[%s15570_s1 + $0xda0] sm:$0xff] }
 0x20c   : > { %9981 = vmatprep.subr.bf16.mxu0 %v9980_v22  ;;  %8617 = vmatmul.mubr.msk.f32.vlgmr.msra.gmra.mrb[0].mxu0 %vm553_vm1, %v2915_v48  ;;  %v10018_v22 = vpack.c.bf16 %v8667_v47, %v8665_v46  ;;  %v8670_v48 = vld [vmem:[%s15570_s1 + $0xdb8] sm:$0xf]  ;;  %v8717_v47 = vld [vmem:[%s15570_s1 + $0xed0] sm:$0xff] }
 0x20d   : > { %9983 = vmatpush1.bf16.msra.mxu0 %v9982_v49  ;;  %3006 = vmatprep.mubr.f32.mxu0 %v11231_v12  ;;  %v8678_v49 = vld [vmem:[%s15570_s1 + $0xdc8] sm:$0xff] }
 0x20e   : > { %9985 = vmatprep.subr.bf16.mxu0 %v9984_v51  ;;  %v8680_v51 = vld [vmem:[%s15570_s1 + $0xdd8] sm:$0xff] }
 0x210   : > { %8618 = vmatmul.mubr.msk.f32.gmra.mrb[2].mxu0 %vm553_vm1, %v2917_v23  ;;  %v10020_v23 = vpack.c.bf16 %v8680_v51, %v8678_v49  ;;  %v8724_v49 = vld [vmem:[%s15570_s1 + $0xf08] sm:$0xff]  ;;  %v11161_v51 = vld [vmem:[%s11408_s23 + $0x14] sm:$0xff] }
 0x211   : > { %9987 = vmatpush1.bf16.msra.mxu0 %v9986_v50  ;;  %3012 = vmatprep.mubr.f32.mxu0 %v11231_v12  ;;  %v8669_v50 = vld [vmem:[%s15570_s1 + $0xdb0] sm:$0xf] }
 0x212   : > { %9989 = vmatprep.subr.bf16.mxu0 %v9988_v56  ;;  %v3199_v56 = vpop.permute.xlu0 %3198 }
 0x214   : > { %8619 = vmatmul.mubr.msk.f32.gmra.mrb[4].mxu0 %vm553_vm1, %v2919_v61  ;;  %v8688_v61 = vld [vmem:[%s15570_s1 + $0xe18] sm:$0xff] }
 0x215   : > { %9991 = vmatpush1.bf16.msra.mxu0 %v9990_v60  ;;  %3018 = vmatprep.mubr.f32.mxu0 %v11231_v12  ;;  %v8686_v60 = vld [vmem:[%s15570_s1 + $0xe08] sm:$0xff] }
 0x216   : > { %9993 = vmatprep.subr.bf16.mxu0 %v9992_v40  ;;  %v10026_v40 = vpack.c.bf16 %v8683_v55, %v8681_v58  ;;  %v10028_v63 = vpack.c.bf16 %v8688_v61, %v8686_v60  ;;  %v3203_v4 = vpop.permute.xlu0 %3202  ;;  %v8733_v58 = vld [vmem:[%s15570_s1 + $0xf20] sm:$0xff]  ;;  %v8735_v55 = vld [vmem:[%s15570_s1 + $0xf30] sm:$0xff]  ;;  %v8738_v60 = vld [vmem:[%s15570_s1 + $0xf48] sm:$0xff] }
 0x217   : > { %v8740_v61 = vld [vmem:[%s15570_s1 + $0xf58] sm:$0xff] }
 0x218   : > { %8620 = vmatmul.mubr.msk.f32.gmra.mrb[6].mxu0 %vm553_vm1, %v2921_v3  ;;  %v8692_v3 = vld [vmem:[%s15570_s1 + $0xe38] sm:$0xff] }
 0x219   : > { %9995 = vmatpush1.bf16.msra.mxu0 %v9994_v2  ;;  %3142 = vmatprep.mubr.f32.mxu0 %v11231_v12  ;;  %v8690_v2 = vld [vmem:[%s15570_s1 + $0xe28] sm:$0xff] }
 0x21a   : > { %9997 = vmatprep.subr.bf16.mxu0 %v9996_v41  ;;  %v10030_v41 = vpack.c.bf16 %v8687_v1, %v8685_v0  ;;  %v10032_v5 = vpack.c.bf16 %v8692_v3, %v8690_v2  ;;  %v10062_v0 = vpack.c.bf16 %v8735_v55, %v8733_v58  ;;  %v10064_v1 = vpack.c.bf16 %v8740_v61, %v8738_v60  ;;  %v8737_v2 = vld [vmem:[%s15570_s1 + $0xf40] sm:$0xff]  ;;  %v8739_v3 = vld [vmem:[%s15570_s1 + $0xf50] sm:$0xff] }
 0x21b   : > { %v8777_v61 = vld [vmem:[%s15570_s1 + $0x1050] sm:$0xff] }
 0x21d   : > { %9999 = vmatpush1.bf16.msra.mxu0 %v9998_v6  ;;  %v8689_v6 = vld [vmem:[%s15570_s1 + $0xe20] sm:$0xff] }
 0x21e   : > { %8643 = vmatprep.subr.msk.mxu0 %vm562_vm0, %v8642_v7  ;;  %v8691_v7 = vld [vmem:[%s15570_s1 + $0xe30] sm:$0xff] }
 0x21f   : > { %v10034_v9 = vpack.c.bf16 %v8691_v7, %v8689_v6  ;;  %v3485_v6 = vpop.permute.xlu1 %3484 }
 0x221   : > { %8644 = vmatpush1.msk.msra.mxu0 %vm562_vm0, %v8641_v13  ;;  %v8695_v13 = vld [vmem:[%s15570_s1 + $0xe50] sm:$0xff] }
 0x222   : > { %10001 = vmatprep.subr.bf16.mxu0 %v10000_v14  ;;  %8645 = vmatmul.mubr.msk.f32.vlgmr.msra.gmra.mrb[0].mxu0 %vm553_vm1, %v3057_v15  ;;  %v10038_v14 = vpack.c.bf16 %v8695_v13, %v8693_v43  ;;  %v8698_v15 = vld [vmem:[%s15570_s1 + $0xe68] sm:$0xf] }
 0x223   : > { %10003 = vmatpush1.bf16.msra.mxu0 %v10002_v16  ;;  %3148 = vmatprep.mubr.f32.mxu0 %v11231_v12  ;;  %v8706_v16 = vld [vmem:[%s15570_s1 + $0xe78] sm:$0xff] }
 0x224   : > { %10005 = vmatprep.subr.bf16.mxu0 %v10004_v17  ;;  %v8708_v17 = vld [vmem:[%s15570_s1 + $0xe88] sm:$0xff] }
 0x226   : > { %8646 = vmatmul.mubr.msk.f32.gmra.mrb[2].mxu0 %vm553_vm1, %v3059_v27  ;;  %v10040_v27 = vpack.c.bf16 %v8708_v17, %v8706_v16  ;;  %v8750_v16 = vld [vmem:[%s15570_s1 + $0xfa8] sm:$0xff]  ;;  %v8752_v17 = vld [vmem:[%s15570_s1 + $0xfb8] sm:$0xff] }
 0x227   : > { %10007 = vmatpush1.bf16.msra.mxu0 %v10006_v26  ;;  %3154 = vmatprep.mubr.f32.mxu0 %v11231_v12  ;;  %v8697_v26 = vld [vmem:[%s15570_s1 + $0xe60] sm:$0xf]  ;;  %v10076_v24 = vpack.c.bf16 %v8752_v17, %v8750_v16  ;;  %v8799_v17 = vld [vmem:[%s15570_s1 + $0x10d0] sm:$0xff] }
 0x228   : > { %10009 = vmatprep.subr.bf16.mxu0 %v10008_v28  ;;  %v10042_v28 = vpack.c.bf16 %v8707_v21, %v8705_v18  ;;  %v3489_v21 = vpop.permute.xlu1 %3488  ;;  %v8797_v16 = vld [vmem:[%s15570_s1 + $0x10c0] sm:$0xff] }
 0x22a   : > { %8647 = vmatmul.mubr.msk.f32.gmra.mrb[4].mxu0 %vm553_vm1, %v3061_v34  ;;  %v11159_v34 = vld [vmem:[%s11408_s23 + $0x4] sm:$0xff] }
 0x22b   : > { %10011 = vmatpush1.bf16.msra.mxu0 %v10010_v33  ;;  %3160 = vmatprep.mubr.f32.mxu0 %v11231_v12  ;;  %v8716_v33 = vld [vmem:[%s15570_s1 + $0xec8] sm:$0xff] }
 0x22c   : > { %10013 = vmatprep.subr.bf16.mxu0 %v10012_v35  ;;  %v10046_v35 = vpack.c.bf16 %v8711_v31, %v8709_v30  ;;  %v10048_v36 = vpack.c.bf16 %v8716_v33, %v8714_v32  ;;  %v8764_v30 = vld [vmem:[%s15570_s1 + $0xfe8] sm:$0xff]  ;;  %v8761_v31 = vld [vmem:[%s15570_s1 + $0xfd0] sm:$0xff]  ;;  %v8763_v32 = vld [vmem:[%s15570_s1 + $0xfe0] sm:$0xff] }
 0x22d   : > { %v8766_v33 = vld [vmem:[%s15570_s1 + $0xff8] sm:$0xff] }
 0x22e   : > { %8648 = vmatmul.mubr.msk.f32.gmra.mrb[6].mxu0 %vm553_vm1, %v3063_v44  ;;  %v11160_v44 = vld [vmem:[%s11408_s23 + $0xc] sm:$0xff] }
 0x22f   : > { %10015 = vmatpush1.bf16.msra.mxu0 %v10014_v39  ;;  %3284 = vmatprep.mubr.f32.mxu0 %v11231_v12  ;;  %v8720_v39 = vld [vmem:[%s15570_s1 + $0xee8] sm:$0xff] }
 0x230   : > { %10017 = vmatprep.subr.bf16.mxu0 %v10016_v45  ;;  %v10050_v45 = vpack.c.bf16 %v8715_v38, %v8713_v37  ;;  %v10052_v46 = vpack.c.bf16 %v8720_v39, %v8718_v19  ;;  %v10082_v38 = vpack.c.bf16 %v8763_v32, %v8761_v31  ;;  %v8765_v39 = vld [vmem:[%s15570_s1 + $0xff0] sm:$0xff] }
 0x233   : > { %10019 = vmatpush1.bf16.msra.mxu0 %v10018_v22  ;;  %v8719_v22 = vld [vmem:[%s15570_s1 + $0xee0] sm:$0xff] }
 0x234   : > { %8671 = vmatprep.subr.msk.mxu0 %vm562_vm0, %v8670_v48  ;;  %v8722_v48 = vld [vmem:[%s15570_s1 + $0xef8] sm:$0xff]  ;;  %v10054_v52 = vpack.c.bf16 %v8719_v22, %v8717_v47  ;;  %v3627_v22 = vpop.permute.xlu1 %3626 }
 0x235   : > { %v10056_v20 = vpack.c.bf16 %v8724_v49, %v8722_v48  ;;  %v8769_v49 = vld [vmem:[%s15570_s1 + $0x1010] sm:$0xff] }
 0x237   : > { %8672 = vmatpush1.msk.msra.mxu0 %vm562_vm0, %v8669_v50  ;;  %v11162_v50 = vld [vmem:[%s11408_s23 + $0x1c] sm:$0xf] }
 0x238   : > { %10021 = vmatprep.subr.bf16.mxu0 %v10020_v23  ;;  %8673 = vmatmul.mubr.msk.f32.vlgmr.msra.gmra.mrb[0].mxu0 %vm553_vm1, %v3199_v56  ;;  %v10058_v23 = vpack.c.bf16 %v8723_v54, %v8721_v53  ;;  %v8726_v56 = vld [vmem:[%s15570_s1 + $0xf18] sm:$0xf]  ;;  %v3631_v55 = vpop.permute.xlu1 %3630 }
 0x239   : > { %10023 = vmatpush1.bf16.msra.mxu0 %v10022_v57  ;;  %3290 = vmatprep.mubr.f32.mxu0 %v11231_v12  ;;  %v8734_v57 = vld [vmem:[%s15570_s1 + $0xf28] sm:$0xff] }
 0x23a   : > { %10025 = vmatprep.subr.bf16.mxu0 %v10024_v59  ;;  %v8736_v59 = vld [vmem:[%s15570_s1 + $0xf38] sm:$0xff] }
 0x23c   : > { %8674 = vmatmul.mubr.msk.f32.gmra.mrb[2].mxu0 %vm553_vm1, %v3201_v62  ;;  %v10060_v62 = vpack.c.bf16 %v8736_v59, %v8734_v57  ;;  %v8778_v57 = vld [vmem:[%s15570_s1 + $0x1058] sm:$0xff]  ;;  %v8780_v59 = vld [vmem:[%s15570_s1 + $0x1068] sm:$0xff] }
 0x23d   : > { %10027 = vmatpush1.bf16.msra.mxu0 %v10026_v40  ;;  %3296 = vmatprep.mubr.f32.mxu0 %v11231_v12  ;;  %v8725_v40 = vld [vmem:[%s15570_s1 + $0xf10] sm:$0xf]  ;;  %v10096_v60 = vpack.c.bf16 %v8780_v59, %v8778_v57 }
 0x23e   : > { %10029 = vmatprep.subr.bf16.mxu0 %v10028_v63  ;;  %v3483_v63 = vpop.permute.xlu0 %3482 }
 0x240   : > { %8675 = vmatmul.mubr.msk.f32.gmra.mrb[4].mxu0 %vm553_vm1, %v3203_v4  ;;  %v8744_v4 = vld [vmem:[%s15570_s1 + $0xf78] sm:$0xff] }
 0x241   : > { %10031 = vmatpush1.bf16.msra.mxu0 %v10030_v41  ;;  %3302 = vmatprep.mubr.f32.mxu0 %v11231_v12  ;;  %v8742_v41 = vld [vmem:[%s15570_s1 + $0xf68] sm:$0xff] }
 0x242   : > { %10033 = vmatprep.subr.bf16.mxu0 %v10032_v5  ;;  %v10066_v5 = vpack.c.bf16 %v8739_v3, %v8737_v2  ;;  %v10068_v7 = vpack.c.bf16 %v8744_v4, %v8742_v41  ;;  %v3487_v43 = vpop.permute.xlu0 %3486  ;;  %v8789_v2 = vld [vmem:[%s15570_s1 + $0x1080] sm:$0xff]  ;;  %v8791_v3 = vld [vmem:[%s15570_s1 + $0x1090] sm:$0xff]  ;;  %v8794_v41 = vld [vmem:[%s15570_s1 + $0x10a8] sm:$0xff] }
 0x243   : > { %v8796_v4 = vld [vmem:[%s15570_s1 + $0x10b8] sm:$0xff] }
 0x244   : > { %8676 = vmatmul.mubr.msk.f32.gmra.mrb[6].mxu0 %vm553_vm1, %v3205_v10  ;;  %v8748_v10 = vld [vmem:[%s15570_s1 + $0xf98] sm:$0xff] }
 0x245   : > { %10035 = vmatpush1.bf16.msra.mxu0 %v10034_v9  ;;  %3426 = vmatprep.mubr.f32.mxu0 %v11231_v12  ;;  %v8746_v9 = vld [vmem:[%s15570_s1 + $0xf88] sm:$0xff] }
 0x246   : > { %10037 = vmatprep.subr.bf16.mxu0 %v10036_v11  ;;  %v10070_v11 = vpack.c.bf16 %v8743_v42, %v8741_v8  ;;  %v10072_v13 = vpack.c.bf16 %v8748_v10, %v8746_v9  ;;  %v3625_v37 = vpop.permute.xlu0 %3624  ;;  %v10102_v8 = vpack.c.bf16 %v8791_v3, %v8789_v2  ;;  %v10104_v42 = vpack.c.bf16 %v8796_v4, %v8794_v41  ;;  %v8793_v9 = vld [vmem:[%s15570_s1 + $0x10a0] sm:$0xff]  ;;  %v8795_v10 = vld [vmem:[%s15570_s1 + $0x10b0] sm:$0xff] }
 0x249   : > { %10039 = vmatpush1.bf16.msra.mxu0 %v10038_v14  ;;  %v8745_v14 = vld [vmem:[%s15570_s1 + $0xf80] sm:$0xff] }
 0x24a   : > { %8699 = vmatprep.subr.msk.mxu0 %vm562_vm0, %v8698_v15  ;;  %v8747_v15 = vld [vmem:[%s15570_s1 + $0xf90] sm:$0xff]  ;;  %v3629_v54 = vpop.permute.xlu0 %3628 }
 0x24b   : > { %v10074_v18 = vpack.c.bf16 %v8747_v15, %v8745_v14  ;;  %v3769_v14 = vpop.permute.xlu1 %3768 }
 0x24d   : > { %8700 = vmatpush1.msk.msra.mxu0 %vm562_vm0, %v8697_v26  ;;  %v8751_v26 = vld [vmem:[%s15570_s1 + $0xfb0] sm:$0xff] }
 0x24e   : > { %10041 = vmatprep.subr.bf16.mxu0 %v10040_v27  ;;  %8701 = vmatmul.mubr.msk.f32.vlgmr.msra.gmra.mrb[0].mxu0 %vm553_vm1, %v11159_v34  ;;  %v10078_v27 = vpack.c.bf16 %v8751_v26, %v8749_v25  ;;  %v8768_v34 = vld [vmem:[%s15570_s1 + $0x1008] sm:$0xff] }
 0x24f   : > { %10043 = vmatpush1.bf16.msra.mxu0 %v10042_v28  ;;  %3432 = vmatprep.mubr.f32.mxu0 %v11231_v12  ;;  %v8754_v28 = vld [vmem:[%s15570_s1 + $0xfc8] sm:$0xf]  ;;  %v10084_v19 = vpack.c.bf16 %v8768_v34, %v8766_v33  ;;  %v3773_v32 = vpop.permute.xlu1 %3772  ;;  %v8805_v34 = vld [vmem:[%s15570_s1 + $0x1100] sm:$0xff] }
 0x250   : > { %10045 = vmatprep.subr.bf16.mxu0 %v10044_v29  ;;  %v8762_v29 = vld [vmem:[%s15570_s1 + $0xfd8] sm:$0xff] }
 0x252   : > { %8702 = vmatmul.mubr.msk.f32.gmra.mrb[2].mxu0 %vm553_vm1, %v11160_v44  ;;  %v8767_v44 = vld [vmem:[%s15570_s1 + $0x1000] sm:$0xff] }
 0x253   : > { %10047 = vmatpush1.bf16.msra.mxu0 %v10046_v35  ;;  %3438 = vmatprep.mubr.f32.mxu0 %v11231_v12  ;;  %v8753_v35 = vld [vmem:[%s15570_s1 + $0xfc0] sm:$0xf]  ;;  %v10086_v47 = vpack.c.bf16 %v8767_v44, %v8765_v39  ;;  %v3911_v39 = vpop.permute.xlu1 %3910 }
 0x254   : > { %10049 = vmatprep.subr.bf16.mxu0 %v10048_v36  ;;  %v10080_v36 = vpack.c.bf16 %v8764_v30, %v8762_v29  ;;  %v8806_v29 = vld [vmem:[%s15570_s1 + $0x1108] sm:$0xff]  ;;  %v8808_v30 = vld [vmem:[%s15570_s1 + $0x1118] sm:$0xff] }
 0x255   : > { %v10116_v33 = vpack.c.bf16 %v8808_v30, %v8806_v29 }
 0x256   : > { %8703 = vmatmul.mubr.msk.f32.gmra.mrb[4].mxu0 %vm553_vm1, %v11161_v51  ;;  %v8771_v51 = vld [vmem:[%s15570_s1 + $0x1020] sm:$0xff] }
 0x257   : > { %10051 = vmatpush1.bf16.msra.mxu0 %v10050_v45  ;;  %3444 = vmatprep.mubr.f32.mxu0 %v11231_v12  ;;  %v8770_v45 = vld [vmem:[%s15570_s1 + $0x1018] sm:$0xff]  ;;  %v10090_v53 = vpack.c.bf16 %v8771_v51, %v8769_v49 }
 0x258   : > { %10053 = vmatprep.subr.bf16.mxu0 %v10052_v46  ;;  %v8772_v46 = vld [vmem:[%s15570_s1 + $0x1028] sm:$0xff] }
 0x259   : > { %v10088_v48 = vpack.c.bf16 %v8772_v46, %v8770_v45  ;;  %v3915_v45 = vpop.permute.xlu1 %3914  ;;  %v4029_v46 = vlaneseq }
 0x25a   : > { %8704 = vmatmul.mubr.msk.f32.gmra.mrb[6].mxu0 %vm553_vm1, %v11162_v50 }
 0x25b   : > { %10055 = vmatpush1.bf16.msra.mxu0 %v10054_v52  ;;  %3568 = vmatprep.mubr.f32.mxu0 %v11231_v12  ;;  %v8774_v52 = vld [vmem:[%s15570_s1 + $0x1038] sm:$0xff] }
 0x25c   : > { %10057 = vmatprep.subr.bf16.mxu0 %v10056_v20  ;;  %v8776_v20 = vld [vmem:[%s15570_s1 + $0x1048] sm:$0xff] }
 0x25d   : > { %v10092_v50 = vpack.c.bf16 %v8776_v20, %v8774_v52 }
 0x25f   : > { %10059 = vmatpush1.bf16.msra.mxu0 %v10058_v23  ;;  %v8773_v23 = vld [vmem:[%s15570_s1 + $0x1030] sm:$0xff] }
 0x260   : > { %8727 = vmatprep.subr.msk.mxu0 %vm562_vm0, %v8726_v56  ;;  %v8775_v56 = vld [vmem:[%s15570_s1 + $0x1040] sm:$0xff] }
 0x261   : > { %v10094_v58 = vpack.c.bf16 %v8775_v56, %v8773_v23 }
 0x263   : > { %8728 = vmatpush1.msk.msra.mxu0 %vm562_vm0, %v8725_v40  ;;  %v8779_v40 = vld [vmem:[%s15570_s1 + $0x1060] sm:$0xff] }
 0x264   : > { %10061 = vmatprep.subr.bf16.mxu0 %v10060_v62  ;;  %8729 = vmatmul.mubr.msk.f32.vlgmr.msra.gmra.mrb[0].mxu0 %vm553_vm1, %v3483_v63  ;;  %v10098_v62 = vpack.c.bf16 %v8779_v40, %v8777_v61  ;;  %v8782_v63 = vld [vmem:[%s15570_s1 + $0x1078] sm:$0xf] }
 0x265   : > { %10063 = vmatpush1.bf16.msra.mxu0 %v10062_v0  ;;  %3574 = vmatprep.mubr.f32.mxu0 %v11231_v12  ;;  %v8790_v0 = vld [vmem:[%s15570_s1 + $0x1088] sm:$0xff] }
 0x266   : > { %10065 = vmatprep.subr.bf16.mxu0 %v10064_v1  ;;  %v8792_v1 = vld [vmem:[%s15570_s1 + $0x1098] sm:$0xff] }
 0x268   : > { %8730 = vmatmul.mubr.msk.f32.gmra.mrb[2].mxu0 %vm553_vm1, %v3485_v6  ;;  %v10100_v6 = vpack.c.bf16 %v8792_v1, %v8790_v0 }
 0x269   : > { %10067 = vmatpush1.bf16.msra.mxu0 %v10066_v5  ;;  %3580 = vmatprep.mubr.f32.mxu0 %v11231_v12  ;;  %v8781_v5 = vld [vmem:[%s15570_s1 + $0x1070] sm:$0xf] }
 0x26a   : > { %10069 = vmatprep.subr.bf16.mxu0 %v10068_v7  ;;  %v3767_v7 = vpop.permute.xlu0 %3766 }
 0x26c   : > { %8731 = vmatmul.mubr.msk.f32.gmra.mrb[4].mxu0 %vm553_vm1, %v3487_v43  ;;  %v8800_v43 = vld [vmem:[%s15570_s1 + $0x10d8] sm:$0xff] }
 0x26d   : > { %10071 = vmatpush1.bf16.msra.mxu0 %v10070_v11  ;;  %3586 = vmatprep.mubr.f32.mxu0 %v11231_v12  ;;  %v8798_v11 = vld [vmem:[%s15570_s1 + $0x10c8] sm:$0xff] }
 0x26e   : > { %10073 = vmatprep.subr.bf16.mxu0 %v10072_v13  ;;  %v10106_v13 = vpack.c.bf16 %v8795_v10, %v8793_v9  ;;  %v10108_v15 = vpack.c.bf16 %v8800_v43, %v8798_v11  ;;  %v3771_v25 = vpop.permute.xlu0 %3770 }
 0x270   : > { %8732 = vmatmul.mubr.msk.f32.gmra.mrb[6].mxu0 %vm553_vm1, %v3489_v21  ;;  %v8804_v21 = vld [vmem:[%s15570_s1 + $0x10f8] sm:$0xff] }
 0x271   : > { %10075 = vmatpush1.bf16.msra.mxu0 %v10074_v18  ;;  %3710 = vmatprep.mubr.f32.mxu0 %v11231_v12  ;;  %v8802_v18 = vld [vmem:[%s15570_s1 + $0x10e8] sm:$0xff] }
 0x272   : > { %10077 = vmatprep.subr.bf16.mxu0 %v10076_v24  ;;  %v10110_v24 = vpack.c.bf16 %v8799_v17, %v8797_v16  ;;  %v10112_v26 = vpack.c.bf16 %v8804_v21, %v8802_v18 }
 0x275   : > { %10079 = vmatpush1.bf16.msra.mxu0 %v10078_v27  ;;  %v8801_v27 = vld [vmem:[%s15570_s1 + $0x10e0] sm:$0xff] }
 0x276   : > { %8755 = vmatprep.subr.msk.mxu0 %vm562_vm0, %v8754_v28  ;;  %v8803_v28 = vld [vmem:[%s15570_s1 + $0x10f0] sm:$0xff] }
 0x277   : > { %v10114_v31 = vpack.c.bf16 %v8803_v28, %v8801_v27 }
 0x279   : > { %8756 = vmatpush1.msk.msra.mxu0 %vm562_vm0, %v8753_v35  ;;  %v8807_v35 = vld [vmem:[%s15570_s1 + $0x1110] sm:$0xff] }
 0x27a   : > { %10081 = vmatprep.subr.bf16.mxu0 %v10080_v36  ;;  %8757 = vmatmul.mubr.msk.f32.vlgmr.msra.gmra.mrb[0].mxu0 %vm553_vm1, %v3625_v37  ;;  %v10118_v36 = vpack.c.bf16 %v8807_v35, %v8805_v34  ;;  %v8810_v37 = vld [vmem:[%s15570_s1 + $0x1128] sm:$0xf] }
 0x27b   : > { %10083 = vmatpush1.bf16.msra.mxu0 %v10082_v38  ;;  %3716 = vmatprep.mubr.f32.mxu0 %v11231_v12  ;;  %v8809_v38 = vld [vmem:[%s15570_s1 + $0x1120] sm:$0xf] }
 0x27c   : > { %10085 = vmatprep.subr.bf16.mxu0 %v10084_v19  ;;  %v3909_v19 = vpop.permute.xlu0 %3908 }
 0x27e   : > { %8758 = vmatmul.mubr.msk.f32.gmra.mrb[2].mxu0 %vm553_vm1, %v3627_v22 }
 0x27f   : > { %10087 = vmatpush1.bf16.msra.mxu0 %v10086_v47  ;;  %3722 = vmatprep.mubr.f32.mxu0 %v11231_v12  ;;  %v13519_v47 = vshrl.u32 %v4029_v46, 7 }
 0x280   : > { %10089 = vmatprep.subr.bf16.mxu0 %v10088_v48  ;;  %v3913_v44 = vpop.permute.xlu0 %3912  ;;  %v4027_v48 = vld [vmem:[%s15571_s2] sm:$0x3] }
 0x281   : > { %v4031_v22 = vsub.s32 0, %v13519_v47  ;;  %v4035_v49 = vsub.s32 1, %v13519_v47 }
 0x282   : > { %8759 = vmatmul.mubr.msk.f32.gmra.mrb[4].mxu0 %vm553_vm1, %v3629_v54 }
 0x283   : > { %10091 = vmatpush1.bf16.msra.mxu0 %v10090_v53  ;;  %3728 = vmatprep.mubr.f32.mxu0 %v11231_v12  ;;  %v4032_v51 = vrot.slane %v4027_v48, %v4031_v22  ;;  %v4036_v52 = vrot.slane %v4027_v48, %v4035_v49 }
 0x284   : > { %10093 = vmatprep.subr.bf16.mxu0 %v10092_v50 }
 0x286   : > { %8760 = vmatmul.mubr.msk.f32.gmra.mrb[6].mxu0 %vm553_vm1, %v3631_v55 }
 0x287   : > { %10095 = vmatpush1.bf16.msra.mxu0 %v10094_v58  ;;  %3852 = vmatprep.mubr.f32.mxu0 %v11231_v12 }
 0x288   : > { %10097 = vmatprep.subr.bf16.mxu0 %v10096_v60 }
 0x28b   : > { %10099 = vmatpush1.bf16.msra.mxu0 %v10098_v62 }
 0x28c   : > { %8783 = vmatprep.subr.msk.mxu0 %vm562_vm0, %v8782_v63 }
 0x28f   : > { %8784 = vmatpush1.msk.msra.mxu0 %vm562_vm0, %v8781_v5 }
 0x290   : > { %10101 = vmatprep.subr.bf16.mxu0 %v10100_v6  ;;  %8785 = vmatmul.mubr.msk.f32.vlgmr.msra.gmra.mrb[0].mxu0 %vm553_vm1, %v3767_v7 }
 0x291   : > { %10103 = vmatpush1.bf16.msra.mxu0 %v10102_v8  ;;  %3858 = vmatprep.mubr.f32.mxu0 %v11231_v12 }
 0x292   : > { %10105 = vmatprep.subr.bf16.mxu0 %v10104_v42 }
 0x294   : > { %8786 = vmatmul.mubr.msk.f32.gmra.mrb[2].mxu0 %vm553_vm1, %v3769_v14 }
 0x295   : > { %10107 = vmatpush1.bf16.msra.mxu0 %v10106_v13  ;;  %3864 = vmatprep.mubr.f32.mxu0 %v11231_v12 }
 0x296   : > { %10109 = vmatprep.subr.bf16.mxu0 %v10108_v15 }
 0x298   : > { %8787 = vmatmul.mubr.msk.f32.gmra.mrb[4].mxu0 %vm553_vm1, %v3771_v25 }
 0x299   : > { %10111 = vmatpush1.bf16.msra.mxu0 %v10110_v24  ;;  %3870 = vmatprep.mubr.f32.mxu0 %v11231_v12 }
 0x29a   : > { %10113 = vmatprep.subr.bf16.mxu0 %v10112_v26  ;;  %v11236_v26 = vmov 0.0|0.0  }
 0x29c   : > { %8788 = vmatmul.mubr.msk.f32.gmra.mrb[6].mxu0 %vm553_vm1, %v3773_v32 }
 0x29d   : > { %10115 = vmatpush1.bf16.msra.mxu0 %v10114_v31  ;;  %3994 = vmatprep.mubr.f32.mxu0 %v11231_v12 }
 0x29e   : > { %10117 = vmatprep.subr.bf16.mxu0 %v10116_v33 }
 0x2a1   : > { %10119 = vmatpush1.bf16.msra.mxu0 %v10118_v36 }
 0x2a2   : > { %8811 = vmatprep.subr.msk.mxu0 %vm562_vm0, %v8810_v37 }
 0x2a5   : > { %8812 = vmatpush1.msk.msra.mxu0 %vm562_vm0, %v8809_v38 }
 0x2a6   : > { %8813 = vmatmul.mubr.msk.f32.vlgmr.msra.gmra.mrb[0].mxu0 %vm553_vm1, %v3909_v19  ;;  %10718 = vmatprep.subr.bf16.mxu0 %v11236_v26 }
 0x2a7   : > { %4000 = vmatprep.mubr.f32.mxu0 %v11231_v12 }
 0x2aa   : > { %8814 = vmatmul.mubr.msk.f32.gmra.mrb[2].mxu0 %vm553_vm1, %v3911_v39 }
 0x2ab   : > { %4006 = vmatprep.mubr.f32.mxu0 %v11231_v12 }
 0x2ae   : > { %8815 = vmatmul.mubr.msk.f32.gmra.mrb[4].mxu0 %vm553_vm1, %v3913_v44 }
 0x2af   : > { %4012 = vmatprep.mubr.f32.mxu0 %v11231_v12 }
 0x2b2   : > { %8816 = vmatmul.mubr.msk.f32.gmra.mrb[6].mxu0 %vm553_vm1, %v3915_v45 }
 0x379   : > { %v3996_v20 = vpop.f32.mrb[0].mxu0 }
 0x37a   : > { %v4039_v53 = vadd.f32 %v4032_v51, %v3996_v20  ;;  %v3998_v54 = vpop.f32.mrb[1].mxu0 }
 0x37b   : > { %v4040_v50 = vadd.f32 %v4036_v52, %v3998_v54 }
 0x37c   : > { %v13530_v23 = vmax.f32 %v4039_v53, 0.0 }
 0x37d   : > { %v4048_v56 = vmax.f32 %v4040_v50, 0.0  ;;  %v4002_v57 = vpop.f32.mrb[2].mxu0 }
 0x37e   : > { %4055 = vst [vmem:[#allocation2] sm:$0xff] %v13530_v23  ;;  %v4041_v59 = vadd.f32 %v4032_v51, %v4002_v57  ;;  %v4004_v58 = vpop.f32.mrb[3].mxu0 }
 0x37f   : > { %4057 = vst.msk [vmem:[#allocation2 + $0x8] sm:$0xff] %vm4056_vm2, %v4048_v56  ;;  %v4042_v55 = vadd.f32 %v4036_v52, %v4004_v58 }
 0x380   : > { %v4049_v60 = vmax.f32 %v4041_v59, 0.0 }
 0x381   : > { %v4050_v61 = vmax.f32 %v4042_v55, 0.0  ;;  %v4008_v40 = vpop.f32.mrb[4].mxu0 }
 0x382   : > { %v13534_v62 = vadd.f32 %v4032_v51, %v4008_v40  ;;  %v4010_v63 = vpop.f32.mrb[5].mxu0 }
 0x383   : > { %4059 = vst.msk [vmem:[#allocation2 + $0x18] sm:$0xff] %vm4056_vm2, %v4050_v61  ;;  %v4044_v0 = vadd.f32 %v4036_v52, %v4010_v63 }
 0x384   : > { %v4051_v1 = vmax.f32 %v13534_v62, 0.0 }
 0x385   : > { %v4052_v2 = vmax.f32 %v4044_v0, 0.0  ;;  %v4014_v3 = vpop.f32.mrb[6].mxu0  ;;  %v4118_v41 = vld [vmem:[#allocation2] sm:$0xfe] }
 0x386   : > { %v4045_v4 = vadd.f32 %v4032_v51, %v4014_v3  ;;  %v4016_v5 = vpop.f32.mrb[7].mxu0  ;;  %v4119_v6 = vld [vmem:[#allocation2 + $0x8] sm:$0xfe] }
 0x387   : > { %4061 = vst.msk [vmem:[#allocation2 + $0x28] sm:$0xff] %vm4056_vm2, %v4052_v2  ;;  %v4046_v7 = vadd.f32 %v4036_v52, %v4016_v5  ;;  %v11101_v8 = vpack.i.bf16 %v4119_v6, %v4118_v41  ;;  %v4066_v14 = vld [vmem:[#allocation2 + $0x8] sm:$0xff]  ;;  %vm7202_vm2 = vcmask 254976  }
 0x388   : > { %v4053_v42 = vmax.f32 %v4045_v4, 0.0  ;;  %v11116_v17 = vpack.i.bf16 %v4066_v14, %v13530_v23 }
 0x389   : > { %v4054_v9 = vmax.f32 %v4046_v7, 0.0  ;;  %11102 = vrot.lane.b32.xlu0 %v11101_v8, %s15616_s0 }
 0x38a   : > { %4062 = vst [vmem:[#allocation2 + $0x30] sm:$0xf] %v4053_v42  ;;  %v4068_v10 = vld [vmem:[#allocation2 + $0x18] sm:$0xff] }
 0x38b   : > { %4064 = vst.msk [vmem:[#allocation2 + $0x38] sm:$0xf] %vm4063_vm3, %v4054_v9  ;;  %v11106_v11 = vpack.i.bf16 %v4068_v10, %v4049_v60  ;;  %vm7220_vm3 = vcmask 916480  }
 0x38d   : > { %11107 = vrot.lane.b32.xlu0 %v11106_v11, %s15616_s0 }
 0x38e   : > { %v4070_v43 = vld [vmem:[#allocation2 + $0x28] sm:$0xff] }
 0x38f   : > { %v11111_v13 = vpack.i.bf16 %v4070_v43, %v4051_v1 }
 0x391   : > { %11112 = vrot.lane.b32.xlu1 %v11111_v13, %s15616_s0  ;;  %v13542_v15 = vld [vmem:[#allocation2 + $0x30] sm:$0xf] }
 0x392   : > { %v4121_v16 = vld [vmem:[#allocation2 + $0x38] sm:$0xf]  ;;  %v13546_v21 = vld [vmem:[#allocation2 + $0x30] sm:$0x7] }
 0x393   : > { %v11121_v18 = vpack.i.bf16 %v4121_v16, %v13542_v15  ;;  %v4072_v24 = vld [vmem:[#allocation2 + $0x38] sm:$0x7] }
 0x394   : > { %v11126_v25 = vpack.i.bf16 %v4072_v24, %v13546_v21 }
 0x395   : > { %11117 = vrot.lane.b32.xlu1 %v11116_v17, %s15616_s0  ;;  %11122 = vrot.lane.b32.xlu0 %v11121_v18, %s15616_s0 }
 0x399   : > { %11127 = vrot.lane.b32.xlu1 %v11126_v25, %s15616_s0 }
 0x3fb   : > { %v11103_v27 = vpop.permute.xlu0 %11102 }
 0x3fc   : > { %v11105_v28 = vunpack.i.h.bf16 %v11103_v27  ;;  %v11104_v29 = vunpack.i.l.bf16 %v11103_v27 }
 0x3fe   : > { %v4134_v31 = vsel %vm4097_vm4, %v11104_v29, %v11105_v28  ;;  %v4141_v36 = vmax.f32 %v4119_v6, %v11105_v28 }
 0x3ff   : > { %v11108_v30 = vpop.permute.xlu0 %11107  ;;  %v4140_v37 = vmax.f32 %v4118_v41, %v4134_v31  ;;  %v4277_v31 = vld [vmem:[%s15573_s4 + $0x8] sm:$0xff] }
 0x400   : > { %v11110_v32 = vunpack.i.h.bf16 %v11108_v30  ;;  %v11109_v33 = vunpack.i.l.bf16 %v11108_v30  ;;  %v4156_v52 = vrot.slane %v4141_v36, 1  ;;  %v4184_v36 = vld [vmem:[%s15572_s3 + $0x8] sm:$0x3f] }
 0x401   : > { %v4153_v20 = vrot.slane %v4140_v37, 1 }
 0x402   : > { %v4113_v34 = vmax.f32 %v4068_v10, %v11110_v32  ;;  %v4099_v35 = vsel %vm4097_vm4, %v11109_v33, %v11110_v32  ;;  %v4183_v32 = vld [vmem:[%s15572_s3] sm:$0xff] }
 0x403   : > { %v11113_v38 = vpop.permute.xlu1 %11112  ;;  %v4112_v19 = vmax.f32 %v4049_v60, %v4099_v35  ;;  %v4279_v35 = vld [vmem:[%s15573_s4 + $0x18] sm:$0xff] }
 0x404   : > { %v11115_v39 = vunpack.i.h.bf16 %v11113_v38  ;;  %v11114_v44 = vunpack.i.l.bf16 %v11113_v38  ;;  %v4157_v45 = vrot.slane %v4113_v34, 1  ;;  %v4280_v38 = vld [vmem:[%s15573_s4 + $0x20] sm:$0xff] }
 0x405   : > { %v4154_v46 = vrot.slane %v4112_v19, 1 }
 0x406   : > { %v4115_v48 = vmax.f32 %v4070_v43, %v11115_v39  ;;  %v4100_v51 = vsel %vm4097_vm4, %v11114_v44, %v11115_v39  ;;  %v4158_v60 = vsel %vm4152_vm5, %v4156_v52, %v4157_v45  ;;  %v4282_v44 = vld [vmem:[%s15573_s4 + $0x30] sm:$0xff] }
 0x407   : > { %v4114_v53 = vmax.f32 %v4051_v1, %v4100_v51  ;;  %v11118_v54 = vpop.permute.xlu1 %11117  ;;  %v11123_v50 = vpop.permute.xlu0 %11122  ;;  %v4155_v61 = vsel %vm4152_vm5, %v4153_v20, %v4154_v46  ;;  %v4285_v51 = vld [vmem:[%s15573_s4 + $0x48] sm:$0xff]  ;;  %v4286_v20 = vld [vmem:[%s15573_s4 + $0x50] sm:$0xff] }
 0x408   : > { %v4161_v56 = vrot.slane %v4115_v48, 1  ;;  %v11120_v57 = vunpack.i.h.bf16 %v11118_v54  ;;  %v11119_v59 = vunpack.i.l.bf16 %v11118_v54  ;;  %v11125_v58 = vunpack.i.h.bf16 %v11123_v50 }
 0x409   : > { %v11124_v55 = vunpack.i.l.bf16 %v11123_v50  ;;  %v4159_v40 = vrot.slane %v4114_v53, 1  ;;  %v4288_v50 = vld [vmem:[%s15573_s4 + $0x60] sm:$0xff] }
 0x40a   : > { %v4111_v62 = vmax.f32 %v4066_v14, %v11120_v57  ;;  %v4098_v63 = vsel %vm4097_vm4, %v11119_v59, %v11120_v57  ;;  %v4143_v0 = vmax.f32 %v4121_v16, %v11125_v58  ;;  %v4162_v2 = vsel %vm4152_vm5, %v4157_v45, %v4161_v56  ;;  %v4283_v45 = vld [vmem:[%s15573_s4 + $0x38] sm:$0xff]  ;;  %v4290_v59 = vld [vmem:[%s15573_s4 + $0x70] sm:$0xff] }
 0x40b   : > { %v4135_v1 = vsel %vm4097_vm4, %v11124_v55, %v11125_v58  ;;  %v11128_v3 = vpop.permute.xlu1 %11127  ;;  %v4178_v41 = vmax.f32 %v4113_v34, %v4162_v2  ;;  %v4110_v4 = vmax.f32 %v13530_v23, %v4098_v63  ;;  %v4160_v5 = vsel %vm4152_vm5, %v4154_v46, %v4159_v40  ;;  %v4278_v34 = vld [vmem:[%s15573_s4 + $0x10] sm:$0xff]  ;;  %v4291_v58 = vld [vmem:[%s15573_s4 + $0x78] sm:$0xff]  ;;  %v4296_v2 = vld [vmem:[%s15573_s4 + $0xa0] sm:$0x3] }
 0x40c   : > { %v4165_v6 = vrot.slane %v4143_v0, 1  ;;  %v4142_v7 = vmax.f32 %v13542_v15, %v4135_v1  ;;  %v11130_v8 = vunpack.i.h.bf16 %v11128_v3  ;;  %v11129_v42 = vunpack.i.l.bf16 %v11128_v3  ;;  %v4295_v63 = vld [vmem:[%s15573_s4 + $0x98] sm:$0xff] }
 0x40d   : > { %v4176_v9 = vmax.f32 %v4111_v62, %v4158_v60  ;;  %v4175_v10 = vmax.f32 %v4110_v4, %v4155_v61  ;;  %v4177_v11 = vmax.f32 %v4112_v19, %v4160_v5  ;;  %v10134_v37 = vpack.c.bf16 %v4279_v35, %v4278_v34  ;;  %v4281_v19 = vld [vmem:[%s15573_s4 + $0x28] sm:$0xff]  ;;  %v4292_v60 = vld [vmem:[%s15573_s4 + $0x80] sm:$0xff]  ;;  %v4294_v62 = vld [vmem:[%s15573_s4 + $0x90] sm:$0xff] }
 0x40e   : > { %v4166_v43 = vsel %vm4152_vm5, %v4161_v56, %v4165_v6  ;;  %v4163_v13 = vrot.slane %v4142_v7, 1  ;;  %v4117_v14 = vmax.f32 %v4072_v24, %v11130_v8  ;;  %v4101_v16 = vsel %vm4097_vm4, %v11129_v42, %v11130_v8  ;;  %v4289_v56 = vld [vmem:[%s15573_s4 + $0x68] sm:$0xff]  ;;  %v8824_v7 = vld [vmem:[%s15574_s5 + $0x80] sm:$0xff]  ;;  %v8826_v42 = vld [vmem:[%s15574_s5 + $0x90] sm:$0xff] }
 0x40f   : > { %v4116_v17 = vmax.f32 %v13546_v21, %v4101_v16  ;;  %v10120_v18 = vpack.c.bf16 %v4178_v41, %v4176_v9  ;;  %v10122_v23 = vpack.c.bf16 %v4177_v11, %v4175_v10  ;;  %v4180_v25 = vmax.f32 %v4115_v48, %v4166_v43  ;;  %v4276_v21 = vld [vmem:[%s15573_s4] sm:$0xff]  ;;  %v4293_v61 = vld [vmem:[%s15573_s4 + $0x88] sm:$0xff]  ;;  %v8831_v10 = vld [vmem:[%s15574_s5 + $0xb8] sm:$0xff] }
 0x410   : > { %v4182_v27 = vmax.f32 %v4117_v14, %v4165_v6  ;;  %v4164_v28 = vsel %vm4152_vm5, %v4159_v40, %v4163_v13  ;;  %v10131_v33 = vpack.c.bf16 %v4277_v31, %v4276_v21  ;;  %v10137_v39 = vpack.c.bf16 %v4281_v19, %v4280_v38  ;;  %v4284_v48 = vld [vmem:[%s15573_s4 + $0x40] sm:$0xff]  ;;  %v8825_v5 = vld [vmem:[%s15574_s5 + $0x88] sm:$0xff]  ;;  %v8827_v6 = vld [vmem:[%s15574_s5 + $0x98] sm:$0xff] }
 0x411   : > { %v4181_v15 = vmax.f32 %v4116_v17, %v4163_v13  ;;  %10121 = vmatprep.subr.bf16.mxu1 %v10120_v18  ;;  %v4179_v29 = vmax.f32 %v4114_v53, %v4164_v28  ;;  %v10140_v46 = vpack.c.bf16 %v4283_v45, %v4282_v44  ;;  %v10143_v52 = vpack.c.bf16 %v4285_v51, %v4284_v48  ;;  %v4287_v53 = vld [vmem:[%s15573_s4 + $0x58] sm:$0xff]  ;;  %v8829_v9 = vld [vmem:[%s15574_s5 + $0xa8] sm:$0xff]  ;;  %v8828_v13 = vld [vmem:[%s15574_s5 + $0xa0] sm:$0xff] }
 0x412   : > { %10123 = vmatpush1.bf16.msra.mxu1 %v10122_v23  ;;  %v10124_v30 = vpack.c.bf16 %v4182_v27, %v4180_v25  ;;  %v10146_v54 = vpack.c.bf16 %v4287_v53, %v4286_v20  ;;  %v10149_v57 = vpack.c.bf16 %v4289_v56, %v4288_v50  ;;  %v10152_v55 = vpack.c.bf16 %v4291_v58, %v4290_v59  ;;  %v8830_v14 = vld [vmem:[%s15574_s5 + $0xb0] sm:$0xff]  ;;  %v8833_v16 = vld [vmem:[%s15574_s5 + $0xc8] sm:$0xff]  ;;  %v8835_v17 = vld [vmem:[%s15574_s5 + $0xd8] sm:$0xff] }
 0x413   : > { %v10127_v24 = vpack.c.bf16 %v4181_v15, %v4179_v29  ;;  %v10155_v40 = vpack.c.bf16 %v4293_v61, %v4292_v60  ;;  %v10158_v0 = vpack.c.bf16 %v4295_v63, %v4294_v62  ;;  %v10160_v8 = vpack.c.bf16 %v8827_v6, %v8825_v5  ;;  %v8832_v25 = vld [vmem:[%s15574_s5 + $0xc0] sm:$0xff]  ;;  %v8834_v27 = vld [vmem:[%s15574_s5 + $0xd0] sm:$0xff]  ;;  %v8837_v28 = vld [vmem:[%s15574_s5 + $0xe8] sm:$0xff] }
 0x414   : > { %10126 = vmatprep.subr.msk.bf16.mxu1 %vm10125_vm8, %v10124_v30  ;;  %v10162_v11 = vpack.c.bf16 %v8826_v42, %v8824_v7  ;;  %v10164_v43 = vpack.c.bf16 %v8831_v10, %v8829_v9  ;;  %v10166_v18 = vpack.c.bf16 %v8830_v14, %v8828_v13  ;;  %v10168_v23 = vpack.c.bf16 %v8835_v17, %v8833_v16  ;;  %v8839_v15 = vld [vmem:[%s15574_s5 + $0xf8] sm:$0xf]  ;;  %v8838_v21 = vld [vmem:[%s15574_s5 + $0xf0] sm:$0xf]  ;;  %v4388_v50 = vld [vmem:[%s15574_s5] sm:$0xff] }
 0x415   : > { %v10170_v29 = vpack.c.bf16 %v8834_v27, %v8832_v25  ;;  %v10172_v30 = vpack.c.bf16 %v8839_v15, %v8837_v28  ;;  %v4390_v56 = vld [vmem:[%s15574_s5 + $0x10] sm:$0xff]  ;;  %v4395_v59 = vld [vmem:[%s15574_s5 + $0x38] sm:$0xff]  ;;  %v4392_v60 = vld [vmem:[%s15574_s5 + $0x20] sm:$0xff]  ;;  %vm7280_vm4 = vcmask 1040384  }
 0x416   : > { %10129 = vmatpush1.bf16.msk.msra.mxu1 %vm10125_vm8, %v10127_v24  ;;  %v8836_v24 = vld [vmem:[%s15574_s5 + $0xe0] sm:$0xff]  ;;  %v10180_v58 = vpack.c.bf16 %v4390_v56, %v4388_v50  ;;  %v4394_v61 = vld [vmem:[%s15574_s5 + $0x30] sm:$0xff]  ;;  %v4397_v62 = vld [vmem:[%s15574_s5 + $0x48] sm:$0xff]  ;;  %vm11241_vm8 = vmmov 0  }
 0x417   : > { %10130 = vmatprep.subr.bf16.mxu1 %v11236_v26  ;;  %v10175_v34 = vpack.c.bf16 %v8838_v21, %v8836_v24  ;;  %v4399_v63 = vld [vmem:[%s15574_s5 + $0x58] sm:$0xff]  ;;  %v4402_v42 = vld [vmem:[%s15574_s5 + $0x70] sm:$0xf]  ;;  %v8849_v9 = vld [vmem:[%s15574_s5 + $0x108] sm:$0xff]  ;;  %9592 = vmatprep.mubr.msk.f32.mxu0 %vm11241_vm8, %v11231_v12 }
 0x418   : > { %v4403_v5 = vld [vmem:[%s15574_s5 + $0x78] sm:$0xf]  ;;  %v8848_v13 = vld [vmem:[%s15574_s5 + $0x100] sm:$0xff]  ;;  %v8850_v14 = vld [vmem:[%s15574_s5 + $0x110] sm:$0xff] }
 0x419   : > { %8819 = vmatmul.mubr.msk.f32.vlgmr.msra.gmra.mrb[0].mxu1 %vm4185_vm9, %v4183_v32  ;;  %v4389_v32 = vld [vmem:[%s15574_s5 + $0x8] sm:$0xff]  ;;  %v8851_v10 = vld [vmem:[%s15574_s5 + $0x118] sm:$0xff]  ;;  %v8852_v25 = vld [vmem:[%s15574_s5 + $0x120] sm:$0xff] }
 0x41a   : > { %4269 = vmatprep.mubr.f32.mxu1 %v11231_v12  ;;  %10132 = vmatpush1.bf16.msra.mxu1 %v10131_v33  ;;  %v4391_v33 = vld [vmem:[%s15574_s5 + $0x18] sm:$0xff]  ;;  %v8853_v16 = vld [vmem:[%s15574_s5 + $0x128] sm:$0xff]  ;;  %v8854_v27 = vld [vmem:[%s15574_s5 + $0x130] sm:$0xff] }
 0x41b   : > { %10133 = vmatprep.subr.bf16.mxu1 %v11236_v26  ;;  %v10178_v35 = vpack.c.bf16 %v4391_v33, %v4389_v32  ;;  %v8855_v17 = vld [vmem:[%s15574_s5 + $0x138] sm:$0xff]  ;;  %v8857_v28 = vld [vmem:[%s15574_s5 + $0x148] sm:$0xff]  ;;  %v8856_v24 = vld [vmem:[%s15574_s5 + $0x140] sm:$0xff] }
 0x41c   : > { %v8859_v15 = vld [vmem:[%s15574_s5 + $0x158] sm:$0xff]  ;;  %v8858_v21 = vld [vmem:[%s15574_s5 + $0x150] sm:$0xff]  ;;  %v8861_v32 = vld [vmem:[%s15574_s5 + $0x168] sm:$0xff] }
 0x41d   : > { %8820 = vmatmul.mubr.msk.f32.gmra.mrb[2].mxu1 %vm4185_vm9, %v4184_v36  ;;  %v8863_v33 = vld [vmem:[%s15574_s5 + $0x178] sm:$0xf]  ;;  %vm10611_vm6 = vmpackc.low %vm7280_vm4, %vm11237_vm7  ;;  %vm7376_vm7 = vcmask 130048   ;;  %vm7450_vm9 = vcmask 651264  }
 0x41e   : > { %10135 = vmatpush1.bf16.msra.mxu1 %v10134_v37 }
 0x41f   : > { %10136 = vmatprep.subr.bf16.mxu1 %v11236_v26 }
 0x422   : > { %10138 = vmatpush1.bf16.msra.mxu1 %v10137_v39 }
 0x423   : > { %10139 = vmatprep.subr.bf16.mxu1 %v11236_v26 }
 0x426   : > { %10141 = vmatpush1.bf16.msra.mxu1 %v10140_v46 }
 0x427   : > { %10142 = vmatprep.subr.bf16.mxu1 %v11236_v26 }
 0x42a   : > { %10144 = vmatpush1.bf16.msra.mxu1 %v10143_v52 }
 0x42b   : > { %10145 = vmatprep.subr.bf16.mxu1 %v11236_v26 }
 0x42e   : > { %10147 = vmatpush1.bf16.msra.mxu1 %v10146_v54 }
 0x42f   : > { %10148 = vmatprep.subr.bf16.mxu1 %v11236_v26 }
 0x432   : > { %10150 = vmatpush1.bf16.msra.mxu1 %v10149_v57  ;;  %v4393_v57 = vld [vmem:[%s15574_s5 + $0x28] sm:$0xff] }
 0x433   : > { %10151 = vmatprep.subr.bf16.mxu1 %v11236_v26 }
 0x436   : > { %10153 = vmatpush1.bf16.msra.mxu1 %v10152_v55  ;;  %v10182_v55 = vpack.c.bf16 %v4395_v59, %v4393_v57  ;;  %v8872_v57 = vld [vmem:[%s15574_s5 + $0x1a0] sm:$0xff]  ;;  %v8874_v59 = vld [vmem:[%s15574_s5 + $0x1b0] sm:$0xff] }
 0x437   : > { %10154 = vmatprep.subr.bf16.mxu1 %v11236_v26 }
 0x43a   : > { %10156 = vmatpush1.bf16.msra.mxu1 %v10155_v40 }
 0x43b   : > { %10157 = vmatprep.subr.bf16.mxu1 %v11236_v26 }
 0x43e   : > { %10159 = vmatpush1.bf16.msra.mxu1 %v10158_v0  ;;  %v10184_v0 = vpack.c.bf16 %v4394_v61, %v4392_v60  ;;  %v8879_v60 = vld [vmem:[%s15574_s5 + $0x1d8] sm:$0xff]  ;;  %v10220_v61 = vpack.c.bf16 %v8874_v59, %v8872_v57  ;;  %v8917_v59 = vld [vmem:[%s15574_s5 + $0x2c8] sm:$0xff] }
 0x43f   : > { %4348 = vmatprep.subr.mxu1 %v11231_v12 }
 0x442   : > { %8821 = vmatpush1.msk.msra.mxu1 %vm4304_vm10, %v4296_v2  ;;  %v10186_v2 = vpack.c.bf16 %v4399_v63, %v4397_v62  ;;  %v8876_v62 = vld [vmem:[%s15574_s5 + $0x1c0] sm:$0xff]  ;;  %v8878_v63 = vld [vmem:[%s15574_s5 + $0x1d0] sm:$0xff]  ;;  %vm7464_vm10 = vcmask 654336  }
 0x443   : > { %10161 = vmatprep.subr.bf16.mxu1 %v10160_v8  ;;  %v4400_v8 = vld [vmem:[%s15574_s5 + $0x60] sm:$0xff] }
 0x4ec   : > { %v4265_v1 = vpop.f32.mrb[0].mxu1 }
 0x4ed   : > { %v4267_v3 = vpop.f32.mrb[1].mxu1 }
 0x4ee   : > { %8822 = vmatprep.mubr.msk.f32.mxu1 %vm4297_vm11, %v4267_v3  ;;  %v4398_v3 = vld [vmem:[%s15574_s5 + $0x50] sm:$0xff] }
 0x4ef   : > { %4373 = vmatmul.mubr.f32.vlgmr.msra.gmra.mrb[4].mxu1 %v4265_v1  ;;  %v4396_v1 = vld [vmem:[%s15574_s5 + $0x40] sm:$0xff] }
 0x4f0   : > { %v4271_v41 = vpop.f32.mrb[2].mxu1  ;;  %10163 = vmatpush1.bf16.msra.mxu1 %v10162_v11  ;;  %v10188_v6 = vpack.c.bf16 %v4398_v3, %v4396_v1  ;;  %v10193_v11 = vpack.c.bf16 %v4402_v42, %v4400_v8  ;;  %v8883_v1 = vld [vmem:[%s15574_s5 + $0x1f8] sm:$0xf]  ;;  %v10224_v3 = vpack.c.bf16 %v8878_v63, %v8876_v62  ;;  %v8921_v63 = vld [vmem:[%s15574_s5 + $0x2e8] sm:$0xff] }
 0x4f1   : > { %v4273_v4 = vpop.f32.mrb[3].mxu1  ;;  %10165 = vmatprep.subr.bf16.mxu1 %v10164_v43  ;;  %v10196_v43 = vpack.c.bf16 %v8851_v10, %v8849_v9  ;;  %v8888_v9 = vld [vmem:[%s15574_s5 + $0x200] sm:$0xff]  ;;  %v8890_v10 = vld [vmem:[%s15574_s5 + $0x210] sm:$0xff] }
 0x4f2   : > { %8823 = vmatprep.mubr.msk.f32.mxu1 %vm4297_vm11, %v4273_v4  ;;  %v4401_v4 = vld [vmem:[%s15574_s5 + $0x68] sm:$0xff]  ;;  %vm7900_vm11 = vcmask 982016  }
 0x4f3   : > { %4378 = vmatmul.mubr.f32.gmra.mrb[6].mxu1 %v4271_v41  ;;  %v10190_v7 = vpack.c.bf16 %v4403_v5, %v4401_v4  ;;  %v8880_v4 = vld [vmem:[%s15574_s5 + $0x1e0] sm:$0xff]  ;;  %v8882_v5 = vld [vmem:[%s15574_s5 + $0x1f0] sm:$0xf] }
 0x4f4   : > { %4502 = vmatprep.mubr.f32.mxu1 %v11231_v12  ;;  %10167 = vmatpush1.bf16.msra.mxu1 %v10166_v18  ;;  %v10198_v18 = vpack.c.bf16 %v8850_v14, %v8848_v13  ;;  %v10229_v8 = vpack.c.bf16 %v8882_v5, %v8880_v4  ;;  %v10234_v13 = vpack.c.bf16 %v8890_v10, %v8888_v9  ;;  %v8929_v4 = vld [vmem:[%s15574_s5 + $0x308] sm:$0xff]  ;;  %v8931_v5 = vld [vmem:[%s15574_s5 + $0x318] sm:$0xff] }
 0x4f5   : > { %10169 = vmatprep.subr.bf16.mxu1 %v10168_v23  ;;  %v10200_v23 = vpack.c.bf16 %v8855_v17, %v8853_v16  ;;  %v8892_v16 = vld [vmem:[%s15574_s5 + $0x220] sm:$0xff]  ;;  %v8894_v17 = vld [vmem:[%s15574_s5 + $0x230] sm:$0xff]  ;;  %v8933_v9 = vld [vmem:[%s15574_s5 + $0x328] sm:$0xff] }
 0x4f6   : > { %v8935_v10 = vld [vmem:[%s15574_s5 + $0x338] sm:$0xff] }
 0x4f8   : > { %10171 = vmatpush1.bf16.msra.mxu1 %v10170_v29  ;;  %v10202_v29 = vpack.c.bf16 %v8854_v27, %v8852_v25  ;;  %v8899_v25 = vld [vmem:[%s15574_s5 + $0x258] sm:$0xff]  ;;  %v10238_v27 = vpack.c.bf16 %v8894_v17, %v8892_v16  ;;  %v8937_v16 = vld [vmem:[%s15574_s5 + $0x348] sm:$0xff] }
 0x4f9   : > { %10174 = vmatprep.subr.msk.bf16.mxu1 %vm13702_vm12, %v10172_v30  ;;  %v10204_v30 = vpack.c.bf16 %v8859_v15, %v8857_v28  ;;  %v8896_v15 = vld [vmem:[%s15574_s5 + $0x240] sm:$0xff]  ;;  %v8939_v17 = vld [vmem:[%s15574_s5 + $0x358] sm:$0xff] }
 0x4fc   : > { %10177 = vmatpush1.bf16.msk.msra.mxu1 %vm13702_vm12, %v10175_v34  ;;  %v10206_v34 = vpack.c.bf16 %v8858_v21, %v8856_v24  ;;  %v8901_v24 = vld [vmem:[%s15574_s5 + $0x268] sm:$0xff]  ;;  %v8903_v21 = vld [vmem:[%s15574_s5 + $0x278] sm:$0xf] }
 0x4fd   : > { %10179 = vmatprep.subr.bf16.mxu1 %v10178_v35  ;;  %v10208_v35 = vpack.c.bf16 %v8863_v33, %v8861_v32  ;;  %v10244_v33 = vpack.c.bf16 %v8903_v21, %v8901_v24  ;;  %v8942_v24 = vld [vmem:[%s15574_s5 + $0x370] sm:$0xf]  ;;  %v8949_v21 = vld [vmem:[%s15574_s5 + $0x388] sm:$0xff] }
 0x5c2   : > { %v4374_v36 = vpop.f32.mrb[4].mxu1 }
 0x5c3   : > { %4383 = vst.msk [vmem:[#allocation3] sm:$0xff] %vm553_vm1, %v4374_v36  ;;  %v4376_v37 = vpop.f32.mrb[5].mxu1  ;;  %v8860_v36 = vld [vmem:[%s15574_s5 + $0x160] sm:$0xff] }
 0x5c4   : > { %v8862_v37 = vld [vmem:[%s15574_s5 + $0x170] sm:$0xf] }
 0x5c6   : > { %v4379_v38 = vpop.f32.mrb[6].mxu1 }
 0x5c7   : > { %4385 = vst.msk [vmem:[#allocation3 + $0x8] sm:$0x3f] %vm4384_vm13, %v4379_v38  ;;  %v4381_v19 = vpop.f32.mrb[7].mxu1  ;;  %v8869_v38 = vld [vmem:[%s15574_s5 + $0x188] sm:$0xff] }
 0x5c8   : > { %v8871_v19 = vld [vmem:[%s15574_s5 + $0x198] sm:$0xff] }
 0x5ca   : > { %v13717_v39 = vld [vmem:[#allocation3] sm:$0xff] }
 0x5cb   : > { %4423 = vrot.lane.b32.xlu0 %v13717_v39, %s15616_s0 }
 0x5ce   : > { %v13721_v44 = vld [vmem:[#allocation3 + $0x8] sm:$0x3]  ;;  %v13761_v51 = vld [vmem:[#allocation3 + $0xa] sm:$0x3]  ;;  %v6619_v54 = vld [vmem:[#allocation3 + $0xc] sm:$0x3] }
 0x5cf   : > { %4619 = vrot.lane.b32.xlu0 %v13717_v39, %s15618_s18  ;;  %4425 = vrot.lane.b32.xlu1 %v13721_v44, %s15616_s0  ;;  %v13735_v45 = vld [vmem:[#allocation3 + $0x1] sm:$0xff]  ;;  %v13741_v46 = vld [vmem:[#allocation3 + $0x9] sm:$0x3]  ;;  %v6059_v20 = vld [vmem:[#allocation3 + $0xb] sm:$0x3] }
 0x5d0   : > { %v13755_v48 = vld [vmem:[#allocation3 + $0x2] sm:$0xff] }
 0x5d1   : > { %v6058_v52 = vld [vmem:[#allocation3 + $0x3] sm:$0xff] }
 0x5d2   : > { %v6618_v53 = vld [vmem:[#allocation3 + $0x4] sm:$0xff] }
 0x5d3   : > { %4731 = vrot.lane.b32.xlu0 %v13717_v39, %s11238_s20  ;;  %4621 = vrot.lane.b32.xlu1 %v13721_v44, %s15618_s18 }
 0x5d7   : > { %4843 = vrot.lane.b32.xlu0 %v13717_v39, %s11239_s30  ;;  %4733 = vrot.lane.b32.xlu1 %v13721_v44, %s11238_s20 }
 0x5db   : > { %5067 = vrot.lane.b32.xlu0 %v13735_v45, %s15616_s0  ;;  %4845 = vrot.lane.b32.xlu1 %v13721_v44, %s11239_s30 }
 0x5df   : > { %5179 = vrot.lane.b32.xlu0 %v13735_v45, %s15618_s18  ;;  %5069 = vrot.lane.b32.xlu1 %v13741_v46, %s15616_s0 }
 0x5e3   : > { %5291 = vrot.lane.b32.xlu0 %v13735_v45, %s11238_s20  ;;  %5181 = vrot.lane.b32.xlu1 %v13741_v46, %s15618_s18 }
 0x5e7   : > { %5403 = vrot.lane.b32.xlu0 %v13735_v45, %s11239_s30  ;;  %5293 = vrot.lane.b32.xlu1 %v13741_v46, %s11238_s20 }
 0x5eb   : > { %5627 = vrot.lane.b32.xlu0 %v13755_v48, %s15616_s0  ;;  %5405 = vrot.lane.b32.xlu1 %v13741_v46, %s11239_s30 }
 0x5ef   : > { %5739 = vrot.lane.b32.xlu0 %v13755_v48, %s15618_s18  ;;  %5629 = vrot.lane.b32.xlu1 %v13761_v51, %s15616_s0 }
 0x5f3   : > { %5851 = vrot.lane.b32.xlu0 %v13755_v48, %s11238_s20  ;;  %5741 = vrot.lane.b32.xlu1 %v13761_v51, %s15618_s18 }
 0x5f7   : > { %5963 = vrot.lane.b32.xlu0 %v13755_v48, %s11239_s30  ;;  %5853 = vrot.lane.b32.xlu1 %v13761_v51, %s11238_s20 }
 0x5fb   : > { %6187 = vrot.lane.b32.xlu0 %v6058_v52, %s15616_s0  ;;  %5965 = vrot.lane.b32.xlu1 %v13761_v51, %s11239_s30 }
 0x5ff   : > { %6299 = vrot.lane.b32.xlu0 %v6058_v52, %s15618_s18  ;;  %6189 = vrot.lane.b32.xlu1 %v6059_v20, %s15616_s0 }
 0x603   : > { %6411 = vrot.lane.b32.xlu0 %v6058_v52, %s11238_s20  ;;  %6301 = vrot.lane.b32.xlu1 %v6059_v20, %s15618_s18 }
 0x607   : > { %6523 = vrot.lane.b32.xlu0 %v6058_v52, %s11239_s30  ;;  %6413 = vrot.lane.b32.xlu1 %v6059_v20, %s11238_s20  ;;  %v8868_v52 = vld [vmem:[%s15574_s5 + $0x180] sm:$0xff] }
 0x60b   : > { %6747 = vrot.lane.b32.xlu0 %v6618_v53, %s15616_s0  ;;  %6525 = vrot.lane.b32.xlu1 %v6059_v20, %s11239_s30  ;;  %v8870_v20 = vld [vmem:[%s15574_s5 + $0x190] sm:$0xff] }
 0x60c   : > { %v10216_v50 = vpack.c.bf16 %v8870_v20, %v8868_v52  ;;  %v8913_v52 = vld [vmem:[%s15574_s5 + $0x2a8] sm:$0xff]  ;;  %v8915_v20 = vld [vmem:[%s15574_s5 + $0x2b8] sm:$0xff] }
 0x60f   : > { %6859 = vrot.lane.b32.xlu0 %v6618_v53, %s15618_s18  ;;  %6749 = vrot.lane.b32.xlu1 %v6619_v54, %s15616_s0  ;;  %s15622_s0 = sld [smem:[#allocation17_spill]] }
 0x613   : > { %6971 = vrot.lane.b32.xlu0 %v6618_v53, %s11238_s20  ;;  %6861 = vrot.lane.b32.xlu1 %v6619_v54, %s15618_s18  ;;  %s486_s18 = scalar_lea.vmem [#allocation6], %s485_s15 }
 0x614   : > { %s8078_s17 = sshll.u32 %s486_s18, 4  ;;  %s15529_s17 = int_to_ptr.vmem [resolvable:$true] %s8078_s17 }
 0x615   : > { %p11174_p0 = scmp.lt.s32.totalorder %s15529_s17, %s11172_s16 }
 0x617   : > { %7083 = vrot.lane.b32.xlu0 %v6618_v53, %s11239_s30  ;;  %6973 = vrot.lane.b32.xlu1 %v6619_v54, %s11238_s20  ;;  %v8873_v53 = vld [vmem:[%s15574_s5 + $0x1a8] sm:$0xff]  ;;  %s11240_s20 = smov 112  }
 0x61b   : > { %7085 = vrot.lane.b32.xlu1 %v6619_v54, %s11239_s30  ;;  %v8875_v54 = vld [vmem:[%s15574_s5 + $0x1b8] sm:$0xff]  ;;  %s11167_s30 = scalar_lea.vmem %s15529_s17, 16 }
 0x61c   : > { %v10218_v56 = vpack.c.bf16 %v8875_v54, %v8873_v53  ;;  %v10254_v54 = vpack.c.bf16 %v8915_v20, %v8913_v52  ;;  %v8957_v20 = vld [vmem:[%s15574_s5 + $0x3c8] sm:$0xff]  ;;  %p11168_p11 = scmp.ne.s32.totalorder %s15529_s17, %s11167_s30  ;;  %p11175_p1 = scmp.lt.s32.totalorder %s11173_s24, %s11167_s30 }
 0x61e   : > { %p11169_p12 = pnand %p11168_p11, %p11361_p5  ;;  %p11176_p2 = por %p11175_p1, %p11174_p0 }
 0x620   : > { %p11170_p13 = pneg %p11169_p12 }
 0x622   : > { %p11177_p3 = pnand %p11176_p2, %p11170_p13 }
 0x63d   : > { %v4424_v40 = vpop.permute.xlu0 %4423 }
 0x63e   : > { %8842 = vmatmul.mubr.msk.f32.vlgmr.msra.gmra.mrb[8].mxu1 %vm4427_vm14, %v4424_v40 }
 0x63f   : > { %10181 = vmatpush1.bf16.msra.mxu1 %v10180_v58  ;;  %4508 = vmatprep.mubr.f32.mxu1 %v11231_v12 }
 0x640   : > { %10183 = vmatprep.subr.bf16.mxu1 %v10182_v55  ;;  %v8877_v55 = vld [vmem:[%s15574_s5 + $0x1c8] sm:$0xff] }
 0x641   : > { %v4426_v41 = vpop.permute.xlu1 %4425  ;;  %v4620_v58 = vpop.permute.xlu0 %4619  ;;  %v10222_v40 = vpack.c.bf16 %v8879_v60, %v8877_v55 }
 0x642   : > { %8843 = vmatmul.mubr.msk.f32.gmra.mrb[10].mxu1 %vm4427_vm14, %v4426_v41 }
 0x643   : > { %10185 = vmatpush1.bf16.msra.mxu1 %v10184_v0  ;;  %4589 = vmatprep.mubr.f32.mxu1 %v11231_v12 }
 0x644   : > { %10187 = vmatprep.subr.bf16.mxu1 %v10186_v2  ;;  %v8881_v2 = vld [vmem:[%s15574_s5 + $0x1e8] sm:$0xff] }
 0x645   : > { %v4622_v0 = vpop.permute.xlu1 %4621  ;;  %v10226_v41 = vpack.c.bf16 %v8883_v1, %v8881_v2 }
 0x647   : > { %10189 = vmatpush1.bf16.msra.mxu1 %v10188_v6  ;;  %v8889_v6 = vld [vmem:[%s15574_s5 + $0x208] sm:$0xff] }
 0x648   : > { %10192 = vmatprep.subr.msk.bf16.mxu1 %vm13702_vm12, %v10190_v7  ;;  %v8891_v7 = vld [vmem:[%s15574_s5 + $0x218] sm:$0xff] }
 0x649   : > { %v10232_v42 = vpack.c.bf16 %v8891_v7, %v8889_v6  ;;  %v10268_v7 = vpack.c.bf16 %v8931_v5, %v8929_v4  ;;  %v8973_v4 = vld [vmem:[%s15574_s5 + $0x428] sm:$0xff]  ;;  %v8975_v5 = vld [vmem:[%s15574_s5 + $0x438] sm:$0xff] }
 0x64b   : > { %10195 = vmatpush1.bf16.msk.msra.mxu1 %vm13702_vm12, %v10193_v11  ;;  %v8893_v11 = vld [vmem:[%s15574_s5 + $0x228] sm:$0xff] }
 0x64c   : > { %10197 = vmatprep.subr.bf16.mxu1 %v10196_v43  ;;  %v8895_v43 = vld [vmem:[%s15574_s5 + $0x238] sm:$0xff] }
 0x64d   : > { %v10236_v14 = vpack.c.bf16 %v8895_v43, %v8893_v11  ;;  %v10272_v43 = vpack.c.bf16 %v8935_v10, %v8933_v9  ;;  %v8977_v10 = vld [vmem:[%s15574_s5 + $0x448] sm:$0xff] }
 0x64e   : > { %8846 = vmatmul.mubr.msk.f32.vlgmr.msra.gmra.mrb[8].mxu1 %vm4427_vm14, %v13717_v39  ;;  %v10211_v39 = vpack.c.bf16 %v8862_v37, %v8860_v36  ;;  %v8909_v36 = vld [vmem:[%s15574_s5 + $0x288] sm:$0xff]  ;;  %v8911_v37 = vld [vmem:[%s15574_s5 + $0x298] sm:$0xff] }
 0x64f   : > { %10199 = vmatpush1.bf16.msra.mxu1 %v10198_v18  ;;  %4595 = vmatprep.mubr.f32.mxu1 %v11231_v12  ;;  %v4732_v18 = vpop.permute.xlu0 %4731 }
 0x650   : > { %10201 = vmatprep.subr.bf16.mxu1 %v10200_v23  ;;  %v8897_v23 = vld [vmem:[%s15574_s5 + $0x248] sm:$0xff] }
 0x651   : > { %v10240_v28 = vpack.c.bf16 %v8899_v25, %v8897_v23  ;;  %v10276_v23 = vpack.c.bf16 %v8939_v17, %v8937_v16  ;;  %v8936_v25 = vld [vmem:[%s15574_s5 + $0x340] sm:$0xff]  ;;  %v8978_v16 = vld [vmem:[%s15574_s5 + $0x450] sm:$0xff] }
 0x652   : > { %8847 = vmatmul.mubr.msk.f32.gmra.mrb[10].mxu1 %vm4427_vm14, %v13721_v44  ;;  %v10214_v44 = vpack.c.bf16 %v8871_v19, %v8869_v38  ;;  %v10250_v19 = vpack.c.bf16 %v8911_v37, %v8909_v36  ;;  %v8953_v36 = vld [vmem:[%s15574_s5 + $0x3a8] sm:$0xff]  ;;  %v8955_v37 = vld [vmem:[%s15574_s5 + $0x3b8] sm:$0xff] }
 0x653   : > { %10203 = vmatpush1.bf16.msra.mxu1 %v10202_v29  ;;  %4697 = vmatprep.mubr.f32.mxu1 %v11231_v12  ;;  %v8898_v29 = vld [vmem:[%s15574_s5 + $0x250] sm:$0xff]  ;;  %v4844_v57 = vpop.permute.xlu0 %4843 }
 0x654   : > { %10205 = vmatprep.subr.bf16.mxu1 %v10204_v30  ;;  %v4734_v30 = vpop.permute.xlu1 %4733  ;;  %v10242_v32 = vpack.c.bf16 %v8898_v29, %v8896_v15 }
 0x657   : > { %10207 = vmatpush1.bf16.msra.mxu1 %v10206_v34  ;;  %v8900_v34 = vld [vmem:[%s15574_s5 + $0x260] sm:$0xff]  ;;  %v5068_v52 = vpop.permute.xlu0 %5067 }
 0x658   : > { %10210 = vmatprep.subr.msk.bf16.mxu1 %vm13702_vm12, %v10208_v35  ;;  %v8902_v35 = vld [vmem:[%s15574_s5 + $0x270] sm:$0xf]  ;;  %v4846_v62 = vpop.permute.xlu1 %4845 }
 0x659   : > { %v10247_v38 = vpack.c.bf16 %v8902_v35, %v8900_v34  ;;  %v8948_v34 = vld [vmem:[%s15574_s5 + $0x380] sm:$0xff]  ;;  %v8950_v35 = vld [vmem:[%s15574_s5 + $0x390] sm:$0xff] }
 0x65b   : > { %10213 = vmatpush1.bf16.msk.msra.mxu1 %vm13702_vm12, %v10211_v39  ;;  %v8908_v39 = vld [vmem:[%s15574_s5 + $0x280] sm:$0xff]  ;;  %v5180_v9 = vpop.permute.xlu0 %5179 }
 0x65c   : > { %10215 = vmatprep.subr.bf16.mxu1 %v10214_v44  ;;  %v8910_v44 = vld [vmem:[%s15574_s5 + $0x290] sm:$0xff] }
 0x65d   : > { %v10252_v53 = vpack.c.bf16 %v8910_v44, %v8908_v39  ;;  %v8952_v39 = vld [vmem:[%s15574_s5 + $0x3a0] sm:$0xff]  ;;  %v8954_v44 = vld [vmem:[%s15574_s5 + $0x3b0] sm:$0xff] }
 0x65e   : > { %8866 = vmatmul.mubr.msk.f32.vlgmr.msra.gmra.mrb[8].mxu1 %vm4427_vm14, %v4620_v58  ;;  %v8919_v58 = vld [vmem:[%s15574_s5 + $0x2d8] sm:$0xff] }
 0x65f   : > { %10217 = vmatpush1.bf16.msra.mxu1 %v10216_v50  ;;  %4703 = vmatprep.mubr.f32.mxu1 %v11231_v12  ;;  %v8912_v50 = vld [vmem:[%s15574_s5 + $0x2a0] sm:$0xff]  ;;  %v10258_v60 = vpack.c.bf16 %v8919_v58, %v8917_v59  ;;  %v5070_v59 = vpop.permute.xlu1 %5069  ;;  %v8961_v58 = vld [vmem:[%s15574_s5 + $0x3e8] sm:$0xff] }
 0x660   : > { %10219 = vmatprep.subr.bf16.mxu1 %v10218_v56  ;;  %v8914_v56 = vld [vmem:[%s15574_s5 + $0x2b0] sm:$0xff] }
 0x661   : > { %v10256_v55 = vpack.c.bf16 %v8914_v56, %v8912_v50  ;;  %v8956_v56 = vld [vmem:[%s15574_s5 + $0x3c0] sm:$0xff] }
 0x662   : > { %8867 = vmatmul.mubr.msk.f32.gmra.mrb[10].mxu1 %vm4427_vm14, %v4622_v0  ;;  %v8923_v0 = vld [vmem:[%s15574_s5 + $0x2f8] sm:$0xf] }
 0x663   : > { %10221 = vmatpush1.bf16.msra.mxu1 %v10220_v61  ;;  %4809 = vmatprep.mubr.f32.mxu1 %v11231_v12  ;;  %v8916_v61 = vld [vmem:[%s15574_s5 + $0x2c0] sm:$0xff]  ;;  %v10262_v1 = vpack.c.bf16 %v8923_v0, %v8921_v63  ;;  %v8969_v63 = vld [vmem:[%s15574_s5 + $0x408] sm:$0xff]  ;;  %v8971_v0 = vld [vmem:[%s15574_s5 + $0x418] sm:$0xff]  ;;  %v5182_v17 = vpop.permute.xlu1 %5181 }
 0x664   : > { %10223 = vmatprep.subr.bf16.mxu1 %v10222_v40  ;;  %v8918_v40 = vld [vmem:[%s15574_s5 + $0x2d0] sm:$0xff] }
 0x665   : > { %v10260_v2 = vpack.c.bf16 %v8918_v40, %v8916_v61  ;;  %v8960_v40 = vld [vmem:[%s15574_s5 + $0x3e0] sm:$0xff] }
 0x667   : > { %10225 = vmatpush1.bf16.msra.mxu1 %v10224_v3  ;;  %v8920_v3 = vld [vmem:[%s15574_s5 + $0x2e0] sm:$0xff] }
 0x668   : > { %10228 = vmatprep.subr.msk.bf16.mxu1 %vm13702_vm12, %v10226_v41  ;;  %v8922_v41 = vld [vmem:[%s15574_s5 + $0x2f0] sm:$0xf] }
 0x669   : > { %v10265_v6 = vpack.c.bf16 %v8922_v41, %v8920_v3  ;;  %v8968_v3 = vld [vmem:[%s15574_s5 + $0x400] sm:$0xff]  ;;  %v8970_v41 = vld [vmem:[%s15574_s5 + $0x410] sm:$0xff] }
 0x66b   : > { %10231 = vmatpush1.bf16.msk.msra.mxu1 %vm13702_vm12, %v10229_v8  ;;  %v8928_v8 = vld [vmem:[%s15574_s5 + $0x300] sm:$0xff] }
 0x66c   : > { %10233 = vmatprep.subr.bf16.mxu1 %v10232_v42  ;;  %v8930_v42 = vld [vmem:[%s15574_s5 + $0x310] sm:$0xff] }
 0x66d   : > { %v10270_v11 = vpack.c.bf16 %v8930_v42, %v8928_v8  ;;  %v8972_v8 = vld [vmem:[%s15574_s5 + $0x420] sm:$0xff]  ;;  %v8974_v42 = vld [vmem:[%s15574_s5 + $0x430] sm:$0xff] }
 0x66e   : > { %8886 = vmatmul.mubr.msk.f32.vlgmr.msra.gmra.mrb[8].mxu1 %vm4427_vm14, %v4732_v18 }
 0x66f   : > { %10235 = vmatpush1.bf16.msra.mxu1 %v10234_v13  ;;  %4815 = vmatprep.mubr.f32.mxu1 %v11231_v12  ;;  %v8932_v13 = vld [vmem:[%s15574_s5 + $0x320] sm:$0xff] }
 0x670   : > { %10237 = vmatprep.subr.bf16.mxu1 %v10236_v14  ;;  %v8934_v14 = vld [vmem:[%s15574_s5 + $0x330] sm:$0xff] }
 0x671   : > { %v10274_v18 = vpack.c.bf16 %v8934_v14, %v8932_v13  ;;  %v8976_v14 = vld [vmem:[%s15574_s5 + $0x440] sm:$0xff] }
 0x672   : > { %8887 = vmatmul.mubr.msk.f32.gmra.mrb[10].mxu1 %vm4427_vm14, %v4734_v30  ;;  %v8940_v30 = vld [vmem:[%s15574_s5 + $0x360] sm:$0xff] }
 0x673   : > { %10239 = vmatpush1.bf16.msra.mxu1 %v10238_v27  ;;  %4921 = vmatprep.mubr.f32.mxu1 %v11231_v12  ;;  %v8938_v27 = vld [vmem:[%s15574_s5 + $0x350] sm:$0xff] }
 0x674   : > { %10241 = vmatprep.subr.bf16.mxu1 %v10240_v28  ;;  %v8941_v28 = vld [vmem:[%s15574_s5 + $0x368] sm:$0xff]  ;;  %v10278_v15 = vpack.c.bf16 %v8938_v27, %v8936_v25  ;;  %v10314_v25 = vpack.c.bf16 %v8978_v16, %v8976_v14  ;;  %v9023_v14 = vld [vmem:[%s15574_s5 + $0x578] sm:$0xf] }
 0x677   : > { %10243 = vmatpush1.bf16.msra.mxu1 %v10242_v32  ;;  %v10283_v32 = vpack.c.bf16 %v8942_v24, %v8940_v30 }
 0x678   : > { %10246 = vmatprep.subr.msk.bf16.mxu1 %vm13702_vm12, %v10244_v33 }
 0x67b   : > { %10249 = vmatpush1.bf16.msk.msra.mxu1 %vm13702_vm12, %v10247_v38  ;;  %v10288_v38 = vpack.c.bf16 %v8950_v35, %v8948_v34 }
 0x67c   : > { %10251 = vmatprep.subr.bf16.mxu1 %v10250_v19  ;;  %v10290_v19 = vpack.c.bf16 %v8955_v37, %v8953_v36  ;;  %v8992_v36 = vld [vmem:[%s15574_s5 + $0x4a0] sm:$0xff]  ;;  %v8994_v37 = vld [vmem:[%s15574_s5 + $0x4b0] sm:$0xff] }
 0x67e   : > { %8906 = vmatmul.mubr.msk.f32.vlgmr.msra.gmra.mrb[8].mxu1 %vm4427_vm14, %v4844_v57  ;;  %v8958_v57 = vld [vmem:[%s15574_s5 + $0x3d0] sm:$0xff] }
 0x67f   : > { %10253 = vmatpush1.bf16.msra.mxu1 %v10252_v53  ;;  %4927 = vmatprep.mubr.f32.mxu1 %v11231_v12  ;;  %v8959_v53 = vld [vmem:[%s15574_s5 + $0x3d8] sm:$0xff] }
 0x680   : > { %10255 = vmatprep.subr.bf16.mxu1 %v10254_v54  ;;  %v10292_v54 = vpack.c.bf16 %v8954_v44, %v8952_v39  ;;  %v10294_v50 = vpack.c.bf16 %v8959_v53, %v8957_v20  ;;  %v8999_v39 = vld [vmem:[%s15574_s5 + $0x4d8] sm:$0xff]  ;;  %v10328_v44 = vpack.c.bf16 %v8994_v37, %v8992_v36  ;;  %v8996_v20 = vld [vmem:[%s15574_s5 + $0x4c0] sm:$0xff]  ;;  %v8998_v53 = vld [vmem:[%s15574_s5 + $0x4d0] sm:$0xff] }
 0x682   : > { %8907 = vmatmul.mubr.msk.f32.gmra.mrb[10].mxu1 %vm4427_vm14, %v4846_v62  ;;  %v8962_v62 = vld [vmem:[%s15574_s5 + $0x3f0] sm:$0xf] }
 0x683   : > { %10257 = vmatpush1.bf16.msra.mxu1 %v10256_v55  ;;  %5033 = vmatprep.mubr.f32.mxu1 %v11231_v12  ;;  %v8963_v55 = vld [vmem:[%s15574_s5 + $0x3f8] sm:$0xf] }
 0x684   : > { %10259 = vmatprep.subr.bf16.mxu1 %v10258_v60  ;;  %v10296_v60 = vpack.c.bf16 %v8958_v57, %v8956_v56  ;;  %v10298_v61 = vpack.c.bf16 %v8963_v55, %v8961_v58  ;;  %v9003_v56 = vld [vmem:[%s15574_s5 + $0x4f8] sm:$0xf]  ;;  %v10332_v57 = vpack.c.bf16 %v8998_v53, %v8996_v20  ;;  %v9000_v58 = vld [vmem:[%s15574_s5 + $0x4e0] sm:$0xff]  ;;  %v9002_v55 = vld [vmem:[%s15574_s5 + $0x4f0] sm:$0xf] }
 0x685   : > { %v9040_v20 = vld [vmem:[%s15574_s5 + $0x5e0] sm:$0xff]  ;;  %v9042_v53 = vld [vmem:[%s15574_s5 + $0x5f0] sm:$0xf] }
 0x687   : > { %10261 = vmatpush1.bf16.msra.mxu1 %v10260_v2  ;;  %v10301_v2 = vpack.c.bf16 %v8962_v62, %v8960_v40  ;;  %v10337_v40 = vpack.c.bf16 %v9002_v55, %v9000_v58  ;;  %v9053_v58 = vld [vmem:[%s15574_s5 + $0x628] sm:$0xff]  ;;  %v9055_v55 = vld [vmem:[%s15574_s5 + $0x638] sm:$0xff] }
 0x688   : > { %10264 = vmatprep.subr.msk.bf16.mxu1 %vm13702_vm12, %v10262_v1  ;;  %v10304_v1 = vpack.c.bf16 %v8971_v0, %v8969_v63  ;;  %v9008_v63 = vld [vmem:[%s15574_s5 + $0x500] sm:$0xff]  ;;  %v9010_v0 = vld [vmem:[%s15574_s5 + $0x510] sm:$0xff] }
 0x68b   : > { %10267 = vmatpush1.bf16.msk.msra.mxu1 %vm13702_vm12, %v10265_v6  ;;  %v10306_v6 = vpack.c.bf16 %v8970_v41, %v8968_v3  ;;  %v10342_v3 = vpack.c.bf16 %v9010_v0, %v9008_v63  ;;  %v9057_v0 = vld [vmem:[%s15574_s5 + $0x648] sm:$0xff] }
 0x68c   : > { %10269 = vmatprep.subr.bf16.mxu1 %v10268_v7  ;;  %v10308_v7 = vpack.c.bf16 %v8975_v5, %v8973_v4  ;;  %v9012_v4 = vld [vmem:[%s15574_s5 + $0x520] sm:$0xff]  ;;  %v9014_v5 = vld [vmem:[%s15574_s5 + $0x530] sm:$0xff] }
 0x68e   : > { %8926 = vmatmul.mubr.msk.f32.vlgmr.msra.gmra.mrb[8].mxu1 %vm4427_vm14, %v13735_v45  ;;  %v8943_v45 = vld [vmem:[%s15574_s5 + $0x378] sm:$0xf] }
 0x68f   : > { %10271 = vmatpush1.bf16.msra.mxu1 %v10270_v11  ;;  %5039 = vmatprep.mubr.f32.mxu1 %v11231_v12  ;;  %v10280_v29 = vpack.c.bf16 %v8943_v45, %v8941_v28  ;;  %v8979_v11 = vld [vmem:[%s15574_s5 + $0x458] sm:$0xff]  ;;  %v8980_v28 = vld [vmem:[%s15574_s5 + $0x460] sm:$0xff]  ;;  %v8982_v45 = vld [vmem:[%s15574_s5 + $0x470] sm:$0xf] }
 0x690   : > { %10273 = vmatprep.subr.bf16.mxu1 %v10272_v43  ;;  %v10310_v43 = vpack.c.bf16 %v8974_v42, %v8972_v8  ;;  %v10312_v13 = vpack.c.bf16 %v8979_v11, %v8977_v10  ;;  %v10319_v30 = vpack.c.bf16 %v8982_v45, %v8980_v28  ;;  %v9019_v8 = vld [vmem:[%s15574_s5 + $0x558] sm:$0xff]  ;;  %v10346_v42 = vpack.c.bf16 %v9014_v5, %v9012_v4  ;;  %v9016_v10 = vld [vmem:[%s15574_s5 + $0x540] sm:$0xff]  ;;  %v9018_v11 = vld [vmem:[%s15574_s5 + $0x550] sm:$0xff] }
 0x691   : > { %v10350_v16 = vpack.c.bf16 %v9018_v11, %v9016_v10  ;;  %v9058_v4 = vld [vmem:[%s15574_s5 + $0x650] sm:$0xff]  ;;  %v9069_v11 = vld [vmem:[%s15574_s5 + $0x688] sm:$0xff] }
 0x692   : > { %8927 = vmatmul.mubr.msk.f32.gmra.mrb[10].mxu1 %vm4427_vm14, %v13741_v46  ;;  %v8951_v46 = vld [vmem:[%s15574_s5 + $0x398] sm:$0xff]  ;;  %v9062_v10 = vld [vmem:[%s15574_s5 + $0x670] sm:$0xf] }
 0x693   : > { %10275 = vmatpush1.bf16.msra.mxu1 %v10274_v18  ;;  %5145 = vmatprep.mubr.f32.mxu1 %v11231_v12  ;;  %v10286_v33 = vpack.c.bf16 %v8951_v46, %v8949_v21  ;;  %v8981_v18 = vld [vmem:[%s15574_s5 + $0x468] sm:$0xff]  ;;  %v8988_v21 = vld [vmem:[%s15574_s5 + $0x480] sm:$0xff]  ;;  %v8990_v46 = vld [vmem:[%s15574_s5 + $0x490] sm:$0xff] }
 0x694   : > { %10277 = vmatprep.subr.bf16.mxu1 %v10276_v23  ;;  %v8983_v23 = vld [vmem:[%s15574_s5 + $0x478] sm:$0xf]  ;;  %v10324_v34 = vpack.c.bf16 %v8990_v46, %v8988_v21 }
 0x695   : > { %v10316_v27 = vpack.c.bf16 %v8983_v23, %v8981_v18  ;;  %v9020_v18 = vld [vmem:[%s15574_s5 + $0x560] sm:$0xff]  ;;  %v9022_v23 = vld [vmem:[%s15574_s5 + $0x570] sm:$0xf] }
 0x696   : > { %v10355_v28 = vpack.c.bf16 %v9022_v23, %v9020_v18  ;;  %v9073_v18 = vld [vmem:[%s15574_s5 + $0x6a8] sm:$0xff]  ;;  %v9075_v23 = vld [vmem:[%s15574_s5 + $0x6b8] sm:$0xff] }
 0x697   : > { %10279 = vmatpush1.bf16.msra.mxu1 %v10278_v15  ;;  %v8989_v15 = vld [vmem:[%s15574_s5 + $0x488] sm:$0xff] }
 0x698   : > { %10282 = vmatprep.subr.msk.bf16.mxu1 %vm13702_vm12, %v10280_v29  ;;  %v8991_v29 = vld [vmem:[%s15574_s5 + $0x498] sm:$0xff] }
 0x699   : > { %v10322_v24 = vpack.c.bf16 %v8991_v29, %v8989_v15  ;;  %v9028_v15 = vld [vmem:[%s15574_s5 + $0x580] sm:$0xff]  ;;  %v9030_v29 = vld [vmem:[%s15574_s5 + $0x590] sm:$0xff] }
 0x69a   : > { %v10360_v21 = vpack.c.bf16 %v9030_v29, %v9028_v15  ;;  %v9077_v29 = vld [vmem:[%s15574_s5 + $0x6c8] sm:$0xff] }
 0x69b   : > { %10285 = vmatpush1.bf16.msk.msra.mxu1 %vm13702_vm12, %v10283_v32  ;;  %v8993_v32 = vld [vmem:[%s15574_s5 + $0x4a8] sm:$0xff] }
 0x69c   : > { %10287 = vmatprep.subr.bf16.mxu1 %v10286_v33  ;;  %v8995_v33 = vld [vmem:[%s15574_s5 + $0x4b8] sm:$0xff] }
 0x69d   : > { %v10326_v35 = vpack.c.bf16 %v8995_v33, %v8993_v32  ;;  %v9032_v32 = vld [vmem:[%s15574_s5 + $0x5a0] sm:$0xff]  ;;  %v9034_v33 = vld [vmem:[%s15574_s5 + $0x5b0] sm:$0xff] }
 0x69e   : > { %8946 = vmatmul.mubr.msk.f32.vlgmr.msra.gmra.mrb[8].mxu1 %vm4427_vm14, %v5068_v52  ;;  %v10364_v36 = vpack.c.bf16 %v9034_v33, %v9032_v32  ;;  %v9078_v32 = vld [vmem:[%s15574_s5 + $0x6d0] sm:$0xff] }
 0x69f   : > { %10289 = vmatpush1.bf16.msra.mxu1 %v10288_v38  ;;  %5151 = vmatprep.mubr.f32.mxu1 %v11231_v12  ;;  %v5292_v38 = vpop.permute.xlu0 %5291 }
 0x6a0   : > { %10291 = vmatprep.subr.bf16.mxu1 %v10290_v19  ;;  %v8997_v19 = vld [vmem:[%s15574_s5 + $0x4c8] sm:$0xff] }
 0x6a1   : > { %v10330_v52 = vpack.c.bf16 %v8999_v39, %v8997_v19  ;;  %v9038_v19 = vld [vmem:[%s15574_s5 + $0x5d0] sm:$0xff]  ;;  %v9041_v39 = vld [vmem:[%s15574_s5 + $0x5e8] sm:$0xff] }
 0x6a2   : > { %8947 = vmatmul.mubr.msk.f32.gmra.mrb[10].mxu1 %vm4427_vm14, %v5070_v59 }
 0x6a3   : > { %10293 = vmatpush1.bf16.msra.mxu1 %v10292_v54  ;;  %5257 = vmatprep.mubr.f32.mxu1 %v11231_v12  ;;  %v5294_v54 = vpop.permute.xlu1 %5293 }
 0x6a4   : > { %10295 = vmatprep.subr.bf16.mxu1 %v10294_v50  ;;  %v9001_v50 = vld [vmem:[%s15574_s5 + $0x4e8] sm:$0xff] }
 0x6a5   : > { %v10334_v59 = vpack.c.bf16 %v9003_v56, %v9001_v50  ;;  %v10373_v50 = vpack.c.bf16 %v9042_v53, %v9040_v20  ;;  %v9088_v20 = vld [vmem:[%s15574_s5 + $0x700] sm:$0xff]  ;;  %v9090_v53 = vld [vmem:[%s15574_s5 + $0x710] sm:$0xff] }
 0x6a7   : > { %10297 = vmatpush1.bf16.msra.mxu1 %v10296_v60  ;;  %v9009_v60 = vld [vmem:[%s15574_s5 + $0x508] sm:$0xff] }
 0x6a8   : > { %10300 = vmatprep.subr.msk.bf16.mxu1 %vm13702_vm12, %v10298_v61  ;;  %v9011_v61 = vld [vmem:[%s15574_s5 + $0x518] sm:$0xff] }
 0x6a9   : > { %v10340_v62 = vpack.c.bf16 %v9011_v61, %v9009_v60  ;;  %v10380_v61 = vpack.c.bf16 %v9055_v55, %v9053_v58  ;;  %v9097_v55 = vld [vmem:[%s15574_s5 + $0x748] sm:$0xff] }
 0x6ab   : > { %10303 = vmatpush1.bf16.msk.msra.mxu1 %vm13702_vm12, %v10301_v2  ;;  %v9013_v2 = vld [vmem:[%s15574_s5 + $0x528] sm:$0xff] }
 0x6ac   : > { %10305 = vmatprep.subr.bf16.mxu1 %v10304_v1  ;;  %v9015_v1 = vld [vmem:[%s15574_s5 + $0x538] sm:$0xff] }
 0x6ad   : > { %v10344_v41 = vpack.c.bf16 %v9015_v1, %v9013_v2  ;;  %v9059_v2 = vld [vmem:[%s15574_s5 + $0x658] sm:$0xff] }
 0x6ae   : > { %8966 = vmatmul.mubr.msk.f32.vlgmr.msra.gmra.mrb[8].mxu1 %vm4427_vm14, %v5180_v9 }
 0x6af   : > { %10307 = vmatpush1.bf16.msra.mxu1 %v10306_v6  ;;  %5263 = vmatprep.mubr.f32.mxu1 %v11231_v12  ;;  %v5404_v6 = vpop.permute.xlu0 %5403 }
 0x6b0   : > { %10309 = vmatprep.subr.bf16.mxu1 %v10308_v7  ;;  %v9017_v7 = vld [vmem:[%s15574_s5 + $0x548] sm:$0xff] }
 0x6b1   : > { %v10348_v9 = vpack.c.bf16 %v9019_v8, %v9017_v7  ;;  %v9063_v7 = vld [vmem:[%s15574_s5 + $0x678] sm:$0xf] }
 0x6b2   : > { %8967 = vmatmul.mubr.msk.f32.gmra.mrb[10].mxu1 %vm4427_vm14, %v5182_v17 }
 0x6b3   : > { %10311 = vmatpush1.bf16.msra.mxu1 %v10310_v43  ;;  %5369 = vmatprep.mubr.f32.mxu1 %v11231_v12  ;;  %v5406_v43 = vpop.permute.xlu1 %5405  ;;  %v5628_v63 = vpop.permute.xlu0 %5627 }
 0x6b4   : > { %10313 = vmatprep.subr.bf16.mxu1 %v10312_v13  ;;  %v9021_v13 = vld [vmem:[%s15574_s5 + $0x568] sm:$0xff] }
 0x6b5   : > { %v10352_v17 = vpack.c.bf16 %v9023_v14, %v9021_v13 }
 0x6b7   : > { %10315 = vmatpush1.bf16.msra.mxu1 %v10314_v25  ;;  %v9029_v25 = vld [vmem:[%s15574_s5 + $0x588] sm:$0xff]  ;;  %v5630_v5 = vpop.permute.xlu1 %5629  ;;  %v5740_v15 = vpop.permute.xlu0 %5739 }
 0x6b8   : > { %10318 = vmatprep.subr.msk.bf16.mxu1 %vm13702_vm12, %v10316_v27  ;;  %v9031_v27 = vld [vmem:[%s15574_s5 + $0x598] sm:$0xff] }
 0x6b9   : > { %v10358_v45 = vpack.c.bf16 %v9031_v27, %v9029_v25  ;;  %v10398_v27 = vpack.c.bf16 %v9075_v23, %v9073_v18  ;;  %v9117_v23 = vld [vmem:[%s15574_s5 + $0x7c8] sm:$0xff] }
 0x6bb   : > { %10321 = vmatpush1.bf16.msk.msra.mxu1 %vm13702_vm12, %v10319_v30  ;;  %v9033_v30 = vld [vmem:[%s15574_s5 + $0x5a8] sm:$0xff]  ;;  %v5742_v33 = vpop.permute.xlu1 %5741  ;;  %v5852_v58 = vpop.permute.xlu0 %5851 }
 0x6bc   : > { %10323 = vmatprep.subr.bf16.mxu1 %v10322_v24  ;;  %v9035_v24 = vld [vmem:[%s15574_s5 + $0x5b8] sm:$0xff] }
 0x6bd   : > { %v10362_v46 = vpack.c.bf16 %v9035_v24, %v9033_v30  ;;  %v9079_v30 = vld [vmem:[%s15574_s5 + $0x6d8] sm:$0xff] }
 0x6be   : > { %8986 = vmatmul.mubr.msk.f32.vlgmr.msra.gmra.mrb[8].mxu1 %vm4427_vm14, %v5292_v38  ;;  %v9036_v38 = vld [vmem:[%s15574_s5 + $0x5c0] sm:$0xff] }
 0x6bf   : > { %10325 = vmatpush1.bf16.msra.mxu1 %v10324_v34  ;;  %5375 = vmatprep.mubr.f32.mxu1 %v11231_v12  ;;  %v9037_v34 = vld [vmem:[%s15574_s5 + $0x5c8] sm:$0xff]  ;;  %v5964_v18 = vpop.permute.xlu0 %5963 }
 0x6c0   : > { %10327 = vmatprep.subr.bf16.mxu1 %v10326_v35  ;;  %v9039_v35 = vld [vmem:[%s15574_s5 + $0x5d8] sm:$0xff] }
 0x6c1   : > { %v10366_v37 = vpack.c.bf16 %v9039_v35, %v9037_v34  ;;  %v9081_v34 = vld [vmem:[%s15574_s5 + $0x6e8] sm:$0xff]  ;;  %v9083_v35 = vld [vmem:[%s15574_s5 + $0x6f8] sm:$0xf] }
 0x6c2   : > { %8987 = vmatmul.mubr.msk.f32.gmra.mrb[10].mxu1 %vm4427_vm14, %v5294_v54  ;;  %v9049_v54 = vld [vmem:[%s15574_s5 + $0x608] sm:$0xff] }
 0x6c3   : > { %10329 = vmatpush1.bf16.msra.mxu1 %v10328_v44  ;;  %5481 = vmatprep.mubr.f32.mxu1 %v11231_v12  ;;  %v10368_v44 = vpack.c.bf16 %v9038_v19, %v9036_v38  ;;  %v9080_v38 = vld [vmem:[%s15574_s5 + $0x6e0] sm:$0xff]  ;;  %v9082_v19 = vld [vmem:[%s15574_s5 + $0x6f0] sm:$0xf] }
 0x6c4   : > { %10331 = vmatprep.subr.bf16.mxu1 %v10330_v52 }
 0x6c7   : > { %10333 = vmatpush1.bf16.msra.mxu1 %v10332_v57  ;;  %v9048_v57 = vld [vmem:[%s15574_s5 + $0x600] sm:$0xff] }
 0x6c8   : > { %10336 = vmatprep.subr.msk.bf16.mxu1 %vm13702_vm12, %v10334_v59  ;;  %v9050_v59 = vld [vmem:[%s15574_s5 + $0x610] sm:$0xff] }
 0x6c9   : > { %v10378_v60 = vpack.c.bf16 %v9050_v59, %v9048_v57  ;;  %v9092_v57 = vld [vmem:[%s15574_s5 + $0x720] sm:$0xff]  ;;  %v9094_v59 = vld [vmem:[%s15574_s5 + $0x730] sm:$0xff] }
 0x6cb   : > { %10339 = vmatpush1.bf16.msk.msra.mxu1 %vm13702_vm12, %v10337_v40  ;;  %v9052_v40 = vld [vmem:[%s15574_s5 + $0x620] sm:$0xff] }
 0x6cc   : > { %10341 = vmatprep.subr.bf16.mxu1 %v10340_v62  ;;  %v9054_v62 = vld [vmem:[%s15574_s5 + $0x630] sm:$0xff] }
 0x6cd   : > { %v10382_v1 = vpack.c.bf16 %v9054_v62, %v9052_v40  ;;  %v9096_v62 = vld [vmem:[%s15574_s5 + $0x740] sm:$0xff] }
 0x6ce   : > { %9006 = vmatmul.mubr.msk.f32.vlgmr.msra.gmra.mrb[8].mxu1 %vm4427_vm14, %v5404_v6  ;;  %v9061_v6 = vld [vmem:[%s15574_s5 + $0x668] sm:$0xff] }
 0x6cf   : > { %10343 = vmatpush1.bf16.msra.mxu1 %v10342_v3  ;;  %5487 = vmatprep.mubr.f32.mxu1 %v11231_v12  ;;  %v10384_v3 = vpack.c.bf16 %v9059_v2, %v9057_v0  ;;  %v5854_v0 = vpop.permute.xlu1 %5853  ;;  %v9101_v2 = vld [vmem:[%s15574_s5 + $0x768] sm:$0xff] }
 0x6d0   : > { %10345 = vmatprep.subr.bf16.mxu1 %v10344_v41  ;;  %v9056_v41 = vld [vmem:[%s15574_s5 + $0x640] sm:$0xff] }
 0x6d1   : > { %v10386_v8 = vpack.c.bf16 %v9058_v4, %v9056_v41  ;;  %v9100_v4 = vld [vmem:[%s15574_s5 + $0x760] sm:$0xff] }
 0x6d2   : > { %9007 = vmatmul.mubr.msk.f32.gmra.mrb[10].mxu1 %vm4427_vm14, %v5406_v43  ;;  %v9071_v43 = vld [vmem:[%s15574_s5 + $0x698] sm:$0xff] }
 0x6d3   : > { %10347 = vmatpush1.bf16.msra.mxu1 %v10346_v42  ;;  %5593 = vmatprep.mubr.f32.mxu1 %v11231_v12  ;;  %v10388_v42 = vpack.c.bf16 %v9063_v7, %v9061_v6  ;;  %v10394_v14 = vpack.c.bf16 %v9071_v43, %v9069_v11  ;;  %v9109_v6 = vld [vmem:[%s15574_s5 + $0x788] sm:$0xff]  ;;  %v9111_v7 = vld [vmem:[%s15574_s5 + $0x798] sm:$0xff] }
 0x6d4   : > { %10349 = vmatprep.subr.bf16.mxu1 %v10348_v9  ;;  %v9060_v9 = vld [vmem:[%s15574_s5 + $0x660] sm:$0xff]  ;;  %v9113_v11 = vld [vmem:[%s15574_s5 + $0x7a8] sm:$0xff]  ;;  %v9115_v43 = vld [vmem:[%s15574_s5 + $0x7b8] sm:$0xff] }
 0x6d5   : > { %v10391_v13 = vpack.c.bf16 %v9062_v10, %v9060_v9  ;;  %v9108_v9 = vld [vmem:[%s15574_s5 + $0x780] sm:$0xff]  ;;  %v9110_v10 = vld [vmem:[%s15574_s5 + $0x790] sm:$0xff] }
 0x6d7   : > { %10351 = vmatpush1.bf16.msra.mxu1 %v10350_v16  ;;  %v9068_v16 = vld [vmem:[%s15574_s5 + $0x680] sm:$0xff] }
 0x6d8   : > { %10354 = vmatprep.subr.msk.bf16.mxu1 %vm13702_vm12, %v10352_v17  ;;  %v9070_v17 = vld [vmem:[%s15574_s5 + $0x690] sm:$0xff] }
 0x6d9   : > { %v10396_v25 = vpack.c.bf16 %v9070_v17, %v9068_v16  ;;  %v9112_v16 = vld [vmem:[%s15574_s5 + $0x7a0] sm:$0xff]  ;;  %v9114_v17 = vld [vmem:[%s15574_s5 + $0x7b0] sm:$0xff] }
 0x6db   : > { %10357 = vmatpush1.bf16.msk.msra.mxu1 %vm13702_vm12, %v10355_v28  ;;  %v9072_v28 = vld [vmem:[%s15574_s5 + $0x6a0] sm:$0xff] }
 0x6dc   : > { %10359 = vmatprep.subr.bf16.mxu1 %v10358_v45  ;;  %v9074_v45 = vld [vmem:[%s15574_s5 + $0x6b0] sm:$0xff] }
 0x6dd   : > { %v10400_v24 = vpack.c.bf16 %v9074_v45, %v9072_v28  ;;  %v9116_v45 = vld [vmem:[%s15574_s5 + $0x7c0] sm:$0xff] }
 0x6de   : > { %9026 = vmatmul.mubr.msk.f32.vlgmr.msra.gmra.mrb[8].mxu1 %vm4427_vm14, %v13755_v48  ;;  %v9043_v48 = vld [vmem:[%s15574_s5 + $0x5f8] sm:$0xf] }
 0x6df   : > { %10361 = vmatpush1.bf16.msra.mxu1 %v10360_v21  ;;  %5599 = vmatprep.mubr.f32.mxu1 %v11231_v12  ;;  %v10370_v52 = vpack.c.bf16 %v9043_v48, %v9041_v39  ;;  %v10402_v21 = vpack.c.bf16 %v9079_v30, %v9077_v29  ;;  %v9089_v39 = vld [vmem:[%s15574_s5 + $0x708] sm:$0xff]  ;;  %v9091_v48 = vld [vmem:[%s15574_s5 + $0x718] sm:$0xff]  ;;  %v5966_v29 = vpop.permute.xlu1 %5965 }
 0x6e0   : > { %10363 = vmatprep.subr.bf16.mxu1 %v10362_v46  ;;  %v9076_v46 = vld [vmem:[%s15574_s5 + $0x6c0] sm:$0xff]  ;;  %v9121_v30 = vld [vmem:[%s15574_s5 + $0x7e8] sm:$0xff] }
 0x6e2   : > { %9027 = vmatmul.mubr.msk.f32.gmra.mrb[10].mxu1 %vm4427_vm14, %v13761_v51  ;;  %v9051_v51 = vld [vmem:[%s15574_s5 + $0x618] sm:$0xff] }
 0x6e3   : > { %10365 = vmatpush1.bf16.msra.mxu1 %v10364_v36  ;;  %5705 = vmatprep.mubr.f32.mxu1 %v11231_v12  ;;  %v10376_v56 = vpack.c.bf16 %v9051_v51, %v9049_v54  ;;  %v10404_v36 = vpack.c.bf16 %v9078_v32, %v9076_v46  ;;  %v9093_v54 = vld [vmem:[%s15574_s5 + $0x728] sm:$0xff]  ;;  %v9095_v51 = vld [vmem:[%s15574_s5 + $0x738] sm:$0xff]  ;;  %v9120_v32 = vld [vmem:[%s15574_s5 + $0x7e0] sm:$0xff] }
 0x6e4   : > { %10367 = vmatprep.subr.bf16.mxu1 %v10366_v37  ;;  %v10406_v37 = vpack.c.bf16 %v9083_v35, %v9081_v34  ;;  %v9129_v34 = vld [vmem:[%s15574_s5 + $0x808] sm:$0xff]  ;;  %v9131_v35 = vld [vmem:[%s15574_s5 + $0x818] sm:$0xff] }
 0x6e7   : > { %10369 = vmatpush1.bf16.msra.mxu1 %v10368_v44  ;;  %v10409_v44 = vpack.c.bf16 %v9082_v19, %v9080_v38  ;;  %v9128_v38 = vld [vmem:[%s15574_s5 + $0x800] sm:$0xff]  ;;  %v9130_v19 = vld [vmem:[%s15574_s5 + $0x810] sm:$0xff] }
 0x6e8   : > { %10372 = vmatprep.subr.msk.bf16.mxu1 %vm13702_vm12, %v10370_v52  ;;  %v10412_v52 = vpack.c.bf16 %v9091_v48, %v9089_v39  ;;  %v9133_v39 = vld [vmem:[%s15574_s5 + $0x828] sm:$0xff]  ;;  %v9135_v48 = vld [vmem:[%s15574_s5 + $0x838] sm:$0xff] }
 0x6eb   : > { %10375 = vmatpush1.bf16.msk.msra.mxu1 %vm13702_vm12, %v10373_v50  ;;  %v10414_v50 = vpack.c.bf16 %v9090_v53, %v9088_v20  ;;  %v9132_v20 = vld [vmem:[%s15574_s5 + $0x820] sm:$0xff]  ;;  %v9134_v53 = vld [vmem:[%s15574_s5 + $0x830] sm:$0xff] }
 0x6ec   : > { %10377 = vmatprep.subr.bf16.mxu1 %v10376_v56  ;;  %v10416_v56 = vpack.c.bf16 %v9095_v51, %v9093_v54  ;;  %v9137_v54 = vld [vmem:[%s15574_s5 + $0x848] sm:$0xff]  ;;  %v9139_v51 = vld [vmem:[%s15574_s5 + $0x858] sm:$0xff] }
 0x6ee   : > { %9046 = vmatmul.mubr.msk.f32.vlgmr.msra.gmra.mrb[8].mxu1 %vm4427_vm14, %v5628_v63  ;;  %v9098_v63 = vld [vmem:[%s15574_s5 + $0x750] sm:$0xff] }
 0x6ef   : > { %10379 = vmatpush1.bf16.msra.mxu1 %v10378_v60  ;;  %5711 = vmatprep.mubr.f32.mxu1 %v11231_v12  ;;  %v9099_v60 = vld [vmem:[%s15574_s5 + $0x758] sm:$0xff] }
 0x6f0   : > { %10381 = vmatprep.subr.bf16.mxu1 %v10380_v61  ;;  %v10418_v61 = vpack.c.bf16 %v9094_v59, %v9092_v57  ;;  %v10420_v40 = vpack.c.bf16 %v9099_v60, %v9097_v55  ;;  %v10456_v57 = vpack.c.bf16 %v9139_v51, %v9137_v54  ;;  %v9136_v59 = vld [vmem:[%s15574_s5 + $0x840] sm:$0xff]  ;;  %v9141_v55 = vld [vmem:[%s15574_s5 + $0x868] sm:$0xff]  ;;  %v9143_v60 = vld [vmem:[%s15574_s5 + $0x878] sm:$0xf] }
 0x6f1   : > { %v9178_v54 = vld [vmem:[%s15574_s5 + $0x950] sm:$0xff] }
 0x6f2   : > { %9047 = vmatmul.mubr.msk.f32.gmra.mrb[10].mxu1 %vm4427_vm14, %v5630_v5  ;;  %v9102_v5 = vld [vmem:[%s15574_s5 + $0x770] sm:$0xf] }
 0x6f3   : > { %10383 = vmatpush1.bf16.msra.mxu1 %v10382_v1  ;;  %5817 = vmatprep.mubr.f32.mxu1 %v11231_v12  ;;  %v9103_v1 = vld [vmem:[%s15574_s5 + $0x778] sm:$0xf] }
 0x6f4   : > { %10385 = vmatprep.subr.bf16.mxu1 %v10384_v3  ;;  %v10422_v3 = vpack.c.bf16 %v9098_v63, %v9096_v62  ;;  %v10424_v41 = vpack.c.bf16 %v9103_v1, %v9101_v2  ;;  %v10460_v62 = vpack.c.bf16 %v9143_v60, %v9141_v55  ;;  %v9140_v63 = vld [vmem:[%s15574_s5 + $0x860] sm:$0xff]  ;;  %v9149_v2 = vld [vmem:[%s15574_s5 + $0x888] sm:$0xff]  ;;  %v9151_v1 = vld [vmem:[%s15574_s5 + $0x898] sm:$0xff] }
 0x6f5   : > { %v9182_v55 = vld [vmem:[%s15574_s5 + $0x970] sm:$0xf]  ;;  %v9189_v60 = vld [vmem:[%s15574_s5 + $0x988] sm:$0xff] }
 0x6f7   : > { %10387 = vmatpush1.bf16.msra.mxu1 %v10386_v8  ;;  %v10427_v8 = vpack.c.bf16 %v9102_v5, %v9100_v4  ;;  %v9148_v4 = vld [vmem:[%s15574_s5 + $0x880] sm:$0xff]  ;;  %v9150_v5 = vld [vmem:[%s15574_s5 + $0x890] sm:$0xff] }
 0x6f8   : > { %10390 = vmatprep.subr.msk.bf16.mxu1 %vm13702_vm12, %v10388_v42  ;;  %v10430_v42 = vpack.c.bf16 %v9111_v7, %v9109_v6  ;;  %v9153_v6 = vld [vmem:[%s15574_s5 + $0x8a8] sm:$0xff]  ;;  %v9155_v7 = vld [vmem:[%s15574_s5 + $0x8b8] sm:$0xff] }
 0x6fb   : > { %10393 = vmatpush1.bf16.msk.msra.mxu1 %vm13702_vm12, %v10391_v13  ;;  %v10432_v13 = vpack.c.bf16 %v9110_v10, %v9108_v9  ;;  %v9152_v9 = vld [vmem:[%s15574_s5 + $0x8a0] sm:$0xff]  ;;  %v9154_v10 = vld [vmem:[%s15574_s5 + $0x8b0] sm:$0xff] }
 0x6fc   : > { %10395 = vmatprep.subr.bf16.mxu1 %v10394_v14  ;;  %v10434_v14 = vpack.c.bf16 %v9115_v43, %v9113_v11  ;;  %v6188_v11 = vpop.permute.xlu0 %6187  ;;  %v9157_v43 = vld [vmem:[%s15574_s5 + $0x8c8] sm:$0xff] }
 0x6fe   : > { %9066 = vmatmul.mubr.msk.f32.vlgmr.msra.gmra.mrb[8].mxu1 %vm4427_vm14, %v5740_v15  ;;  %v9118_v15 = vld [vmem:[%s15574_s5 + $0x7d0] sm:$0xff] }
 0x6ff   : > { %10397 = vmatpush1.bf16.msra.mxu1 %v10396_v25  ;;  %5823 = vmatprep.mubr.f32.mxu1 %v11231_v12  ;;  %v9119_v25 = vld [vmem:[%s15574_s5 + $0x7d8] sm:$0xff] }
 0x700   : > { %10399 = vmatprep.subr.bf16.mxu1 %v10398_v27  ;;  %v10436_v27 = vpack.c.bf16 %v9114_v17, %v9112_v16  ;;  %v10438_v28 = vpack.c.bf16 %v9119_v25, %v9117_v23  ;;  %v9156_v17 = vld [vmem:[%s15574_s5 + $0x8c0] sm:$0xff]  ;;  %v6190_v23 = vpop.permute.xlu1 %6189  ;;  %v9161_v25 = vld [vmem:[%s15574_s5 + $0x8e8] sm:$0xff] }
 0x702   : > { %9067 = vmatmul.mubr.msk.f32.gmra.mrb[10].mxu1 %vm4427_vm14, %v5742_v33  ;;  %v9122_v33 = vld [vmem:[%s15574_s5 + $0x7f0] sm:$0xf] }
 0x703   : > { %10401 = vmatpush1.bf16.msra.mxu1 %v10400_v24  ;;  %5929 = vmatprep.mubr.f32.mxu1 %v11231_v12  ;;  %v9123_v24 = vld [vmem:[%s15574_s5 + $0x7f8] sm:$0xf] }
 0x704   : > { %10403 = vmatprep.subr.bf16.mxu1 %v10402_v21  ;;  %v10440_v21 = vpack.c.bf16 %v9118_v15, %v9116_v45  ;;  %v10442_v46 = vpack.c.bf16 %v9123_v24, %v9121_v30  ;;  %v9160_v15 = vld [vmem:[%s15574_s5 + $0x8e0] sm:$0xff]  ;;  %v9169_v30 = vld [vmem:[%s15574_s5 + $0x908] sm:$0xff]  ;;  %v9171_v24 = vld [vmem:[%s15574_s5 + $0x918] sm:$0xff]  ;;  %v6302_v51 = vpop.permute.xlu1 %6301 }
 0x707   : > { %10405 = vmatpush1.bf16.msra.mxu1 %v10404_v36  ;;  %v10445_v36 = vpack.c.bf16 %v9122_v33, %v9120_v32  ;;  %v9168_v32 = vld [vmem:[%s15574_s5 + $0x900] sm:$0xff]  ;;  %v9170_v33 = vld [vmem:[%s15574_s5 + $0x910] sm:$0xff] }
 0x708   : > { %10408 = vmatprep.subr.msk.bf16.mxu1 %vm13702_vm12, %v10406_v37  ;;  %v10448_v37 = vpack.c.bf16 %v9131_v35, %v9129_v34  ;;  %v9173_v34 = vld [vmem:[%s15574_s5 + $0x928] sm:$0xff]  ;;  %v9175_v35 = vld [vmem:[%s15574_s5 + $0x938] sm:$0xff] }
 0x70b   : > { %10411 = vmatpush1.bf16.msk.msra.mxu1 %vm13702_vm12, %v10409_v44  ;;  %v10450_v44 = vpack.c.bf16 %v9130_v19, %v9128_v38  ;;  %v9172_v38 = vld [vmem:[%s15574_s5 + $0x920] sm:$0xff]  ;;  %v9174_v19 = vld [vmem:[%s15574_s5 + $0x930] sm:$0xff] }
 0x70c   : > { %10413 = vmatprep.subr.bf16.mxu1 %v10412_v52  ;;  %v10452_v52 = vpack.c.bf16 %v9135_v48, %v9133_v39  ;;  %v6300_v39 = vpop.permute.xlu0 %6299  ;;  %v9177_v48 = vld [vmem:[%s15574_s5 + $0x948] sm:$0xff] }
 0x70e   : > { %9086 = vmatmul.mubr.msk.f32.vlgmr.msra.gmra.mrb[8].mxu1 %vm4427_vm14, %v5852_v58  ;;  %v9138_v58 = vld [vmem:[%s15574_s5 + $0x850] sm:$0xff] }
 0x70f   : > { %10415 = vmatpush1.bf16.msra.mxu1 %v10414_v50  ;;  %5935 = vmatprep.mubr.f32.mxu1 %v11231_v12  ;;  %v11163_v50 = vld [vmem:[#allocation3 + $0x3] sm:$0xff] }
 0x710   : > { %10417 = vmatprep.subr.bf16.mxu1 %v10416_v56  ;;  %v10454_v56 = vpack.c.bf16 %v9134_v53, %v9132_v20  ;;  %v9176_v53 = vld [vmem:[%s15574_s5 + $0x940] sm:$0xff] }
 0x712   : > { %9087 = vmatmul.mubr.msk.f32.gmra.mrb[10].mxu1 %vm4427_vm14, %v5854_v0  ;;  %v9142_v0 = vld [vmem:[%s15574_s5 + $0x870] sm:$0xf] }
 0x713   : > { %10419 = vmatpush1.bf16.msra.mxu1 %v10418_v61  ;;  %6041 = vmatprep.mubr.f32.mxu1 %v11231_v12  ;;  %v11164_v61 = vld [vmem:[#allocation3 + $0xb] sm:$0x3] }
 0x714   : > { %10421 = vmatprep.subr.bf16.mxu1 %v10420_v40  ;;  %v10458_v40 = vpack.c.bf16 %v9138_v58, %v9136_v59  ;;  %v9180_v58 = vld [vmem:[%s15574_s5 + $0x960] sm:$0xff] }
 0x717   : > { %10423 = vmatpush1.bf16.msra.mxu1 %v10422_v3  ;;  %v10463_v3 = vpack.c.bf16 %v9142_v0, %v9140_v63  ;;  %v9188_v63 = vld [vmem:[%s15574_s5 + $0x980] sm:$0xff]  ;;  %v9190_v0 = vld [vmem:[%s15574_s5 + $0x990] sm:$0xff] }
 0x718   : > { %10426 = vmatprep.subr.msk.bf16.mxu1 %vm13702_vm12, %v10424_v41  ;;  %v10466_v41 = vpack.c.bf16 %v9151_v1, %v9149_v2  ;;  %v9193_v2 = vld [vmem:[%s15574_s5 + $0x9a8] sm:$0xff]  ;;  %v9195_v1 = vld [vmem:[%s15574_s5 + $0x9b8] sm:$0xff] }
 0x71b   : > { %10429 = vmatpush1.bf16.msk.msra.mxu1 %vm13702_vm12, %v10427_v8  ;;  %v10468_v8 = vpack.c.bf16 %v9150_v5, %v9148_v4  ;;  %v9192_v4 = vld [vmem:[%s15574_s5 + $0x9a0] sm:$0xff]  ;;  %v9194_v5 = vld [vmem:[%s15574_s5 + $0x9b0] sm:$0xff] }
 0x71c   : > { %10431 = vmatprep.subr.bf16.mxu1 %v10430_v42  ;;  %v10470_v42 = vpack.c.bf16 %v9155_v7, %v9153_v6  ;;  %v6412_v6 = vpop.permute.xlu0 %6411  ;;  %v9197_v7 = vld [vmem:[%s15574_s5 + $0x9c8] sm:$0xff] }
 0x71e   : > { %9106 = vmatmul.mubr.msk.f32.vlgmr.msra.gmra.mrb[8].mxu1 %vm4427_vm14, %v5964_v18  ;;  %v9158_v18 = vld [vmem:[%s15574_s5 + $0x8d0] sm:$0xff] }
 0x71f   : > { %10433 = vmatpush1.bf16.msra.mxu1 %v10432_v13  ;;  %6047 = vmatprep.mubr.f32.mxu1 %v11231_v12  ;;  %v9159_v13 = vld [vmem:[%s15574_s5 + $0x8d8] sm:$0xff] }
 0x720   : > { %10435 = vmatprep.subr.bf16.mxu1 %v10434_v14  ;;  %v10472_v14 = vpack.c.bf16 %v9154_v10, %v9152_v9  ;;  %v10474_v16 = vpack.c.bf16 %v9159_v13, %v9157_v43  ;;  %v9196_v10 = vld [vmem:[%s15574_s5 + $0x9c0] sm:$0xff]  ;;  %v6414_v43 = vpop.permute.xlu1 %6413  ;;  %v9201_v13 = vld [vmem:[%s15574_s5 + $0x9e8] sm:$0xff] }
 0x722   : > { %9107 = vmatmul.mubr.msk.f32.gmra.mrb[10].mxu1 %vm4427_vm14, %v5966_v29  ;;  %v9162_v29 = vld [vmem:[%s15574_s5 + $0x8f0] sm:$0xf] }
 0x723   : > { %10437 = vmatpush1.bf16.msra.mxu1 %v10436_v27  ;;  %6153 = vmatprep.mubr.f32.mxu1 %v11231_v12  ;;  %v9163_v27 = vld [vmem:[%s15574_s5 + $0x8f8] sm:$0xf] }
 0x724   : > { %10439 = vmatprep.subr.bf16.mxu1 %v10438_v28  ;;  %v10476_v28 = vpack.c.bf16 %v9158_v18, %v9156_v17  ;;  %v10478_v45 = vpack.c.bf16 %v9163_v27, %v9161_v25  ;;  %v9200_v18 = vld [vmem:[%s15574_s5 + $0x9e0] sm:$0xff]  ;;  %v9209_v25 = vld [vmem:[%s15574_s5 + $0xa08] sm:$0xff]  ;;  %v9211_v27 = vld [vmem:[%s15574_s5 + $0xa18] sm:$0xff] }
 0x727   : > { %10441 = vmatpush1.bf16.msra.mxu1 %v10440_v21  ;;  %v10481_v21 = vpack.c.bf16 %v9162_v29, %v9160_v15  ;;  %v9208_v15 = vld [vmem:[%s15574_s5 + $0xa00] sm:$0xff]  ;;  %v9210_v29 = vld [vmem:[%s15574_s5 + $0xa10] sm:$0xff] }
 0x728   : > { %10444 = vmatprep.subr.msk.bf16.mxu1 %vm13702_vm12, %v10442_v46  ;;  %v10484_v46 = vpack.c.bf16 %v9171_v24, %v9169_v30  ;;  %v9213_v30 = vld [vmem:[%s15574_s5 + $0xa28] sm:$0xff]  ;;  %v9215_v24 = vld [vmem:[%s15574_s5 + $0xa38] sm:$0xff] }
 0x72b   : > { %10447 = vmatpush1.bf16.msk.msra.mxu1 %vm13702_vm12, %v10445_v36  ;;  %v10486_v36 = vpack.c.bf16 %v9170_v33, %v9168_v32  ;;  %v9212_v32 = vld [vmem:[%s15574_s5 + $0xa20] sm:$0xff]  ;;  %v9214_v33 = vld [vmem:[%s15574_s5 + $0xa30] sm:$0xff] }
 0x72c   : > { %10449 = vmatprep.subr.bf16.mxu1 %v10448_v37  ;;  %v10488_v37 = vpack.c.bf16 %v9175_v35, %v9173_v34  ;;  %v6524_v34 = vpop.permute.xlu0 %6523  ;;  %v9217_v35 = vld [vmem:[%s15574_s5 + $0xa48] sm:$0xff] }
 0x72e   : > { %9126 = vmatmul.mubr.msk.f32.vlgmr.msra.gmra.mrb[8].mxu1 %vm4427_vm14, %v11163_v50  ;;  %v9181_v50 = vld [vmem:[%s15574_s5 + $0x968] sm:$0xff] }
 0x72f   : > { %10451 = vmatpush1.bf16.msra.mxu1 %v10450_v44  ;;  %6159 = vmatprep.mubr.f32.mxu1 %v11231_v12  ;;  %v9179_v44 = vld [vmem:[%s15574_s5 + $0x958] sm:$0xff] }
 0x730   : > { %10453 = vmatprep.subr.bf16.mxu1 %v10452_v52  ;;  %v10490_v52 = vpack.c.bf16 %v9174_v19, %v9172_v38  ;;  %v10492_v20 = vpack.c.bf16 %v9179_v44, %v9177_v48  ;;  %v9216_v19 = vld [vmem:[%s15574_s5 + $0xa40] sm:$0xff]  ;;  %v6526_v48 = vpop.permute.xlu1 %6525  ;;  %v9221_v44 = vld [vmem:[%s15574_s5 + $0xa68] sm:$0xff] }
 0x732   : > { %9127 = vmatmul.mubr.msk.f32.gmra.mrb[10].mxu1 %vm4427_vm14, %v11164_v61  ;;  %v9191_v61 = vld [vmem:[%s15574_s5 + $0x998] sm:$0xff] }
 0x733   : > { %10455 = vmatpush1.bf16.msra.mxu1 %v10454_v56  ;;  %6265 = vmatprep.mubr.f32.mxu1 %v11231_v12  ;;  %v9183_v56 = vld [vmem:[%s15574_s5 + $0x978] sm:$0xf] }
 0x734   : > { %10457 = vmatprep.subr.bf16.mxu1 %v10456_v57  ;;  %v10494_v57 = vpack.c.bf16 %v9178_v54, %v9176_v53  ;;  %v10496_v59 = vpack.c.bf16 %v9183_v56, %v9181_v50  ;;  %v9220_v54 = vld [vmem:[%s15574_s5 + $0xa60] sm:$0xff]  ;;  %v9229_v50 = vld [vmem:[%s15574_s5 + $0xa88] sm:$0xff]  ;;  %v9231_v56 = vld [vmem:[%s15574_s5 + $0xa98] sm:$0xff] }
 0x737   : > { %10459 = vmatpush1.bf16.msra.mxu1 %v10458_v40  ;;  %v10499_v40 = vpack.c.bf16 %v9182_v55, %v9180_v58  ;;  %v9228_v58 = vld [vmem:[%s15574_s5 + $0xa80] sm:$0xff]  ;;  %v9230_v55 = vld [vmem:[%s15574_s5 + $0xa90] sm:$0xff] }
 0x738   : > { %10462 = vmatprep.subr.msk.bf16.mxu1 %vm13702_vm12, %v10460_v62  ;;  %v10502_v62 = vpack.c.bf16 %v9191_v61, %v9189_v60  ;;  %v9233_v60 = vld [vmem:[%s15574_s5 + $0xaa8] sm:$0xff]  ;;  %v9235_v61 = vld [vmem:[%s15574_s5 + $0xab8] sm:$0xff] }
 0x73b   : > { %10465 = vmatpush1.bf16.msk.msra.mxu1 %vm13702_vm12, %v10463_v3  ;;  %v10504_v3 = vpack.c.bf16 %v9190_v0, %v9188_v63  ;;  %v9232_v63 = vld [vmem:[%s15574_s5 + $0xaa0] sm:$0xff]  ;;  %v9234_v0 = vld [vmem:[%s15574_s5 + $0xab0] sm:$0xff] }
 0x73c   : > { %10467 = vmatprep.subr.bf16.mxu1 %v10466_v41  ;;  %v10506_v41 = vpack.c.bf16 %v9195_v1, %v9193_v2  ;;  %v9237_v2 = vld [vmem:[%s15574_s5 + $0xac8] sm:$0xff]  ;;  %v9239_v1 = vld [vmem:[%s15574_s5 + $0xad8] sm:$0xff] }
 0x73e   : > { %9146 = vmatmul.mubr.msk.f32.vlgmr.msra.gmra.mrb[8].mxu1 %vm4427_vm14, %v6188_v11  ;;  %v9198_v11 = vld [vmem:[%s15574_s5 + $0x9d0] sm:$0xff] }
 0x73f   : > { %10469 = vmatpush1.bf16.msra.mxu1 %v10468_v8  ;;  %6271 = vmatprep.mubr.f32.mxu1 %v11231_v12  ;;  %v9199_v8 = vld [vmem:[%s15574_s5 + $0x9d8] sm:$0xff] }
 0x740   : > { %10471 = vmatprep.subr.bf16.mxu1 %v10470_v42  ;;  %v10508_v42 = vpack.c.bf16 %v9194_v5, %v9192_v4  ;;  %v10510_v9 = vpack.c.bf16 %v9199_v8, %v9197_v7  ;;  %v10546_v4 = vpack.c.bf16 %v9239_v1, %v9237_v2  ;;  %v9236_v5 = vld [vmem:[%s15574_s5 + $0xac0] sm:$0xff]  ;;  %v9241_v7 = vld [vmem:[%s15574_s5 + $0xae8] sm:$0xff]  ;;  %v9243_v8 = vld [vmem:[%s15574_s5 + $0xaf8] sm:$0xf] }
 0x741   : > { %v9278_v2 = vld [vmem:[%s15574_s5 + $0xbd0] sm:$0xff] }
 0x742   : > { %9147 = vmatmul.mubr.msk.f32.gmra.mrb[10].mxu1 %vm4427_vm14, %v6190_v23  ;;  %v9202_v23 = vld [vmem:[%s15574_s5 + $0x9f0] sm:$0xf] }
 0x743   : > { %10473 = vmatpush1.bf16.msra.mxu1 %v10472_v14  ;;  %6377 = vmatprep.mubr.f32.mxu1 %v11231_v12  ;;  %v9203_v14 = vld [vmem:[%s15574_s5 + $0x9f8] sm:$0xf] }
 0x744   : > { %10475 = vmatprep.subr.bf16.mxu1 %v10474_v16  ;;  %v10512_v16 = vpack.c.bf16 %v9198_v11, %v9196_v10  ;;  %v10514_v17 = vpack.c.bf16 %v9203_v14, %v9201_v13  ;;  %v10550_v10 = vpack.c.bf16 %v9243_v8, %v9241_v7  ;;  %v9240_v11 = vld [vmem:[%s15574_s5 + $0xae0] sm:$0xff]  ;;  %v9249_v13 = vld [vmem:[%s15574_s5 + $0xb08] sm:$0xff]  ;;  %v9251_v14 = vld [vmem:[%s15574_s5 + $0xb18] sm:$0xff] }
 0x745   : > { %v9282_v7 = vld [vmem:[%s15574_s5 + $0xbf0] sm:$0xf]  ;;  %v9289_v8 = vld [vmem:[%s15574_s5 + $0xc08] sm:$0xff] }
 0x747   : > { %10477 = vmatpush1.bf16.msra.mxu1 %v10476_v28  ;;  %v10517_v28 = vpack.c.bf16 %v9202_v23, %v9200_v18  ;;  %v9248_v18 = vld [vmem:[%s15574_s5 + $0xb00] sm:$0xff]  ;;  %v9250_v23 = vld [vmem:[%s15574_s5 + $0xb10] sm:$0xff] }
 0x748   : > { %10480 = vmatprep.subr.msk.bf16.mxu1 %vm13702_vm12, %v10478_v45  ;;  %v10520_v45 = vpack.c.bf16 %v9211_v27, %v9209_v25  ;;  %v9253_v25 = vld [vmem:[%s15574_s5 + $0xb28] sm:$0xff]  ;;  %v9255_v27 = vld [vmem:[%s15574_s5 + $0xb38] sm:$0xff] }
 0x74b   : > { %10483 = vmatpush1.bf16.msk.msra.mxu1 %vm13702_vm12, %v10481_v21  ;;  %v10522_v21 = vpack.c.bf16 %v9210_v29, %v9208_v15  ;;  %v9252_v15 = vld [vmem:[%s15574_s5 + $0xb20] sm:$0xff]  ;;  %v9254_v29 = vld [vmem:[%s15574_s5 + $0xb30] sm:$0xff] }
 0x74c   : > { %10485 = vmatprep.subr.bf16.mxu1 %v10484_v46  ;;  %v10524_v46 = vpack.c.bf16 %v9215_v24, %v9213_v30  ;;  %v6748_v30 = vpop.permute.xlu0 %6747  ;;  %v9257_v24 = vld [vmem:[%s15574_s5 + $0xb48] sm:$0xff] }
 0x74e   : > { %9166 = vmatmul.mubr.msk.f32.vlgmr.msra.gmra.mrb[8].mxu1 %vm4427_vm14, %v6300_v39  ;;  %v9218_v39 = vld [vmem:[%s15574_s5 + $0xa50] sm:$0xff] }
 0x74f   : > { %10487 = vmatpush1.bf16.msra.mxu1 %v10486_v36  ;;  %6383 = vmatprep.mubr.f32.mxu1 %v11231_v12  ;;  %v9219_v36 = vld [vmem:[%s15574_s5 + $0xa58] sm:$0xff] }
 0x750   : > { %10489 = vmatprep.subr.bf16.mxu1 %v10488_v37  ;;  %v10526_v37 = vpack.c.bf16 %v9214_v33, %v9212_v32  ;;  %v10528_v38 = vpack.c.bf16 %v9219_v36, %v9217_v35  ;;  %v9256_v33 = vld [vmem:[%s15574_s5 + $0xb40] sm:$0xff]  ;;  %v6750_v35 = vpop.permute.xlu1 %6749  ;;  %v9261_v36 = vld [vmem:[%s15574_s5 + $0xb68] sm:$0xff] }
 0x752   : > { %9167 = vmatmul.mubr.msk.f32.gmra.mrb[10].mxu1 %vm4427_vm14, %v6302_v51  ;;  %v9222_v51 = vld [vmem:[%s15574_s5 + $0xa70] sm:$0xf] }
 0x753   : > { %10491 = vmatpush1.bf16.msra.mxu1 %v10490_v52  ;;  %6489 = vmatprep.mubr.f32.mxu1 %v11231_v12  ;;  %v9223_v52 = vld [vmem:[%s15574_s5 + $0xa78] sm:$0xf] }
 0x754   : > { %10493 = vmatprep.subr.bf16.mxu1 %v10492_v20  ;;  %v10530_v20 = vpack.c.bf16 %v9218_v39, %v9216_v19  ;;  %v10532_v53 = vpack.c.bf16 %v9223_v52, %v9221_v44  ;;  %v9260_v39 = vld [vmem:[%s15574_s5 + $0xb60] sm:$0xff]  ;;  %v9269_v44 = vld [vmem:[%s15574_s5 + $0xb88] sm:$0xff]  ;;  %v9271_v52 = vld [vmem:[%s15574_s5 + $0xb98] sm:$0xff]  ;;  %v6862_v1 = vpop.permute.xlu1 %6861 }
 0x757   : > { %10495 = vmatpush1.bf16.msra.mxu1 %v10494_v57  ;;  %v10535_v57 = vpack.c.bf16 %v9222_v51, %v9220_v54  ;;  %v9268_v54 = vld [vmem:[%s15574_s5 + $0xb80] sm:$0xff]  ;;  %v9270_v51 = vld [vmem:[%s15574_s5 + $0xb90] sm:$0xff] }
 0x758   : > { %10498 = vmatprep.subr.msk.bf16.mxu1 %vm13702_vm12, %v10496_v59  ;;  %v10538_v59 = vpack.c.bf16 %v9231_v56, %v9229_v50  ;;  %v9273_v50 = vld [vmem:[%s15574_s5 + $0xba8] sm:$0xff]  ;;  %v9275_v56 = vld [vmem:[%s15574_s5 + $0xbb8] sm:$0xff] }
 0x75b   : > { %10501 = vmatpush1.bf16.msk.msra.mxu1 %vm13702_vm12, %v10499_v40  ;;  %v10540_v40 = vpack.c.bf16 %v9230_v55, %v9228_v58  ;;  %v9272_v58 = vld [vmem:[%s15574_s5 + $0xba0] sm:$0xff]  ;;  %v9274_v55 = vld [vmem:[%s15574_s5 + $0xbb0] sm:$0xff] }
 0x75c   : > { %10503 = vmatprep.subr.bf16.mxu1 %v10502_v62  ;;  %v10542_v62 = vpack.c.bf16 %v9235_v61, %v9233_v60  ;;  %v6860_v60 = vpop.permute.xlu0 %6859  ;;  %v9277_v61 = vld [vmem:[%s15574_s5 + $0xbc8] sm:$0xff] }
 0x75e   : > { %9186 = vmatmul.mubr.msk.f32.vlgmr.msra.gmra.mrb[8].mxu1 %vm4427_vm14, %v6412_v6  ;;  %v9238_v6 = vld [vmem:[%s15574_s5 + $0xad0] sm:$0xff] }
 0x75f   : > { %10505 = vmatpush1.bf16.msra.mxu1 %v10504_v3  ;;  %6495 = vmatprep.mubr.f32.mxu1 %v11231_v12  ;;  %v11165_v3 = vld [vmem:[#allocation3 + $0x4] sm:$0xff] }
 0x760   : > { %10507 = vmatprep.subr.bf16.mxu1 %v10506_v41  ;;  %v10544_v41 = vpack.c.bf16 %v9234_v0, %v9232_v63  ;;  %v9276_v0 = vld [vmem:[%s15574_s5 + $0xbc0] sm:$0xff] }
 0x762   : > { %9187 = vmatmul.mubr.msk.f32.gmra.mrb[10].mxu1 %vm4427_vm14, %v6414_v43  ;;  %v9242_v43 = vld [vmem:[%s15574_s5 + $0xaf0] sm:$0xf] }
 0x763   : > { %10509 = vmatpush1.bf16.msra.mxu1 %v10508_v42  ;;  %6601 = vmatprep.mubr.f32.mxu1 %v11231_v12  ;;  %v11166_v42 = vld [vmem:[#allocation3 + $0xc] sm:$0x3] }
 0x764   : > { %10511 = vmatprep.subr.bf16.mxu1 %v10510_v9  ;;  %v10548_v9 = vpack.c.bf16 %v9238_v6, %v9236_v5  ;;  %v9280_v6 = vld [vmem:[%s15574_s5 + $0xbe0] sm:$0xff] }
 0x767   : > { %10513 = vmatpush1.bf16.msra.mxu1 %v10512_v16  ;;  %v10553_v16 = vpack.c.bf16 %v9242_v43, %v9240_v11  ;;  %v9288_v11 = vld [vmem:[%s15574_s5 + $0xc00] sm:$0xff]  ;;  %v9290_v43 = vld [vmem:[%s15574_s5 + $0xc10] sm:$0xff] }
 0x768   : > { %10516 = vmatprep.subr.msk.bf16.mxu1 %vm13702_vm12, %v10514_v17  ;;  %v10556_v17 = vpack.c.bf16 %v9251_v14, %v9249_v13  ;;  %v9293_v13 = vld [vmem:[%s15574_s5 + $0xc28] sm:$0xff]  ;;  %v9295_v14 = vld [vmem:[%s15574_s5 + $0xc38] sm:$0xff] }
 0x76b   : > { %10519 = vmatpush1.bf16.msk.msra.mxu1 %vm13702_vm12, %v10517_v28  ;;  %v10558_v28 = vpack.c.bf16 %v9250_v23, %v9248_v18  ;;  %v9292_v18 = vld [vmem:[%s15574_s5 + $0xc20] sm:$0xff]  ;;  %v9294_v23 = vld [vmem:[%s15574_s5 + $0xc30] sm:$0xff] }
 0x76c   : > { %10521 = vmatprep.subr.bf16.mxu1 %v10520_v45  ;;  %v10560_v45 = vpack.c.bf16 %v9255_v27, %v9253_v25  ;;  %v6972_v25 = vpop.permute.xlu0 %6971  ;;  %v9297_v27 = vld [vmem:[%s15574_s5 + $0xc48] sm:$0xff] }
 0x76e   : > { %9206 = vmatmul.mubr.msk.f32.vlgmr.msra.gmra.mrb[8].mxu1 %vm4427_vm14, %v6524_v34  ;;  %v9258_v34 = vld [vmem:[%s15574_s5 + $0xb50] sm:$0xff] }
 0x76f   : > { %10523 = vmatpush1.bf16.msra.mxu1 %v10522_v21  ;;  %6607 = vmatprep.mubr.f32.mxu1 %v11231_v12  ;;  %v9259_v21 = vld [vmem:[%s15574_s5 + $0xb58] sm:$0xff] }
 0x770   : > { %10525 = vmatprep.subr.bf16.mxu1 %v10524_v46  ;;  %v10562_v46 = vpack.c.bf16 %v9254_v29, %v9252_v15  ;;  %v10564_v32 = vpack.c.bf16 %v9259_v21, %v9257_v24  ;;  %v9296_v29 = vld [vmem:[%s15574_s5 + $0xc40] sm:$0xff]  ;;  %v6974_v24 = vpop.permute.xlu1 %6973  ;;  %v9301_v21 = vld [vmem:[%s15574_s5 + $0xc68] sm:$0xff] }
 0x772   : > { %9207 = vmatmul.mubr.msk.f32.gmra.mrb[10].mxu1 %vm4427_vm14, %v6526_v48  ;;  %v9262_v48 = vld [vmem:[%s15574_s5 + $0xb70] sm:$0xf] }
 0x773   : > { %10527 = vmatpush1.bf16.msra.mxu1 %v10526_v37  ;;  %6713 = vmatprep.mubr.f32.mxu1 %v11231_v12  ;;  %v9263_v37 = vld [vmem:[%s15574_s5 + $0xb78] sm:$0xf] }
 0x774   : > { %10529 = vmatprep.subr.bf16.mxu1 %v10528_v38  ;;  %v10566_v38 = vpack.c.bf16 %v9258_v34, %v9256_v33  ;;  %v10568_v19 = vpack.c.bf16 %v9263_v37, %v9261_v36  ;;  %v9300_v34 = vld [vmem:[%s15574_s5 + $0xc60] sm:$0xff]  ;;  %v7084_v37 = vpop.permute.xlu0 %7083 }
 0x777   : > { %10531 = vmatpush1.bf16.msra.mxu1 %v10530_v20  ;;  %v10571_v20 = vpack.c.bf16 %v9262_v48, %v9260_v39 }
 0x778   : > { %10534 = vmatprep.subr.msk.bf16.mxu1 %vm13702_vm12, %v10532_v53  ;;  %v10574_v53 = vpack.c.bf16 %v9271_v52, %v9269_v44 }
 0x77b   : > { %10537 = vmatpush1.bf16.msk.msra.mxu1 %vm13702_vm12, %v10535_v57  ;;  %v10576_v57 = vpack.c.bf16 %v9270_v51, %v9268_v54 }
 0x77c   : > { %10539 = vmatprep.subr.bf16.mxu1 %v10538_v59  ;;  %v10578_v59 = vpack.c.bf16 %v9275_v56, %v9273_v50 }
 0x77e   : > { %9226 = vmatmul.mubr.msk.f32.vlgmr.msra.gmra.mrb[8].mxu1 %vm4427_vm14, %v11165_v3  ;;  %v9281_v3 = vld [vmem:[%s15574_s5 + $0xbe8] sm:$0xff] }
 0x77f   : > { %10541 = vmatpush1.bf16.msra.mxu1 %v10540_v40  ;;  %6719 = vmatprep.mubr.f32.mxu1 %v11231_v12  ;;  %v9279_v40 = vld [vmem:[%s15574_s5 + $0xbd8] sm:$0xff] }
 0x780   : > { %10543 = vmatprep.subr.bf16.mxu1 %v10542_v62  ;;  %v10580_v62 = vpack.c.bf16 %v9274_v55, %v9272_v58  ;;  %v10582_v63 = vpack.c.bf16 %v9279_v40, %v9277_v61 }
 0x782   : > { %9227 = vmatmul.mubr.msk.f32.gmra.mrb[10].mxu1 %vm4427_vm14, %v11166_v42  ;;  %v9291_v42 = vld [vmem:[%s15574_s5 + $0xc18] sm:$0xff] }
 0x783   : > { %10545 = vmatpush1.bf16.msra.mxu1 %v10544_v41  ;;  %6825 = vmatprep.mubr.f32.mxu1 %v11231_v12  ;;  %v9283_v41 = vld [vmem:[%s15574_s5 + $0xbf8] sm:$0xf] }
 0x784   : > { %10547 = vmatprep.subr.bf16.mxu1 %v10546_v4  ;;  %v10584_v4 = vpack.c.bf16 %v9278_v2, %v9276_v0  ;;  %v10586_v5 = vpack.c.bf16 %v9283_v41, %v9281_v3 }
 0x787   : > { %10549 = vmatpush1.bf16.msra.mxu1 %v10548_v9  ;;  %v10589_v9 = vpack.c.bf16 %v9282_v7, %v9280_v6 }
 0x788   : > { %10552 = vmatprep.subr.msk.bf16.mxu1 %vm13702_vm12, %v10550_v10  ;;  %v10592_v10 = vpack.c.bf16 %v9291_v42, %v9289_v8 }
 0x78b   : > { %10555 = vmatpush1.bf16.msk.msra.mxu1 %vm13702_vm12, %v10553_v16  ;;  %v10594_v16 = vpack.c.bf16 %v9290_v43, %v9288_v11 }
 0x78c   : > { %10557 = vmatprep.subr.bf16.mxu1 %v10556_v17  ;;  %v10596_v17 = vpack.c.bf16 %v9295_v14, %v9293_v13 }
 0x78e   : > { %9246 = vmatmul.mubr.msk.f32.vlgmr.msra.gmra.mrb[8].mxu1 %vm4427_vm14, %v6748_v30  ;;  %v9298_v30 = vld [vmem:[%s15574_s5 + $0xc50] sm:$0xff] }
 0x78f   : > { %10559 = vmatpush1.bf16.msra.mxu1 %v10558_v28  ;;  %6831 = vmatprep.mubr.f32.mxu1 %v11231_v12  ;;  %v9299_v28 = vld [vmem:[%s15574_s5 + $0xc58] sm:$0xff] }
 0x790   : > { %10561 = vmatprep.subr.bf16.mxu1 %v10560_v45  ;;  %v10598_v45 = vpack.c.bf16 %v9294_v23, %v9292_v18  ;;  %v10600_v15 = vpack.c.bf16 %v9299_v28, %v9297_v27 }
 0x792   : > { %9247 = vmatmul.mubr.msk.f32.gmra.mrb[10].mxu1 %vm4427_vm14, %v6750_v35  ;;  %v9302_v35 = vld [vmem:[%s15574_s5 + $0xc70] sm:$0xf] }
 0x793   : > { %10563 = vmatpush1.bf16.msra.mxu1 %v10562_v46  ;;  %6937 = vmatprep.mubr.f32.mxu1 %v11231_v12  ;;  %v9303_v46 = vld [vmem:[%s15574_s5 + $0xc78] sm:$0xf]  ;;  %v10607_v36 = vpack.c.bf16 %v9302_v35, %v9300_v34 }
 0x794   : > { %10565 = vmatprep.subr.bf16.mxu1 %v10564_v32  ;;  %v10602_v32 = vpack.c.bf16 %v9298_v30, %v9296_v29  ;;  %v10604_v33 = vpack.c.bf16 %v9303_v46, %v9301_v21 }
 0x797   : > { %10567 = vmatpush1.bf16.msra.mxu1 %v10566_v38  ;;  %v7086_v38 = vpop.permute.xlu1 %7085 }
 0x798   : > { %10570 = vmatprep.subr.msk.bf16.mxu1 %vm13702_vm12, %v10568_v19  ;;  %v7178_v19 = vld [vmem:[%s15575_s6] sm:$0x3] }
 0x799   : > { %v7183_v39 = vrot.slane %v7178_v19, %v4031_v22  ;;  %v7187_v31 = vrot.slane %v7178_v19, %v4035_v49  ;;  %v7359_v19 = vld [vmem:[%s15577_s8 + $0x8] sm:$0xff] }
 0x79b   : > { %10573 = vmatpush1.bf16.msk.msra.mxu1 %vm13702_vm12, %v10571_v20 }
 0x79c   : > { %10575 = vmatprep.subr.bf16.mxu1 %v10574_v53 }
 0x79e   : > { %9266 = vmatmul.mubr.msk.f32.vlgmr.msra.gmra.mrb[8].mxu1 %vm4427_vm14, %v6860_v60 }
 0x79f   : > { %10577 = vmatpush1.bf16.msra.mxu1 %v10576_v57  ;;  %6943 = vmatprep.mubr.f32.mxu1 %v11231_v12 }
 0x7a0   : > { %10579 = vmatprep.subr.bf16.mxu1 %v10578_v59 }
 0x7a2   : > { %9267 = vmatmul.mubr.msk.f32.gmra.mrb[10].mxu1 %vm4427_vm14, %v6862_v1 }
 0x7a3   : > { %10581 = vmatpush1.bf16.msra.mxu1 %v10580_v62  ;;  %7049 = vmatprep.mubr.f32.mxu1 %v11231_v12 }
 0x7a4   : > { %10583 = vmatprep.subr.bf16.mxu1 %v10582_v63 }
 0x7a7   : > { %10585 = vmatpush1.bf16.msra.mxu1 %v10584_v4 }
 0x7a8   : > { %10588 = vmatprep.subr.msk.bf16.mxu1 %vm13702_vm12, %v10586_v5 }
 0x7ab   : > { %10591 = vmatpush1.bf16.msk.msra.mxu1 %vm13702_vm12, %v10589_v9 }
 0x7ac   : > { %10593 = vmatprep.subr.bf16.mxu1 %v10592_v10 }
 0x7ae   : > { %9286 = vmatmul.mubr.msk.f32.vlgmr.msra.gmra.mrb[8].mxu1 %vm4427_vm14, %v6972_v25 }
 0x7af   : > { %10595 = vmatpush1.bf16.msra.mxu1 %v10594_v16  ;;  %7055 = vmatprep.mubr.f32.mxu1 %v11231_v12 }
 0x7b0   : > { %10597 = vmatprep.subr.bf16.mxu1 %v10596_v17 }
 0x7b2   : > { %9287 = vmatmul.mubr.msk.f32.gmra.mrb[10].mxu1 %vm4427_vm14, %v6974_v24 }
 0x7b3   : > { %10599 = vmatpush1.bf16.msra.mxu1 %v10598_v45  ;;  %7161 = vmatprep.mubr.f32.mxu1 %v11231_v12 }
 0x7b4   : > { %10601 = vmatprep.subr.bf16.mxu1 %v10600_v15 }
 0x7b7   : > { %10603 = vmatpush1.bf16.msra.mxu1 %v10602_v32 }
 0x7b8   : > { %10606 = vmatprep.subr.msk.bf16.mxu1 %vm13702_vm12, %v10604_v33 }
 0x7bb   : > { %10609 = vmatpush1.bf16.msk.msra.mxu1 %vm13702_vm12, %v10607_v36 }
 0x7be   : > { %9306 = vmatmul.mubr.msk.f32.vlgmr.msra.gmra.mrb[8].mxu1 %vm4427_vm14, %v7084_v37 }
 0x7bf   : > { %7167 = vmatprep.mubr.f32.mxu1 %v11231_v12 }
 0x7c2   : > { %9307 = vmatmul.mubr.msk.f32.gmra.mrb[10].mxu1 %vm4427_vm14, %v7086_v38  ;;  %v7358_v38 = vld [vmem:[%s15577_s8] sm:$0xff] }
 0x7c3   : > { %7351 = vmatprep.mubr.f32.mxu1 %v11231_v12 }
 0x891   : > { %v7163_v48 = vpop.f32.mrb[8].mxu1 }
 0x892   : > { %v7190_v44 = vadd.f32 %v7183_v39, %v7163_v48  ;;  %v7165_v52 = vpop.f32.mrb[9].mxu1  ;;  %v10617_v48 = vpack.c.bf16 %v7359_v19, %v7358_v38  ;;  %v7895_v38 = vld [vmem:[%s15580_s11 + $0x58] sm:$0xff] }
 0x893   : > { %v7191_v20 = vadd.f32 %v7187_v31, %v7165_v52  ;;  %v7361_v52 = vld [vmem:[%s15577_s8 + $0x18] sm:$0xff] }
 0x894   : > { %v15148_v53 = vmax.f32 %v7190_v44, 0.0  ;;  %v7360_v44 = vld [vmem:[%s15577_s8 + $0x10] sm:$0xff] }
 0x895   : > { %v7195_v54 = vmax.f32 %v7191_v20, 0.0  ;;  %v7169_v51 = vpop.f32.mrb[10].mxu1  ;;  %v10620_v20 = vpack.c.bf16 %v7361_v52, %v7360_v44  ;;  %v9314_v44 = vld [vmem:[%s15578_s9 + $0x58] sm:$0xff] }
 0x896   : > { %7198 = vst [vmem:[#allocation4] sm:$0xff] %v15148_v53  ;;  %v7192_v50 = vadd.f32 %v7183_v39, %v7169_v51  ;;  %v7171_v56 = vpop.f32.mrb[11].mxu1 }
 0x897   : > { %7200 = vst.msk [vmem:[#allocation4 + $0x8] sm:$0xff] %vm7199_vm15, %v7195_v54  ;;  %v7193_v57 = vadd.f32 %v7187_v31, %v7171_v56  ;;  %v7275_v31 = vld [vmem:[%s15576_s7] sm:$0x1f]  ;;  %v7363_v54 = vld [vmem:[%s15577_s8 + $0x28] sm:$0xff]  ;;  %v7365_v56 = vld [vmem:[%s15577_s8 + $0x38] sm:$0xff] }
 0x898   : > { %v7196_v59 = vmax.f32 %v7192_v50, 0.0  ;;  %v7364_v50 = vld [vmem:[%s15577_s8 + $0x30] sm:$0xff] }
 0x899   : > { %v7197_v22 = vmax.f32 %v7193_v57, 0.0  ;;  %v10626_v57 = vpack.c.bf16 %v7365_v56, %v7364_v50  ;;  %v9317_v50 = vld [vmem:[%s15578_s9 + $0x70] sm:$0xff]  ;;  %v9318_v56 = vld [vmem:[%s15578_s9 + $0x78] sm:$0xff] }
 0x89a   : > { %7201 = vst [vmem:[#allocation4 + $0x10] sm:$0x3] %v7196_v59  ;;  %v7366_v59 = vld [vmem:[%s15577_s8 + $0x40] sm:$0xff] }
 0x89b   : > { %7203 = vst.msk [vmem:[#allocation4 + $0x18] sm:$0x3] %vm7202_vm2, %v7197_v22  ;;  %v7367_v22 = vld [vmem:[%s15577_s8 + $0x48] sm:$0xff] }
 0x89d   : > { %v7231_v47 = vld [vmem:[#allocation4] sm:$0xfe] }
 0x89e   : > { %v7232_v49 = vld [vmem:[#allocation4 + $0x8] sm:$0xfe] }
 0x89f   : > { %v11131_v58 = vpack.i.bf16 %v7232_v49, %v7231_v47  ;;  %v7205_v55 = vld [vmem:[#allocation4 + $0x8] sm:$0xff] }
 0x8a0   : > { %v11141_v40 = vpack.i.bf16 %v7205_v55, %v15148_v53 }
 0x8a1   : > { %11132 = vrot.lane.b32.xlu0 %v11131_v58, %s11240_s20  ;;  %v7233_v60 = vld [vmem:[#allocation4 + $0x10] sm:$0x3]  ;;  %v7369_v58 = vld [vmem:[%s15577_s8 + $0x58] sm:$0xff] }
 0x8a2   : > { %v7234_v61 = vld [vmem:[#allocation4 + $0x18] sm:$0x3]  ;;  %v7206_v63 = vld [vmem:[#allocation4 + $0x10] sm:$0x1] }
 0x8a3   : > { %v11136_v62 = vpack.i.bf16 %v7234_v61, %v7233_v60  ;;  %v7207_v0 = vld [vmem:[#allocation4 + $0x18] sm:$0x1] }
 0x8a4   : > { %v11146_v2 = vpack.i.bf16 %v7207_v0, %v7206_v63 }
 0x8a5   : > { %11142 = vrot.lane.b32.xlu0 %v11141_v40, %s11240_s20  ;;  %11137 = vrot.lane.b32.xlu1 %v11136_v62, %s11240_s20  ;;  %v7372_v62 = vld [vmem:[%s15577_s8 + $0x70] sm:$0xff] }
 0x8a9   : > { %11147 = vrot.lane.b32.xlu1 %v11146_v2, %s11240_s20  ;;  %v7374_v2 = vld [vmem:[%s15577_s8 + $0x80] sm:$0xff]  ;;  %s8066_s20 = scalar_lea.sflag [#allocation7], %s485_s15 }
 0x913   : > { %v11133_v1 = vpop.permute.xlu0 %11132 }
 0x914   : > { %v11135_v3 = vunpack.i.h.bf16 %v11133_v1  ;;  %v11134_v41 = vunpack.i.l.bf16 %v11133_v1  ;;  %v7375_v1 = vld [vmem:[%s15577_s8 + $0x88] sm:$0xff] }
 0x916   : > { %v7247_v4 = vsel %vm7220_vm3, %v11134_v41, %v11135_v3  ;;  %v7254_v5 = vmax.f32 %v7232_v49, %v11135_v3  ;;  %v7368_v49 = vld [vmem:[%s15577_s8 + $0x50] sm:$0xff]  ;;  %v10641_v3 = vpack.c.bf16 %v7375_v1, %v7374_v2  ;;  %v7454_v41 = vld [vmem:[%s15578_s9] sm:$0xff] }
 0x917   : > { %v11143_v6 = vpop.permute.xlu0 %11142  ;;  %v11138_v7 = vpop.permute.xlu1 %11137  ;;  %v7253_v10 = vmax.f32 %v7231_v47, %v7247_v4  ;;  %v10629_v47 = vpack.c.bf16 %v7367_v22, %v7366_v59  ;;  %v7455_v4 = vld [vmem:[%s15578_s9 + $0x8] sm:$0xff]  ;;  %v9319_v59 = vld [vmem:[%s15578_s9 + $0x80] sm:$0xff] }
 0x918   : > { %v11145_v8 = vunpack.i.h.bf16 %v11143_v6  ;;  %v11144_v42 = vunpack.i.l.bf16 %v11143_v6  ;;  %v11140_v9 = vunpack.i.h.bf16 %v11138_v7  ;;  %v11139_v11 = vunpack.i.l.bf16 %v11138_v7  ;;  %v9320_v22 = vld [vmem:[%s15578_s9 + $0x88] sm:$0xff]  ;;  %v9328_v1 = vld [vmem:[%s15578_s9 + $0xc0] sm:$0xff] }
 0x919   : > { %v7264_v13 = vrot.slane %v7254_v5, 1  ;;  %v7261_v28 = vrot.slane %v7253_v10, 1  ;;  %v10644_v6 = vpack.c.bf16 %v7455_v4, %v7454_v41  ;;  %v7458_v10 = vld [vmem:[%s15578_s9 + $0x20] sm:$0xff]  ;;  %v9330_v4 = vld [vmem:[%s15578_s9 + $0xd0] sm:$0xff] }
 0x91a   : > { %v7256_v43 = vmax.f32 %v7234_v61, %v11140_v9  ;;  %v7221_v14 = vsel %vm7220_vm3, %v11144_v42, %v11145_v8  ;;  %v7248_v16 = vsel %vm7220_vm3, %v11139_v11, %v11140_v9  ;;  %v7228_v45 = vmax.f32 %v7205_v55, %v11145_v8  ;;  %v7371_v61 = vld [vmem:[%s15577_s8 + $0x68] sm:$0xff]  ;;  %v7456_v8 = vld [vmem:[%s15578_s9 + $0x10] sm:$0xff]  ;;  %v7457_v42 = vld [vmem:[%s15578_s9 + $0x18] sm:$0xff] }
 0x91b   : > { %v11148_v17 = vpop.permute.xlu1 %11147  ;;  %v7255_v23 = vmax.f32 %v7233_v60, %v7248_v16  ;;  %v7227_v21 = vmax.f32 %v15148_v53, %v7221_v14  ;;  %v7362_v53 = vld [vmem:[%s15577_s8 + $0x20] sm:$0xff]  ;;  %v10632_v55 = vpack.c.bf16 %v7369_v58, %v7368_v49  ;;  %v10647_v9 = vpack.c.bf16 %v7457_v42, %v7456_v8  ;;  %v7459_v11 = vld [vmem:[%s15578_s9 + $0x28] sm:$0xff]  ;;  %v7461_v14 = vld [vmem:[%s15578_s9 + $0x38] sm:$0xff] }
 0x91c   : > { %v7265_v18 = vrot.slane %v7256_v43, 1  ;;  %v11150_v25 = vunpack.i.h.bf16 %v11148_v17  ;;  %v11149_v27 = vunpack.i.l.bf16 %v11148_v17  ;;  %v10623_v51 = vpack.c.bf16 %v7363_v54, %v7362_v53  ;;  %v7370_v60 = vld [vmem:[%s15577_s8 + $0x60] sm:$0xff]  ;;  %v9316_v53 = vld [vmem:[%s15578_s9 + $0x68] sm:$0xff]  ;;  %v9321_v49 = vld [vmem:[%s15578_s9 + $0x90] sm:$0xff] }
 0x91d   : > { %v7262_v29 = vrot.slane %v7255_v23, 1  ;;  %v10635_v40 = vpack.c.bf16 %v7371_v61, %v7370_v60  ;;  %v10650_v43 = vpack.c.bf16 %v7459_v11, %v7458_v10  ;;  %v7462_v17 = vld [vmem:[%s15578_s9 + $0x40] sm:$0xff]  ;;  %v9322_v58 = vld [vmem:[%s15578_s9 + $0x98] sm:$0xff]  ;;  %v9325_v61 = vld [vmem:[%s15578_s9 + $0xa8] sm:$0xff] }
 0x91e   : > { %v7266_v15 = vsel %vm4152_vm5, %v7264_v13, %v7265_v18  ;;  %v7230_v30 = vmax.f32 %v7207_v0, %v11150_v25  ;;  %v7222_v24 = vsel %vm7220_vm3, %v11149_v27, %v11150_v25  ;;  %v7460_v13 = vld [vmem:[%s15578_s9 + $0x30] sm:$0xff]  ;;  %v7884_v25 = vld [vmem:[%s15580_s11] sm:$0xff]  ;;  %v7885_v27 = vld [vmem:[%s15580_s11 + $0x8] sm:$0xff] }
 0x91f   : > { %v7272_v46 = vmax.f32 %v7228_v45, %v7266_v15  ;;  %v7229_v32 = vmax.f32 %v7206_v63, %v7222_v24  ;;  %v7263_v33 = vsel %vm4152_vm5, %v7261_v28, %v7262_v29  ;;  %vm7276_vm5 = vcmask 72704   ;;  %v7373_v63 = vld [vmem:[%s15577_s8 + $0x78] sm:$0xff]  ;;  %v7886_v28 = vld [vmem:[%s15580_s11 + $0x10] sm:$0xff]  ;;  %v7889_v24 = vld [vmem:[%s15580_s11 + $0x28] sm:$0xff] }
 0x920   : > { %v7274_v34 = vmax.f32 %v7230_v30, %v7265_v18  ;;  %v7271_v35 = vmax.f32 %v7227_v21, %v7263_v33  ;;  %v10638_v0 = vpack.c.bf16 %v7373_v63, %v7372_v62  ;;  %v10653_v16 = vpack.c.bf16 %v7461_v14, %v7460_v13  ;;  %v7463_v18 = vld [vmem:[%s15578_s9 + $0x48] sm:$0xff]  ;;  %v7887_v15 = vld [vmem:[%s15580_s11 + $0x18] sm:$0xff]  ;;  %v7888_v30 = vld [vmem:[%s15580_s11 + $0x20] sm:$0xff] }
 0x921   : > { %v7273_v36 = vmax.f32 %v7229_v32, %v7262_v29  ;;  %v10656_v23 = vpack.c.bf16 %v7463_v18, %v7462_v17  ;;  %v10719_v45 = vpack.c.bf16 %v7885_v27, %v7884_v25  ;;  %v10722_v29 = vpack.c.bf16 %v7887_v15, %v7886_v28  ;;  %v7891_v32 = vld [vmem:[%s15580_s11 + $0x38] sm:$0xff]  ;;  %v9324_v60 = vld [vmem:[%s15578_s9 + $0xa0] sm:$0xff]  ;;  %v9326_v62 = vld [vmem:[%s15578_s9 + $0xb0] sm:$0xff] }
 0x922   : > { %v10610_v37 = vpack.c.bf16 %v7274_v34, %v7272_v46  ;;  %v10725_v21 = vpack.c.bf16 %v7889_v24, %v7888_v30  ;;  %v7890_v46 = vld [vmem:[%s15580_s11 + $0x30] sm:$0xff]  ;;  %v7892_v34 = vld [vmem:[%s15580_s11 + $0x40] sm:$0xff]  ;;  %v9327_v63 = vld [vmem:[%s15578_s9 + $0xb8] sm:$0xff] }
 0x923   : > { %v10613_v39 = vpack.c.bf16 %v7273_v36, %v7271_v35  ;;  %10720 = vmatpush3.bf16.msra.mxu0 %v10719_v45  ;;  %v10728_v33 = vpack.c.bf16 %v7891_v32, %v7890_v46  ;;  %v7893_v35 = vld [vmem:[%s15580_s11 + $0x48] sm:$0xff]  ;;  %v10677_v2 = vpack.c.bf16 %v9327_v63, %v9326_v62  ;;  %v9336_v10 = vld [vmem:[%s15578_s9 + $0xf8] sm:$0xff]  ;;  %v9339_v17 = vld [vmem:[%s15578_s9 + $0x110] sm:$0xff] }
 0x924   : > { %10612 = vmatprep.subr.msk.bf16.mxu1 %vm10611_vm6, %v10610_v37  ;;  %10721 = vmatprep.subr.bf16.mxu0 %v11236_v26  ;;  %v10731_v36 = vpack.c.bf16 %v7893_v35, %v7892_v34  ;;  %v7894_v37 = vld [vmem:[%s15580_s11 + $0x50] sm:$0xff]  ;;  %v9333_v8 = vld [vmem:[%s15578_s9 + $0xe8] sm:$0xff]  ;;  %v9340_v18 = vld [vmem:[%s15578_s9 + $0x118] sm:$0xff] }
 0x925   : > { %10615 = vmatpush1.bf16.msk.msra.mxu1 %vm10611_vm6, %v10613_v39  ;;  %v10734_v19 = vpack.c.bf16 %v7895_v38, %v7894_v37  ;;  %v9338_v13 = vld [vmem:[%s15578_s9 + $0x108] sm:$0xff]  ;;  %v9341_v25 = vld [vmem:[%s15578_s9 + $0x120] sm:$0xff]  ;;  %v9343_v45 = vld [vmem:[%s15578_s9 + $0x130] sm:$0xff] }
 0x926   : > { %10616 = vmatprep.subr.bf16.mxu1 %v11236_v26  ;;  %v9342_v27 = vld [vmem:[%s15578_s9 + $0x128] sm:$0xff]  ;;  %v9344_v15 = vld [vmem:[%s15578_s9 + $0x138] sm:$0xff]  ;;  %v9346_v30 = vld [vmem:[%s15578_s9 + $0x140] sm:$0xff] }
 0x927   : > { %10723 = vmatpush3.bf16.msra.mxu0 %v10722_v29  ;;  %v10698_v28 = vpack.c.bf16 %v9342_v27, %v9341_v25  ;;  %v10701_v29 = vpack.c.bf16 %v9344_v15, %v9343_v45  ;;  %v9347_v24 = vld [vmem:[%s15578_s9 + $0x148] sm:$0xff]  ;;  %v9348_v46 = vld [vmem:[%s15578_s9 + $0x150] sm:$0xff]  ;;  %v9349_v32 = vld [vmem:[%s15578_s9 + $0x158] sm:$0xff] }
 0x928   : > { %9310 = vmatmul.mubr.msk.f32.vlgmr.msra.gmra.mrb[12].mxu1 %vm7276_vm5, %v7275_v31  ;;  %10724 = vmatprep.subr.bf16.mxu0 %v11236_v26  ;;  %v10707_v34 = vpack.c.bf16 %v9349_v32, %v9348_v46  ;;  %v9350_v35 = vld [vmem:[%s15578_s9 + $0x160] sm:$0xff]  ;;  %v9352_v38 = vld [vmem:[%s15578_s9 + $0x170] sm:$0xff]  ;;  %v7980_v62 = vld [vmem:[%s15582_s13 + $0x28] sm:$0xff] }
 0x929   : > { %10618 = vmatpush1.bf16.msra.mxu1 %v10617_v48  ;;  %v9313_v48 = vld [vmem:[%s15578_s9 + $0x50] sm:$0xff] }
 0x92a   : > { %10619 = vmatprep.subr.bf16.mxu1 %v11236_v26  ;;  %v10659_v52 = vpack.c.bf16 %v9314_v44, %v9313_v48  ;;  %v9355_v48 = vld [vmem:[%s15578_s9 + $0x188] sm:$0xff] }
 0x92b   : > { %10726 = vmatpush3.bf16.msra.mxu0 %v10725_v21  ;;  %v10704_v21 = vpack.c.bf16 %v9347_v24, %v9346_v30 }
 0x92c   : > { %10727 = vmatprep.subr.bf16.mxu0 %v11236_v26 }
 0x92d   : > { %10621 = vmatpush1.bf16.msra.mxu1 %v10620_v20  ;;  %v9315_v20 = vld [vmem:[%s15578_s9 + $0x60] sm:$0xff] }
 0x92e   : > { %10622 = vmatprep.subr.bf16.mxu1 %v11236_v26 }
 0x92f   : > { %10729 = vmatpush3.bf16.msra.mxu0 %v10728_v33 }
 0x930   : > { %10730 = vmatprep.subr.bf16.mxu0 %v11236_v26 }
 0x931   : > { %10624 = vmatpush1.bf16.msra.mxu1 %v10623_v51  ;;  %v10662_v51 = vpack.c.bf16 %v9316_v53, %v9315_v20  ;;  %v7896_v20 = vld [vmem:[%s15580_s11 + $0x60] sm:$0xff]  ;;  %v7897_v53 = vld [vmem:[%s15580_s11 + $0x68] sm:$0xff] }
 0x932   : > { %10625 = vmatprep.subr.bf16.mxu1 %v11236_v26 }
 0x933   : > { %10732 = vmatpush3.bf16.msra.mxu0 %v10731_v36  ;;  %v9351_v36 = vld [vmem:[%s15578_s9 + $0x168] sm:$0xff] }
 0x934   : > { %10733 = vmatprep.subr.bf16.mxu0 %v11236_v26  ;;  %v10710_v37 = vpack.c.bf16 %v9351_v36, %v9350_v35 }
 0x935   : > { %10627 = vmatpush1.bf16.msra.mxu1 %v10626_v57  ;;  %v10665_v57 = vpack.c.bf16 %v9318_v56, %v9317_v50  ;;  %v7452_v50 = vld [vmem:[%s15579_s10] sm:$0x1] }
 0x936   : > { %10628 = vmatprep.subr.bf16.mxu1 %v11236_v26  ;;  %v7975_v56 = vld [vmem:[%s15582_s13] sm:$0xff] }
 0x937   : > { %10735 = vmatpush3.bf16.msra.mxu0 %v10734_v19  ;;  %v9353_v19 = vld [vmem:[%s15578_s9 + $0x178] sm:$0xff] }
 0x938   : > { %10736 = vmatprep.subr.bf16.mxu0 %v11236_v26 }
 0x939   : > { %10630 = vmatpush1.bf16.msra.mxu1 %v10629_v47  ;;  %v10668_v47 = vpack.c.bf16 %v9320_v22, %v9319_v59 }
 0x93a   : > { %10631 = vmatprep.subr.bf16.mxu1 %v11236_v26 }
 0x93d   : > { %10633 = vmatpush1.bf16.msra.mxu1 %v10632_v55  ;;  %v10671_v55 = vpack.c.bf16 %v9322_v58, %v9321_v49 }
 0x93e   : > { %10634 = vmatprep.subr.bf16.mxu1 %v11236_v26 }
 0x941   : > { %10636 = vmatpush1.bf16.msra.mxu1 %v10635_v40  ;;  %v10674_v40 = vpack.c.bf16 %v9325_v61, %v9324_v60  ;;  %v7978_v60 = vld [vmem:[%s15582_s13 + $0x18] sm:$0xff] }
 0x942   : > { %10637 = vmatprep.subr.bf16.mxu1 %v11236_v26 }
 0x945   : > { %10639 = vmatpush1.bf16.msra.mxu1 %v10638_v0 }
 0x946   : > { %10640 = vmatprep.subr.bf16.mxu1 %v11236_v26 }
 0x949   : > { %10642 = vmatpush1.bf16.msra.mxu1 %v10641_v3  ;;  %v9329_v3 = vld [vmem:[%s15578_s9 + $0xc8] sm:$0xff] }
 0x94a   : > { %10643 = vmatprep.subr.bf16.mxu1 %v11236_v26  ;;  %v10680_v41 = vpack.c.bf16 %v9329_v3, %v9328_v1  ;;  %v7983_v3 = vld [vmem:[%s15582_s13 + $0x40] sm:$0xff] }
 0x9fb   : > { %v7353_v5 = vpop.f32.mrb[12].mxu1 }
 0x9fc   : > { %v7355_v7 = vpop.f32.mrb[13].mxu1 }
 0x9fd   : > { %9311 = vmatprep.mubr.msk.f32.mxu1 %vm7376_vm7, %v7355_v7  ;;  %v9332_v7 = vld [vmem:[%s15578_s9 + $0xe0] sm:$0xff] }
 0x9fe   : > { %7445 = vmatmul.mubr.f32.vlgmr.msra.gmra.mrb[14].mxu1 %v7353_v5  ;;  %v9331_v5 = vld [vmem:[%s15578_s9 + $0xd8] sm:$0xff]  ;;  %v10686_v42 = vpack.c.bf16 %v9333_v8, %v9332_v7 }
 0x9ff   : > { %10645 = vmatpush3.bf16.msra.mxu1 %v10644_v6  ;;  %9467 = vmatprep.mubr.msk.f32.mxu1 %vm11241_vm8, %v11231_v12  ;;  %v10683_v6 = vpack.c.bf16 %v9331_v5, %v9330_v4  ;;  %v7985_v5 = vld [vmem:[%s15582_s13 + $0x50] sm:$0xf] }
 0xa00   : > { %10646 = vmatprep.subr.bf16.mxu1 %v11236_v26 }
 0xa03   : > { %10648 = vmatpush3.bf16.msra.mxu1 %v10647_v9  ;;  %v9335_v9 = vld [vmem:[%s15578_s9 + $0xf0] sm:$0xff] }
 0xa04   : > { %10649 = vmatprep.subr.bf16.mxu1 %v11236_v26  ;;  %v10689_v11 = vpack.c.bf16 %v9336_v10, %v9335_v9 }
 0xa07   : > { %10651 = vmatpush3.bf16.msra.mxu1 %v10650_v43  ;;  %v9337_v43 = vld [vmem:[%s15578_s9 + $0x100] sm:$0xff] }
 0xa08   : > { %10652 = vmatprep.subr.bf16.mxu1 %v11236_v26 }
 0xa0b   : > { %10654 = vmatpush3.bf16.msra.mxu1 %v10653_v16  ;;  %v10692_v16 = vpack.c.bf16 %v9338_v13, %v9337_v43 }
 0xa0c   : > { %10655 = vmatprep.subr.bf16.mxu1 %v11236_v26 }
 0xa0f   : > { %10657 = vmatpush3.bf16.msra.mxu1 %v10656_v23  ;;  %v10695_v23 = vpack.c.bf16 %v9340_v18, %v9339_v17 }
 0xa10   : > { %10658 = vmatprep.subr.bf16.mxu1 %v11236_v26 }
 0xad1   : > { %v7446_v39 = vpop.f32.mrb[14].mxu1 }
 0xad2   : > { %7451 = vst.msk [vmem:[#allocation5] sm:$0x1f] %vm7450_vm9, %v7446_v39  ;;  %v7448_v31 = vpop.f32.mrb[15].mxu1  ;;  %v10713_v39 = vpack.c.bf16 %v9353_v19, %v9352_v38 }
 0xad3   : > { %v9354_v31 = vld [vmem:[%s15578_s9 + $0x180] sm:$0xff] }
 0xad4   : > { %v10716_v44 = vpack.c.bf16 %v9355_v48, %v9354_v31 }
 0xad9   : > { %v7453_v54 = vld [vmem:[#allocation5] sm:$0x1]  ;;  %v7539_v0 = vld [vmem:[#allocation5 + $0x1] sm:$0x1]  ;;  %v7625_v14 = vld [vmem:[#allocation5 + $0x2] sm:$0x1] }
 0xada   : > { %9468 = vmatmul.mubr.msk.f32.vlgmr.msra.gmra.mrb[16].mxu1 %vm7464_vm10, %v7453_v54  ;;  %v7711_v33 = vld [vmem:[#allocation5 + $0x3] sm:$0x1]  ;;  %v10737_v54 = vpack.c.bf16 %v7897_v53, %v7896_v20 }
 0xadb   : > { %10660 = vmatpush3.bf16.msra.mxu1 %v10659_v52  ;;  %9490 = vmatprep.mubr.msk.f32.mxu1 %vm11241_vm8, %v11231_v12  ;;  %v7797_v52 = vld [vmem:[#allocation5 + $0x4] sm:$0x1] }
 0xadc   : > { %10661 = vmatprep.subr.bf16.mxu1 %v11236_v26  ;;  %10738 = vmatpush3.bf16.msra.mxu0 %v10737_v54 }
 0xadd   : > { %9590 = vmatprep.subr.mxu0 %v11231_v12 }
 0xadf   : > { %10663 = vmatpush3.bf16.msra.mxu1 %v10662_v51  ;;  %v7898_v51 = vld [vmem:[%s15580_s11 + $0x70] sm:$0xff] }
 0xae0   : > { %10664 = vmatprep.subr.bf16.mxu1 %v11236_v26  ;;  %9591 = vmatpush3.msra.mxu0 %v7898_v51 }
 0xae1   : > { %10739 = vmatprep.subr.bf16.mxu0 %v11236_v26 }
 0xae3   : > { %10666 = vmatpush3.bf16.msra.mxu1 %v10665_v57  ;;  %v7976_v57 = vld [vmem:[%s15582_s13 + $0x8] sm:$0xff] }
 0xae4   : > { %10667 = vmatprep.subr.bf16.mxu1 %v11236_v26  ;;  %v10740_v49 = vpack.c.bf16 %v7976_v57, %v7975_v56 }
 0xae7   : > { %10669 = vmatpush3.bf16.msra.mxu1 %v10668_v47 }
 0xae8   : > { %10670 = vmatprep.subr.bf16.mxu1 %v11236_v26 }
 0xaeb   : > { %10672 = vmatpush3.bf16.msra.mxu1 %v10671_v55  ;;  %v7977_v55 = vld [vmem:[%s15582_s13 + $0x10] sm:$0xff] }
 0xaec   : > { %10673 = vmatprep.subr.bf16.mxu1 %v11236_v26  ;;  %v10743_v61 = vpack.c.bf16 %v7978_v60, %v7977_v55 }
 0xaee   : > { %9491 = vmatmul.mubr.msk.f32.vlgmr.msra.gmra.mrb[16].mxu1 %vm7464_vm10, %v7539_v0  ;;  %v7981_v0 = vld [vmem:[%s15582_s13 + $0x30] sm:$0xff] }
 0xaef   : > { %10675 = vmatpush3.bf16.msra.mxu1 %v10674_v40  ;;  %9513 = vmatprep.mubr.msk.f32.mxu1 %vm11241_vm8, %v11231_v12  ;;  %v7979_v40 = vld [vmem:[%s15582_s13 + $0x20] sm:$0xff] }
 0xaf0   : > { %10676 = vmatprep.subr.bf16.mxu1 %v11236_v26  ;;  %v10746_v63 = vpack.c.bf16 %v7980_v62, %v7979_v40 }
 0xaf3   : > { %10678 = vmatpush3.bf16.msra.mxu1 %v10677_v2  ;;  %v7982_v2 = vld [vmem:[%s15582_s13 + $0x38] sm:$0xff] }
 0xaf4   : > { %10679 = vmatprep.subr.bf16.mxu1 %v11236_v26  ;;  %v10749_v1 = vpack.c.bf16 %v7982_v2, %v7981_v0 }
 0xaf7   : > { %10681 = vmatpush3.bf16.msra.mxu1 %v10680_v41  ;;  %v7984_v41 = vld [vmem:[%s15582_s13 + $0x48] sm:$0xff] }
 0xaf8   : > { %10682 = vmatprep.subr.bf16.mxu1 %v11236_v26  ;;  %v10752_v4 = vpack.c.bf16 %v7984_v41, %v7983_v3 }
 0xafb   : > { %10684 = vmatpush3.bf16.msra.mxu1 %v10683_v6 }
 0xafc   : > { %10685 = vmatprep.subr.bf16.mxu1 %v11236_v26 }
 0xaff   : > { %10687 = vmatpush3.bf16.msra.mxu1 %v10686_v42 }
 0xb00   : > { %10688 = vmatprep.subr.bf16.mxu1 %v11236_v26 }
 0xb02   : > { %9514 = vmatmul.mubr.msk.f32.vlgmr.msra.gmra.mrb[16].mxu1 %vm7464_vm10, %v7625_v14 }
 0xb03   : > { %10690 = vmatpush3.bf16.msra.mxu1 %v10689_v11  ;;  %9536 = vmatprep.mubr.msk.f32.mxu1 %vm11241_vm8, %v11231_v12 }
 0xb04   : > { %10691 = vmatprep.subr.bf16.mxu1 %v11236_v26 }
 0xb07   : > { %10693 = vmatpush3.bf16.msra.mxu1 %v10692_v16 }
 0xb08   : > { %10694 = vmatprep.subr.bf16.mxu1 %v11236_v26 }
 0xb0b   : > { %10696 = vmatpush3.bf16.msra.mxu1 %v10695_v23 }
 0xb0c   : > { %10697 = vmatprep.subr.bf16.mxu1 %v11236_v26 }
 0xb0f   : > { %10699 = vmatpush3.bf16.msra.mxu1 %v10698_v28 }
 0xb10   : > { %10700 = vmatprep.subr.bf16.mxu1 %v11236_v26 }
 0xb13   : > { %10702 = vmatpush3.bf16.msra.mxu1 %v10701_v29 }
 0xb14   : > { %10703 = vmatprep.subr.bf16.mxu1 %v11236_v26 }
 0xb16   : > { %9537 = vmatmul.mubr.msk.f32.vlgmr.msra.gmra.mrb[16].mxu1 %vm7464_vm10, %v7711_v33 }
 0xb17   : > { %10705 = vmatpush3.bf16.msra.mxu1 %v10704_v21  ;;  %9559 = vmatprep.mubr.msk.f32.mxu1 %vm11241_vm8, %v11231_v12 }
 0xb18   : > { %10706 = vmatprep.subr.bf16.mxu1 %v11236_v26 }
 0xb1b   : > { %10708 = vmatpush3.bf16.msra.mxu1 %v10707_v34 }
 0xb1c   : > { %10709 = vmatprep.subr.bf16.mxu1 %v11236_v26 }
 0xb1f   : > { %10711 = vmatpush3.bf16.msra.mxu1 %v10710_v37 }
 0xb20   : > { %10712 = vmatprep.subr.bf16.mxu1 %v11236_v26 }
 0xb23   : > { %10714 = vmatpush3.bf16.msra.mxu1 %v10713_v39 }
 0xb24   : > { %10715 = vmatprep.subr.bf16.mxu1 %v11236_v26 }
 0xb27   : > { %10717 = vmatpush3.bf16.msra.mxu1 %v10716_v44 }
 0xb2a   : > { %9560 = vmatmul.mubr.msk.f32.vlgmr.msra.gmra.mrb[16].mxu1 %vm7464_vm10, %v7797_v52 }
 0xbfd   : > { %v7878_v59 = vpop.f32.mrb[16].mxu1 }
 0xbfe   : > { %v10754_v22 = vadd.f32 %v7878_v59, %v7452_v50  ;;  %v9561_v47 = vpop.f32.mrb[17].mxu1 }
 0xc00   : > { %v7883_v58 = vmax.f32 %v10754_v22, 0.0 }
 0xc02   : > { %9593 = vmatmul.mubr.msk.f32.vlgmr.msra.gmra.mrb[8].mxu0 %vm7900_vm11, %v7883_v58 }
 0xc03   : > { %10741 = vmatpush3.bf16.msra.mxu0 %v10740_v49  ;;  %9617 = vmatprep.mubr.msk.f32.mxu0 %vm11241_vm8, %v11231_v12 }
 0xc04   : > { %10742 = vmatprep.subr.bf16.mxu0 %v11236_v26 }
 0xc07   : > { %10744 = vmatpush3.bf16.msra.mxu0 %v10743_v61 }
 0xc08   : > { %10745 = vmatprep.subr.bf16.mxu0 %v11236_v26 }
 0xc0b   : > { %10747 = vmatpush3.bf16.msra.mxu0 %v10746_v63 }
 0xc0c   : > { %10748 = vmatprep.subr.bf16.mxu0 %v11236_v26 }
 0xc0f   : > { %10750 = vmatpush3.bf16.msra.mxu0 %v10749_v1 }
 0xc10   : > { %10751 = vmatprep.subr.bf16.mxu0 %v11236_v26  ;;  %v7899_v26 = vld [vmem:[%s15581_s12] sm:$0x1] }
 0xc13   : > { %10753 = vmatpush3.bf16.msra.mxu0 %v10752_v4 }
 0xc14   : > { %9615 = vmatprep.subr.mxu0 %v11231_v12  ;;  %v7986_v12 = vld [vmem:[%s15622_s0] sm:$0x1] }
 0xc17   : > { %9616 = vmatpush3.msk.msra.mxu0 %vm562_vm0, %v7985_v5  ;;  %vm8063_vm0 = vcmask 73728  }
 0xcd5   : > { %v7970_v6 = vpop.f32.mrb[8].mxu0 }
 0xcd6   : > { %v7971_v7 = vadd.f32 %v7970_v6, %v7899_v26  ;;  %v9594_v8 = vpop.f32.mrb[9].mxu0 }
 0xcd8   : > { %v7974_v42 = vmax.f32 %v7971_v7, 0.0 }
 0xcda   : > { %9618 = vmatmul.mubr.msk.f32.vlgmr.msra.gmra.mrb[10].mxu0 %vm553_vm1, %v7974_v42 }
 0xdad   : > { %v8059_v9 = vpop.f32.mrb[10].mxu0 }
 0xdae   : > { %v8060_v10 = vadd.f32 %v8059_v9, %v7986_v12  ;;  %v9619_v11 = vpop.f32.mrb[11].mxu0 }
 0xdb0   : > { %8064 = vst.msk [vmem:[%s486_s18] sm:$0x1] %vm8063_vm0, %v8060_v10 }
 0xdb1   : > { %11180 = shalt.err (!%p11177_p3)
}
 0xdb2   : > { %s11181_s15 = scalar_lea.hbm %s15527_s26, 16  ;;  %s11185_s29 = scalar_lea.hbm %s15624_s25, 32 }
 0xdb3   : > { %p11182_p4 = scmp.ne.s32.totalorder %s15527_s26, %s11181_s15  ;;  %p11186_p9 = scmp.lt.u32.totalorder %s15527_s26, %s15624_s25 }
 0xdb4   : > { %p11187_p10 = scmp.lt.u32.totalorder %s11185_s29, %s11181_s15  ;;  %p11189_p12 = scmp.lt.u32.totalorder %s11181_s15, %s15527_s26 }
 0xdb5   : > { %p11183_p7 = pnand %p11182_p4, %p11361_p5 }
 0xdb6   : > { %p11188_p11 = por %p11187_p10, %p11186_p9 }
 0xdb7   : > { %p11184_p8 = pneg %p11183_p7 }
 0xdb8   : > { %p11190_p13 = por %p11189_p12, %p11188_p11 }
 0xdba   : > { %p11191_p0 = pnand %p11190_p13, %p11184_p8 }
 0xdbc   : > { %11194 = shalt.err (!%p11191_p0)
}
 0xdbd   : > { %11051 = dma.vmem_to_hbm [thread:$0]  (%p11361_p5), %s15529_s17, 16, %s15527_s26, %s8066_s20  }
 0xdbe PF: > { %s15625_s23 = sld [smem:[#allocation11_spill]]  ;;  %s15626_s21 = sld [smem:[#allocation9_spill]] }
 0xdc4   : > { %p11057_p1 = scmp.ge.s32.totalorder %s15625_s23, 2  ;;  %s8090_s22 = sand.u32 1, %s15626_s21  }
 0xdc5   : > { %s8091_s16 = scalar_lea.sflag [#allocation7], %s8090_s22 }
 0xdc6   : > { %p11054_p2 = pnand %p11057_p1, %p11365_p6 }
 0xdc8   : > { %11212 = dma.done.wait (!%p11054_p2), %s8091_s16, 16  }
 0xdc9   : > { %11214 = vsyncadd (!%p11054_p2), %s8091_s16, 4294967280  ;;  %s15628_s21 = sld [smem:[#allocation12_spill]]  ;;  %s15629_s24 = sld [smem:[#allocation10_spill]] }
 0xdca   : > { %s15630_s20 = sld [smem:[#allocation13_spill]]  ;;  %s15631_s18 = smov %s11221_s19 }
 0xdcf   : > { %p25_p3 = scmp.ge.s32.totalorder %s15628_s21, 4   ;;  %s15632_s19 = smov %s15629_s24 }
 0xdd1   :  { %27 = sbr.rel (!%p25_p3) target bundleno = 7 (0x7), region = 167 }
 0xdd8   :  { %8095 = vsyncpa [#allocation7], 1 }
 0xdd9   :  { %8097 = vsyncpa [#allocation7 + $0x1], 1 }

</bundles_post_ra>
